<compile_context>
chip_gen: v6e
topology: v6e:2x2x1
jax: 0.10.0
libtpu: 0.0.40
codegen_flags: <defaults>
</compile_context>

<pallas_src>
import functools

import jax
import jax.numpy as jnp
from jax.experimental import pallas as pl
from jax.experimental.pallas import tpu as pltpu

_BN_EPS = 1e-5
_CRISP_SMOOTH = 1e-2
# MXU operand dtype (accumulation is always f32).  bf16 halves MXU passes on
# v5e/v6e/v7x; switch to jnp.float32 for tight parity tests vs. PyTorch.
_MM_DTYPE = jnp.bfloat16

# Tap order t = kh*3 + kw  <->  (dh, dw) with dh = kh-1, dw = kw-1.
_OFFSETS = tuple((dh, dw) for dh in (-1, 0, 1) for dw in (-1, 0, 1))


# --------------------------- fused Pallas kernel -----------------------------

def _head_cmtsk_kernel(x_ref, w3_ref, w1_ref, sh_ref, o_ref,
                       *, H, W, N, nf, ncl, softmax_channel):
    """Whole head_cmtsk forward; activations are lane-batched (C, N*H*W).

    x_ref  : (N, nf, H*W)        input, NCHW with spatial flattened
    w3_ref : (6*9, nf, 2*nf)     per-tap 3x3 weights, BN-scale folded, zero-padded
    w1_ref : (6, rmax, cmax)     1x1 weights, BN-scale / SigmoidCrisp folded, padded
    sh_ref : (rmax, 12)          folded BN shifts / conv biases (column-packed)
    o_ref  : (N, 3*ncl, H*W)     [segm, bound, dist] stacked on the channel axis
    """
    HW = H * W
    L = N * HW

    # ---- lane-batched input: (nf, N*HW) ------------------------------------
    if N == 1:
        x = x_ref[0]
    else:
        x = jnp.concatenate([x_ref[n] for n in range(N)], axis=1)

    # ---- border masks for the 9 taps, computed once, shared by all 6 convs --
    # Positions are within-image, so the masks also kill cross-image leakage
    # and wrap-around lanes produced by the full-buffer rolls.
    pos = jax.lax.broadcasted_iota(jnp.int32, (1, L), 1)
    if (HW & (HW - 1)) == 0:
        pin = pos & (HW - 1)                    # position within image
    else:
        pin = pos % HW                          # TODO(synk): non-pow2 HW untested
    if (W & (W - 1)) == 0:
        ww = pin & (W - 1)                      # column within image
    else:
        ww = pin % W                            # TODO(synk): non-pow2 W untested

    def tap_mask(dh, dw):
        conds = []
        if dh == -1:
            conds.append(pin >= W)              # h - 1 >= 0
        elif dh == 1:
            conds.append(pin < HW - W)          # h + 1 <= H - 1
        if dw == -1:
            conds.append(ww >= 1)               # w - 1 >= 0
        elif dw == 1:
            conds.append(ww <= W - 2)           # w + 1 <= W - 1
        if not conds:
            return None
        m = conds[0]
        for c in conds[1:]:
            m = jnp.logical_and(m, c)
        return m

    masks = [tap_mask(dh, dw) for dh, dw in _OFFSETS]

    # ---- layer helpers (all operate on (C, L) f32 values) -------------------
    def conv3x3_bn(a, w_base, sh_idx, relu):
        """3x3 'same' conv + folded BN: 9 roll+mask tap dots, accumulated in f32."""
        cin = a.shape[0]
        y = None
        for t, (dh, dw) in enumerate(_OFFSETS):
            s = dh * W + dw
            tap = a if s == 0 else pltpu.roll(a, (-s) % L, axis=1)   # XLU slot
            if masks[t] is not None:
                tap = jnp.where(masks[t], tap, 0.0)
            w = w3_ref[w_base * 9 + t, :, 0:cin].astype(_MM_DTYPE)
            c = jnp.dot(w, tap.astype(_MM_DTYPE),
                        preferred_element_type=jnp.float32)
            y = c if y is None else y + c
        y = y + sh_ref[0:nf, sh_idx:sh_idx + 1]
        return jnp.maximum(y, 0.0) if relu else y

    def conv1x1(a, w_idx, sh_idx, rows, relu):
        cin = a.shape[0]
        w = w1_ref[w_idx, 0:rows, 0:cin].astype(_MM_DTYPE)
        y = jnp.dot(w, a.astype(_MM_DTYPE), preferred_element_type=jnp.float32)
        y = y + sh_ref[0:rows, sh_idx:sh_idx + 1]
        return jnp.maximum(y, 0.0) if relu else y

    def head_single(a, w3_base, sh_base, w1_idx, sh_c3):
        y = conv3x3_bn(a, w3_base, sh_base, relu=False)          # Conv2DNormed 3x3
        y = conv3x3_bn(y, w3_base + 1, sh_base + 1, relu=True)   # Conv2DNormed 3x3 + ReLU
        return conv1x1(y, w1_idx, sh_c3, rows=ncl, relu=False)   # Conv2d 1x1 (+bias)

    # ---- distance head + ChannelAct -----------------------------------------
    dist = head_single(x, 0, 0, 0, 2)                            # (ncl, L)
    if softmax_channel:                                          # Softmax over channels
        dist = dist - jnp.max(dist, axis=0, keepdims=True)
        e = jnp.exp(dist)
        dist = e * pl.reciprocal(jnp.sum(e, axis=0, keepdims=True), approx=True)
    else:                                                        # SigmoidCrisp (folded)
        dist = jax.nn.sigmoid(dist)

    dist_eq = conv1x1(dist, 1, 3, rows=nf, relu=True)            # (nf, L)

    # ---- boundary head -------------------------------------------------------
    bound_in = jnp.concatenate([x, dist_eq], axis=0)             # (2nf, L)
    bound = jax.nn.sigmoid(                                      # CrispSigm (folded)
        head_single(bound_in, 2, 4, 2, 6))
    bound_eq = conv1x1(bound, 3, 7, rows=nf, relu=True)          # (nf, L)

    # ---- combine + final segmentation head -----------------------------------
    comb = conv1x1(jnp.concatenate([bound_eq, dist_eq], axis=0), 4, 8,
                   rows=nf, relu=True)                           # (nf, L)
    all_layers = jnp.concatenate([comb, x], axis=0)              # (2nf, L)
    segm = jax.nn.sigmoid(                                       # segm_act (folded)
        head_single(all_layers, 4, 9, 5, 11))

    # ---- one concatenated store per batch element (== torch.cat dim=1) ------
    out = jnp.concatenate([segm, bound, dist], axis=0)           # (3*ncl, L)
    for n in range(N):
        o_ref[n] = out[:, n * HW:(n + 1) * HW]


# --------------------------- parameter init ----------------------------------

def _bn_fold(key, cout):
    kg, kb, km, kv = jax.random.split(key, 4)
    gamma = 1.0 + 0.1 * jax.random.normal(kg, (cout,), jnp.float32)
    beta = 0.1 * jax.random.normal(kb, (cout,), jnp.float32)
    mean = 0.1 * jax.random.normal(km, (cout,), jnp.float32)
    var = 1.0 + 0.1 * jax.random.uniform(kv, (cout,), jnp.float32)
    scale = gamma / jnp.sqrt(var + _BN_EPS)
    shift = beta - mean * scale
    return scale, shift


def _conv3x3_normed(key, cin, cout):
    kw, kb = jax.random.split(key)
    w = jax.random.normal(kw, (cout, cin, 3, 3), jnp.float32) / jnp.sqrt(9.0 * cin)
    scale, shift = _bn_fold(kb, cout)
    return {"w": w, "scale": scale, "shift": shift}


def _conv1x1_normed(key, cin, cout):
    kw, kb = jax.random.split(key)
    w = jax.random.normal(kw, (cout, cin), jnp.float32) / jnp.sqrt(float(cin))
    scale, shift = _bn_fold(kb, cout)
    return {"w": w, "scale": scale, "shift": shift}


def _conv1x1_bias(key, cin, cout):
    kw, kb = jax.random.split(key)
    w = jax.random.normal(kw, (cout, cin), jnp.float32) / jnp.sqrt(float(cin))
    b = 0.1 * jax.random.normal(kb, (cout,), jnp.float32)
    return {"w": w, "b": b}


def _head_single_params(key, cin, cout, nclasses):
    k1, k2, k3 = jax.random.split(key, 3)
    return {"c1": _conv3x3_normed(k1, cin, cout),
            "c2": _conv3x3_normed(k2, cout, cout),
            "c3": _conv1x1_bias(k3, cout, nclasses)}


def init_head_cmtsk_params(key, nfilters, nclasses):
    ks = jax.random.split(key, 6)
    return {
        "distance_logits": _head_single_params(ks[0], nfilters, nfilters, nclasses),
        "dist_Equalizer": _conv1x1_normed(ks[1], nclasses, nfilters),
        "Comb_bound_dist": _conv1x1_normed(ks[2], 2 * nfilters, nfilters),
        "bound_logits": _head_single_params(ks[3], 2 * nfilters, nfilters, nclasses),
        "bound_Equalizer": _conv1x1_normed(ks[4], nclasses, nfilters),
        "final_segm_logits": _head_single_params(ks[5], 2 * nfilters, nfilters, nclasses),
        "crisp_gamma": jnp.ones((), jnp.float32),    # SigmoidCrisp (CrispSigm)
        "segm_gamma": jnp.ones((), jnp.float32),     # SigmoidCrisp (segm_act)
        "channel_gamma": jnp.ones((), jnp.float32),  # SigmoidCrisp (ChannelAct, NClasses==1)
    }


# ------------------- host-side folding / packing (done once) ------------------

def pack_head_cmtsk_params(params, nfilters, nclasses):
    """Fold BN scale + SigmoidCrisp into the weights and pack into 3 arrays."""
    nf, ncl = nfilters, nclasses
    softmax_channel = ncl > 1
    rmax = max(nf, ncl)
    c3max = 2 * nf                 # max cin among the 3x3 convs
    c1max = max(2 * nf, ncl)       # max cin among the 1x1 convs

    def crisp(g):                  # SigmoidCrisp scale: 1 / (smooth + sigmoid(gamma))
        return 1.0 / (_CRISP_SMOOTH + jax.nn.sigmoid(g))

    def pack3(c):                  # (cout,cin,3,3)*scale -> (9, nf, c3max), tap-major
        w = c["w"] * c["scale"][:, None, None, None]
        cout, cin = w.shape[0], w.shape[1]
        w = jnp.transpose(w, (2, 3, 0, 1)).reshape(9, cout, cin)
        return jnp.pad(w, ((0, 0), (0, nf - cout), (0, c3max - cin)))

    def pad1(w):                   # (cout,cin) -> (rmax, c1max), zero padded
        cout, cin = w.shape
        return jnp.pad(w, ((0, rmax - cout), (0, c1max - cin)))

    def padv(v):                   # (c,) -> (rmax,), zero padded
        return jnp.pad(v, (0, rmax - v.shape[0]))

    dl, bl, sl = (params["distance_logits"], params["bound_logits"],
                  params["final_segm_logits"])
    deq, beq, comb = (params["dist_Equalizer"], params["bound_Equalizer"],
                      params["Comb_bound_dist"])

    # sigmoid(c * (Wx + b)) == sigmoid((cW)x + cb): fold crisp into final 1x1s.
    c_crisp = crisp(params["crisp_gamma"])
    c_segm = crisp(params["segm_gamma"])
    c_chan = jnp.float32(1.0) if softmax_channel else crisp(params["channel_gamma"])

    # order: dist c1, dist c2, bound c1, bound c2, segm c1, segm c2
    w3 = jnp.concatenate([pack3(dl["c1"]), pack3(dl["c2"]),
                          pack3(bl["c1"]), pack3(bl["c2"]),
                          pack3(sl["c1"]), pack3(sl["c2"])], axis=0)   # (54, nf, 2nf)

    # order: dist c3, dist_Eq, bound c3, bound_Eq, comb, segm c3
    w1 = jnp.stack([pad1(dl["c3"]["w"] * c_chan),
                    pad1(deq["w"] * deq["scale"][:, None]),
                    pad1(bl["c3"]["w"] * c_crisp),
                    pad1(beq["w"] * beq["scale"][:, None]),
                    pad1(comb["w"] * comb["scale"][:, None]),
                    pad1(sl["c3"]["w"] * c_segm)], axis=0)             # (6, rmax, c1max)

    # shift/bias columns: dist c1, c2, c3, distEq, bound c1, c2, c3, boundEq,
    #                     comb, segm c1, c2, c3
    shifts = jnp.stack([padv(dl["c1"]["shift"]), padv(dl["c2"]["shift"]),
                        padv(dl["c3"]["b"] * c_chan), padv(deq["shift"]),
                        padv(bl["c1"]["shift"]), padv(bl["c2"]["shift"]),
                        padv(bl["c3"]["b"] * c_crisp), padv(beq["shift"]),
                        padv(comb["shift"]),
                        padv(sl["c1"]["shift"]), padv(sl["c2"]["shift"]),
                        padv(sl["c3"]["b"] * c_segm)], axis=1)         # (rmax, 12)

    return {"w3": w3.astype(jnp.float32),
            "w1": w1.astype(jnp.float32),
            "shifts": shifts.astype(jnp.float32)}


# --------------------------- forward pass -------------------------------------

def head_cmtsk_forward(packed, conv_nchw, nclasses):
    N, nf, H, W = conv_nchw.shape
    HW = H * W
    ncl = nclasses
    x = conv_nchw.reshape(N, nf, HW).astype(jnp.float32)     # free reshape (NCHW-flat)

    kern = functools.partial(
        _head_cmtsk_kernel, H=H, W=W, N=N, nf=nf, ncl=ncl,
        softmax_channel=(nclasses > 1))

    vmem = pl.BlockSpec(memory_space=pltpu.MemorySpace.VMEM)
    out = pl.pallas_call(
        kern,
        out_shape=jax.ShapeDtypeStruct((N, 3 * ncl, HW), jnp.float32),
        in_specs=[vmem, vmem, vmem, vmem],
        out_specs=vmem,
    )(x, packed["w3"], packed["w1"], packed["shifts"])

    # (N, 3*ncl, H*W) -> (N, 3*ncl, H, W): contiguous, free reshape
    return out.reshape(N, 3 * ncl, H, W)


# --------------------------- main ---------------------------------------------

if __name__ == "__main__":
    nfilters, nclasses = 8, 3
    N, H, W = 2, 16, 16

    key = jax.random.PRNGKey(0)
    kx, kp = jax.random.split(key)
    conv = jax.random.normal(kx, (N, nfilters, H, W), jnp.float32)   # NCHW input
    params = init_head_cmtsk_params(kp, nfilters, nclasses)
    packed = pack_head_cmtsk_params(params, nfilters, nclasses)      # once, host-side

    fwd = jax.jit(lambda pk, c: head_cmtsk_forward(pk, c, nclasses))
    out = jax.block_until_ready(fwd(packed, conv))

    assert out.shape == (N, 3 * nclasses, H, W), out.shape
    assert bool(jnp.all(jnp.isfinite(out)))
    print("KERNEL_OK")
</pallas_src>

<mosaic_0001>
module attributes {stable_mosaic.version = 11 : i64} {
  func.func @_head_cmtsk_kernel(%arg0: memref<2x8x256xf32, #tpu.memory_space<vmem>>, %arg1: memref<54x8x16xf32, #tpu.memory_space<vmem>>, %arg2: memref<6x8x16xf32, #tpu.memory_space<vmem>>, %arg3: memref<8x12xf32, #tpu.memory_space<vmem>>, %arg4: memref<2x9x256xf32, #tpu.memory_space<vmem>>) attributes {dimension_semantics = [], scalar_prefetch = 0 : i64, scratch_operands = 0 : i64, tpu.core_type = #tpu.core_type<tc>} {
    %c0 = arith.constant 0 : index
    %c0_0 = arith.constant 0 : index
    %c0_1 = arith.constant 0 : index
    %0 = vector.load %arg0[%c0, %c0_0, %c0_1] : memref<2x8x256xf32, #tpu.memory_space<vmem>>, vector<1x8x256xf32>
    %1 = vector.shape_cast %0 : vector<1x8x256xf32> to vector<8x256xf32>
    %c1 = arith.constant 1 : index
    %c0_2 = arith.constant 0 : index
    %c0_3 = arith.constant 0 : index
    %2 = vector.load %arg0[%c1, %c0_2, %c0_3] : memref<2x8x256xf32, #tpu.memory_space<vmem>>, vector<1x8x256xf32>
    %3 = vector.shape_cast %2 : vector<1x8x256xf32> to vector<8x256xf32>
    %4 = tpu.concatenate %1, %3 in 1 : vector<8x256xf32>, vector<8x256xf32> -> vector<8x512xf32>
    %5 = tpu.iota {dimensions = array<i32: 1>} : vector<1x512xi32>
    %c255_i32 = arith.constant 255 : i32
    %6 = vector.broadcast %c255_i32 : i32 to vector<1x512xi32>
    %7 = arith.andi %5, %6 : vector<1x512xi32>
    %c15_i32 = arith.constant 15 : i32
    %8 = vector.broadcast %c15_i32 : i32 to vector<1x512xi32>
    %9 = arith.andi %7, %8 : vector<1x512xi32>
    %c16_i32 = arith.constant 16 : i32
    %10 = vector.broadcast %c16_i32 : i32 to vector<1x512xi32>
    %11 = arith.cmpi sge, %7, %10 : vector<1x512xi32>
    %c1_i32 = arith.constant 1 : i32
    %12 = vector.broadcast %c1_i32 : i32 to vector<1x512xi32>
    %13 = arith.cmpi sge, %9, %12 : vector<1x512xi32>
    %14 = arith.andi %11, %13 : vector<1x512xi1>
    %c16_i32_4 = arith.constant 16 : i32
    %15 = vector.broadcast %c16_i32_4 : i32 to vector<1x512xi32>
    %16 = arith.cmpi sge, %7, %15 : vector<1x512xi32>
    %c16_i32_5 = arith.constant 16 : i32
    %17 = vector.broadcast %c16_i32_5 : i32 to vector<1x512xi32>
    %18 = arith.cmpi sge, %7, %17 : vector<1x512xi32>
    %c14_i32 = arith.constant 14 : i32
    %19 = vector.broadcast %c14_i32 : i32 to vector<1x512xi32>
    %20 = arith.cmpi sle, %9, %19 : vector<1x512xi32>
    %21 = arith.andi %18, %20 : vector<1x512xi1>
    %c1_i32_6 = arith.constant 1 : i32
    %22 = vector.broadcast %c1_i32_6 : i32 to vector<1x512xi32>
    %23 = arith.cmpi sge, %9, %22 : vector<1x512xi32>
    %c14_i32_7 = arith.constant 14 : i32
    %24 = vector.broadcast %c14_i32_7 : i32 to vector<1x512xi32>
    %25 = arith.cmpi sle, %9, %24 : vector<1x512xi32>
    %c240_i32 = arith.constant 240 : i32
    %26 = vector.broadcast %c240_i32 : i32 to vector<1x512xi32>
    %27 = arith.cmpi slt, %7, %26 : vector<1x512xi32>
    %c1_i32_8 = arith.constant 1 : i32
    %28 = vector.broadcast %c1_i32_8 : i32 to vector<1x512xi32>
    %29 = arith.cmpi sge, %9, %28 : vector<1x512xi32>
    %30 = arith.andi %27, %29 : vector<1x512xi1>
    %c240_i32_9 = arith.constant 240 : i32
    %31 = vector.broadcast %c240_i32_9 : i32 to vector<1x512xi32>
    %32 = arith.cmpi slt, %7, %31 : vector<1x512xi32>
    %c240_i32_10 = arith.constant 240 : i32
    %33 = vector.broadcast %c240_i32_10 : i32 to vector<1x512xi32>
    %34 = arith.cmpi slt, %7, %33 : vector<1x512xi32>
    %c14_i32_11 = arith.constant 14 : i32
    %35 = vector.broadcast %c14_i32_11 : i32 to vector<1x512xi32>
    %36 = arith.cmpi sle, %9, %35 : vector<1x512xi32>
    %37 = arith.andi %34, %36 : vector<1x512xi1>
    %c17_i32 = arith.constant 17 : i32
    %38 = tpu.dynamic_rotate %4 by %c17_i32 dim 1 : vector<8x512xf32>, i32 -> vector<8x512xf32>
    %cst = arith.constant 0.000000e+00 : f32
    %39 = vector.shape_cast %14 : vector<1x512xi1> to vector<1x512xi1>
    %40 = vector.broadcast %39 : vector<1x512xi1> to vector<8x512xi1>
    %41 = vector.broadcast %cst : f32 to vector<8x512xf32>
    %42 = arith.select %40, %38, %41 : vector<8x512xi1>, vector<8x512xf32>
    %c0_12 = arith.constant 0 : index
    %c0_13 = arith.constant 0 : index
    %c0_14 = arith.constant 0 : index
    %43 = vector.load %arg1[%c0_12, %c0_13, %c0_14] : memref<54x8x16xf32, #tpu.memory_space<vmem>>, vector<1x8x8xf32>
    %44 = vector.shape_cast %43 : vector<1x8x8xf32> to vector<8x8xf32>
    %45 = arith.truncf %44 : vector<8x8xf32> to vector<8x8xbf16>
    %46 = arith.truncf %42 : vector<8x512xf32> to vector<8x512xbf16>
    %cst_15 = arith.constant dense<0.000000e+00> : vector<8x512xf32>
    %47 = tpu.matmul %45, %46, %cst_15 {dimension_numbers = #tpu.dot_dimension_numbers<[1], [0], [0], [1], [0, 0, 1, 1], [], []>} : vector<8x8xbf16>, vector<8x512xbf16>, vector<8x512xf32> -> vector<8x512xf32>
    %c16_i32_16 = arith.constant 16 : i32
    %48 = tpu.dynamic_rotate %4 by %c16_i32_16 dim 1 : vector<8x512xf32>, i32 -> vector<8x512xf32>
    %cst_17 = arith.constant 0.000000e+00 : f32
    %49 = vector.shape_cast %16 : vector<1x512xi1> to vector<1x512xi1>
    %50 = vector.broadcast %49 : vector<1x512xi1> to vector<8x512xi1>
    %51 = vector.broadcast %cst_17 : f32 to vector<8x512xf32>
    %52 = arith.select %50, %48, %51 : vector<8x512xi1>, vector<8x512xf32>
    %c1_18 = arith.constant 1 : index
    %c0_19 = arith.constant 0 : index
    %c0_20 = arith.constant 0 : index
    %53 = vector.load %arg1[%c1_18, %c0_19, %c0_20] : memref<54x8x16xf32, #tpu.memory_space<vmem>>, vector<1x8x8xf32>
    %54 = vector.shape_cast %53 : vector<1x8x8xf32> to vector<8x8xf32>
    %55 = arith.truncf %54 : vector<8x8xf32> to vector<8x8xbf16>
    %56 = arith.truncf %52 : vector<8x512xf32> to vector<8x512xbf16>
    %cst_21 = arith.constant dense<0.000000e+00> : vector<8x512xf32>
    %57 = tpu.matmul %55, %56, %cst_21 {dimension_numbers = #tpu.dot_dimension_numbers<[1], [0], [0], [1], [0, 0, 1, 1], [], []>} : vector<8x8xbf16>, vector<8x512xbf16>, vector<8x512xf32> -> vector<8x512xf32>
    %58 = arith.addf %47, %57 : vector<8x512xf32>
    %c15_i32_22 = arith.constant 15 : i32
    %59 = tpu.dynamic_rotate %4 by %c15_i32_22 dim 1 : vector<8x512xf32>, i32 -> vector<8x512xf32>
    %cst_23 = arith.constant 0.000000e+00 : f32
    %60 = vector.shape_cast %21 : vector<1x512xi1> to vector<1x512xi1>
    %61 = vector.broadcast %60 : vector<1x512xi1> to vector<8x512xi1>
    %62 = vector.broadcast %cst_23 : f32 to vector<8x512xf32>
    %63 = arith.select %61, %59, %62 : vector<8x512xi1>, vector<8x512xf32>
    %c2 = arith.constant 2 : index
    %c0_24 = arith.constant 0 : index
    %c0_25 = arith.constant 0 : index
    %64 = vector.load %arg1[%c2, %c0_24, %c0_25] : memref<54x8x16xf32, #tpu.memory_space<vmem>>, vector<1x8x8xf32>
    %65 = vector.shape_cast %64 : vector<1x8x8xf32> to vector<8x8xf32>
    %66 = arith.truncf %65 : vector<8x8xf32> to vector<8x8xbf16>
    %67 = arith.truncf %63 : vector<8x512xf32> to vector<8x512xbf16>
    %cst_26 = arith.constant dense<0.000000e+00> : vector<8x512xf32>
    %68 = tpu.matmul %66, %67, %cst_26 {dimension_numbers = #tpu.dot_dimension_numbers<[1], [0], [0], [1], [0, 0, 1, 1], [], []>} : vector<8x8xbf16>, vector<8x512xbf16>, vector<8x512xf32> -> vector<8x512xf32>
    %69 = arith.addf %58, %68 : vector<8x512xf32>
    %c1_i32_27 = arith.constant 1 : i32
    %70 = tpu.dynamic_rotate %4 by %c1_i32_27 dim 1 : vector<8x512xf32>, i32 -> vector<8x512xf32>
    %cst_28 = arith.constant 0.000000e+00 : f32
    %71 = vector.shape_cast %23 : vector<1x512xi1> to vector<1x512xi1>
    %72 = vector.broadcast %71 : vector<1x512xi1> to vector<8x512xi1>
    %73 = vector.broadcast %cst_28 : f32 to vector<8x512xf32>
    %74 = arith.select %72, %70, %73 : vector<8x512xi1>, vector<8x512xf32>
    %c3 = arith.constant 3 : index
    %c0_29 = arith.constant 0 : index
    %c0_30 = arith.constant 0 : index
    %75 = vector.load %arg1[%c3, %c0_29, %c0_30] : memref<54x8x16xf32, #tpu.memory_space<vmem>>, vector<1x8x8xf32>
    %76 = vector.shape_cast %75 : vector<1x8x8xf32> to vector<8x8xf32>
    %77 = arith.truncf %76 : vector<8x8xf32> to vector<8x8xbf16>
    %78 = arith.truncf %74 : vector<8x512xf32> to vector<8x512xbf16>
    %cst_31 = arith.constant dense<0.000000e+00> : vector<8x512xf32>
    %79 = tpu.matmul %77, %78, %cst_31 {dimension_numbers = #tpu.dot_dimension_numbers<[1], [0], [0], [1], [0, 0, 1, 1], [], []>} : vector<8x8xbf16>, vector<8x512xbf16>, vector<8x512xf32> -> vector<8x512xf32>
    %80 = arith.addf %69, %79 : vector<8x512xf32>
    %c4 = arith.constant 4 : index
    %c0_32 = arith.constant 0 : index
    %c0_33 = arith.constant 0 : index
    %81 = vector.load %arg1[%c4, %c0_32, %c0_33] : memref<54x8x16xf32, #tpu.memory_space<vmem>>, vector<1x8x8xf32>
    %82 = vector.shape_cast %81 : vector<1x8x8xf32> to vector<8x8xf32>
    %83 = arith.truncf %82 : vector<8x8xf32> to vector<8x8xbf16>
    %84 = arith.truncf %4 : vector<8x512xf32> to vector<8x512xbf16>
    %cst_34 = arith.constant dense<0.000000e+00> : vector<8x512xf32>
    %85 = tpu.matmul %83, %84, %cst_34 {dimension_numbers = #tpu.dot_dimension_numbers<[1], [0], [0], [1], [0, 0, 1, 1], [], []>} : vector<8x8xbf16>, vector<8x512xbf16>, vector<8x512xf32> -> vector<8x512xf32>
    %86 = arith.addf %80, %85 : vector<8x512xf32>
    %c511_i32 = arith.constant 511 : i32
    %87 = tpu.dynamic_rotate %4 by %c511_i32 dim 1 : vector<8x512xf32>, i32 -> vector<8x512xf32>
    %cst_35 = arith.constant 0.000000e+00 : f32
    %88 = vector.shape_cast %25 : vector<1x512xi1> to vector<1x512xi1>
    %89 = vector.broadcast %88 : vector<1x512xi1> to vector<8x512xi1>
    %90 = vector.broadcast %cst_35 : f32 to vector<8x512xf32>
    %91 = arith.select %89, %87, %90 : vector<8x512xi1>, vector<8x512xf32>
    %c5 = arith.constant 5 : index
    %c0_36 = arith.constant 0 : index
    %c0_37 = arith.constant 0 : index
    %92 = vector.load %arg1[%c5, %c0_36, %c0_37] : memref<54x8x16xf32, #tpu.memory_space<vmem>>, vector<1x8x8xf32>
    %93 = vector.shape_cast %92 : vector<1x8x8xf32> to vector<8x8xf32>
    %94 = arith.truncf %93 : vector<8x8xf32> to vector<8x8xbf16>
    %95 = arith.truncf %91 : vector<8x512xf32> to vector<8x512xbf16>
    %cst_38 = arith.constant dense<0.000000e+00> : vector<8x512xf32>
    %96 = tpu.matmul %94, %95, %cst_38 {dimension_numbers = #tpu.dot_dimension_numbers<[1], [0], [0], [1], [0, 0, 1, 1], [], []>} : vector<8x8xbf16>, vector<8x512xbf16>, vector<8x512xf32> -> vector<8x512xf32>
    %97 = arith.addf %86, %96 : vector<8x512xf32>
    %c497_i32 = arith.constant 497 : i32
    %98 = tpu.dynamic_rotate %4 by %c497_i32 dim 1 : vector<8x512xf32>, i32 -> vector<8x512xf32>
    %cst_39 = arith.constant 0.000000e+00 : f32
    %99 = vector.shape_cast %30 : vector<1x512xi1> to vector<1x512xi1>
    %100 = vector.broadcast %99 : vector<1x512xi1> to vector<8x512xi1>
    %101 = vector.broadcast %cst_39 : f32 to vector<8x512xf32>
    %102 = arith.select %100, %98, %101 : vector<8x512xi1>, vector<8x512xf32>
    %c6 = arith.constant 6 : index
    %c0_40 = arith.constant 0 : index
    %c0_41 = arith.constant 0 : index
    %103 = vector.load %arg1[%c6, %c0_40, %c0_41] : memref<54x8x16xf32, #tpu.memory_space<vmem>>, vector<1x8x8xf32>
    %104 = vector.shape_cast %103 : vector<1x8x8xf32> to vector<8x8xf32>
    %105 = arith.truncf %104 : vector<8x8xf32> to vector<8x8xbf16>
    %106 = arith.truncf %102 : vector<8x512xf32> to vector<8x512xbf16>
    %cst_42 = arith.constant dense<0.000000e+00> : vector<8x512xf32>
    %107 = tpu.matmul %105, %106, %cst_42 {dimension_numbers = #tpu.dot_dimension_numbers<[1], [0], [0], [1], [0, 0, 1, 1], [], []>} : vector<8x8xbf16>, vector<8x512xbf16>, vector<8x512xf32> -> vector<8x512xf32>
    %108 = arith.addf %97, %107 : vector<8x512xf32>
    %c496_i32 = arith.constant 496 : i32
    %109 = tpu.dynamic_rotate %4 by %c496_i32 dim 1 : vector<8x512xf32>, i32 -> vector<8x512xf32>
    %cst_43 = arith.constant 0.000000e+00 : f32
    %110 = vector.shape_cast %32 : vector<1x512xi1> to vector<1x512xi1>
    %111 = vector.broadcast %110 : vector<1x512xi1> to vector<8x512xi1>
    %112 = vector.broadcast %cst_43 : f32 to vector<8x512xf32>
    %113 = arith.select %111, %109, %112 : vector<8x512xi1>, vector<8x512xf32>
    %c7 = arith.constant 7 : index
    %c0_44 = arith.constant 0 : index
    %c0_45 = arith.constant 0 : index
    %114 = vector.load %arg1[%c7, %c0_44, %c0_45] : memref<54x8x16xf32, #tpu.memory_space<vmem>>, vector<1x8x8xf32>
    %115 = vector.shape_cast %114 : vector<1x8x8xf32> to vector<8x8xf32>
    %116 = arith.truncf %115 : vector<8x8xf32> to vector<8x8xbf16>
    %117 = arith.truncf %113 : vector<8x512xf32> to vector<8x512xbf16>
    %cst_46 = arith.constant dense<0.000000e+00> : vector<8x512xf32>
    %118 = tpu.matmul %116, %117, %cst_46 {dimension_numbers = #tpu.dot_dimension_numbers<[1], [0], [0], [1], [0, 0, 1, 1], [], []>} : vector<8x8xbf16>, vector<8x512xbf16>, vector<8x512xf32> -> vector<8x512xf32>
    %119 = arith.addf %108, %118 : vector<8x512xf32>
    %c495_i32 = arith.constant 495 : i32
    %120 = tpu.dynamic_rotate %4 by %c495_i32 dim 1 : vector<8x512xf32>, i32 -> vector<8x512xf32>
    %cst_47 = arith.constant 0.000000e+00 : f32
    %121 = vector.shape_cast %37 : vector<1x512xi1> to vector<1x512xi1>
    %122 = vector.broadcast %121 : vector<1x512xi1> to vector<8x512xi1>
    %123 = vector.broadcast %cst_47 : f32 to vector<8x512xf32>
    %124 = arith.select %122, %120, %123 : vector<8x512xi1>, vector<8x512xf32>
    %c8 = arith.constant 8 : index
    %c0_48 = arith.constant 0 : index
    %c0_49 = arith.constant 0 : index
    %125 = vector.load %arg1[%c8, %c0_48, %c0_49] : memref<54x8x16xf32, #tpu.memory_space<vmem>>, vector<1x8x8xf32>
    %126 = vector.shape_cast %125 : vector<1x8x8xf32> to vector<8x8xf32>
    %127 = arith.truncf %126 : vector<8x8xf32> to vector<8x8xbf16>
    %128 = arith.truncf %124 : vector<8x512xf32> to vector<8x512xbf16>
    %cst_50 = arith.constant dense<0.000000e+00> : vector<8x512xf32>
    %129 = tpu.matmul %127, %128, %cst_50 {dimension_numbers = #tpu.dot_dimension_numbers<[1], [0], [0], [1], [0, 0, 1, 1], [], []>} : vector<8x8xbf16>, vector<8x512xbf16>, vector<8x512xf32> -> vector<8x512xf32>
    %130 = arith.addf %119, %129 : vector<8x512xf32>
    %c0_51 = arith.constant 0 : index
    %c0_52 = arith.constant 0 : index
    %131 = vector.load %arg3[%c0_51, %c0_52] : memref<8x12xf32, #tpu.memory_space<vmem>>, vector<8x1xf32>
    %132 = vector.broadcast %131 : vector<8x1xf32> to vector<8x512xf32>
    %133 = arith.addf %130, %132 : vector<8x512xf32>
    %c17_i32_53 = arith.constant 17 : i32
    %134 = tpu.dynamic_rotate %133 by %c17_i32_53 dim 1 : vector<8x512xf32>, i32 -> vector<8x512xf32>
    %cst_54 = arith.constant 0.000000e+00 : f32
    %135 = vector.shape_cast %14 : vector<1x512xi1> to vector<1x512xi1>
    %136 = vector.broadcast %135 : vector<1x512xi1> to vector<8x512xi1>
    %137 = vector.broadcast %cst_54 : f32 to vector<8x512xf32>
    %138 = arith.select %136, %134, %137 : vector<8x512xi1>, vector<8x512xf32>
    %c9 = arith.constant 9 : index
    %c0_55 = arith.constant 0 : index
    %c0_56 = arith.constant 0 : index
    %139 = vector.load %arg1[%c9, %c0_55, %c0_56] : memref<54x8x16xf32, #tpu.memory_space<vmem>>, vector<1x8x8xf32>
    %140 = vector.shape_cast %139 : vector<1x8x8xf32> to vector<8x8xf32>
    %141 = arith.truncf %140 : vector<8x8xf32> to vector<8x8xbf16>
    %142 = arith.truncf %138 : vector<8x512xf32> to vector<8x512xbf16>
    %cst_57 = arith.constant dense<0.000000e+00> : vector<8x512xf32>
    %143 = tpu.matmul %141, %142, %cst_57 {dimension_numbers = #tpu.dot_dimension_numbers<[1], [0], [0], [1], [0, 0, 1, 1], [], []>} : vector<8x8xbf16>, vector<8x512xbf16>, vector<8x512xf32> -> vector<8x512xf32>
    %c16_i32_58 = arith.constant 16 : i32
    %144 = tpu.dynamic_rotate %133 by %c16_i32_58 dim 1 : vector<8x512xf32>, i32 -> vector<8x512xf32>
    %cst_59 = arith.constant 0.000000e+00 : f32
    %145 = vector.shape_cast %16 : vector<1x512xi1> to vector<1x512xi1>
    %146 = vector.broadcast %145 : vector<1x512xi1> to vector<8x512xi1>
    %147 = vector.broadcast %cst_59 : f32 to vector<8x512xf32>
    %148 = arith.select %146, %144, %147 : vector<8x512xi1>, vector<8x512xf32>
    %c10 = arith.constant 10 : index
    %c0_60 = arith.constant 0 : index
    %c0_61 = arith.constant 0 : index
    %149 = vector.load %arg1[%c10, %c0_60, %c0_61] : memref<54x8x16xf32, #tpu.memory_space<vmem>>, vector<1x8x8xf32>
    %150 = vector.shape_cast %149 : vector<1x8x8xf32> to vector<8x8xf32>
    %151 = arith.truncf %150 : vector<8x8xf32> to vector<8x8xbf16>
    %152 = arith.truncf %148 : vector<8x512xf32> to vector<8x512xbf16>
    %cst_62 = arith.constant dense<0.000000e+00> : vector<8x512xf32>
    %153 = tpu.matmul %151, %152, %cst_62 {dimension_numbers = #tpu.dot_dimension_numbers<[1], [0], [0], [1], [0, 0, 1, 1], [], []>} : vector<8x8xbf16>, vector<8x512xbf16>, vector<8x512xf32> -> vector<8x512xf32>
    %154 = arith.addf %143, %153 : vector<8x512xf32>
    %c15_i32_63 = arith.constant 15 : i32
    %155 = tpu.dynamic_rotate %133 by %c15_i32_63 dim 1 : vector<8x512xf32>, i32 -> vector<8x512xf32>
    %cst_64 = arith.constant 0.000000e+00 : f32
    %156 = vector.shape_cast %21 : vector<1x512xi1> to vector<1x512xi1>
    %157 = vector.broadcast %156 : vector<1x512xi1> to vector<8x512xi1>
    %158 = vector.broadcast %cst_64 : f32 to vector<8x512xf32>
    %159 = arith.select %157, %155, %158 : vector<8x512xi1>, vector<8x512xf32>
    %c11 = arith.constant 11 : index
    %c0_65 = arith.constant 0 : index
    %c0_66 = arith.constant 0 : index
    %160 = vector.load %arg1[%c11, %c0_65, %c0_66] : memref<54x8x16xf32, #tpu.memory_space<vmem>>, vector<1x8x8xf32>
    %161 = vector.shape_cast %160 : vector<1x8x8xf32> to vector<8x8xf32>
    %162 = arith.truncf %161 : vector<8x8xf32> to vector<8x8xbf16>
    %163 = arith.truncf %159 : vector<8x512xf32> to vector<8x512xbf16>
    %cst_67 = arith.constant dense<0.000000e+00> : vector<8x512xf32>
    %164 = tpu.matmul %162, %163, %cst_67 {dimension_numbers = #tpu.dot_dimension_numbers<[1], [0], [0], [1], [0, 0, 1, 1], [], []>} : vector<8x8xbf16>, vector<8x512xbf16>, vector<8x512xf32> -> vector<8x512xf32>
    %165 = arith.addf %154, %164 : vector<8x512xf32>
    %c1_i32_68 = arith.constant 1 : i32
    %166 = tpu.dynamic_rotate %133 by %c1_i32_68 dim 1 : vector<8x512xf32>, i32 -> vector<8x512xf32>
    %cst_69 = arith.constant 0.000000e+00 : f32
    %167 = vector.shape_cast %23 : vector<1x512xi1> to vector<1x512xi1>
    %168 = vector.broadcast %167 : vector<1x512xi1> to vector<8x512xi1>
    %169 = vector.broadcast %cst_69 : f32 to vector<8x512xf32>
    %170 = arith.select %168, %166, %169 : vector<8x512xi1>, vector<8x512xf32>
    %c12 = arith.constant 12 : index
    %c0_70 = arith.constant 0 : index
    %c0_71 = arith.constant 0 : index
    %171 = vector.load %arg1[%c12, %c0_70, %c0_71] : memref<54x8x16xf32, #tpu.memory_space<vmem>>, vector<1x8x8xf32>
    %172 = vector.shape_cast %171 : vector<1x8x8xf32> to vector<8x8xf32>
    %173 = arith.truncf %172 : vector<8x8xf32> to vector<8x8xbf16>
    %174 = arith.truncf %170 : vector<8x512xf32> to vector<8x512xbf16>
    %cst_72 = arith.constant dense<0.000000e+00> : vector<8x512xf32>
    %175 = tpu.matmul %173, %174, %cst_72 {dimension_numbers = #tpu.dot_dimension_numbers<[1], [0], [0], [1], [0, 0, 1, 1], [], []>} : vector<8x8xbf16>, vector<8x512xbf16>, vector<8x512xf32> -> vector<8x512xf32>
    %176 = arith.addf %165, %175 : vector<8x512xf32>
    %c13 = arith.constant 13 : index
    %c0_73 = arith.constant 0 : index
    %c0_74 = arith.constant 0 : index
    %177 = vector.load %arg1[%c13, %c0_73, %c0_74] : memref<54x8x16xf32, #tpu.memory_space<vmem>>, vector<1x8x8xf32>
    %178 = vector.shape_cast %177 : vector<1x8x8xf32> to vector<8x8xf32>
    %179 = arith.truncf %178 : vector<8x8xf32> to vector<8x8xbf16>
    %180 = arith.truncf %133 : vector<8x512xf32> to vector<8x512xbf16>
    %cst_75 = arith.constant dense<0.000000e+00> : vector<8x512xf32>
    %181 = tpu.matmul %179, %180, %cst_75 {dimension_numbers = #tpu.dot_dimension_numbers<[1], [0], [0], [1], [0, 0, 1, 1], [], []>} : vector<8x8xbf16>, vector<8x512xbf16>, vector<8x512xf32> -> vector<8x512xf32>
    %182 = arith.addf %176, %181 : vector<8x512xf32>
    %c511_i32_76 = arith.constant 511 : i32
    %183 = tpu.dynamic_rotate %133 by %c511_i32_76 dim 1 : vector<8x512xf32>, i32 -> vector<8x512xf32>
    %cst_77 = arith.constant 0.000000e+00 : f32
    %184 = vector.shape_cast %25 : vector<1x512xi1> to vector<1x512xi1>
    %185 = vector.broadcast %184 : vector<1x512xi1> to vector<8x512xi1>
    %186 = vector.broadcast %cst_77 : f32 to vector<8x512xf32>
    %187 = arith.select %185, %183, %186 : vector<8x512xi1>, vector<8x512xf32>
    %c14 = arith.constant 14 : index
    %c0_78 = arith.constant 0 : index
    %c0_79 = arith.constant 0 : index
    %188 = vector.load %arg1[%c14, %c0_78, %c0_79] : memref<54x8x16xf32, #tpu.memory_space<vmem>>, vector<1x8x8xf32>
    %189 = vector.shape_cast %188 : vector<1x8x8xf32> to vector<8x8xf32>
    %190 = arith.truncf %189 : vector<8x8xf32> to vector<8x8xbf16>
    %191 = arith.truncf %187 : vector<8x512xf32> to vector<8x512xbf16>
    %cst_80 = arith.constant dense<0.000000e+00> : vector<8x512xf32>
    %192 = tpu.matmul %190, %191, %cst_80 {dimension_numbers = #tpu.dot_dimension_numbers<[1], [0], [0], [1], [0, 0, 1, 1], [], []>} : vector<8x8xbf16>, vector<8x512xbf16>, vector<8x512xf32> -> vector<8x512xf32>
    %193 = arith.addf %182, %192 : vector<8x512xf32>
    %c497_i32_81 = arith.constant 497 : i32
    %194 = tpu.dynamic_rotate %133 by %c497_i32_81 dim 1 : vector<8x512xf32>, i32 -> vector<8x512xf32>
    %cst_82 = arith.constant 0.000000e+00 : f32
    %195 = vector.shape_cast %30 : vector<1x512xi1> to vector<1x512xi1>
    %196 = vector.broadcast %195 : vector<1x512xi1> to vector<8x512xi1>
    %197 = vector.broadcast %cst_82 : f32 to vector<8x512xf32>
    %198 = arith.select %196, %194, %197 : vector<8x512xi1>, vector<8x512xf32>
    %c15 = arith.constant 15 : index
    %c0_83 = arith.constant 0 : index
    %c0_84 = arith.constant 0 : index
    %199 = vector.load %arg1[%c15, %c0_83, %c0_84] : memref<54x8x16xf32, #tpu.memory_space<vmem>>, vector<1x8x8xf32>
    %200 = vector.shape_cast %199 : vector<1x8x8xf32> to vector<8x8xf32>
    %201 = arith.truncf %200 : vector<8x8xf32> to vector<8x8xbf16>
    %202 = arith.truncf %198 : vector<8x512xf32> to vector<8x512xbf16>
    %cst_85 = arith.constant dense<0.000000e+00> : vector<8x512xf32>
    %203 = tpu.matmul %201, %202, %cst_85 {dimension_numbers = #tpu.dot_dimension_numbers<[1], [0], [0], [1], [0, 0, 1, 1], [], []>} : vector<8x8xbf16>, vector<8x512xbf16>, vector<8x512xf32> -> vector<8x512xf32>
    %204 = arith.addf %193, %203 : vector<8x512xf32>
    %c496_i32_86 = arith.constant 496 : i32
    %205 = tpu.dynamic_rotate %133 by %c496_i32_86 dim 1 : vector<8x512xf32>, i32 -> vector<8x512xf32>
    %cst_87 = arith.constant 0.000000e+00 : f32
    %206 = vector.shape_cast %32 : vector<1x512xi1> to vector<1x512xi1>
    %207 = vector.broadcast %206 : vector<1x512xi1> to vector<8x512xi1>
    %208 = vector.broadcast %cst_87 : f32 to vector<8x512xf32>
    %209 = arith.select %207, %205, %208 : vector<8x512xi1>, vector<8x512xf32>
    %c16 = arith.constant 16 : index
    %c0_88 = arith.constant 0 : index
    %c0_89 = arith.constant 0 : index
    %210 = vector.load %arg1[%c16, %c0_88, %c0_89] : memref<54x8x16xf32, #tpu.memory_space<vmem>>, vector<1x8x8xf32>
    %211 = vector.shape_cast %210 : vector<1x8x8xf32> to vector<8x8xf32>
    %212 = arith.truncf %211 : vector<8x8xf32> to vector<8x8xbf16>
    %213 = arith.truncf %209 : vector<8x512xf32> to vector<8x512xbf16>
    %cst_90 = arith.constant dense<0.000000e+00> : vector<8x512xf32>
    %214 = tpu.matmul %212, %213, %cst_90 {dimension_numbers = #tpu.dot_dimension_numbers<[1], [0], [0], [1], [0, 0, 1, 1], [], []>} : vector<8x8xbf16>, vector<8x512xbf16>, vector<8x512xf32> -> vector<8x512xf32>
    %215 = arith.addf %204, %214 : vector<8x512xf32>
    %c495_i32_91 = arith.constant 495 : i32
    %216 = tpu.dynamic_rotate %133 by %c495_i32_91 dim 1 : vector<8x512xf32>, i32 -> vector<8x512xf32>
    %cst_92 = arith.constant 0.000000e+00 : f32
    %217 = vector.shape_cast %37 : vector<1x512xi1> to vector<1x512xi1>
    %218 = vector.broadcast %217 : vector<1x512xi1> to vector<8x512xi1>
    %219 = vector.broadcast %cst_92 : f32 to vector<8x512xf32>
    %220 = arith.select %218, %216, %219 : vector<8x512xi1>, vector<8x512xf32>
    %c17 = arith.constant 17 : index
    %c0_93 = arith.constant 0 : index
    %c0_94 = arith.constant 0 : index
    %221 = vector.load %arg1[%c17, %c0_93, %c0_94] : memref<54x8x16xf32, #tpu.memory_space<vmem>>, vector<1x8x8xf32>
    %222 = vector.shape_cast %221 : vector<1x8x8xf32> to vector<8x8xf32>
    %223 = arith.truncf %222 : vector<8x8xf32> to vector<8x8xbf16>
    %224 = arith.truncf %220 : vector<8x512xf32> to vector<8x512xbf16>
    %cst_95 = arith.constant dense<0.000000e+00> : vector<8x512xf32>
    %225 = tpu.matmul %223, %224, %cst_95 {dimension_numbers = #tpu.dot_dimension_numbers<[1], [0], [0], [1], [0, 0, 1, 1], [], []>} : vector<8x8xbf16>, vector<8x512xbf16>, vector<8x512xf32> -> vector<8x512xf32>
    %226 = arith.addf %215, %225 : vector<8x512xf32>
    %c0_96 = arith.constant 0 : index
    %c1_97 = arith.constant 1 : index
    %227 = vector.load %arg3[%c0_96, %c1_97] : memref<8x12xf32, #tpu.memory_space<vmem>>, vector<8x1xf32>
    %228 = vector.broadcast %227 : vector<8x1xf32> to vector<8x512xf32>
    %229 = arith.addf %226, %228 : vector<8x512xf32>
    %cst_98 = arith.constant 0.000000e+00 : f32
    %230 = vector.broadcast %cst_98 : f32 to vector<8x512xf32>
    %231 = arith.maximumf %229, %230 : vector<8x512xf32>
    %c0_99 = arith.constant 0 : index
    %c0_100 = arith.constant 0 : index
    %c0_101 = arith.constant 0 : index
    %232 = vector.load %arg2[%c0_99, %c0_100, %c0_101] : memref<6x8x16xf32, #tpu.memory_space<vmem>>, vector<1x3x8xf32>
    %233 = vector.shape_cast %232 : vector<1x3x8xf32> to vector<3x8xf32>
    %234 = arith.truncf %233 : vector<3x8xf32> to vector<3x8xbf16>
    %235 = arith.truncf %231 : vector<8x512xf32> to vector<8x512xbf16>
    %cst_102 = arith.constant dense<0.000000e+00> : vector<3x512xf32>
    %236 = tpu.matmul %234, %235, %cst_102 {dimension_numbers = #tpu.dot_dimension_numbers<[1], [0], [0], [1], [0, 0, 1, 1], [], []>} : vector<3x8xbf16>, vector<8x512xbf16>, vector<3x512xf32> -> vector<3x512xf32>
    %c0_103 = arith.constant 0 : index
    %c2_104 = arith.constant 2 : index
    %237 = vector.load %arg3[%c0_103, %c2_104] : memref<8x12xf32, #tpu.memory_space<vmem>>, vector<3x1xf32>
    %238 = vector.broadcast %237 : vector<3x1xf32> to vector<3x512xf32>
    %239 = arith.addf %236, %238 : vector<3x512xf32>
    %cst_105 = arith.constant dense<0xFF800000> : vector<512xf32>
    %240 = vector.multi_reduction <maximumf>, %239, %cst_105 [0] : vector<3x512xf32> to vector<512xf32>
    %241 = vector.shape_cast %240 : vector<512xf32> to vector<1x512xf32>
    %242 = vector.broadcast %241 : vector<1x512xf32> to vector<3x512xf32>
    %243 = arith.subf %239, %242 : vector<3x512xf32>
    %244 = math.exp %243 : vector<3x512xf32>
    %cst_106 = arith.constant dense<0.000000e+00> : vector<512xf32>
    %245 = vector.multi_reduction <add>, %244, %cst_106 [0] : vector<3x512xf32> to vector<512xf32>
    %246 = vector.shape_cast %245 : vector<512xf32> to vector<1x512xf32>
    %247 = tpu.reciprocal %246 {approx = true} : vector<1x512xf32> -> vector<1x512xf32>
    %248 = vector.broadcast %247 : vector<1x512xf32> to vector<3x512xf32>
    %249 = arith.mulf %244, %248 : vector<3x512xf32>
    %c1_107 = arith.constant 1 : index
    %c0_108 = arith.constant 0 : index
    %c0_109 = arith.constant 0 : index
    %250 = vector.load %arg2[%c1_107, %c0_108, %c0_109] : memref<6x8x16xf32, #tpu.memory_space<vmem>>, vector<1x8x3xf32>
    %251 = vector.shape_cast %250 : vector<1x8x3xf32> to vector<8x3xf32>
    %252 = arith.truncf %251 : vector<8x3xf32> to vector<8x3xbf16>
    %253 = arith.truncf %249 : vector<3x512xf32> to vector<3x512xbf16>
    %cst_110 = arith.constant dense<0.000000e+00> : vector<8x512xf32>
    %254 = tpu.matmul %252, %253, %cst_110 {dimension_numbers = #tpu.dot_dimension_numbers<[1], [0], [0], [1], [0, 0, 1, 1], [], []>} : vector<8x3xbf16>, vector<3x512xbf16>, vector<8x512xf32> -> vector<8x512xf32>
    %c0_111 = arith.constant 0 : index
    %c3_112 = arith.constant 3 : index
    %255 = vector.load %arg3[%c0_111, %c3_112] : memref<8x12xf32, #tpu.memory_space<vmem>>, vector<8x1xf32>
    %256 = vector.broadcast %255 : vector<8x1xf32> to vector<8x512xf32>
    %257 = arith.addf %254, %256 : vector<8x512xf32>
    %cst_113 = arith.constant 0.000000e+00 : f32
    %258 = vector.broadcast %cst_113 : f32 to vector<8x512xf32>
    %259 = arith.maximumf %257, %258 : vector<8x512xf32>
    %260 = tpu.concatenate %4, %259 in 0 : vector<8x512xf32>, vector<8x512xf32> -> vector<16x512xf32>
    %c17_i32_114 = arith.constant 17 : i32
    %261 = tpu.dynamic_rotate %260 by %c17_i32_114 dim 1 : vector<16x512xf32>, i32 -> vector<16x512xf32>
    %cst_115 = arith.constant 0.000000e+00 : f32
    %262 = vector.shape_cast %14 : vector<1x512xi1> to vector<1x512xi1>
    %263 = vector.broadcast %262 : vector<1x512xi1> to vector<16x512xi1>
    %264 = vector.broadcast %cst_115 : f32 to vector<16x512xf32>
    %265 = arith.select %263, %261, %264 : vector<16x512xi1>, vector<16x512xf32>
    %c18 = arith.constant 18 : index
    %c0_116 = arith.constant 0 : index
    %c0_117 = arith.constant 0 : index
    %266 = vector.load %arg1[%c18, %c0_116, %c0_117] : memref<54x8x16xf32, #tpu.memory_space<vmem>>, vector<1x8x16xf32>
    %267 = vector.shape_cast %266 : vector<1x8x16xf32> to vector<8x16xf32>
    %268 = arith.truncf %267 : vector<8x16xf32> to vector<8x16xbf16>
    %269 = arith.truncf %265 : vector<16x512xf32> to vector<16x512xbf16>
    %cst_118 = arith.constant dense<0.000000e+00> : vector<8x512xf32>
    %270 = tpu.matmul %268, %269, %cst_118 {dimension_numbers = #tpu.dot_dimension_numbers<[1], [0], [0], [1], [0, 0, 1, 1], [], []>} : vector<8x16xbf16>, vector<16x512xbf16>, vector<8x512xf32> -> vector<8x512xf32>
    %c16_i32_119 = arith.constant 16 : i32
    %271 = tpu.dynamic_rotate %260 by %c16_i32_119 dim 1 : vector<16x512xf32>, i32 -> vector<16x512xf32>
    %cst_120 = arith.constant 0.000000e+00 : f32
    %272 = vector.shape_cast %16 : vector<1x512xi1> to vector<1x512xi1>
    %273 = vector.broadcast %272 : vector<1x512xi1> to vector<16x512xi1>
    %274 = vector.broadcast %cst_120 : f32 to vector<16x512xf32>
    %275 = arith.select %273, %271, %274 : vector<16x512xi1>, vector<16x512xf32>
    %c19 = arith.constant 19 : index
    %c0_121 = arith.constant 0 : index
    %c0_122 = arith.constant 0 : index
    %276 = vector.load %arg1[%c19, %c0_121, %c0_122] : memref<54x8x16xf32, #tpu.memory_space<vmem>>, vector<1x8x16xf32>
    %277 = vector.shape_cast %276 : vector<1x8x16xf32> to vector<8x16xf32>
    %278 = arith.truncf %277 : vector<8x16xf32> to vector<8x16xbf16>
    %279 = arith.truncf %275 : vector<16x512xf32> to vector<16x512xbf16>
    %cst_123 = arith.constant dense<0.000000e+00> : vector<8x512xf32>
    %280 = tpu.matmul %278, %279, %cst_123 {dimension_numbers = #tpu.dot_dimension_numbers<[1], [0], [0], [1], [0, 0, 1, 1], [], []>} : vector<8x16xbf16>, vector<16x512xbf16>, vector<8x512xf32> -> vector<8x512xf32>
    %281 = arith.addf %270, %280 : vector<8x512xf32>
    %c15_i32_124 = arith.constant 15 : i32
    %282 = tpu.dynamic_rotate %260 by %c15_i32_124 dim 1 : vector<16x512xf32>, i32 -> vector<16x512xf32>
    %cst_125 = arith.constant 0.000000e+00 : f32
    %283 = vector.shape_cast %21 : vector<1x512xi1> to vector<1x512xi1>
    %284 = vector.broadcast %283 : vector<1x512xi1> to vector<16x512xi1>
    %285 = vector.broadcast %cst_125 : f32 to vector<16x512xf32>
    %286 = arith.select %284, %282, %285 : vector<16x512xi1>, vector<16x512xf32>
    %c20 = arith.constant 20 : index
    %c0_126 = arith.constant 0 : index
    %c0_127 = arith.constant 0 : index
    %287 = vector.load %arg1[%c20, %c0_126, %c0_127] : memref<54x8x16xf32, #tpu.memory_space<vmem>>, vector<1x8x16xf32>
    %288 = vector.shape_cast %287 : vector<1x8x16xf32> to vector<8x16xf32>
    %289 = arith.truncf %288 : vector<8x16xf32> to vector<8x16xbf16>
    %290 = arith.truncf %286 : vector<16x512xf32> to vector<16x512xbf16>
    %cst_128 = arith.constant dense<0.000000e+00> : vector<8x512xf32>
    %291 = tpu.matmul %289, %290, %cst_128 {dimension_numbers = #tpu.dot_dimension_numbers<[1], [0], [0], [1], [0, 0, 1, 1], [], []>} : vector<8x16xbf16>, vector<16x512xbf16>, vector<8x512xf32> -> vector<8x512xf32>
    %292 = arith.addf %281, %291 : vector<8x512xf32>
    %c1_i32_129 = arith.constant 1 : i32
    %293 = tpu.dynamic_rotate %260 by %c1_i32_129 dim 1 : vector<16x512xf32>, i32 -> vector<16x512xf32>
    %cst_130 = arith.constant 0.000000e+00 : f32
    %294 = vector.shape_cast %23 : vector<1x512xi1> to vector<1x512xi1>
    %295 = vector.broadcast %294 : vector<1x512xi1> to vector<16x512xi1>
    %296 = vector.broadcast %cst_130 : f32 to vector<16x512xf32>
    %297 = arith.select %295, %293, %296 : vector<16x512xi1>, vector<16x512xf32>
    %c21 = arith.constant 21 : index
    %c0_131 = arith.constant 0 : index
    %c0_132 = arith.constant 0 : index
    %298 = vector.load %arg1[%c21, %c0_131, %c0_132] : memref<54x8x16xf32, #tpu.memory_space<vmem>>, vector<1x8x16xf32>
    %299 = vector.shape_cast %298 : vector<1x8x16xf32> to vector<8x16xf32>
    %300 = arith.truncf %299 : vector<8x16xf32> to vector<8x16xbf16>
    %301 = arith.truncf %297 : vector<16x512xf32> to vector<16x512xbf16>
    %cst_133 = arith.constant dense<0.000000e+00> : vector<8x512xf32>
    %302 = tpu.matmul %300, %301, %cst_133 {dimension_numbers = #tpu.dot_dimension_numbers<[1], [0], [0], [1], [0, 0, 1, 1], [], []>} : vector<8x16xbf16>, vector<16x512xbf16>, vector<8x512xf32> -> vector<8x512xf32>
    %303 = arith.addf %292, %302 : vector<8x512xf32>
    %c22 = arith.constant 22 : index
    %c0_134 = arith.constant 0 : index
    %c0_135 = arith.constant 0 : index
    %304 = vector.load %arg1[%c22, %c0_134, %c0_135] : memref<54x8x16xf32, #tpu.memory_space<vmem>>, vector<1x8x16xf32>
    %305 = vector.shape_cast %304 : vector<1x8x16xf32> to vector<8x16xf32>
    %306 = arith.truncf %305 : vector<8x16xf32> to vector<8x16xbf16>
    %307 = arith.truncf %260 : vector<16x512xf32> to vector<16x512xbf16>
    %cst_136 = arith.constant dense<0.000000e+00> : vector<8x512xf32>
    %308 = tpu.matmul %306, %307, %cst_136 {dimension_numbers = #tpu.dot_dimension_numbers<[1], [0], [0], [1], [0, 0, 1, 1], [], []>} : vector<8x16xbf16>, vector<16x512xbf16>, vector<8x512xf32> -> vector<8x512xf32>
    %309 = arith.addf %303, %308 : vector<8x512xf32>
    %c511_i32_137 = arith.constant 511 : i32
    %310 = tpu.dynamic_rotate %260 by %c511_i32_137 dim 1 : vector<16x512xf32>, i32 -> vector<16x512xf32>
    %cst_138 = arith.constant 0.000000e+00 : f32
    %311 = vector.shape_cast %25 : vector<1x512xi1> to vector<1x512xi1>
    %312 = vector.broadcast %311 : vector<1x512xi1> to vector<16x512xi1>
    %313 = vector.broadcast %cst_138 : f32 to vector<16x512xf32>
    %314 = arith.select %312, %310, %313 : vector<16x512xi1>, vector<16x512xf32>
    %c23 = arith.constant 23 : index
    %c0_139 = arith.constant 0 : index
    %c0_140 = arith.constant 0 : index
    %315 = vector.load %arg1[%c23, %c0_139, %c0_140] : memref<54x8x16xf32, #tpu.memory_space<vmem>>, vector<1x8x16xf32>
    %316 = vector.shape_cast %315 : vector<1x8x16xf32> to vector<8x16xf32>
    %317 = arith.truncf %316 : vector<8x16xf32> to vector<8x16xbf16>
    %318 = arith.truncf %314 : vector<16x512xf32> to vector<16x512xbf16>
    %cst_141 = arith.constant dense<0.000000e+00> : vector<8x512xf32>
    %319 = tpu.matmul %317, %318, %cst_141 {dimension_numbers = #tpu.dot_dimension_numbers<[1], [0], [0], [1], [0, 0, 1, 1], [], []>} : vector<8x16xbf16>, vector<16x512xbf16>, vector<8x512xf32> -> vector<8x512xf32>
    %320 = arith.addf %309, %319 : vector<8x512xf32>
    %c497_i32_142 = arith.constant 497 : i32
    %321 = tpu.dynamic_rotate %260 by %c497_i32_142 dim 1 : vector<16x512xf32>, i32 -> vector<16x512xf32>
    %cst_143 = arith.constant 0.000000e+00 : f32
    %322 = vector.shape_cast %30 : vector<1x512xi1> to vector<1x512xi1>
    %323 = vector.broadcast %322 : vector<1x512xi1> to vector<16x512xi1>
    %324 = vector.broadcast %cst_143 : f32 to vector<16x512xf32>
    %325 = arith.select %323, %321, %324 : vector<16x512xi1>, vector<16x512xf32>
    %c24 = arith.constant 24 : index
    %c0_144 = arith.constant 0 : index
    %c0_145 = arith.constant 0 : index
    %326 = vector.load %arg1[%c24, %c0_144, %c0_145] : memref<54x8x16xf32, #tpu.memory_space<vmem>>, vector<1x8x16xf32>
    %327 = vector.shape_cast %326 : vector<1x8x16xf32> to vector<8x16xf32>
    %328 = arith.truncf %327 : vector<8x16xf32> to vector<8x16xbf16>
    %329 = arith.truncf %325 : vector<16x512xf32> to vector<16x512xbf16>
    %cst_146 = arith.constant dense<0.000000e+00> : vector<8x512xf32>
    %330 = tpu.matmul %328, %329, %cst_146 {dimension_numbers = #tpu.dot_dimension_numbers<[1], [0], [0], [1], [0, 0, 1, 1], [], []>} : vector<8x16xbf16>, vector<16x512xbf16>, vector<8x512xf32> -> vector<8x512xf32>
    %331 = arith.addf %320, %330 : vector<8x512xf32>
    %c496_i32_147 = arith.constant 496 : i32
    %332 = tpu.dynamic_rotate %260 by %c496_i32_147 dim 1 : vector<16x512xf32>, i32 -> vector<16x512xf32>
    %cst_148 = arith.constant 0.000000e+00 : f32
    %333 = vector.shape_cast %32 : vector<1x512xi1> to vector<1x512xi1>
    %334 = vector.broadcast %333 : vector<1x512xi1> to vector<16x512xi1>
    %335 = vector.broadcast %cst_148 : f32 to vector<16x512xf32>
    %336 = arith.select %334, %332, %335 : vector<16x512xi1>, vector<16x512xf32>
    %c25 = arith.constant 25 : index
    %c0_149 = arith.constant 0 : index
    %c0_150 = arith.constant 0 : index
    %337 = vector.load %arg1[%c25, %c0_149, %c0_150] : memref<54x8x16xf32, #tpu.memory_space<vmem>>, vector<1x8x16xf32>
    %338 = vector.shape_cast %337 : vector<1x8x16xf32> to vector<8x16xf32>
    %339 = arith.truncf %338 : vector<8x16xf32> to vector<8x16xbf16>
    %340 = arith.truncf %336 : vector<16x512xf32> to vector<16x512xbf16>
    %cst_151 = arith.constant dense<0.000000e+00> : vector<8x512xf32>
    %341 = tpu.matmul %339, %340, %cst_151 {dimension_numbers = #tpu.dot_dimension_numbers<[1], [0], [0], [1], [0, 0, 1, 1], [], []>} : vector<8x16xbf16>, vector<16x512xbf16>, vector<8x512xf32> -> vector<8x512xf32>
    %342 = arith.addf %331, %341 : vector<8x512xf32>
    %c495_i32_152 = arith.constant 495 : i32
    %343 = tpu.dynamic_rotate %260 by %c495_i32_152 dim 1 : vector<16x512xf32>, i32 -> vector<16x512xf32>
    %cst_153 = arith.constant 0.000000e+00 : f32
    %344 = vector.shape_cast %37 : vector<1x512xi1> to vector<1x512xi1>
    %345 = vector.broadcast %344 : vector<1x512xi1> to vector<16x512xi1>
    %346 = vector.broadcast %cst_153 : f32 to vector<16x512xf32>
    %347 = arith.select %345, %343, %346 : vector<16x512xi1>, vector<16x512xf32>
    %c26 = arith.constant 26 : index
    %c0_154 = arith.constant 0 : index
    %c0_155 = arith.constant 0 : index
    %348 = vector.load %arg1[%c26, %c0_154, %c0_155] : memref<54x8x16xf32, #tpu.memory_space<vmem>>, vector<1x8x16xf32>
    %349 = vector.shape_cast %348 : vector<1x8x16xf32> to vector<8x16xf32>
    %350 = arith.truncf %349 : vector<8x16xf32> to vector<8x16xbf16>
    %351 = arith.truncf %347 : vector<16x512xf32> to vector<16x512xbf16>
    %cst_156 = arith.constant dense<0.000000e+00> : vector<8x512xf32>
    %352 = tpu.matmul %350, %351, %cst_156 {dimension_numbers = #tpu.dot_dimension_numbers<[1], [0], [0], [1], [0, 0, 1, 1], [], []>} : vector<8x16xbf16>, vector<16x512xbf16>, vector<8x512xf32> -> vector<8x512xf32>
    %353 = arith.addf %342, %352 : vector<8x512xf32>
    %c0_157 = arith.constant 0 : index
    %c4_158 = arith.constant 4 : index
    %354 = vector.load %arg3[%c0_157, %c4_158] : memref<8x12xf32, #tpu.memory_space<vmem>>, vector<8x1xf32>
    %355 = vector.broadcast %354 : vector<8x1xf32> to vector<8x512xf32>
    %356 = arith.addf %353, %355 : vector<8x512xf32>
    %c17_i32_159 = arith.constant 17 : i32
    %357 = tpu.dynamic_rotate %356 by %c17_i32_159 dim 1 : vector<8x512xf32>, i32 -> vector<8x512xf32>
    %cst_160 = arith.constant 0.000000e+00 : f32
    %358 = vector.shape_cast %14 : vector<1x512xi1> to vector<1x512xi1>
    %359 = vector.broadcast %358 : vector<1x512xi1> to vector<8x512xi1>
    %360 = vector.broadcast %cst_160 : f32 to vector<8x512xf32>
    %361 = arith.select %359, %357, %360 : vector<8x512xi1>, vector<8x512xf32>
    %c27 = arith.constant 27 : index
    %c0_161 = arith.constant 0 : index
    %c0_162 = arith.constant 0 : index
    %362 = vector.load %arg1[%c27, %c0_161, %c0_162] : memref<54x8x16xf32, #tpu.memory_space<vmem>>, vector<1x8x8xf32>
    %363 = vector.shape_cast %362 : vector<1x8x8xf32> to vector<8x8xf32>
    %364 = arith.truncf %363 : vector<8x8xf32> to vector<8x8xbf16>
    %365 = arith.truncf %361 : vector<8x512xf32> to vector<8x512xbf16>
    %cst_163 = arith.constant dense<0.000000e+00> : vector<8x512xf32>
    %366 = tpu.matmul %364, %365, %cst_163 {dimension_numbers = #tpu.dot_dimension_numbers<[1], [0], [0], [1], [0, 0, 1, 1], [], []>} : vector<8x8xbf16>, vector<8x512xbf16>, vector<8x512xf32> -> vector<8x512xf32>
    %c16_i32_164 = arith.constant 16 : i32
    %367 = tpu.dynamic_rotate %356 by %c16_i32_164 dim 1 : vector<8x512xf32>, i32 -> vector<8x512xf32>
    %cst_165 = arith.constant 0.000000e+00 : f32
    %368 = vector.shape_cast %16 : vector<1x512xi1> to vector<1x512xi1>
    %369 = vector.broadcast %368 : vector<1x512xi1> to vector<8x512xi1>
    %370 = vector.broadcast %cst_165 : f32 to vector<8x512xf32>
    %371 = arith.select %369, %367, %370 : vector<8x512xi1>, vector<8x512xf32>
    %c28 = arith.constant 28 : index
    %c0_166 = arith.constant 0 : index
    %c0_167 = arith.constant 0 : index
    %372 = vector.load %arg1[%c28, %c0_166, %c0_167] : memref<54x8x16xf32, #tpu.memory_space<vmem>>, vector<1x8x8xf32>
    %373 = vector.shape_cast %372 : vector<1x8x8xf32> to vector<8x8xf32>
    %374 = arith.truncf %373 : vector<8x8xf32> to vector<8x8xbf16>
    %375 = arith.truncf %371 : vector<8x512xf32> to vector<8x512xbf16>
    %cst_168 = arith.constant dense<0.000000e+00> : vector<8x512xf32>
    %376 = tpu.matmul %374, %375, %cst_168 {dimension_numbers = #tpu.dot_dimension_numbers<[1], [0], [0], [1], [0, 0, 1, 1], [], []>} : vector<8x8xbf16>, vector<8x512xbf16>, vector<8x512xf32> -> vector<8x512xf32>
    %377 = arith.addf %366, %376 : vector<8x512xf32>
    %c15_i32_169 = arith.constant 15 : i32
    %378 = tpu.dynamic_rotate %356 by %c15_i32_169 dim 1 : vector<8x512xf32>, i32 -> vector<8x512xf32>
    %cst_170 = arith.constant 0.000000e+00 : f32
    %379 = vector.shape_cast %21 : vector<1x512xi1> to vector<1x512xi1>
    %380 = vector.broadcast %379 : vector<1x512xi1> to vector<8x512xi1>
    %381 = vector.broadcast %cst_170 : f32 to vector<8x512xf32>
    %382 = arith.select %380, %378, %381 : vector<8x512xi1>, vector<8x512xf32>
    %c29 = arith.constant 29 : index
    %c0_171 = arith.constant 0 : index
    %c0_172 = arith.constant 0 : index
    %383 = vector.load %arg1[%c29, %c0_171, %c0_172] : memref<54x8x16xf32, #tpu.memory_space<vmem>>, vector<1x8x8xf32>
    %384 = vector.shape_cast %383 : vector<1x8x8xf32> to vector<8x8xf32>
    %385 = arith.truncf %384 : vector<8x8xf32> to vector<8x8xbf16>
    %386 = arith.truncf %382 : vector<8x512xf32> to vector<8x512xbf16>
    %cst_173 = arith.constant dense<0.000000e+00> : vector<8x512xf32>
    %387 = tpu.matmul %385, %386, %cst_173 {dimension_numbers = #tpu.dot_dimension_numbers<[1], [0], [0], [1], [0, 0, 1, 1], [], []>} : vector<8x8xbf16>, vector<8x512xbf16>, vector<8x512xf32> -> vector<8x512xf32>
    %388 = arith.addf %377, %387 : vector<8x512xf32>
    %c1_i32_174 = arith.constant 1 : i32
    %389 = tpu.dynamic_rotate %356 by %c1_i32_174 dim 1 : vector<8x512xf32>, i32 -> vector<8x512xf32>
    %cst_175 = arith.constant 0.000000e+00 : f32
    %390 = vector.shape_cast %23 : vector<1x512xi1> to vector<1x512xi1>
    %391 = vector.broadcast %390 : vector<1x512xi1> to vector<8x512xi1>
    %392 = vector.broadcast %cst_175 : f32 to vector<8x512xf32>
    %393 = arith.select %391, %389, %392 : vector<8x512xi1>, vector<8x512xf32>
    %c30 = arith.constant 30 : index
    %c0_176 = arith.constant 0 : index
    %c0_177 = arith.constant 0 : index
    %394 = vector.load %arg1[%c30, %c0_176, %c0_177] : memref<54x8x16xf32, #tpu.memory_space<vmem>>, vector<1x8x8xf32>
    %395 = vector.shape_cast %394 : vector<1x8x8xf32> to vector<8x8xf32>
    %396 = arith.truncf %395 : vector<8x8xf32> to vector<8x8xbf16>
    %397 = arith.truncf %393 : vector<8x512xf32> to vector<8x512xbf16>
    %cst_178 = arith.constant dense<0.000000e+00> : vector<8x512xf32>
    %398 = tpu.matmul %396, %397, %cst_178 {dimension_numbers = #tpu.dot_dimension_numbers<[1], [0], [0], [1], [0, 0, 1, 1], [], []>} : vector<8x8xbf16>, vector<8x512xbf16>, vector<8x512xf32> -> vector<8x512xf32>
    %399 = arith.addf %388, %398 : vector<8x512xf32>
    %c31 = arith.constant 31 : index
    %c0_179 = arith.constant 0 : index
    %c0_180 = arith.constant 0 : index
    %400 = vector.load %arg1[%c31, %c0_179, %c0_180] : memref<54x8x16xf32, #tpu.memory_space<vmem>>, vector<1x8x8xf32>
    %401 = vector.shape_cast %400 : vector<1x8x8xf32> to vector<8x8xf32>
    %402 = arith.truncf %401 : vector<8x8xf32> to vector<8x8xbf16>
    %403 = arith.truncf %356 : vector<8x512xf32> to vector<8x512xbf16>
    %cst_181 = arith.constant dense<0.000000e+00> : vector<8x512xf32>
    %404 = tpu.matmul %402, %403, %cst_181 {dimension_numbers = #tpu.dot_dimension_numbers<[1], [0], [0], [1], [0, 0, 1, 1], [], []>} : vector<8x8xbf16>, vector<8x512xbf16>, vector<8x512xf32> -> vector<8x512xf32>
    %405 = arith.addf %399, %404 : vector<8x512xf32>
    %c511_i32_182 = arith.constant 511 : i32
    %406 = tpu.dynamic_rotate %356 by %c511_i32_182 dim 1 : vector<8x512xf32>, i32 -> vector<8x512xf32>
    %cst_183 = arith.constant 0.000000e+00 : f32
    %407 = vector.shape_cast %25 : vector<1x512xi1> to vector<1x512xi1>
    %408 = vector.broadcast %407 : vector<1x512xi1> to vector<8x512xi1>
    %409 = vector.broadcast %cst_183 : f32 to vector<8x512xf32>
    %410 = arith.select %408, %406, %409 : vector<8x512xi1>, vector<8x512xf32>
    %c32 = arith.constant 32 : index
    %c0_184 = arith.constant 0 : index
    %c0_185 = arith.constant 0 : index
    %411 = vector.load %arg1[%c32, %c0_184, %c0_185] : memref<54x8x16xf32, #tpu.memory_space<vmem>>, vector<1x8x8xf32>
    %412 = vector.shape_cast %411 : vector<1x8x8xf32> to vector<8x8xf32>
    %413 = arith.truncf %412 : vector<8x8xf32> to vector<8x8xbf16>
    %414 = arith.truncf %410 : vector<8x512xf32> to vector<8x512xbf16>
    %cst_186 = arith.constant dense<0.000000e+00> : vector<8x512xf32>
    %415 = tpu.matmul %413, %414, %cst_186 {dimension_numbers = #tpu.dot_dimension_numbers<[1], [0], [0], [1], [0, 0, 1, 1], [], []>} : vector<8x8xbf16>, vector<8x512xbf16>, vector<8x512xf32> -> vector<8x512xf32>
    %416 = arith.addf %405, %415 : vector<8x512xf32>
    %c497_i32_187 = arith.constant 497 : i32
    %417 = tpu.dynamic_rotate %356 by %c497_i32_187 dim 1 : vector<8x512xf32>, i32 -> vector<8x512xf32>
    %cst_188 = arith.constant 0.000000e+00 : f32
    %418 = vector.shape_cast %30 : vector<1x512xi1> to vector<1x512xi1>
    %419 = vector.broadcast %418 : vector<1x512xi1> to vector<8x512xi1>
    %420 = vector.broadcast %cst_188 : f32 to vector<8x512xf32>
    %421 = arith.select %419, %417, %420 : vector<8x512xi1>, vector<8x512xf32>
    %c33 = arith.constant 33 : index
    %c0_189 = arith.constant 0 : index
    %c0_190 = arith.constant 0 : index
    %422 = vector.load %arg1[%c33, %c0_189, %c0_190] : memref<54x8x16xf32, #tpu.memory_space<vmem>>, vector<1x8x8xf32>
    %423 = vector.shape_cast %422 : vector<1x8x8xf32> to vector<8x8xf32>
    %424 = arith.truncf %423 : vector<8x8xf32> to vector<8x8xbf16>
    %425 = arith.truncf %421 : vector<8x512xf32> to vector<8x512xbf16>
    %cst_191 = arith.constant dense<0.000000e+00> : vector<8x512xf32>
    %426 = tpu.matmul %424, %425, %cst_191 {dimension_numbers = #tpu.dot_dimension_numbers<[1], [0], [0], [1], [0, 0, 1, 1], [], []>} : vector<8x8xbf16>, vector<8x512xbf16>, vector<8x512xf32> -> vector<8x512xf32>
    %427 = arith.addf %416, %426 : vector<8x512xf32>
    %c496_i32_192 = arith.constant 496 : i32
    %428 = tpu.dynamic_rotate %356 by %c496_i32_192 dim 1 : vector<8x512xf32>, i32 -> vector<8x512xf32>
    %cst_193 = arith.constant 0.000000e+00 : f32
    %429 = vector.shape_cast %32 : vector<1x512xi1> to vector<1x512xi1>
    %430 = vector.broadcast %429 : vector<1x512xi1> to vector<8x512xi1>
    %431 = vector.broadcast %cst_193 : f32 to vector<8x512xf32>
    %432 = arith.select %430, %428, %431 : vector<8x512xi1>, vector<8x512xf32>
    %c34 = arith.constant 34 : index
    %c0_194 = arith.constant 0 : index
    %c0_195 = arith.constant 0 : index
    %433 = vector.load %arg1[%c34, %c0_194, %c0_195] : memref<54x8x16xf32, #tpu.memory_space<vmem>>, vector<1x8x8xf32>
    %434 = vector.shape_cast %433 : vector<1x8x8xf32> to vector<8x8xf32>
    %435 = arith.truncf %434 : vector<8x8xf32> to vector<8x8xbf16>
    %436 = arith.truncf %432 : vector<8x512xf32> to vector<8x512xbf16>
    %cst_196 = arith.constant dense<0.000000e+00> : vector<8x512xf32>
    %437 = tpu.matmul %435, %436, %cst_196 {dimension_numbers = #tpu.dot_dimension_numbers<[1], [0], [0], [1], [0, 0, 1, 1], [], []>} : vector<8x8xbf16>, vector<8x512xbf16>, vector<8x512xf32> -> vector<8x512xf32>
    %438 = arith.addf %427, %437 : vector<8x512xf32>
    %c495_i32_197 = arith.constant 495 : i32
    %439 = tpu.dynamic_rotate %356 by %c495_i32_197 dim 1 : vector<8x512xf32>, i32 -> vector<8x512xf32>
    %cst_198 = arith.constant 0.000000e+00 : f32
    %440 = vector.shape_cast %37 : vector<1x512xi1> to vector<1x512xi1>
    %441 = vector.broadcast %440 : vector<1x512xi1> to vector<8x512xi1>
    %442 = vector.broadcast %cst_198 : f32 to vector<8x512xf32>
    %443 = arith.select %441, %439, %442 : vector<8x512xi1>, vector<8x512xf32>
    %c35 = arith.constant 35 : index
    %c0_199 = arith.constant 0 : index
    %c0_200 = arith.constant 0 : index
    %444 = vector.load %arg1[%c35, %c0_199, %c0_200] : memref<54x8x16xf32, #tpu.memory_space<vmem>>, vector<1x8x8xf32>
    %445 = vector.shape_cast %444 : vector<1x8x8xf32> to vector<8x8xf32>
    %446 = arith.truncf %445 : vector<8x8xf32> to vector<8x8xbf16>
    %447 = arith.truncf %443 : vector<8x512xf32> to vector<8x512xbf16>
    %cst_201 = arith.constant dense<0.000000e+00> : vector<8x512xf32>
    %448 = tpu.matmul %446, %447, %cst_201 {dimension_numbers = #tpu.dot_dimension_numbers<[1], [0], [0], [1], [0, 0, 1, 1], [], []>} : vector<8x8xbf16>, vector<8x512xbf16>, vector<8x512xf32> -> vector<8x512xf32>
    %449 = arith.addf %438, %448 : vector<8x512xf32>
    %c0_202 = arith.constant 0 : index
    %c5_203 = arith.constant 5 : index
    %450 = vector.load %arg3[%c0_202, %c5_203] : memref<8x12xf32, #tpu.memory_space<vmem>>, vector<8x1xf32>
    %451 = vector.broadcast %450 : vector<8x1xf32> to vector<8x512xf32>
    %452 = arith.addf %449, %451 : vector<8x512xf32>
    %cst_204 = arith.constant 0.000000e+00 : f32
    %453 = vector.broadcast %cst_204 : f32 to vector<8x512xf32>
    %454 = arith.maximumf %452, %453 : vector<8x512xf32>
    %c2_205 = arith.constant 2 : index
    %c0_206 = arith.constant 0 : index
    %c0_207 = arith.constant 0 : index
    %455 = vector.load %arg2[%c2_205, %c0_206, %c0_207] : memref<6x8x16xf32, #tpu.memory_space<vmem>>, vector<1x3x8xf32>
    %456 = vector.shape_cast %455 : vector<1x3x8xf32> to vector<3x8xf32>
    %457 = arith.truncf %456 : vector<3x8xf32> to vector<3x8xbf16>
    %458 = arith.truncf %454 : vector<8x512xf32> to vector<8x512xbf16>
    %cst_208 = arith.constant dense<0.000000e+00> : vector<3x512xf32>
    %459 = tpu.matmul %457, %458, %cst_208 {dimension_numbers = #tpu.dot_dimension_numbers<[1], [0], [0], [1], [0, 0, 1, 1], [], []>} : vector<3x8xbf16>, vector<8x512xbf16>, vector<3x512xf32> -> vector<3x512xf32>
    %c0_209 = arith.constant 0 : index
    %c6_210 = arith.constant 6 : index
    %460 = vector.load %arg3[%c0_209, %c6_210] : memref<8x12xf32, #tpu.memory_space<vmem>>, vector<3x1xf32>
    %461 = vector.broadcast %460 : vector<3x1xf32> to vector<3x512xf32>
    %462 = arith.addf %459, %461 : vector<3x512xf32>
    %463 = arith.negf %462 : vector<3x512xf32>
    %464 = math.exp %463 : vector<3x512xf32>
    %cst_211 = arith.constant 1.000000e+00 : f32
    %465 = vector.broadcast %cst_211 : f32 to vector<3x512xf32>
    %466 = arith.addf %465, %464 : vector<3x512xf32>
    %467 = arith.divf %465, %466 : vector<3x512xf32>
    %c3_212 = arith.constant 3 : index
    %c0_213 = arith.constant 0 : index
    %c0_214 = arith.constant 0 : index
    %468 = vector.load %arg2[%c3_212, %c0_213, %c0_214] : memref<6x8x16xf32, #tpu.memory_space<vmem>>, vector<1x8x3xf32>
    %469 = vector.shape_cast %468 : vector<1x8x3xf32> to vector<8x3xf32>
    %470 = arith.truncf %469 : vector<8x3xf32> to vector<8x3xbf16>
    %471 = arith.truncf %467 : vector<3x512xf32> to vector<3x512xbf16>
    %cst_215 = arith.constant dense<0.000000e+00> : vector<8x512xf32>
    %472 = tpu.matmul %470, %471, %cst_215 {dimension_numbers = #tpu.dot_dimension_numbers<[1], [0], [0], [1], [0, 0, 1, 1], [], []>} : vector<8x3xbf16>, vector<3x512xbf16>, vector<8x512xf32> -> vector<8x512xf32>
    %c0_216 = arith.constant 0 : index
    %c7_217 = arith.constant 7 : index
    %473 = vector.load %arg3[%c0_216, %c7_217] : memref<8x12xf32, #tpu.memory_space<vmem>>, vector<8x1xf32>
    %474 = vector.broadcast %473 : vector<8x1xf32> to vector<8x512xf32>
    %475 = arith.addf %472, %474 : vector<8x512xf32>
    %cst_218 = arith.constant 0.000000e+00 : f32
    %476 = vector.broadcast %cst_218 : f32 to vector<8x512xf32>
    %477 = arith.maximumf %475, %476 : vector<8x512xf32>
    %478 = tpu.concatenate %477, %259 in 0 : vector<8x512xf32>, vector<8x512xf32> -> vector<16x512xf32>
    %c4_219 = arith.constant 4 : index
    %c0_220 = arith.constant 0 : index
    %c0_221 = arith.constant 0 : index
    %479 = vector.load %arg2[%c4_219, %c0_220, %c0_221] : memref<6x8x16xf32, #tpu.memory_space<vmem>>, vector<1x8x16xf32>
    %480 = vector.shape_cast %479 : vector<1x8x16xf32> to vector<8x16xf32>
    %481 = arith.truncf %480 : vector<8x16xf32> to vector<8x16xbf16>
    %482 = arith.truncf %478 : vector<16x512xf32> to vector<16x512xbf16>
    %cst_222 = arith.constant dense<0.000000e+00> : vector<8x512xf32>
    %483 = tpu.matmul %481, %482, %cst_222 {dimension_numbers = #tpu.dot_dimension_numbers<[1], [0], [0], [1], [0, 0, 1, 1], [], []>} : vector<8x16xbf16>, vector<16x512xbf16>, vector<8x512xf32> -> vector<8x512xf32>
    %c0_223 = arith.constant 0 : index
    %c8_224 = arith.constant 8 : index
    %484 = vector.load %arg3[%c0_223, %c8_224] : memref<8x12xf32, #tpu.memory_space<vmem>>, vector<8x1xf32>
    %485 = vector.broadcast %484 : vector<8x1xf32> to vector<8x512xf32>
    %486 = arith.addf %483, %485 : vector<8x512xf32>
    %cst_225 = arith.constant 0.000000e+00 : f32
    %487 = vector.broadcast %cst_225 : f32 to vector<8x512xf32>
    %488 = arith.maximumf %486, %487 : vector<8x512xf32>
    %489 = tpu.concatenate %488, %4 in 0 : vector<8x512xf32>, vector<8x512xf32> -> vector<16x512xf32>
    %c17_i32_226 = arith.constant 17 : i32
    %490 = tpu.dynamic_rotate %489 by %c17_i32_226 dim 1 : vector<16x512xf32>, i32 -> vector<16x512xf32>
    %cst_227 = arith.constant 0.000000e+00 : f32
    %491 = vector.shape_cast %14 : vector<1x512xi1> to vector<1x512xi1>
    %492 = vector.broadcast %491 : vector<1x512xi1> to vector<16x512xi1>
    %493 = vector.broadcast %cst_227 : f32 to vector<16x512xf32>
    %494 = arith.select %492, %490, %493 : vector<16x512xi1>, vector<16x512xf32>
    %c36 = arith.constant 36 : index
    %c0_228 = arith.constant 0 : index
    %c0_229 = arith.constant 0 : index
    %495 = vector.load %arg1[%c36, %c0_228, %c0_229] : memref<54x8x16xf32, #tpu.memory_space<vmem>>, vector<1x8x16xf32>
    %496 = vector.shape_cast %495 : vector<1x8x16xf32> to vector<8x16xf32>
    %497 = arith.truncf %496 : vector<8x16xf32> to vector<8x16xbf16>
    %498 = arith.truncf %494 : vector<16x512xf32> to vector<16x512xbf16>
    %cst_230 = arith.constant dense<0.000000e+00> : vector<8x512xf32>
    %499 = tpu.matmul %497, %498, %cst_230 {dimension_numbers = #tpu.dot_dimension_numbers<[1], [0], [0], [1], [0, 0, 1, 1], [], []>} : vector<8x16xbf16>, vector<16x512xbf16>, vector<8x512xf32> -> vector<8x512xf32>
    %c16_i32_231 = arith.constant 16 : i32
    %500 = tpu.dynamic_rotate %489 by %c16_i32_231 dim 1 : vector<16x512xf32>, i32 -> vector<16x512xf32>
    %cst_232 = arith.constant 0.000000e+00 : f32
    %501 = vector.shape_cast %16 : vector<1x512xi1> to vector<1x512xi1>
    %502 = vector.broadcast %501 : vector<1x512xi1> to vector<16x512xi1>
    %503 = vector.broadcast %cst_232 : f32 to vector<16x512xf32>
    %504 = arith.select %502, %500, %503 : vector<16x512xi1>, vector<16x512xf32>
    %c37 = arith.constant 37 : index
    %c0_233 = arith.constant 0 : index
    %c0_234 = arith.constant 0 : index
    %505 = vector.load %arg1[%c37, %c0_233, %c0_234] : memref<54x8x16xf32, #tpu.memory_space<vmem>>, vector<1x8x16xf32>
    %506 = vector.shape_cast %505 : vector<1x8x16xf32> to vector<8x16xf32>
    %507 = arith.truncf %506 : vector<8x16xf32> to vector<8x16xbf16>
    %508 = arith.truncf %504 : vector<16x512xf32> to vector<16x512xbf16>
    %cst_235 = arith.constant dense<0.000000e+00> : vector<8x512xf32>
    %509 = tpu.matmul %507, %508, %cst_235 {dimension_numbers = #tpu.dot_dimension_numbers<[1], [0], [0], [1], [0, 0, 1, 1], [], []>} : vector<8x16xbf16>, vector<16x512xbf16>, vector<8x512xf32> -> vector<8x512xf32>
    %510 = arith.addf %499, %509 : vector<8x512xf32>
    %c15_i32_236 = arith.constant 15 : i32
    %511 = tpu.dynamic_rotate %489 by %c15_i32_236 dim 1 : vector<16x512xf32>, i32 -> vector<16x512xf32>
    %cst_237 = arith.constant 0.000000e+00 : f32
    %512 = vector.shape_cast %21 : vector<1x512xi1> to vector<1x512xi1>
    %513 = vector.broadcast %512 : vector<1x512xi1> to vector<16x512xi1>
    %514 = vector.broadcast %cst_237 : f32 to vector<16x512xf32>
    %515 = arith.select %513, %511, %514 : vector<16x512xi1>, vector<16x512xf32>
    %c38 = arith.constant 38 : index
    %c0_238 = arith.constant 0 : index
    %c0_239 = arith.constant 0 : index
    %516 = vector.load %arg1[%c38, %c0_238, %c0_239] : memref<54x8x16xf32, #tpu.memory_space<vmem>>, vector<1x8x16xf32>
    %517 = vector.shape_cast %516 : vector<1x8x16xf32> to vector<8x16xf32>
    %518 = arith.truncf %517 : vector<8x16xf32> to vector<8x16xbf16>
    %519 = arith.truncf %515 : vector<16x512xf32> to vector<16x512xbf16>
    %cst_240 = arith.constant dense<0.000000e+00> : vector<8x512xf32>
    %520 = tpu.matmul %518, %519, %cst_240 {dimension_numbers = #tpu.dot_dimension_numbers<[1], [0], [0], [1], [0, 0, 1, 1], [], []>} : vector<8x16xbf16>, vector<16x512xbf16>, vector<8x512xf32> -> vector<8x512xf32>
    %521 = arith.addf %510, %520 : vector<8x512xf32>
    %c1_i32_241 = arith.constant 1 : i32
    %522 = tpu.dynamic_rotate %489 by %c1_i32_241 dim 1 : vector<16x512xf32>, i32 -> vector<16x512xf32>
    %cst_242 = arith.constant 0.000000e+00 : f32
    %523 = vector.shape_cast %23 : vector<1x512xi1> to vector<1x512xi1>
    %524 = vector.broadcast %523 : vector<1x512xi1> to vector<16x512xi1>
    %525 = vector.broadcast %cst_242 : f32 to vector<16x512xf32>
    %526 = arith.select %524, %522, %525 : vector<16x512xi1>, vector<16x512xf32>
    %c39 = arith.constant 39 : index
    %c0_243 = arith.constant 0 : index
    %c0_244 = arith.constant 0 : index
    %527 = vector.load %arg1[%c39, %c0_243, %c0_244] : memref<54x8x16xf32, #tpu.memory_space<vmem>>, vector<1x8x16xf32>
    %528 = vector.shape_cast %527 : vector<1x8x16xf32> to vector<8x16xf32>
    %529 = arith.truncf %528 : vector<8x16xf32> to vector<8x16xbf16>
    %530 = arith.truncf %526 : vector<16x512xf32> to vector<16x512xbf16>
    %cst_245 = arith.constant dense<0.000000e+00> : vector<8x512xf32>
    %531 = tpu.matmul %529, %530, %cst_245 {dimension_numbers = #tpu.dot_dimension_numbers<[1], [0], [0], [1], [0, 0, 1, 1], [], []>} : vector<8x16xbf16>, vector<16x512xbf16>, vector<8x512xf32> -> vector<8x512xf32>
    %532 = arith.addf %521, %531 : vector<8x512xf32>
    %c40 = arith.constant 40 : index
    %c0_246 = arith.constant 0 : index
    %c0_247 = arith.constant 0 : index
    %533 = vector.load %arg1[%c40, %c0_246, %c0_247] : memref<54x8x16xf32, #tpu.memory_space<vmem>>, vector<1x8x16xf32>
    %534 = vector.shape_cast %533 : vector<1x8x16xf32> to vector<8x16xf32>
    %535 = arith.truncf %534 : vector<8x16xf32> to vector<8x16xbf16>
    %536 = arith.truncf %489 : vector<16x512xf32> to vector<16x512xbf16>
    %cst_248 = arith.constant dense<0.000000e+00> : vector<8x512xf32>
    %537 = tpu.matmul %535, %536, %cst_248 {dimension_numbers = #tpu.dot_dimension_numbers<[1], [0], [0], [1], [0, 0, 1, 1], [], []>} : vector<8x16xbf16>, vector<16x512xbf16>, vector<8x512xf32> -> vector<8x512xf32>
    %538 = arith.addf %532, %537 : vector<8x512xf32>
    %c511_i32_249 = arith.constant 511 : i32
    %539 = tpu.dynamic_rotate %489 by %c511_i32_249 dim 1 : vector<16x512xf32>, i32 -> vector<16x512xf32>
    %cst_250 = arith.constant 0.000000e+00 : f32
    %540 = vector.shape_cast %25 : vector<1x512xi1> to vector<1x512xi1>
    %541 = vector.broadcast %540 : vector<1x512xi1> to vector<16x512xi1>
    %542 = vector.broadcast %cst_250 : f32 to vector<16x512xf32>
    %543 = arith.select %541, %539, %542 : vector<16x512xi1>, vector<16x512xf32>
    %c41 = arith.constant 41 : index
    %c0_251 = arith.constant 0 : index
    %c0_252 = arith.constant 0 : index
    %544 = vector.load %arg1[%c41, %c0_251, %c0_252] : memref<54x8x16xf32, #tpu.memory_space<vmem>>, vector<1x8x16xf32>
    %545 = vector.shape_cast %544 : vector<1x8x16xf32> to vector<8x16xf32>
    %546 = arith.truncf %545 : vector<8x16xf32> to vector<8x16xbf16>
    %547 = arith.truncf %543 : vector<16x512xf32> to vector<16x512xbf16>
    %cst_253 = arith.constant dense<0.000000e+00> : vector<8x512xf32>
    %548 = tpu.matmul %546, %547, %cst_253 {dimension_numbers = #tpu.dot_dimension_numbers<[1], [0], [0], [1], [0, 0, 1, 1], [], []>} : vector<8x16xbf16>, vector<16x512xbf16>, vector<8x512xf32> -> vector<8x512xf32>
    %549 = arith.addf %538, %548 : vector<8x512xf32>
    %c497_i32_254 = arith.constant 497 : i32
    %550 = tpu.dynamic_rotate %489 by %c497_i32_254 dim 1 : vector<16x512xf32>, i32 -> vector<16x512xf32>
    %cst_255 = arith.constant 0.000000e+00 : f32
    %551 = vector.shape_cast %30 : vector<1x512xi1> to vector<1x512xi1>
    %552 = vector.broadcast %551 : vector<1x512xi1> to vector<16x512xi1>
    %553 = vector.broadcast %cst_255 : f32 to vector<16x512xf32>
    %554 = arith.select %552, %550, %553 : vector<16x512xi1>, vector<16x512xf32>
    %c42 = arith.constant 42 : index
    %c0_256 = arith.constant 0 : index
    %c0_257 = arith.constant 0 : index
    %555 = vector.load %arg1[%c42, %c0_256, %c0_257] : memref<54x8x16xf32, #tpu.memory_space<vmem>>, vector<1x8x16xf32>
    %556 = vector.shape_cast %555 : vector<1x8x16xf32> to vector<8x16xf32>
    %557 = arith.truncf %556 : vector<8x16xf32> to vector<8x16xbf16>
    %558 = arith.truncf %554 : vector<16x512xf32> to vector<16x512xbf16>
    %cst_258 = arith.constant dense<0.000000e+00> : vector<8x512xf32>
    %559 = tpu.matmul %557, %558, %cst_258 {dimension_numbers = #tpu.dot_dimension_numbers<[1], [0], [0], [1], [0, 0, 1, 1], [], []>} : vector<8x16xbf16>, vector<16x512xbf16>, vector<8x512xf32> -> vector<8x512xf32>
    %560 = arith.addf %549, %559 : vector<8x512xf32>
    %c496_i32_259 = arith.constant 496 : i32
    %561 = tpu.dynamic_rotate %489 by %c496_i32_259 dim 1 : vector<16x512xf32>, i32 -> vector<16x512xf32>
    %cst_260 = arith.constant 0.000000e+00 : f32
    %562 = vector.shape_cast %32 : vector<1x512xi1> to vector<1x512xi1>
    %563 = vector.broadcast %562 : vector<1x512xi1> to vector<16x512xi1>
    %564 = vector.broadcast %cst_260 : f32 to vector<16x512xf32>
    %565 = arith.select %563, %561, %564 : vector<16x512xi1>, vector<16x512xf32>
    %c43 = arith.constant 43 : index
    %c0_261 = arith.constant 0 : index
    %c0_262 = arith.constant 0 : index
    %566 = vector.load %arg1[%c43, %c0_261, %c0_262] : memref<54x8x16xf32, #tpu.memory_space<vmem>>, vector<1x8x16xf32>
    %567 = vector.shape_cast %566 : vector<1x8x16xf32> to vector<8x16xf32>
    %568 = arith.truncf %567 : vector<8x16xf32> to vector<8x16xbf16>
    %569 = arith.truncf %565 : vector<16x512xf32> to vector<16x512xbf16>
    %cst_263 = arith.constant dense<0.000000e+00> : vector<8x512xf32>
    %570 = tpu.matmul %568, %569, %cst_263 {dimension_numbers = #tpu.dot_dimension_numbers<[1], [0], [0], [1], [0, 0, 1, 1], [], []>} : vector<8x16xbf16>, vector<16x512xbf16>, vector<8x512xf32> -> vector<8x512xf32>
    %571 = arith.addf %560, %570 : vector<8x512xf32>
    %c495_i32_264 = arith.constant 495 : i32
    %572 = tpu.dynamic_rotate %489 by %c495_i32_264 dim 1 : vector<16x512xf32>, i32 -> vector<16x512xf32>
    %cst_265 = arith.constant 0.000000e+00 : f32
    %573 = vector.shape_cast %37 : vector<1x512xi1> to vector<1x512xi1>
    %574 = vector.broadcast %573 : vector<1x512xi1> to vector<16x512xi1>
    %575 = vector.broadcast %cst_265 : f32 to vector<16x512xf32>
    %576 = arith.select %574, %572, %575 : vector<16x512xi1>, vector<16x512xf32>
    %c44 = arith.constant 44 : index
    %c0_266 = arith.constant 0 : index
    %c0_267 = arith.constant 0 : index
    %577 = vector.load %arg1[%c44, %c0_266, %c0_267] : memref<54x8x16xf32, #tpu.memory_space<vmem>>, vector<1x8x16xf32>
    %578 = vector.shape_cast %577 : vector<1x8x16xf32> to vector<8x16xf32>
    %579 = arith.truncf %578 : vector<8x16xf32> to vector<8x16xbf16>
    %580 = arith.truncf %576 : vector<16x512xf32> to vector<16x512xbf16>
    %cst_268 = arith.constant dense<0.000000e+00> : vector<8x512xf32>
    %581 = tpu.matmul %579, %580, %cst_268 {dimension_numbers = #tpu.dot_dimension_numbers<[1], [0], [0], [1], [0, 0, 1, 1], [], []>} : vector<8x16xbf16>, vector<16x512xbf16>, vector<8x512xf32> -> vector<8x512xf32>
    %582 = arith.addf %571, %581 : vector<8x512xf32>
    %c0_269 = arith.constant 0 : index
    %c9_270 = arith.constant 9 : index
    %583 = vector.load %arg3[%c0_269, %c9_270] : memref<8x12xf32, #tpu.memory_space<vmem>>, vector<8x1xf32>
    %584 = vector.broadcast %583 : vector<8x1xf32> to vector<8x512xf32>
    %585 = arith.addf %582, %584 : vector<8x512xf32>
    %c17_i32_271 = arith.constant 17 : i32
    %586 = tpu.dynamic_rotate %585 by %c17_i32_271 dim 1 : vector<8x512xf32>, i32 -> vector<8x512xf32>
    %cst_272 = arith.constant 0.000000e+00 : f32
    %587 = vector.shape_cast %14 : vector<1x512xi1> to vector<1x512xi1>
    %588 = vector.broadcast %587 : vector<1x512xi1> to vector<8x512xi1>
    %589 = vector.broadcast %cst_272 : f32 to vector<8x512xf32>
    %590 = arith.select %588, %586, %589 : vector<8x512xi1>, vector<8x512xf32>
    %c45 = arith.constant 45 : index
    %c0_273 = arith.constant 0 : index
    %c0_274 = arith.constant 0 : index
    %591 = vector.load %arg1[%c45, %c0_273, %c0_274] : memref<54x8x16xf32, #tpu.memory_space<vmem>>, vector<1x8x8xf32>
    %592 = vector.shape_cast %591 : vector<1x8x8xf32> to vector<8x8xf32>
    %593 = arith.truncf %592 : vector<8x8xf32> to vector<8x8xbf16>
    %594 = arith.truncf %590 : vector<8x512xf32> to vector<8x512xbf16>
    %cst_275 = arith.constant dense<0.000000e+00> : vector<8x512xf32>
    %595 = tpu.matmul %593, %594, %cst_275 {dimension_numbers = #tpu.dot_dimension_numbers<[1], [0], [0], [1], [0, 0, 1, 1], [], []>} : vector<8x8xbf16>, vector<8x512xbf16>, vector<8x512xf32> -> vector<8x512xf32>
    %c16_i32_276 = arith.constant 16 : i32
    %596 = tpu.dynamic_rotate %585 by %c16_i32_276 dim 1 : vector<8x512xf32>, i32 -> vector<8x512xf32>
    %cst_277 = arith.constant 0.000000e+00 : f32
    %597 = vector.shape_cast %16 : vector<1x512xi1> to vector<1x512xi1>
    %598 = vector.broadcast %597 : vector<1x512xi1> to vector<8x512xi1>
    %599 = vector.broadcast %cst_277 : f32 to vector<8x512xf32>
    %600 = arith.select %598, %596, %599 : vector<8x512xi1>, vector<8x512xf32>
    %c46 = arith.constant 46 : index
    %c0_278 = arith.constant 0 : index
    %c0_279 = arith.constant 0 : index
    %601 = vector.load %arg1[%c46, %c0_278, %c0_279] : memref<54x8x16xf32, #tpu.memory_space<vmem>>, vector<1x8x8xf32>
    %602 = vector.shape_cast %601 : vector<1x8x8xf32> to vector<8x8xf32>
    %603 = arith.truncf %602 : vector<8x8xf32> to vector<8x8xbf16>
    %604 = arith.truncf %600 : vector<8x512xf32> to vector<8x512xbf16>
    %cst_280 = arith.constant dense<0.000000e+00> : vector<8x512xf32>
    %605 = tpu.matmul %603, %604, %cst_280 {dimension_numbers = #tpu.dot_dimension_numbers<[1], [0], [0], [1], [0, 0, 1, 1], [], []>} : vector<8x8xbf16>, vector<8x512xbf16>, vector<8x512xf32> -> vector<8x512xf32>
    %606 = arith.addf %595, %605 : vector<8x512xf32>
    %c15_i32_281 = arith.constant 15 : i32
    %607 = tpu.dynamic_rotate %585 by %c15_i32_281 dim 1 : vector<8x512xf32>, i32 -> vector<8x512xf32>
    %cst_282 = arith.constant 0.000000e+00 : f32
    %608 = vector.shape_cast %21 : vector<1x512xi1> to vector<1x512xi1>
    %609 = vector.broadcast %608 : vector<1x512xi1> to vector<8x512xi1>
    %610 = vector.broadcast %cst_282 : f32 to vector<8x512xf32>
    %611 = arith.select %609, %607, %610 : vector<8x512xi1>, vector<8x512xf32>
    %c47 = arith.constant 47 : index
    %c0_283 = arith.constant 0 : index
    %c0_284 = arith.constant 0 : index
    %612 = vector.load %arg1[%c47, %c0_283, %c0_284] : memref<54x8x16xf32, #tpu.memory_space<vmem>>, vector<1x8x8xf32>
    %613 = vector.shape_cast %612 : vector<1x8x8xf32> to vector<8x8xf32>
    %614 = arith.truncf %613 : vector<8x8xf32> to vector<8x8xbf16>
    %615 = arith.truncf %611 : vector<8x512xf32> to vector<8x512xbf16>
    %cst_285 = arith.constant dense<0.000000e+00> : vector<8x512xf32>
    %616 = tpu.matmul %614, %615, %cst_285 {dimension_numbers = #tpu.dot_dimension_numbers<[1], [0], [0], [1], [0, 0, 1, 1], [], []>} : vector<8x8xbf16>, vector<8x512xbf16>, vector<8x512xf32> -> vector<8x512xf32>
    %617 = arith.addf %606, %616 : vector<8x512xf32>
    %c1_i32_286 = arith.constant 1 : i32
    %618 = tpu.dynamic_rotate %585 by %c1_i32_286 dim 1 : vector<8x512xf32>, i32 -> vector<8x512xf32>
    %cst_287 = arith.constant 0.000000e+00 : f32
    %619 = vector.shape_cast %23 : vector<1x512xi1> to vector<1x512xi1>
    %620 = vector.broadcast %619 : vector<1x512xi1> to vector<8x512xi1>
    %621 = vector.broadcast %cst_287 : f32 to vector<8x512xf32>
    %622 = arith.select %620, %618, %621 : vector<8x512xi1>, vector<8x512xf32>
    %c48 = arith.constant 48 : index
    %c0_288 = arith.constant 0 : index
    %c0_289 = arith.constant 0 : index
    %623 = vector.load %arg1[%c48, %c0_288, %c0_289] : memref<54x8x16xf32, #tpu.memory_space<vmem>>, vector<1x8x8xf32>
    %624 = vector.shape_cast %623 : vector<1x8x8xf32> to vector<8x8xf32>
    %625 = arith.truncf %624 : vector<8x8xf32> to vector<8x8xbf16>
    %626 = arith.truncf %622 : vector<8x512xf32> to vector<8x512xbf16>
    %cst_290 = arith.constant dense<0.000000e+00> : vector<8x512xf32>
    %627 = tpu.matmul %625, %626, %cst_290 {dimension_numbers = #tpu.dot_dimension_numbers<[1], [0], [0], [1], [0, 0, 1, 1], [], []>} : vector<8x8xbf16>, vector<8x512xbf16>, vector<8x512xf32> -> vector<8x512xf32>
    %628 = arith.addf %617, %627 : vector<8x512xf32>
    %c49 = arith.constant 49 : index
    %c0_291 = arith.constant 0 : index
    %c0_292 = arith.constant 0 : index
    %629 = vector.load %arg1[%c49, %c0_291, %c0_292] : memref<54x8x16xf32, #tpu.memory_space<vmem>>, vector<1x8x8xf32>
    %630 = vector.shape_cast %629 : vector<1x8x8xf32> to vector<8x8xf32>
    %631 = arith.truncf %630 : vector<8x8xf32> to vector<8x8xbf16>
    %632 = arith.truncf %585 : vector<8x512xf32> to vector<8x512xbf16>
    %cst_293 = arith.constant dense<0.000000e+00> : vector<8x512xf32>
    %633 = tpu.matmul %631, %632, %cst_293 {dimension_numbers = #tpu.dot_dimension_numbers<[1], [0], [0], [1], [0, 0, 1, 1], [], []>} : vector<8x8xbf16>, vector<8x512xbf16>, vector<8x512xf32> -> vector<8x512xf32>
    %634 = arith.addf %628, %633 : vector<8x512xf32>
    %c511_i32_294 = arith.constant 511 : i32
    %635 = tpu.dynamic_rotate %585 by %c511_i32_294 dim 1 : vector<8x512xf32>, i32 -> vector<8x512xf32>
    %cst_295 = arith.constant 0.000000e+00 : f32
    %636 = vector.shape_cast %25 : vector<1x512xi1> to vector<1x512xi1>
    %637 = vector.broadcast %636 : vector<1x512xi1> to vector<8x512xi1>
    %638 = vector.broadcast %cst_295 : f32 to vector<8x512xf32>
    %639 = arith.select %637, %635, %638 : vector<8x512xi1>, vector<8x512xf32>
    %c50 = arith.constant 50 : index
    %c0_296 = arith.constant 0 : index
    %c0_297 = arith.constant 0 : index
    %640 = vector.load %arg1[%c50, %c0_296, %c0_297] : memref<54x8x16xf32, #tpu.memory_space<vmem>>, vector<1x8x8xf32>
    %641 = vector.shape_cast %640 : vector<1x8x8xf32> to vector<8x8xf32>
    %642 = arith.truncf %641 : vector<8x8xf32> to vector<8x8xbf16>
    %643 = arith.truncf %639 : vector<8x512xf32> to vector<8x512xbf16>
    %cst_298 = arith.constant dense<0.000000e+00> : vector<8x512xf32>
    %644 = tpu.matmul %642, %643, %cst_298 {dimension_numbers = #tpu.dot_dimension_numbers<[1], [0], [0], [1], [0, 0, 1, 1], [], []>} : vector<8x8xbf16>, vector<8x512xbf16>, vector<8x512xf32> -> vector<8x512xf32>
    %645 = arith.addf %634, %644 : vector<8x512xf32>
    %c497_i32_299 = arith.constant 497 : i32
    %646 = tpu.dynamic_rotate %585 by %c497_i32_299 dim 1 : vector<8x512xf32>, i32 -> vector<8x512xf32>
    %cst_300 = arith.constant 0.000000e+00 : f32
    %647 = vector.shape_cast %30 : vector<1x512xi1> to vector<1x512xi1>
    %648 = vector.broadcast %647 : vector<1x512xi1> to vector<8x512xi1>
    %649 = vector.broadcast %cst_300 : f32 to vector<8x512xf32>
    %650 = arith.select %648, %646, %649 : vector<8x512xi1>, vector<8x512xf32>
    %c51 = arith.constant 51 : index
    %c0_301 = arith.constant 0 : index
    %c0_302 = arith.constant 0 : index
    %651 = vector.load %arg1[%c51, %c0_301, %c0_302] : memref<54x8x16xf32, #tpu.memory_space<vmem>>, vector<1x8x8xf32>
    %652 = vector.shape_cast %651 : vector<1x8x8xf32> to vector<8x8xf32>
    %653 = arith.truncf %652 : vector<8x8xf32> to vector<8x8xbf16>
    %654 = arith.truncf %650 : vector<8x512xf32> to vector<8x512xbf16>
    %cst_303 = arith.constant dense<0.000000e+00> : vector<8x512xf32>
    %655 = tpu.matmul %653, %654, %cst_303 {dimension_numbers = #tpu.dot_dimension_numbers<[1], [0], [0], [1], [0, 0, 1, 1], [], []>} : vector<8x8xbf16>, vector<8x512xbf16>, vector<8x512xf32> -> vector<8x512xf32>
    %656 = arith.addf %645, %655 : vector<8x512xf32>
    %c496_i32_304 = arith.constant 496 : i32
    %657 = tpu.dynamic_rotate %585 by %c496_i32_304 dim 1 : vector<8x512xf32>, i32 -> vector<8x512xf32>
    %cst_305 = arith.constant 0.000000e+00 : f32
    %658 = vector.shape_cast %32 : vector<1x512xi1> to vector<1x512xi1>
    %659 = vector.broadcast %658 : vector<1x512xi1> to vector<8x512xi1>
    %660 = vector.broadcast %cst_305 : f32 to vector<8x512xf32>
    %661 = arith.select %659, %657, %660 : vector<8x512xi1>, vector<8x512xf32>
    %c52 = arith.constant 52 : index
    %c0_306 = arith.constant 0 : index
    %c0_307 = arith.constant 0 : index
    %662 = vector.load %arg1[%c52, %c0_306, %c0_307] : memref<54x8x16xf32, #tpu.memory_space<vmem>>, vector<1x8x8xf32>
    %663 = vector.shape_cast %662 : vector<1x8x8xf32> to vector<8x8xf32>
    %664 = arith.truncf %663 : vector<8x8xf32> to vector<8x8xbf16>
    %665 = arith.truncf %661 : vector<8x512xf32> to vector<8x512xbf16>
    %cst_308 = arith.constant dense<0.000000e+00> : vector<8x512xf32>
    %666 = tpu.matmul %664, %665, %cst_308 {dimension_numbers = #tpu.dot_dimension_numbers<[1], [0], [0], [1], [0, 0, 1, 1], [], []>} : vector<8x8xbf16>, vector<8x512xbf16>, vector<8x512xf32> -> vector<8x512xf32>
    %667 = arith.addf %656, %666 : vector<8x512xf32>
    %c495_i32_309 = arith.constant 495 : i32
    %668 = tpu.dynamic_rotate %585 by %c495_i32_309 dim 1 : vector<8x512xf32>, i32 -> vector<8x512xf32>
    %cst_310 = arith.constant 0.000000e+00 : f32
    %669 = vector.shape_cast %37 : vector<1x512xi1> to vector<1x512xi1>
    %670 = vector.broadcast %669 : vector<1x512xi1> to vector<8x512xi1>
    %671 = vector.broadcast %cst_310 : f32 to vector<8x512xf32>
    %672 = arith.select %670, %668, %671 : vector<8x512xi1>, vector<8x512xf32>
    %c53 = arith.constant 53 : index
    %c0_311 = arith.constant 0 : index
    %c0_312 = arith.constant 0 : index
    %673 = vector.load %arg1[%c53, %c0_311, %c0_312] : memref<54x8x16xf32, #tpu.memory_space<vmem>>, vector<1x8x8xf32>
    %674 = vector.shape_cast %673 : vector<1x8x8xf32> to vector<8x8xf32>
    %675 = arith.truncf %674 : vector<8x8xf32> to vector<8x8xbf16>
    %676 = arith.truncf %672 : vector<8x512xf32> to vector<8x512xbf16>
    %cst_313 = arith.constant dense<0.000000e+00> : vector<8x512xf32>
    %677 = tpu.matmul %675, %676, %cst_313 {dimension_numbers = #tpu.dot_dimension_numbers<[1], [0], [0], [1], [0, 0, 1, 1], [], []>} : vector<8x8xbf16>, vector<8x512xbf16>, vector<8x512xf32> -> vector<8x512xf32>
    %678 = arith.addf %667, %677 : vector<8x512xf32>
    %c0_314 = arith.constant 0 : index
    %c10_315 = arith.constant 10 : index
    %679 = vector.load %arg3[%c0_314, %c10_315] : memref<8x12xf32, #tpu.memory_space<vmem>>, vector<8x1xf32>
    %680 = vector.broadcast %679 : vector<8x1xf32> to vector<8x512xf32>
    %681 = arith.addf %678, %680 : vector<8x512xf32>
    %cst_316 = arith.constant 0.000000e+00 : f32
    %682 = vector.broadcast %cst_316 : f32 to vector<8x512xf32>
    %683 = arith.maximumf %681, %682 : vector<8x512xf32>
    %c5_317 = arith.constant 5 : index
    %c0_318 = arith.constant 0 : index
    %c0_319 = arith.constant 0 : index
    %684 = vector.load %arg2[%c5_317, %c0_318, %c0_319] : memref<6x8x16xf32, #tpu.memory_space<vmem>>, vector<1x3x8xf32>
    %685 = vector.shape_cast %684 : vector<1x3x8xf32> to vector<3x8xf32>
    %686 = arith.truncf %685 : vector<3x8xf32> to vector<3x8xbf16>
    %687 = arith.truncf %683 : vector<8x512xf32> to vector<8x512xbf16>
    %cst_320 = arith.constant dense<0.000000e+00> : vector<3x512xf32>
    %688 = tpu.matmul %686, %687, %cst_320 {dimension_numbers = #tpu.dot_dimension_numbers<[1], [0], [0], [1], [0, 0, 1, 1], [], []>} : vector<3x8xbf16>, vector<8x512xbf16>, vector<3x512xf32> -> vector<3x512xf32>
    %c0_321 = arith.constant 0 : index
    %c11_322 = arith.constant 11 : index
    %689 = vector.load %arg3[%c0_321, %c11_322] : memref<8x12xf32, #tpu.memory_space<vmem>>, vector<3x1xf32>
    %690 = vector.broadcast %689 : vector<3x1xf32> to vector<3x512xf32>
    %691 = arith.addf %688, %690 : vector<3x512xf32>
    %692 = arith.negf %691 : vector<3x512xf32>
    %693 = math.exp %692 : vector<3x512xf32>
    %cst_323 = arith.constant 1.000000e+00 : f32
    %694 = vector.broadcast %cst_323 : f32 to vector<3x512xf32>
    %695 = arith.addf %694, %693 : vector<3x512xf32>
    %696 = arith.divf %694, %695 : vector<3x512xf32>
    %697 = tpu.concatenate %696, %467, %249 in 0 : vector<3x512xf32>, vector<3x512xf32>, vector<3x512xf32> -> vector<9x512xf32>
    %698 = vector.extract_strided_slice %697 {offsets = [0, 0], sizes = [9, 256], strides = [1, 1]} : vector<9x512xf32> to vector<9x256xf32>
    %c0_324 = arith.constant 0 : index
    %c0_325 = arith.constant 0 : index
    %c0_326 = arith.constant 0 : index
    %699 = vector.load %arg4[%c0_324, %c0_325, %c0_326] : memref<2x9x256xf32, #tpu.memory_space<vmem>>, vector<1x9x256xf32>
    %700 = vector.shape_cast %699 : vector<1x9x256xf32> to vector<9x256xf32>
    %701 = vector.shape_cast %698 : vector<9x256xf32> to vector<1x9x256xf32>
    tpu.vector_store %arg4[%c0_324, %c0_325, %c0_326], %701 {strides = array<i32>} : memref<2x9x256xf32, #tpu.memory_space<vmem>>, vector<1x9x256xf32>,
    %702 = vector.extract_strided_slice %697 {offsets = [0, 256], sizes = [9, 256], strides = [1, 1]} : vector<9x512xf32> to vector<9x256xf32>
    %c1_327 = arith.constant 1 : index
    %c0_328 = arith.constant 0 : index
    %c0_329 = arith.constant 0 : index
    %703 = vector.load %arg4[%c1_327, %c0_328, %c0_329] : memref<2x9x256xf32, #tpu.memory_space<vmem>>, vector<1x9x256xf32>
    %704 = vector.shape_cast %703 : vector<1x9x256xf32> to vector<9x256xf32>
    %705 = vector.shape_cast %702 : vector<9x256xf32> to vector<1x9x256xf32>
    tpu.vector_store %arg4[%c1_327, %c0_328, %c0_329], %705 {strides = array<i32>} : memref<2x9x256xf32, #tpu.memory_space<vmem>>, vector<1x9x256xf32>,
    return
  }
}

</mosaic_0001>

<bundles_post_ra>
// kernel: _lambda_.1
= control target key start
LH: loop header
LB: loop body
LE: loop exit
PB: predicated region body
PF: predicated region fallthrough
CT: control target
= control target key end

     0   :  { %s8378_s23 = smov 16   ;;  %s8379_s24 = smov 17   ;;  %v10618_v6 = vmov 0   ;;  %v23_v8 = vlaneseq  ;;  %vm10677_vm1 = vcmask 1043456   ;;  %v10765_v29 = vmov 0  ;;  %s10581_s0 = inlined_call_operand.vmem [shape: f32[2,8,256], index: 0, kind: input, shape index: {}]   ;;  %s10582_s3 = inlined_call_operand.vmem [shape: f32[8,12], index: 3, kind: input, shape index: {}]   ;;  %s10583_s1 = inlined_call_operand.vmem [shape: f32[54,8,16], index: 1, kind: input, shape index: {}]   ;;  %s10584_s2 = inlined_call_operand.vmem [shape: f32[6,8,16], index: 2, kind: input, shape index: {}]   ;;  %s10585_s4 = inlined_call_operand.vmem [shape: f32[2,9,256], index: 4, kind: output, shape index: {}]  }
   0x1   :  { %v8427_v0 = vld [vmem:[%s10581_s0] sm:$0xff]  ;;  %v8432_v1 = vld [vmem:[%s10581_s0 + $0x8] sm:$0xff]  ;;  %v8437_v2 = vld [vmem:[%s10581_s0 + $0x10] sm:$0xff]  ;;  %180 = vmatprep.mubr.bf16.mxu0 %v10618_v6  ;;  %221 = vmatprep.mubr.bf16.mxu1 %v10618_v6  ;;  %s8381_s25 = smov 15   ;;  %s8382_s26 = smov 1   ;;  %v10769_v32 = vmov 0 }
   0x2   :  { %v7824_v3 = vpack.i.bf16 %v8432_v1, %v8427_v0  ;;  %v8444_v4 = vld [vmem:[%s10581_s0 + $0x18] sm:$0xff]  ;;  %7904 = vset.pattern.permute.xlu0 %v10618_v6  ;;  %s8383_s27 = smov 127   ;;  %s8384_s28 = smov 113   ;;  %v8470_v7 = vld [vmem:[%s10582_s3] sm:$0xff]  ;;  %v8473_v9 = vand.u32 127, %v23_v8  ;;  %v7367_v18 = vld [vmem:[%s10583_s1 + $0x8] sm:$0xff] }
   0x3   :  { %v7829_v5 = vpack.i.bf16 %v8444_v4, %v8437_v2  ;;  %s8385_s29 = smov 112   ;;  %s8386_s30 = smov 111   ;;  %v8498_v23 = vpack.c.bf16 %v7367_v18, %v7367_v18  ;;  %vm10601_vm11 = vcmask 64512   ;;  %v10775_v46 = vmov 0 }
   0x4   :  { %7825 = vrot.lane.b32.xlu0 %v7824_v3, %s8378_s23  ;;  %7835 = vrot.lane.b32.xlu1 %v7824_v3, %s8379_s24  ;;  %v8476_v10 = vadd.s32 128, %v8473_v9  ;;  %v26_v11 = vadd.s32 256, %v8473_v9  ;;  %v8481_v13 = vadd.s32 384, %v8473_v9  ;;  %v28_v14 = vand.u32 255, %v8473_v9 }
   0x5   :  { %vm10588_vm0 = vcmp.lt.s32.totalorder %v8473_v9, 17  ;;  %vm10587_vm2 = vcmp.lt.s32.totalorder %v8473_v9, 16  ;;  %vm10590_vm7 = vcmp.lt.s32.totalorder %v8473_v9, 15  ;;  %vm10591_vm15 = vcmp.lt.s32.totalorder %v8473_v9, 1 }
   0x6   :  { %v29_v12 = vand.u32 255, %v8476_v10  ;;  %v30_v15 = vand.u32 255, %v26_v11  ;;  %v31_v17 = vand.u32 255, %v8481_v13  ;;  %v8492_v19 = vand.u32 15, %v28_v14  ;;  %v7386_v13 = vld [vmem:[%s10583_s1 + $0x20] sm:$0xff] }
   0x7   :  { %vm8505_vm4 = vcmp.ge.s32.totalorder %v28_v14, 16  ;;  %v10777_v51 = vmov 0 }
   0x8   :  { %7830 = vrot.lane.b32.xlu0 %v7829_v5, %s8378_s23  ;;  %7840 = vrot.lane.b32.xlu1 %v7829_v5, %s8379_s24  ;;  %v8486_v16 = vand.u32 15, %v29_v12  ;;  %10762 = vst [vmem:[#allocation2_spill] sm:$0xff] %v8492_v19  ;;  %v8495_v20 = vand.u32 15, %v30_v15  ;;  %v8503_v24 = vand.u32 15, %v31_v17  ;;  %v10766_v29 = vsel %vm8505_vm4, 4294967295, %v10765_v29 }
   0x9   :  { %vm10596_vm5 = vcmp.ge.s32.totalorder %v8492_v19, 1  ;;  %vm10589_vm6 = vcmp.le.s32.totalorder %v8492_v19, 14  ;;  %vm8520_vm8 = vcmp.ge.s32.totalorder %v30_v15, 16 }
   0xa   :  { %10763 = vst [vmem:[#allocation3_spill] sm:$0xff] %v8495_v20  ;;  %vm10586_vm3 = vcmp.ge.s32.totalorder %v8486_v16, 1  ;;  %10764 = vst [vmem:[#allocation4_spill] sm:$0xff] %v8503_v24  ;;  %v10770_v32 = vsel %vm8520_vm8, 4294967295, %v10769_v32  ;;  %vm10592_vm9 = vcmp.ge.s32.totalorder %v8495_v20, 1  ;;  %vm10599_vm10 = vcmp.le.s32.totalorder %v8495_v20, 14 }
   0xb   :  { %vm10597_vm12 = vcmp.ge.s32.totalorder %v8503_v24, 1  ;;  %vm10593_vm13 = vcmp.le.s32.totalorder %v8486_v16, 14  ;;  %vm10595_vm14 = vcmp.le.s32.totalorder %v8503_v24, 14 }
   0xc   :  { %7850 = vrot.lane.b32.xlu1 %v7829_v5, %s8381_s25  ;;  %7845 = vrot.lane.b32.xlu0 %v7824_v3, %s8381_s25 }
  0x10   :  { %7860 = vrot.lane.b32.xlu1 %v7829_v5, %s8382_s26  ;;  %7855 = vrot.lane.b32.xlu0 %v7824_v3, %s8382_s26 }
  0x14   :  { %7870 = vrot.lane.b32.xlu1 %v7829_v5, %s8383_s27  ;;  %7865 = vrot.lane.b32.xlu0 %v7824_v3, %s8383_s27 }
  0x18   :  { %7880 = vrot.lane.b32.xlu1 %v7829_v5, %s8384_s28  ;;  %7875 = vrot.lane.b32.xlu0 %v7824_v3, %s8384_s28 }
  0x1c   :  { %7890 = vrot.lane.b32.xlu1 %v7829_v5, %s8385_s29  ;;  %7885 = vrot.lane.b32.xlu0 %v7824_v3, %s8385_s29 }
  0x20   :  { %7900 = vrot.lane.b32.xlu1 %v7829_v5, %s8386_s30  ;;  %7895 = vrot.lane.b32.xlu0 %v7824_v3, %s8386_s30 }
  0x24   :  { %1236 = vperm.xlu0 %7904, %v8470_v7  }
  0x76   :  { %v7826_v21 = vpop.permute.xlu0 %7825  ;;  %v7836_v22 = vpop.permute.xlu1 %7835 }
  0x77   :  { %v7828_v25 = vunpack.i.h.bf16 %v7826_v21  ;;  %v7827_v26 = vunpack.i.l.bf16 %v7826_v21  ;;  %v7838_v27 = vunpack.i.h.bf16 %v7836_v22  ;;  %v7837_v28 = vunpack.i.l.bf16 %v7836_v22 }
  0x79   :  { %v8514_v30 = vsel %vm10588_vm0, %v7837_v28, %v7838_v27  ;;  %v8518_v31 = vsel %vm10587_vm2, %v7827_v26, %v7828_v25 }
  0x7a   :  { %10767 = vst [vmem:[#allocation5_spill] sm:$0xff] %v8514_v30  ;;  %10768 = vst [vmem:[#allocation6_spill] sm:$0xff] %v8518_v31  ;;  %v7831_v33 = vpop.permute.xlu0 %7830  ;;  %v128_v34 = vpack.c.bf16 %v8518_v31, %v8518_v31  ;;  %v7841_v35 = vpop.permute.xlu1 %7840  ;;  %v90_v36 = vsel %vm10586_vm3, %v8514_v30, 0.0 }
  0x7b   :  { %v7833_v37 = vunpack.i.h.bf16 %v7831_v33  ;;  %v7832_v38 = vunpack.i.l.bf16 %v7831_v33  ;;  %v7843_v39 = vunpack.i.h.bf16 %v7841_v35  ;;  %v7842_v40 = vunpack.i.l.bf16 %v7841_v35  ;;  %vm8556_vm3 = vmand %vm8505_vm4, %vm10596_vm5 }
  0x7c   :  { %7368 = vmatprep.subr.msk.bf16.mxu0 %vm10677_vm1, %v128_v34  ;;  %v96_v41 = vpack.c.bf16 %v90_v36, %v90_v36  ;;  %v10776_v46 = vsel %vm8556_vm3, 4294967295, %v10775_v46  ;;  %v10784_v33 = vmov 0 }
  0x7d   :  { %v8538_v42 = vsel %vm10588_vm0, %v7842_v40, %v7843_v39  ;;  %v8542_v43 = vsel %vm10587_vm2, %v7832_v38, %v7833_v37  ;;  %v8546_v44 = vsel %vm10587_vm2, %v7833_v37, %v7827_v26  ;;  %v8550_v45 = vsel %vm10587_vm2, %v7828_v25, %v7832_v38  ;;  %vm8575_vm2 = vmand %vm8520_vm8, %vm10592_vm9  ;;  %v93_v38 = vld [vmem:[%s10583_s1] sm:$0xff] }
  0x7e   :  { %10771 = vst [vmem:[#allocation7_spill] sm:$0xff] %v8538_v42  ;;  %10772 = vst [vmem:[#allocation8_spill] sm:$0xff] %v8542_v43  ;;  %v130_v47 = vpack.c.bf16 %v8542_v43, %v8542_v43  ;;  %v120_v48 = vsel %vm8505_vm4, %v8546_v44, 0.0  ;;  %v122_v49 = vsel %vm8520_vm8, %v8550_v45, 0.0  ;;  %v92_v50 = vsel %vm10597_vm12, %v8538_v42, 0.0  ;;  %v7851_v52 = vpop.permute.xlu1 %7850  ;;  %v7846_v53 = vpop.permute.xlu0 %7845 }
  0x7f   :  { %10773 = vst [vmem:[#allocation9_spill] sm:$0xff] %v8546_v44  ;;  %10774 = vst [vmem:[#allocation10_spill] sm:$0xff] %v8550_v45  ;;  %v10778_v51 = vsel %vm8575_vm2, 4294967295, %v10777_v51  ;;  %v127_v54 = vpack.c.bf16 %v120_v48, %v120_v48  ;;  %v129_v55 = vpack.c.bf16 %v122_v49, %v122_v49  ;;  %v98_v56 = vpack.c.bf16 %v92_v50, %v92_v50 }
  0x80   :  { %v8581_v57 = vsel %vm10588_vm0, %v7843_v39, %v7837_v28  ;;  %7370 = vmatprep.subr.msk.bf16.mxu1 %vm10677_vm1, %v130_v47  ;;  %v8589_v59 = vsel %vm10588_vm0, %v7838_v27, %v7842_v40  ;;  %v7853_v60 = vunpack.i.h.bf16 %v7851_v52  ;;  %v7852_v61 = vunpack.i.l.bf16 %v7851_v52  ;;  %vm8604_vm0 = vmand %vm8505_vm4, %vm10589_vm6 }
  0x81   :  { %10779 = vst [vmem:[#allocation11_spill] sm:$0xff] %v8581_v57  ;;  %v89_v58 = vsel %vm8556_vm3, %v8581_v57, 0.0  ;;  %10780 = vst [vmem:[#allocation12_spill] sm:$0xff] %v8589_v59  ;;  %v137_v62 = vsel %vm10677_vm1, %v127_v54, 0  ;;  %v143_v63 = vsel %vm10677_vm1, %v129_v55, 0  ;;  %v91_v5 = vsel %vm8575_vm2, %v8589_v59, 0.0 }
  0x82   :  { %v95_v3 = vpack.c.bf16 %v89_v58, %v89_v58  ;;  %163 = vmatpush1.bf16.msra.mxu0 %v137_v62  ;;  %204 = vmatpush1.bf16.msra.mxu1 %v143_v63  ;;  %v97_v8 = vpack.c.bf16 %v91_v5, %v91_v5  ;;  %v8598_v11 = vsel %vm10590_vm7, %v7852_v61, %v7853_v60  ;;  %v7848_v14 = vunpack.i.h.bf16 %v7846_v53  ;;  %v7861_v18 = vpop.permute.xlu1 %7860  ;;  %v7856_v21 = vpop.permute.xlu0 %7855  ;;  %vm8618_vm6 = vmand %vm8520_vm8, %vm10599_vm10 }
  0x83   :  { %10781 = vst [vmem:[#allocation13_spill] sm:$0xff] %v8598_v11  ;;  %v7847_v15 = vunpack.i.l.bf16 %v7846_v53  ;;  %7372 = vmatprep.subr.msk.bf16.mxu0 %vm10677_vm1, %v96_v41  ;;  %7374 = vmatprep.subr.msk.bf16.mxu1 %vm10677_vm1, %v98_v56  ;;  %v351_v26 = vsel %vm10595_vm14, %v8598_v11, 0.0  ;;  %v7863_v27 = vunpack.i.h.bf16 %v7861_v18  ;;  %v7862_v28 = vunpack.i.l.bf16 %v7861_v18 }
  0x84   :  { %v234_v25 = vsel %vm10677_vm1, %v95_v3, 0  ;;  %v10785_v33 = vsel %vm8618_vm6, 4294967295, %v10784_v33  ;;  %v240_v34 = vsel %vm10677_vm1, %v97_v8, 0  ;;  %v8625_v35 = vsel %vm10590_vm7, %v7848_v14, %v7852_v61 }
  0x85   :  { %10786 = vst [vmem:[#allocation14_spill] sm:$0xff] %v8625_v35  ;;  %v8629_v36 = vsel %vm10590_vm7, %v7847_v15, %v7848_v14  ;;  %v8633_v37 = vsel %vm10590_vm7, %v7853_v60, %v7847_v15  ;;  %7369 = vmatmul.mubr.msk.bf16.vlgmr.msra.gmra.mxu0 %vm10601_vm11, %v8498_v23  ;;  %7371 = vmatmul.mubr.msk.bf16.vlgmr.msra.gmra.mxu1 %vm10601_vm11, %v8498_v23  ;;  %v7858_v47 = vunpack.i.h.bf16 %v7856_v21  ;;  %v7857_v49 = vunpack.i.l.bf16 %v7856_v21  ;;  %v7376_v15 = vld [vmem:[%s10583_s1 + $0x10] sm:$0xff] }
  0x86   :  { %10787 = vst [vmem:[#allocation15_spill] sm:$0xff] %v8629_v36  ;;  %10788 = vst [vmem:[#allocation16_spill] sm:$0xff] %v8633_v37  ;;  %v349_v39 = vsel %vm10593_vm13, %v8629_v36, 0.0  ;;  %v358_v40 = vpack.c.bf16 %v351_v26, %v351_v26  ;;  %v8647_v41 = vsel %vm10591_vm15, %v7862_v28, %v7863_v27  ;;  %260 = vmatpush1.bf16.msra.mxu0 %v234_v25  ;;  %301 = vmatpush1.bf16.msra.mxu1 %v240_v34  ;;  %v7871_v25 = vpop.permute.xlu1 %7870  ;;  %v7866_v26 = vpop.permute.xlu0 %7865 }
  0x87   :  { %10789 = vst [vmem:[#allocation17_spill] sm:$0xff] %v8647_v41  ;;  %v356_v48 = vpack.c.bf16 %v349_v39, %v349_v39  ;;  %v348_v23 = vsel %vm8604_vm0, %v8633_v37, 0.0  ;;  %v350_v50 = vsel %vm8618_vm6, %v8625_v35, 0.0  ;;  %277 = vmatprep.mubr.bf16.mxu0 %v10618_v6  ;;  %318 = vmatprep.mubr.bf16.mxu1 %v10618_v6  ;;  %v94_v54 = vpack.c.bf16 %v93_v38, %v93_v38 }
  0x88   :  { %v355_v52 = vpack.c.bf16 %v348_v23, %v348_v23  ;;  %v357_v53 = vpack.c.bf16 %v350_v50, %v350_v50  ;;  %7379 = vmatprep.subr.msk.bf16.mxu1 %vm10677_vm1, %v358_v40  ;;  %v8661_v55 = vsel %vm10591_vm15, %v7857_v49, %v7858_v47  ;;  %v8665_v56 = vsel %vm10591_vm15, %v7858_v47, %v7862_v28  ;;  %v7381_v23 = vld [vmem:[%s10583_s1 + $0x18] sm:$0xff] }
  0x89   :  { %7377 = vmatprep.subr.msk.bf16.mxu0 %vm10677_vm1, %v356_v48  ;;  %10790 = vst [vmem:[#allocation18_spill] sm:$0xff] %v8661_v55  ;;  %10791 = vst [vmem:[#allocation19_spill] sm:$0xff] %v8665_v56  ;;  %v8669_v58 = vsel %vm10591_vm15, %v7863_v27, %v7857_v49  ;;  %vm10793_vm7 = vcmp.ge.s32.totalorder %v8486_v16, 1  ;;  %v484_v61 = vsel %vm10597_vm12, %v8647_v41, 0.0  ;;  %v483_v14 = vsel %vm10592_vm9, %v8665_v56, 0.0 }
  0x8a   :  { %10792 = vst [vmem:[#allocation20_spill] sm:$0xff] %v8669_v58  ;;  %v482_v60 = vsel %vm10793_vm7, %v8661_v55, 0.0  ;;  %v363_v62 = vsel %vm10677_vm1, %v355_v52, 0  ;;  %v369_v63 = vsel %vm10677_vm1, %v357_v53, 0  ;;  %v491_v5 = vpack.c.bf16 %v484_v61, %v484_v61  ;;  %v7881_v53 = vpop.permute.xlu1 %7880  ;;  %v7775_v61 = vld [vmem:[%s10583_s1 + $0x198] sm:$0xff] }
  0x8b   :  { %v489_v3 = vpack.c.bf16 %v482_v60, %v482_v60  ;;  %v481_v8 = vsel %vm10596_vm5, %v8669_v58, 0.0  ;;  %v490_v21 = vpack.c.bf16 %v483_v14, %v483_v14  ;;  %v354_v27 = vpack.c.bf16 %v7376_v15, %v7376_v15 }
  0x8c   :  { %v488_v18 = vpack.c.bf16 %v481_v8, %v481_v8  ;;  %v7873_v28 = vunpack.i.h.bf16 %v7871_v25  ;;  %v7872_v34 = vunpack.i.l.bf16 %v7871_v25  ;;  %v7868_v38 = vunpack.i.h.bf16 %v7866_v26 }
  0x8d   :  { %7373 = vmatmul.mubr.msk.bf16.vlgmr.msra.gmra.mxu0 %vm10601_vm11, %v94_v54  ;;  %7375 = vmatmul.mubr.msk.bf16.vlgmr.msra.gmra.mxu1 %vm10601_vm11, %v94_v54  ;;  %v7867_v39 = vunpack.i.l.bf16 %v7866_v26  ;;  %v502_v47 = vsel %vm10677_vm1, %v490_v21, 0  ;;  %vm10594_vm7 = vcmp.lt.s32.totalorder %v8473_v9, 127  ;;  %v597_v48 = vpack.c.bf16 %v8432_v1, %v8432_v1  ;;  %v7876_v54 = vpop.permute.xlu0 %7875 }
  0x8e   :  { %389 = vmatpush1.bf16.msra.mxu0 %v363_v62  ;;  %430 = vmatpush1.bf16.msra.mxu1 %v369_v63  ;;  %v496_v40 = vsel %vm10677_vm1, %v488_v18, 0  ;;  %v599_v49 = vpack.c.bf16 %v8444_v4, %v8444_v4  ;;  %v8708_v50 = vsel %vm10594_vm7, %v7868_v38, %v7872_v34  ;;  %v596_v4 = vpack.c.bf16 %v8427_v0, %v8427_v0 }
  0x8f   :  { %406 = vmatprep.mubr.bf16.mxu0 %v10618_v6  ;;  %447 = vmatprep.mubr.bf16.mxu1 %v10618_v6  ;;  %10794 = vst [vmem:[#allocation21_spill] sm:$0xff] %v8708_v50  ;;  %v8712_v1 = vsel %vm10594_vm7, %v7873_v28, %v7867_v39  ;;  %v598_v52 = vpack.c.bf16 %v8437_v2, %v8437_v2  ;;  %vm8724_vm15 = vcmp.lt.s32.totalorder %v29_v12, 240  ;;  %v723_v0 = vsel %vm10593_vm13, %v8708_v50, 0.0 }
  0x90   :  { %7382 = vmatprep.subr.msk.bf16.mxu0 %vm10677_vm1, %v489_v3  ;;  %7384 = vmatprep.subr.msk.bf16.mxu1 %vm10677_vm1, %v491_v5  ;;  %10795 = vst [vmem:[#allocation22_spill] sm:$0xff] %v8712_v1  ;;  %v487_v60 = vpack.c.bf16 %v7381_v23, %v7381_v23  ;;  %v8730_v62 = vsel %vm10594_vm7, %v7867_v39, %v7868_v38  ;;  %v725_v2 = vsel %vm10595_vm14, %v8712_v1, 0.0  ;;  %v7883_v10 = vunpack.i.h.bf16 %v7881_v53 }
  0x91   :  { %10798 = vst [vmem:[#allocation23_spill] sm:$0xff] %v8730_v62  ;;  %v8740_v63 = vsel %vm10594_vm7, %v7872_v34, %v7873_v28  ;;  %v7882_v12 = vunpack.i.l.bf16 %v7881_v53  ;;  %v7878_v3 = vunpack.i.h.bf16 %v7876_v54  ;;  %v7877_v5 = vunpack.i.l.bf16 %v7876_v54 }
  0x92   :  { %10799 = vst [vmem:[#allocation24_spill] sm:$0xff] %v8740_v63  ;;  %v604_v8 = vsel %vm10677_vm1, %v596_v4, 0  ;;  %v610_v14 = vsel %vm10677_vm1, %v598_v52, 0  ;;  %vm10598_vm9 = vcmp.lt.s32.totalorder %v8473_v9, 113  ;;  %vm8747_vm13 = vcmp.lt.s32.totalorder %v31_v17, 240 }
  0x93   :  { %v730_v18 = vpack.c.bf16 %v723_v0, %v723_v0  ;;  %v732_v21 = vpack.c.bf16 %v725_v2, %v725_v2  ;;  %vm10802_vm7 = vcmp.le.s32.totalorder %v8492_v19, 14  ;;  %v724_v26 = vsel %vm10599_vm10, %v8740_v63, 0.0 }
  0x94   :  { %v722_v25 = vsel %vm10802_vm7, %v8730_v62, 0.0  ;;  %vm10803_vm14 = vcmp.ge.s32.totalorder %v8486_v16, 1  ;;  %v10804_v17 = vmov 0  ;;  %v8776_v28 = vsel %vm10598_vm9, %v7883_v10, %v7877_v5  ;;  %vm8782_vm7 = vmand %vm8747_vm13, %vm10597_vm12 }
  0x95   :  { %7378 = vmatmul.mubr.msk.bf16.vlgmr.msra.gmra.mxu0 %vm10601_vm11, %v354_v27  ;;  %7380 = vmatmul.mubr.msk.bf16.vlgmr.msra.gmra.mxu1 %vm10601_vm11, %v354_v27  ;;  %vm8766_vm5 = vmand %vm8724_vm15, %vm10803_vm14  ;;  %v8772_v27 = vsel %vm10598_vm9, %v7878_v3, %v7882_v12  ;;  %10807 = vst [vmem:[#allocation26_spill] sm:$0xff] %v8776_v28  ;;  %v729_v38 = vpack.c.bf16 %v722_v25, %v722_v25  ;;  %v858_v4 = vsel %vm8782_vm7, %v8776_v28, 0.0  ;;  %vm10600_vm14 = vcmp.lt.s32.totalorder %v8473_v9, 112 }
  0x96   :  { %522 = vmatpush1.bf16.msra.mxu0 %v496_v40  ;;  %563 = vmatpush1.bf16.msra.mxu1 %v502_v47  ;;  %v10805_v17 = vsel %vm8766_vm5, 4294967295, %v10804_v17  ;;  %10806 = vst [vmem:[#allocation25_spill] sm:$0xff] %v8772_v27  ;;  %v731_v39 = vpack.c.bf16 %v724_v26, %v724_v26  ;;  %v7891_v40 = vpop.permute.xlu1 %7890  ;;  %v7886_v47 = vpop.permute.xlu0 %7885  ;;  %v856_v23 = vsel %vm8766_vm5, %v8772_v27, 0.0  ;;  %v8802_v52 = vsel %vm10598_vm9, %v7882_v12, %v7883_v10  ;;  %v7391_v12 = vld [vmem:[%s10583_s1 + $0x28] sm:$0xff] }
  0x97   :  { %539 = vmatprep.mubr.bf16.mxu0 %v10618_v6  ;;  %580 = vmatprep.mubr.bf16.mxu1 %v10618_v6  ;;  %10811 = vst [vmem:[#allocation28_spill] sm:$0xff] %v8802_v52  ;;  %v7893_v53 = vunpack.i.h.bf16 %v7891_v40  ;;  %v7892_v54 = vunpack.i.l.bf16 %v7891_v40  ;;  %v7887_v0 = vunpack.i.l.bf16 %v7886_v47  ;;  %v737_v2 = vsel %vm10677_vm1, %v729_v38, 0 }
  0x98   :  { %7387 = vmatprep.subr.msk.bf16.mxu0 %vm10677_vm1, %v597_v48  ;;  %7389 = vmatprep.subr.msk.bf16.mxu1 %vm10677_vm1, %v599_v49  ;;  %v595_v48 = vpack.c.bf16 %v7386_v13, %v7386_v13  ;;  %v8792_v49 = vsel %vm10598_vm9, %v7877_v5, %v7878_v3  ;;  %v743_v3 = vsel %vm10677_vm1, %v731_v39, 0  ;;  %v863_v5 = vpack.c.bf16 %v856_v23, %v856_v23 }
  0x99   :  { %10810 = vst [vmem:[#allocation27_spill] sm:$0xff] %v8792_v49  ;;  %vm10812_vm12 = vcmp.ge.s32.totalorder %v8492_v19, 1  ;;  %vm10813_vm9 = vcmp.ge.s32.totalorder %v8495_v20, 1  ;;  %v728_v39 = vpack.c.bf16 %v7391_v12, %v7391_v12  ;;  %v8845_v12 = vsel %vm10600_vm14, %v7892_v54, %v7893_v53 }
  0x9a   :  { %v857_v10 = vsel %vm10813_vm9, %v8802_v52, 0.0  ;;  %v7901_v13 = vpop.permute.xlu1 %7900  ;;  %v7896_v38 = vpop.permute.xlu0 %7895  ;;  %vm10676_vm9 = vcmp.lt.s32.totalorder %v8473_v9, 111  ;;  %10817 = vst [vmem:[#allocation32_spill] sm:$0xff] %v8845_v12 }
  0x9b   :  { %v864_v26 = vpack.c.bf16 %v857_v10, %v857_v10  ;;  %v7902_v23 = vunpack.i.l.bf16 %v7901_v13 }
  0x9d   :  { %7383 = vmatmul.mubr.msk.bf16.vlgmr.msra.gmra.mxu0 %vm10601_vm11, %v487_v60  ;;  %7385 = vmatmul.mubr.msk.bf16.vlgmr.msra.gmra.mxu1 %vm10601_vm11, %v487_v60  ;;  %v7888_v60 = vunpack.i.h.bf16 %v7886_v47 }
  0x9e   :  { %630 = vmatpush1.bf16.msra.mxu0 %v604_v8  ;;  %671 = vmatpush1.bf16.msra.mxu1 %v610_v14  ;;  %v865_v8 = vpack.c.bf16 %v858_v4, %v858_v4  ;;  %v855_v14 = vsel %vm10812_vm12, %v8792_v49, 0.0  ;;  %v7898_v4 = vunpack.i.h.bf16 %v7896_v38  ;;  %vm10818_vm12 = vcmp.le.s32.totalorder %v8486_v16, 14 }
  0x9f   :  { %647 = vmatprep.mubr.bf16.mxu0 %v10618_v6  ;;  %688 = vmatprep.mubr.bf16.mxu1 %v10618_v6  ;;  %v862_v25 = vpack.c.bf16 %v855_v14, %v855_v14  ;;  %v876_v14 = vsel %vm10677_vm1, %v864_v26, 0  ;;  %vm8856_vm10 = vmand %vm8724_vm15, %vm10818_vm12  ;;  %vm10831_vm12 = vcmp.le.s32.totalorder %v8495_v20, 14 }
  0xa0   :  { %7392 = vmatprep.subr.msk.bf16.mxu0 %vm10677_vm1, %v730_v18  ;;  %7394 = vmatprep.subr.msk.bf16.mxu1 %vm10677_vm1, %v732_v21  ;;  %v8820_v18 = vsel %vm10600_vm14, %v7888_v60, %v7892_v54  ;;  %v8824_v21 = vsel %vm10600_vm14, %v7893_v53, %v7887_v0  ;;  %v8862_v53 = vsel %vm10676_vm9, %v7898_v4, %v7902_v23 }
  0xa1   :  { %10814 = vst [vmem:[#allocation29_spill] sm:$0xff] %v8820_v18  ;;  %10815 = vst [vmem:[#allocation30_spill] sm:$0xff] %v8824_v21  ;;  %v989_v40 = vsel %vm8724_vm15, %v8820_v18, 0.0  ;;  %v991_v47 = vsel %vm8747_vm13, %v8824_v21, 0.0 }
  0xa2   :  { %v998_v10 = vpack.c.bf16 %v991_v47, %v991_v47  ;;  %10822 = vst [vmem:[#allocation34_spill] sm:$0xff] %v8862_v53 }
  0xa5   :  { %7388 = vmatmul.mubr.msk.bf16.vlgmr.msra.gmra.mxu0 %vm10601_vm11, %v595_v48  ;;  %7390 = vmatmul.mubr.msk.bf16.vlgmr.msra.gmra.mxu1 %vm10601_vm11, %v595_v48  ;;  %v7903_v48 = vunpack.i.h.bf16 %v7901_v13  ;;  %v997_v13 = vpack.c.bf16 %v8845_v12, %v8845_v12 }
  0xa6   :  { %763 = vmatpush1.bf16.msra.mxu0 %v737_v2  ;;  %804 = vmatpush1.bf16.msra.mxu1 %v743_v3  ;;  %v7897_v2 = vunpack.i.l.bf16 %v7896_v38  ;;  %v870_v3 = vsel %vm10677_vm1, %v862_v25, 0  ;;  %v7396_v25 = vld [vmem:[%s10583_s1 + $0x30] sm:$0xff] }
  0xa7   :  { %780 = vmatprep.mubr.bf16.mxu0 %v10618_v6  ;;  %821 = vmatprep.mubr.bf16.mxu1 %v10618_v6  ;;  %v861_v38 = vpack.c.bf16 %v7396_v25, %v7396_v25 }
  0xa8   :  { %7397 = vmatprep.subr.msk.bf16.mxu0 %vm10677_vm1, %v863_v5  ;;  %7399 = vmatprep.subr.msk.bf16.mxu1 %vm10677_vm1, %v865_v8  ;;  %v8841_v5 = vsel %vm10600_vm14, %v7887_v0, %v7888_v60  ;;  %v996_v8 = vpack.c.bf16 %v989_v40, %v989_v40  ;;  %v10819_v60 = vmov 0  ;;  %v8866_v54 = vsel %vm10676_vm9, %v7903_v48, %v7897_v2 }
  0xa9   :  { %10816 = vst [vmem:[#allocation31_spill] sm:$0xff] %v8841_v5  ;;  %v10820_v60 = vsel %vm8856_vm10, 4294967295, %v10819_v60  ;;  %10823 = vst [vmem:[#allocation35_spill] sm:$0xff] %v8866_v54  ;;  %vm10824_vm14 = vcmp.le.s32.totalorder %v8503_v24, 14  ;;  %v10825_v0 = vmov 0  ;;  %v995_v26 = vpack.c.bf16 %v8841_v5, %v8841_v5 }
  0xaa   :  { %10821 = vst [vmem:[#allocation33_spill] sm:$0xff] %v10820_v60  ;;  %v1122_v40 = vsel %vm8856_vm10, %v8862_v53, 0.0  ;;  %vm10832_vm10 = vcmask 64512  }
  0xad   :  { %7393 = vmatmul.mubr.msk.bf16.vlgmr.msra.gmra.mxu0 %vm10601_vm11, %v728_v39  ;;  %7395 = vmatmul.mubr.msk.bf16.vlgmr.msra.gmra.mxu1 %vm10601_vm11, %v728_v39  ;;  %vm8872_vm11 = vmand %vm8747_vm13, %vm10824_vm14  ;;  %v8886_v39 = vsel %vm10676_vm9, %v7897_v2, %v7898_v4  ;;  %vm10830_vm14 = vcmp.le.s32.totalorder %v8492_v19, 14 }
  0xae   :  { %896 = vmatpush1.bf16.msra.mxu0 %v870_v3  ;;  %937 = vmatpush1.bf16.msra.mxu1 %v876_v14  ;;  %v10826_v0 = vsel %vm8872_vm11, 4294967295, %v10825_v0  ;;  %10828 = vst [vmem:[#allocation37_spill] sm:$0xff] %v8886_v39  ;;  %v1124_v47 = vsel %vm8872_vm11, %v8866_v54, 0.0  ;;  %v8896_v3 = vsel %vm10676_vm9, %v7902_v23, %v7903_v48  ;;  %v1003_v14 = vsel %vm10677_vm1, %v995_v26, 0  ;;  %vm10833_vm11 = vmmov %vm10832_vm10  ;;  %v7401_v48 = vld [vmem:[%s10583_s1 + $0x38] sm:$0xff] }
  0xaf   :  { %10827 = vst [vmem:[#allocation36_spill] sm:$0xff] %v10826_v0  ;;  %913 = vmatprep.mubr.bf16.mxu0 %v10618_v6  ;;  %954 = vmatprep.mubr.bf16.mxu1 %v10618_v6  ;;  %10829 = vst [vmem:[#allocation38_spill] sm:$0xff] %v8896_v3  ;;  %v1131_v25 = vpack.c.bf16 %v1124_v47, %v1124_v47  ;;  %v1121_v4 = vsel %vm10830_vm14, %v8886_v39, 0.0  ;;  %v1123_v2 = vsel %vm10831_vm12, %v8896_v3, 0.0  ;;  %v7406_v47 = vld [vmem:[%s10583_s1 + $0x40] sm:$0xff] }
  0xb0   :  { %7402 = vmatprep.subr.msk.bf16.mxu0 %vm10677_vm1, %v996_v8  ;;  %7404 = vmatprep.subr.msk.bf16.mxu1 %vm10677_vm1, %v998_v10  ;;  %v1009_v8 = vsel %vm10677_vm1, %v997_v13, 0  ;;  %v1129_v10 = vpack.c.bf16 %v1122_v40, %v1122_v40  ;;  %v1128_v23 = vpack.c.bf16 %v1121_v4, %v1121_v4  ;;  %v1130_v26 = vpack.c.bf16 %v1123_v2, %v1123_v2  ;;  %vm10835_vm14 = vmmov %vm10832_vm10 }
  0xb1   :  { %v994_v13 = vpack.c.bf16 %v7401_v48, %v7401_v48  ;;  %vm10836_vm12 = vmmov %vm10832_vm10 }
  0xb2   :  { %v1136_v40 = vsel %vm10677_vm1, %v1128_v23, 0 }
  0xb5   :  { %7398 = vmatmul.mubr.msk.bf16.vlgmr.msra.gmra.mxu0 %vm10832_vm10, %v861_v38  ;;  %7400 = vmatmul.mubr.msk.bf16.vlgmr.msra.gmra.mxu1 %vm10833_vm11, %v861_v38  ;;  %v1142_v38 = vsel %vm10677_vm1, %v1130_v26, 0  ;;  %vm10834_vm11 = vmmov %vm10832_vm10 }
  0xb6   :  { %1029 = vmatpush1.bf16.msra.mxu0 %v1003_v14  ;;  %1070 = vmatpush1.bf16.msra.mxu1 %v1009_v8  ;;  %v1127_v14 = vpack.c.bf16 %v7406_v47, %v7406_v47 }
  0xb7   :  { %1046 = vmatprep.mubr.bf16.mxu0 %v10618_v6  ;;  %1087 = vmatprep.mubr.bf16.mxu1 %v10618_v6 }
  0xb8   :  { %7407 = vmatprep.subr.msk.bf16.mxu0 %vm10677_vm1, %v1129_v10  ;;  %7409 = vmatprep.subr.msk.bf16.mxu1 %vm10677_vm1, %v1131_v25 }
  0xbd   :  { %7403 = vmatmul.mubr.msk.bf16.vlgmr.msra.gmra.mxu0 %vm10832_vm10, %v994_v13  ;;  %7405 = vmatmul.mubr.msk.bf16.vlgmr.msra.gmra.mxu1 %vm10834_vm11, %v994_v13  ;;  %vm10837_vm10 = vcmp.lt.s32.totalorder %v8473_v9, 16  ;;  %vm10838_vm11 = vcmp.lt.s32.totalorder %v8473_v9, 17 }
  0xbe   :  { %1162 = vmatpush1.bf16.msra.mxu0 %v1136_v40  ;;  %1203 = vmatpush1.bf16.msra.mxu1 %v1142_v38 }
  0xbf   :  { %1179 = vmatprep.mubr.bf16.mxu0 %v10618_v6  ;;  %1220 = vmatprep.mubr.bf16.mxu1 %v10618_v6 }
  0xc5   :  { %7408 = vmatmul.mubr.msk.bf16.vlgmr.msra.gmra.mxu0 %vm10835_vm14, %v1127_v14  ;;  %7410 = vmatmul.mubr.msk.bf16.vlgmr.msra.gmra.mxu1 %vm10836_vm12, %v1127_v14  ;;  %vm10839_vm14 = vmmov %vm10837_vm10 }
  0xc6   :  { %1336 = vmatprep.mubr.bf16.mxu0 %v10618_v6  ;;  %1377 = vmatprep.mubr.bf16.mxu1 %v10618_v6  ;;  %vm10840_vm12 = vmmov %vm10837_vm10 }
 0x145   :  { %v182_v8 = vpop.f32.mrf.mxu0  ;;  %v223_v10 = vpop.f32.mrf.mxu1 }
 0x147   :  { %v184_v25 = vpop.f32.mrf.mxu0  ;;  %v225_v4 = vpop.f32.mrf.mxu1 }
 0x149   :  { %v186_v2 = vpop.f32.mrf.mxu0  ;;  %v227_v48 = vpop.f32.mrf.mxu1 }
 0x14b   :  { %v187_v23 = vpop.f32.mrf.mxu0  ;;  %v228_v26 = vpop.f32.mrf.mxu1 }
 0x14d   :  { %v279_v13 = vpop.f32.mrf.mxu0  ;;  %v320_v40 = vpop.f32.mrf.mxu1 }
 0x14e   :  { %v280_v36 = vadd.f32 %v279_v13, %v182_v8  ;;  %v321_v42 = vadd.f32 %v320_v40, %v223_v10 }
 0x14f   :  { %v281_v38 = vpop.f32.mrf.mxu0  ;;  %v322_v47 = vpop.f32.mrf.mxu1 }
 0x150   :  { %v282_v59 = vadd.f32 %v281_v38, %v184_v25 }
 0x151   :  { %v283_v3 = vpop.f32.mrf.mxu0  ;;  %v324_v39 = vpop.f32.mrf.mxu1 }
 0x153   :  { %v284_v54 = vpop.f32.mrf.mxu0  ;;  %v325_v14 = vpop.f32.mrf.mxu1 }
 0x155   :  { %v408_v12 = vpop.f32.mrf.mxu0  ;;  %v449_v53 = vpop.f32.mrf.mxu1 }
 0x157   :  { %v410_v5 = vpop.f32.mrf.mxu0  ;;  %v451_v6 = vpop.f32.mrf.mxu1 }
 0x158   :  { %v457_v30 = vadd.f32 %v410_v5, %v282_v59 }
 0x159   :  { %v412_v21 = vpop.f32.mrf.mxu0  ;;  %v453_v52 = vpop.f32.mrf.mxu1 }
 0x15b   :  { %v413_v18 = vpop.f32.mrf.mxu0  ;;  %v454_v49 = vpop.f32.mrf.mxu1 }
 0x15d   :  { %v541_v2 = vpop.f32.mrf.mxu0  ;;  %v582_v48 = vpop.f32.mrf.mxu1 }
 0x15f   :  { %v543_v23 = vpop.f32.mrf.mxu0  ;;  %v584_v26 = vpop.f32.mrf.mxu1 }
 0x161   :  { %v545_v28 = vpop.f32.mrf.mxu0  ;;  %v586_v63 = vpop.f32.mrf.mxu1 }
 0x163   :  { %v546_v27 = vpop.f32.mrf.mxu0  ;;  %v587_v62 = vpop.f32.mrf.mxu1 }
 0x165   :  { %v649_v3 = vpop.f32.mrf.mxu0  ;;  %v690_v39 = vpop.f32.mrf.mxu1 }
 0x167   :  { %v651_v54 = vpop.f32.mrf.mxu0  ;;  %v692_v14 = vpop.f32.mrf.mxu1 }
 0x169   :  { %v653_v1 = vpop.f32.mrf.mxu0  ;;  %v694_v50 = vpop.f32.mrf.mxu1 }
 0x16a   :  { %v323_v1 = vadd.f32 %v322_v47, %v225_v4  ;;  %v456_v50 = vadd.f32 %v408_v12, %v280_v36 }
 0x16b   :  { %v654_v56 = vpop.f32.mrf.mxu0  ;;  %v695_v58 = vpop.f32.mrf.mxu1 }
 0x16c   :  { %v459_v43 = vadd.f32 %v451_v6, %v323_v1  ;;  %v589_v44 = vadd.f32 %v541_v2, %v456_v50 }
 0x16d   :  { %v782_v21 = vpop.f32.mrf.mxu0  ;;  %v823_v52 = vpop.f32.mrf.mxu1 }
 0x16e   :  { %v592_v45 = vadd.f32 %v584_v26, %v459_v43  ;;  %v697_v31 = vadd.f32 %v649_v3, %v589_v44 }
 0x16f   :  { %v784_v18 = vpop.f32.mrf.mxu0  ;;  %v825_v49 = vpop.f32.mrf.mxu1 }
 0x170   :  { %v830_v25 = vadd.f32 %v782_v21, %v697_v31 }
 0x171   :  { %v786_v35 = vpop.f32.mrf.mxu0  ;;  %v827_v55 = vpop.f32.mrf.mxu1 }
 0x173   :  { %v787_v41 = vpop.f32.mrf.mxu0  ;;  %v828_v37 = vpop.f32.mrf.mxu1 }
 0x174   :  { %v458_v41 = vadd.f32 %v449_v53, %v321_v42  ;;  %v590_v37 = vadd.f32 %v543_v23, %v457_v30 }
 0x175   :  { %v915_v28 = vpop.f32.mrf.mxu0  ;;  %v956_v63 = vpop.f32.mrf.mxu1 }
 0x176   :  { %v591_v8 = vadd.f32 %v582_v48, %v458_v41  ;;  %v963_v59 = vadd.f32 %v915_v28, %v830_v25 }
 0x177   :  { %v917_v27 = vpop.f32.mrf.mxu0  ;;  %v958_v62 = vpop.f32.mrf.mxu1 }
 0x178   :  { %v699_v12 = vadd.f32 %v690_v39, %v591_v8 }
 0x179   :  { %v919_v11 = vpop.f32.mrf.mxu0  ;;  %v960_v57 = vpop.f32.mrf.mxu1 }
 0x17a   :  { %v698_v11 = vadd.f32 %v651_v54, %v590_v37  ;;  %v700_v57 = vadd.f32 %v692_v14, %v592_v45  ;;  %v832_v40 = vadd.f32 %v823_v52, %v699_v12  ;;  %v1237_v45 = vpop.permute.xlu0 %1236 }
 0x17b   :  { %v920_v56 = vpop.f32.mrf.mxu0  ;;  %v961_v58 = vpop.f32.mrf.mxu1 }
 0x17c   :  { %v831_v13 = vadd.f32 %v784_v18, %v698_v11  ;;  %v833_v10 = vadd.f32 %v825_v49, %v700_v57  ;;  %v965_v53 = vadd.f32 %v956_v63, %v832_v40 }
 0x17d   :  { %v1048_v35 = vpop.f32.mrf.mxu0  ;;  %v1089_v55 = vpop.f32.mrf.mxu1 }
 0x17e   :  { %v964_v38 = vadd.f32 %v917_v27, %v831_v13  ;;  %v966_v42 = vadd.f32 %v958_v62, %v833_v10  ;;  %v1096_v30 = vadd.f32 %v1048_v35, %v963_v59  ;;  %v1098_v26 = vadd.f32 %v1089_v55, %v965_v53 }
 0x17f   :  { %v1050_v60 = vpop.f32.mrf.mxu0  ;;  %v1091_v0 = vpop.f32.mrf.mxu1  ;;  %v8387_v62 = vmov 1  }
 0x180   :  { %v1097_v47 = vadd.f32 %v1050_v60, %v964_v38  ;;  %v1099_v2 = vadd.f32 %v1091_v0, %v966_v42  ;;  %7985 = vset.pattern.permute.xlu0 %v8387_v62  ;;  %v7412_v38 = vld [vmem:[%s10583_s1 + $0x50] sm:$0xff] }
 0x181   :  { %v1052_v4 = vpop.f32.mrf.mxu0  ;;  %v1093_v36 = vpop.f32.mrf.mxu1 }
 0x183   :  { %v1053_v6 = vpop.f32.mrf.mxu0  ;;  %v1094_v5 = vpop.f32.mrf.mxu1 }
 0x185   :  { %v1181_v43 = vpop.f32.mrf.mxu0  ;;  %v1222_v44 = vpop.f32.mrf.mxu1 }
 0x186   :  { %v1229_v48 = vadd.f32 %v1181_v43, %v1096_v30  ;;  %v1231_v21 = vadd.f32 %v1222_v44, %v1098_v26 }
 0x187   :  { %v1183_v31 = vpop.f32.mrf.mxu0  ;;  %v1224_v23 = vpop.f32.mrf.mxu1 }
 0x188   :  { %v1230_v3 = vadd.f32 %v1183_v31, %v1097_v47  ;;  %v1232_v39 = vadd.f32 %v1224_v23, %v1099_v2  ;;  %v8928_v18 = vadd.f32 %v1237_v45, %v1229_v48  ;;  %v8936_v0 = vadd.f32 %v1237_v45, %v1231_v21 }
 0x189   :  { %v1185_v54 = vpop.f32.mrf.mxu0  ;;  %v1226_v14 = vpop.f32.mrf.mxu1  ;;  %v1284_v23 = vpack.c.bf16 %v7412_v38, %v7412_v38 }
 0x18a   :  { %v8930_v52 = vadd.f32 %v1237_v45, %v1230_v3  ;;  %v8932_v27 = vadd.f32 %v1237_v45, %v1232_v39 }
 0x18b   :  { %v1186_v49 = vpop.f32.mrf.mxu0  ;;  %v1227_v28 = vpop.f32.mrf.mxu1 }
 0x18c   :  { %v7915_v60 = vpack.i.bf16 %v8930_v52, %v8928_v18  ;;  %v7910_v63 = vpack.i.bf16 %v8932_v27, %v8936_v0 }
 0x18e   :  { %7916 = vrot.lane.b32.xlu0 %v7915_v60, %s8379_s24  ;;  %7906 = vrot.lane.b32.xlu1 %v7915_v60, %s8378_s23 }
 0x192   :  { %7926 = vrot.lane.b32.xlu0 %v7915_v60, %s8381_s25  ;;  %7911 = vrot.lane.b32.xlu1 %v7910_v63, %s8378_s23 }
 0x196   :  { %7936 = vrot.lane.b32.xlu0 %v7915_v60, %s8382_s26  ;;  %7921 = vrot.lane.b32.xlu1 %v7910_v63, %s8379_s24 }
 0x19a   :  { %7946 = vrot.lane.b32.xlu0 %v7915_v60, %s8383_s27  ;;  %7931 = vrot.lane.b32.xlu1 %v7910_v63, %s8381_s25 }
 0x19e   :  { %7956 = vrot.lane.b32.xlu0 %v7915_v60, %s8384_s28  ;;  %7941 = vrot.lane.b32.xlu1 %v7910_v63, %s8382_s26 }
 0x1a2   :  { %7966 = vrot.lane.b32.xlu0 %v7915_v60, %s8385_s29  ;;  %7951 = vrot.lane.b32.xlu1 %v7910_v63, %s8383_s27 }
 0x1a6   :  { %7976 = vrot.lane.b32.xlu0 %v7915_v60, %s8386_s30  ;;  %7961 = vrot.lane.b32.xlu1 %v7910_v63, %s8384_s28 }
 0x1aa   :  { %7971 = vrot.lane.b32.xlu1 %v7910_v63, %s8385_s29  ;;  %2336 = vperm.xlu0 %7985, %v8470_v7  }
 0x1ae   :  { %7981 = vrot.lane.b32.xlu1 %v7910_v63, %s8386_s30 }
 0x200   :  { %v7917_v1 = vpop.permute.xlu0 %7916  ;;  %v7907_v50 = vpop.permute.xlu1 %7906 }
 0x201   :  { %v7909_v56 = vunpack.i.h.bf16 %v7907_v50  ;;  %v7908_v58 = vunpack.i.l.bf16 %v7907_v50  ;;  %v7919_v35 = vunpack.i.h.bf16 %v7917_v1  ;;  %v7918_v55 = vunpack.i.l.bf16 %v7917_v1 }
 0x203   :  { %v1276_v41 = vsel %vm10837_vm10, %v7908_v58, %v7909_v56  ;;  %v1253_v4 = vsel %vm10838_vm11, %v7918_v55, %v7919_v35  ;;  %vm10841_vm11 = vcmp.ge.s32.totalorder %v8486_v16, 1 }
 0x204   :  { %v1286_v37 = vpack.c.bf16 %v1276_v41, %v1276_v41  ;;  %v7927_v8 = vpop.permute.xlu0 %7926  ;;  %v7912_v11 = vpop.permute.xlu1 %7911  ;;  %v1256_v42 = vsel %vm10841_vm11, %v1253_v4, 0.0  ;;  %vm10846_vm11 = vcmp.ge.s32.totalorder %v8503_v24, 1  ;;  %v10855_v4 = vmov 0  }
 0x205   :  { %v7914_v57 = vunpack.i.h.bf16 %v7912_v11  ;;  %v7913_v25 = vunpack.i.l.bf16 %v7912_v11  ;;  %v7929_v36 = vunpack.i.h.bf16 %v7927_v8  ;;  %v7928_v12 = vunpack.i.l.bf16 %v7927_v8 }
 0x206   :  { %7413 = vmatprep.subr.msk.bf16.mxu0 %vm10677_vm1, %v1286_v37  ;;  %v1263_v14 = vpack.c.bf16 %v1256_v42, %v1256_v42 }
 0x207   :  { %v1274_v7 = vsel %vm10839_vm14, %v7913_v25, %v7914_v57  ;;  %v1275_v13 = vsel %vm10840_vm12, %v7909_v56, %v7913_v25  ;;  %v1277_v10 = vsel %vm10837_vm10, %v7914_v57, %v7908_v58  ;;  %vm10842_vm14 = vcmp.lt.s32.totalorder %v8473_v9, 15 }
 0x208   :  { %v1288_v59 = vpack.c.bf16 %v1274_v7, %v1274_v7  ;;  %v7922_v6 = vpop.permute.xlu1 %7921  ;;  %v1278_v5 = vsel %vm8505_vm4, %v1277_v10, 0.0  ;;  %v1280_v40 = vsel %vm8520_vm8, %v1275_v13, 0.0  ;;  %v1493_v44 = vsel %vm10842_vm14, %v7928_v12, %v7929_v36  ;;  %v7937_v53 = vpop.permute.xlu0 %7936 }
 0x209   :  { %v7924_v30 = vunpack.i.h.bf16 %v7922_v6  ;;  %v7923_v43 = vunpack.i.l.bf16 %v7922_v6  ;;  %v1285_v47 = vpack.c.bf16 %v1278_v5, %v1278_v5  ;;  %v1287_v2 = vpack.c.bf16 %v1280_v40, %v1280_v40 }
 0x20a   :  { %7415 = vmatprep.subr.msk.bf16.mxu1 %vm10677_vm1, %v1288_v59  ;;  %vm10843_vm12 = vcmp.lt.s32.totalorder %v8473_v9, 17  ;;  %vm10847_vm14 = vcmp.le.s32.totalorder %v8486_v16, 14  ;;  %v7939_v49 = vunpack.i.h.bf16 %v7937_v53  ;;  %v7938_v63 = vunpack.i.l.bf16 %v7937_v53 }
 0x20b   :  { %v1254_v48 = vsel %vm10843_vm12, %v7924_v30, %v7918_v55  ;;  %vm10844_vm10 = vmmov %vm10843_vm12  ;;  %v1293_v39 = vsel %vm10677_vm1, %v1285_v47, 0  ;;  %v1299_v54 = vsel %vm10677_vm1, %v1287_v2, 0  ;;  %v1496_v21 = vsel %vm10847_vm14, %v1493_v44, 0.0 }
 0x20c   :  { %v1251_v45 = vsel %vm10844_vm10, %v7923_v43, %v7924_v30  ;;  %vm10845_vm9 = vmmov %vm10844_vm10  ;;  %v7932_v3 = vpop.permute.xlu1 %7931  ;;  %1319 = vmatpush1.bf16.msra.mxu0 %v1293_v39  ;;  %1360 = vmatpush1.bf16.msra.mxu1 %v1299_v54  ;;  %v1255_v1 = vsel %vm8556_vm3, %v1254_v48, 0.0  ;;  %vm10850_vm10 = vcmp.le.s32.totalorder %v8503_v24, 14  ;;  %v1503_v8 = vpack.c.bf16 %v1496_v21, %v1496_v21  ;;  %v7947_v21 = vpop.permute.xlu0 %7946 }
 0x20d   :  { %v1252_v31 = vsel %vm10845_vm9, %v7919_v35, %v7923_v43  ;;  %v1258_v26 = vsel %vm10846_vm11, %v1251_v45, 0.0  ;;  %v7934_v28 = vunpack.i.h.bf16 %v7932_v3  ;;  %v7933_v60 = vunpack.i.l.bf16 %v7932_v3  ;;  %7417 = vmatprep.subr.msk.bf16.mxu0 %vm10677_vm1, %v1263_v14 }
 0x20e   :  { %v1265_v62 = vpack.c.bf16 %v1258_v26, %v1258_v26  ;;  %v1257_v50 = vsel %vm8575_vm2, %v1252_v31, 0.0  ;;  %vm10848_vm9 = vcmp.lt.s32.totalorder %v8473_v9, 15  ;;  %vm10851_vm11 = vcmask 64512   ;;  %v7421_v31 = vld [vmem:[%s10583_s1 + $0x58] sm:$0xff] }
 0x20f   :  { %v1494_v56 = vsel %vm10848_vm9, %v7934_v28, %v7928_v12  ;;  %vm10849_vm12 = vmmov %vm10848_vm9  ;;  %7414 = vmatmul.mubr.msk.bf16.vlgmr.msra.gmra.mxu0 %vm10851_vm11, %v1284_v23  ;;  %v1262_v41 = vpack.c.bf16 %v1255_v1, %v1255_v1  ;;  %v1264_v37 = vpack.c.bf16 %v1257_v50, %v1257_v50  ;;  %vm10854_vm2 = vcmask 1043456   ;;  %v7411_v12 = vld [vmem:[%s10583_s1 + $0x48] sm:$0xff] }
 0x210   :  { %v1491_v58 = vsel %vm10849_vm12, %v7933_v60, %v7934_v28  ;;  %vm10852_vm14 = vmmov %vm10851_vm11  ;;  %v7942_v55 = vpop.permute.xlu1 %7941  ;;  %7419 = vmatprep.subr.msk.bf16.mxu1 %vm10854_vm2, %v1265_v62  ;;  %1433 = vmatprep.mubr.bf16.mxu0 %v10855_v4  ;;  %v1495_v7 = vsel %vm8604_vm0, %v1494_v56, 0.0  ;;  %v1261_v40 = vpack.c.bf16 %v7411_v12, %v7411_v12  ;;  %v1501_v39 = vpack.c.bf16 %v7421_v31, %v7421_v31 }
 0x211   :  { %v1498_v35 = vsel %vm10850_vm10, %v1491_v58, 0.0  ;;  %7416 = vmatmul.mubr.msk.bf16.vlgmr.msra.gmra.mxu1 %vm10852_vm14, %v1284_v23  ;;  %vm10853_vm1 = vmmov %vm10848_vm9  ;;  %v7944_v57 = vunpack.i.h.bf16 %v7942_v55  ;;  %v7943_v25 = vunpack.i.l.bf16 %v7942_v55  ;;  %vm10856_vm9 = vcmp.lt.s32.totalorder %v8473_v9, 1  ;;  %v7426_v58 = vld [vmem:[%s10583_s1 + $0x60] sm:$0xff] }
 0x212   :  { %v1492_v11 = vsel %vm10853_vm1, %v7929_v36, %v7933_v60  ;;  %v1617_v13 = vsel %vm10856_vm9, %v7938_v63, %v7939_v49  ;;  %vm10857_vm12 = vmmov %vm10854_vm2  ;;  %v1505_v59 = vpack.c.bf16 %v1498_v35, %v1498_v35  ;;  %1474 = vmatprep.mubr.bf16.mxu1 %v10855_v4  ;;  %v1502_v38 = vpack.c.bf16 %v1495_v7, %v1495_v7 }
 0x213   :  { %v1390_v10 = vsel %vm10857_vm12, %v1262_v41, 0  ;;  %vm10858_vm10 = vmmov %vm10854_vm2  ;;  %vm10860_vm2 = vcmp.ge.s32.totalorder %v8503_v24, 1  ;;  %v1497_v42 = vsel %vm8618_vm6, %v1492_v11, 0.0  ;;  %vm10862_vm14 = vcmp.ge.s32.totalorder %v8486_v16, 1 }
 0x214   :  { %v1396_v36 = vsel %vm10858_vm10, %v1264_v37, 0  ;;  %vm10859_vm1 = vmmov %vm10856_vm9  ;;  %1416 = vmatpush1.bf16.msra.mxu0 %v1390_v10  ;;  %v1620_v30 = vsel %vm10862_vm14, %v1617_v13, 0.0  ;;  %v1504_v53 = vpack.c.bf16 %v1497_v42, %v1497_v42  ;;  %vm10870_vm14 = vcmp.ge.s32.totalorder %v8492_v19, 1  ;;  %v7952_v3 = vpop.permute.xlu1 %7951 }
 0x215   :  { %v1615_v6 = vsel %vm10859_vm1, %v7943_v25, %v7944_v57  ;;  %1457 = vmatpush1.bf16.msra.mxu1 %v1396_v36  ;;  %vm10861_vm11 = vmmov %vm10858_vm10  ;;  %v1627_v45 = vpack.c.bf16 %v1620_v30, %v1620_v30  ;;  %v7953_v28 = vunpack.i.l.bf16 %v7952_v3  ;;  %v1735_v60 = vpack.c.bf16 %v8930_v52, %v8930_v52 }
 0x216   :  { %v1622_v5 = vsel %vm10860_vm2, %v1615_v6, 0.0  ;;  %7422 = vmatprep.subr.msk.bf16.mxu0 %vm10861_vm11, %v1503_v8  ;;  %vm10863_vm9 = vmmov %vm10858_vm10  ;;  %v7949_v62 = vunpack.i.h.bf16 %v7947_v21  ;;  %v7948_v1 = vunpack.i.l.bf16 %v7947_v21  ;;  %v1734_v55 = vpack.c.bf16 %v8928_v18, %v8928_v18  ;;  %v7957_v8 = vpop.permute.xlu0 %7956 }
 0x217   :  { %7424 = vmatprep.subr.msk.bf16.mxu1 %vm10863_vm9, %v1505_v59  ;;  %vm10864_vm12 = vmmov %vm10859_vm1  ;;  %v1629_v47 = vpack.c.bf16 %v1622_v5, %v1622_v5  ;;  %v1736_v41 = vpack.c.bf16 %v8936_v0, %v8936_v0  ;;  %v1625_v37 = vpack.c.bf16 %v7426_v58, %v7426_v58  ;;  %v7959_v10 = vunpack.i.h.bf16 %v7957_v8  ;;  %v7431_v5 = vld [vmem:[%s10583_s1 + $0x68] sm:$0xff] }
 0x218   :  { %v1618_v43 = vsel %vm10864_vm12, %v7944_v57, %v7938_v63  ;;  %vm10865_vm10 = vmmov %vm10859_vm1  ;;  %vm10866_vm1 = vcmask 64512   ;;  %v1737_v63 = vpack.c.bf16 %v8932_v27, %v8932_v27  ;;  %v7962_v35 = vpop.permute.xlu1 %7961  ;;  %v7958_v36 = vunpack.i.l.bf16 %v7957_v8 }
 0x219   :  { %v1616_v44 = vsel %vm10865_vm10, %v7939_v49, %v7943_v25  ;;  %7418 = vmatmul.mubr.msk.bf16.vlgmr.msra.gmra.mxu0 %vm10866_vm1, %v1261_v40  ;;  %vm10867_vm2 = vmmov %vm10866_vm1  ;;  %v1619_v23 = vsel %vm10870_vm14, %v1618_v43, 0.0  ;;  %v7954_v49 = vunpack.i.h.bf16 %v7952_v3  ;;  %vm10877_vm14 = vcmp.lt.s32.totalorder %v8473_v9, 127 }
 0x21a   :  { %7420 = vmatmul.mubr.msk.bf16.vlgmr.msra.gmra.mxu1 %vm10867_vm2, %v1261_v40  ;;  %vm10868_vm11 = vmmov %vm10863_vm9  ;;  %1553 = vmatprep.mubr.bf16.mxu0 %v10855_v4  ;;  %v1626_v54 = vpack.c.bf16 %v1619_v23, %v1619_v23  ;;  %v7964_v7 = vunpack.i.h.bf16 %v7962_v35  ;;  %v7963_v13 = vunpack.i.l.bf16 %v7962_v35 }
 0x21b   :  { %v1510_v2 = vsel %vm10868_vm11, %v1502_v38, 0  ;;  %vm10869_vm6 = vmmov %vm10863_vm9  ;;  %vm10871_vm9 = vcmp.ge.s32.totalorder %v8495_v20, 1  ;;  %1594 = vmatprep.mubr.bf16.mxu1 %v10855_v4  ;;  %v1850_v52 = vsel %vm10877_vm14, %v7954_v49, %v7948_v1 }
 0x21c   :  { %v1516_v48 = vsel %vm10869_vm6, %v1504_v53, 0  ;;  %1536 = vmatpush1.bf16.msra.mxu0 %v1510_v2  ;;  %v1621_v26 = vsel %vm10871_vm9, %v1616_v44, 0.0  ;;  %vm10872_vm12 = vmmov %vm10869_vm6  ;;  %v7972_v43 = vpop.permute.xlu1 %7971  ;;  %v7967_v44 = vpop.permute.xlu0 %7966  ;;  %v1733_v53 = vpack.c.bf16 %v7431_v5, %v7431_v5 }
 0x21d   :  { %1577 = vmatpush1.bf16.msra.mxu1 %v1516_v48  ;;  %7427 = vmatprep.subr.msk.bf16.mxu0 %vm10872_vm12, %v1627_v45  ;;  %vm10873_vm10 = vmmov %vm10869_vm6  ;;  %v1628_v14 = vpack.c.bf16 %v1621_v26, %v1621_v26  ;;  %v7974_v26 = vunpack.i.h.bf16 %v7972_v43  ;;  %v7973_v3 = vunpack.i.l.bf16 %v7972_v43 }
 0x21e   :  { %7429 = vmatprep.subr.msk.bf16.mxu1 %vm10873_vm10, %v1629_v47  ;;  %vm10874_vm6 = vmmov %vm10866_vm1 }
 0x21f   :  { %vm10875_vm2 = vmmov %vm10873_vm10 }
 0x220   :  { %v1634_v50 = vsel %vm10875_vm2, %v1626_v54, 0  ;;  %vm10876_vm11 = vmmov %vm10875_vm2  ;;  %v7968_v54 = vunpack.i.l.bf16 %v7967_v44  ;;  %v7977_v58 = vpop.permute.xlu0 %7976 }
 0x221   :  { %7423 = vmatmul.mubr.msk.bf16.vlgmr.msra.gmra.mxu0 %vm10874_vm6, %v1501_v39  ;;  %v1640_v56 = vsel %vm10876_vm11, %v1628_v14, 0  ;;  %vm10878_vm9 = vmmov %vm10877_vm14  ;;  %vm10881_vm6 = vcmp.le.s32.totalorder %v8503_v24, 14 }
 0x222   :  { %7425 = vmatmul.mubr.msk.bf16.vlgmr.msra.gmra.mxu1 %vm10866_vm1, %v1501_v39  ;;  %1660 = vmatpush1.bf16.msra.mxu0 %v1634_v50  ;;  %v1848_v27 = vsel %vm10878_vm9, %v7949_v62, %v7953_v28  ;;  %vm10879_vm12 = vmmov %vm10875_vm2  ;;  %v1854_v11 = vsel %vm10881_vm6, %v1850_v52, 0.0  ;;  %vm10882_vm1 = vcmp.le.s32.totalorder %v8486_v16, 14  ;;  %vm10889_vm6 = vcmp.le.s32.totalorder %v8492_v19, 14 }
 0x223   :  { %1701 = vmatpush1.bf16.msra.mxu1 %v1640_v56  ;;  %7432 = vmatprep.subr.msk.bf16.mxu0 %vm10879_vm12, %v1735_v60  ;;  %vm10880_vm10 = vmmov %vm10875_vm2  ;;  %v1852_v57 = vsel %vm10882_vm1, %v1848_v27, 0.0  ;;  %vm10887_vm12 = vcmask 64512   ;;  %v1861_v6 = vpack.c.bf16 %v1854_v11, %v1854_v11  ;;  %vm10890_vm1 = vcmp.le.s32.totalorder %v8495_v20, 14  ;;  %v7436_v60 = vld [vmem:[%s10583_s1 + $0x70] sm:$0xff]  ;;  %v7982_v56 = vpop.permute.xlu1 %7981 }
 0x224   :  { %7434 = vmatprep.subr.msk.bf16.mxu1 %vm10880_vm10, %v1737_v63  ;;  %1677 = vmatprep.mubr.bf16.mxu0 %v10855_v4  ;;  %vm10883_vm2 = vmmov %vm10878_vm9  ;;  %v1859_v59 = vpack.c.bf16 %v1852_v57, %v1852_v57  ;;  %v7969_v39 = vunpack.i.h.bf16 %v7967_v44  ;;  %v1857_v52 = vpack.c.bf16 %v7436_v60, %v7436_v60  ;;  %v7983_v8 = vunpack.i.l.bf16 %v7982_v56  ;;  %v2353_v60 = vld [vmem:[%s10582_s3] sm:$0x7] }
 0x225   :  { %1718 = vmatprep.mubr.bf16.mxu1 %v10855_v4  ;;  %v1849_v25 = vsel %vm10883_vm2, %v7948_v1, %v7949_v62  ;;  %vm10884_vm11 = vmmov %vm10883_vm2  ;;  %vm10891_vm2 = vcmp.lt.s32.totalorder %v8473_v9, 113  ;;  %v7979_v11 = vunpack.i.h.bf16 %v7977_v58  ;;  %v7978_v57 = vunpack.i.l.bf16 %v7977_v58 }
 0x226   :  { %v1847_v12 = vsel %vm10884_vm11, %v7953_v28, %v7954_v49  ;;  %vm10885_vm14 = vmmov %vm10880_vm10  ;;  %v1851_v40 = vsel %vm10889_vm6, %v1849_v25, 0.0  ;;  %v1974_v42 = vsel %vm10891_vm2, %v7964_v7, %v7958_v36  ;;  %vm10896_vm6 = vcmask 64512  }
 0x227   :  { %v1742_v18 = vsel %vm10885_vm14, %v1734_v55, 0  ;;  %vm10886_vm9 = vmmov %vm10880_vm10  ;;  %v1853_v38 = vsel %vm10890_vm1, %v1847_v12, 0.0  ;;  %v1858_v47 = vpack.c.bf16 %v1851_v40, %v1851_v40  ;;  %v1978_v48 = vsel %vm8782_vm7, %v1974_v42, 0.0 }
 0x228   :  { %v1748_v0 = vsel %vm10886_vm9, %v1736_v41, 0  ;;  %vm10888_vm10 = vmmov %vm10887_vm12  ;;  %v1860_v2 = vpack.c.bf16 %v1853_v38, %v1853_v38  ;;  %v1985_v28 = vpack.c.bf16 %v1978_v48, %v1978_v48  ;;  %v10915_v38 = vld [vmem:[#allocation36_spill] sm:$0xff] }
 0x229   :  { %7428 = vmatmul.mubr.msk.bf16.vlgmr.msra.gmra.mxu0 %vm10887_vm12, %v1625_v37  ;;  %vm10892_vm11 = vmmov %vm10891_vm2 }
 0x22a   :  { %7430 = vmatmul.mubr.msk.bf16.vlgmr.msra.gmra.mxu1 %vm10888_vm10, %v1625_v37  ;;  %1768 = vmatpush1.bf16.msra.mxu0 %v1742_v18  ;;  %v1972_v30 = vsel %vm10892_vm11, %v7959_v10, %v7963_v13  ;;  %vm10893_vm14 = vmmov %vm10886_vm9  ;;  %v7984_v37 = vunpack.i.h.bf16 %v7982_v56  ;;  %v7441_v18 = vld [vmem:[%s10583_s1 + $0x78] sm:$0xff] }
 0x22b   :  { %1809 = vmatpush1.bf16.msra.mxu1 %v1748_v0  ;;  %7437 = vmatprep.subr.msk.bf16.mxu0 %vm10893_vm14, %v1859_v59  ;;  %v1976_v45 = vsel %vm8766_vm5, %v1972_v30, 0.0  ;;  %vm10894_vm12 = vmmov %vm10891_vm2  ;;  %vm10900_vm14 = vcmp.ge.s32.totalorder %v8492_v19, 1  ;;  %v10917_v30 = vld [vmem:[#allocation33_spill] sm:$0xff] }
 0x22c   :  { %7439 = vmatprep.subr.msk.bf16.mxu1 %vm10886_vm9, %v1861_v6  ;;  %1785 = vmatprep.mubr.bf16.mxu0 %v10855_v4  ;;  %v1973_v31 = vsel %vm10894_vm12, %v7958_v36, %v7959_v10  ;;  %vm10895_vm10 = vmmov %vm10891_vm2  ;;  %v1983_v49 = vpack.c.bf16 %v1976_v45, %v1976_v45  ;;  %vm10902_vm12 = vcmp.lt.s32.totalorder %v8473_v9, 112  ;;  %v1981_v6 = vpack.c.bf16 %v7441_v18, %v7441_v18 }
 0x22d   :  { %1826 = vmatprep.mubr.bf16.mxu1 %v10855_v4  ;;  %v1971_v23 = vsel %vm10895_vm10, %v7963_v13, %v7964_v7  ;;  %vm10897_vm1 = vmmov %vm10896_vm6  ;;  %v1975_v63 = vsel %vm10900_vm14, %v1973_v31, 0.0  ;;  %v2098_v1 = vsel %vm10902_vm12, %v7974_v26, %v7968_v54  ;;  %v7446_v31 = vld [vmem:[%s10583_s1 + $0x80] sm:$0xff] }
 0x22e   :  { %vm10898_vm2 = vmmov %vm10886_vm9  ;;  %vm10901_vm9 = vcmp.ge.s32.totalorder %v8495_v20, 1  ;;  %v1982_v27 = vpack.c.bf16 %v1975_v63, %v1975_v63  ;;  %v2102_v55 = vsel %vm8747_vm13, %v2098_v1, 0.0  ;;  %v8388_v63 = vmov 2  }
 0x22f   :  { %v1866_v14 = vsel %vm10898_vm2, %v1858_v47, 0  ;;  %vm10899_vm11 = vmmov %vm10898_vm2  ;;  %v1977_v62 = vsel %vm10901_vm9, %v1971_v23, 0.0  ;;  %v2109_v13 = vpack.c.bf16 %v2102_v55, %v2102_v55  ;;  %7986 = vset.pattern.permute.xlu1 %v8388_v63 }
 0x230   :  { %v1872_v21 = vsel %vm10899_vm11, %v1860_v2, 0  ;;  %vm10903_vm10 = vmmov %vm10902_vm12  ;;  %v1984_v35 = vpack.c.bf16 %v1977_v62, %v1977_v62  ;;  %2356 = vperm.xlu1 %7986, %v2353_v60  }
 0x231   :  { %7433 = vmatmul.mubr.msk.bf16.vlgmr.msra.gmra.mxu0 %vm10896_vm6, %v1733_v53  ;;  %v2096_v50 = vsel %vm10903_vm10, %v7969_v39, %v7973_v3  ;;  %vm10904_vm6 = vmmov %vm10898_vm2  ;;  %v2095_v10 = vsel %vm10903_vm10, %v7973_v3, %v7974_v26  ;;  %v2105_v3 = vpack.c.bf16 %v7446_v31, %v7446_v31 }
 0x232   :  { %7435 = vmatmul.mubr.msk.bf16.vlgmr.msra.gmra.mxu1 %vm10897_vm1, %v1733_v53  ;;  %1892 = vmatpush1.bf16.msra.mxu0 %v1866_v14  ;;  %vm10905_vm1 = vmmov %vm10898_vm2  ;;  %v2100_v41 = vsel %vm8724_vm15, %v2096_v50, 0.0  ;;  %vm10906_vm2 = vcmask 64512   ;;  %v2108_v40 = vpack.c.bf16 %v2095_v10, %v2095_v10 }
 0x233   :  { %1933 = vmatpush1.bf16.msra.mxu1 %v1872_v21  ;;  %7442 = vmatprep.subr.msk.bf16.mxu0 %vm10904_vm6, %v1983_v49  ;;  %vm10907_vm11 = vmmov %vm10906_vm2  ;;  %v2107_v7 = vpack.c.bf16 %v2100_v41, %v2100_v41  ;;  %vm10911_vm6 = vcmp.lt.s32.totalorder %v8473_v9, 111  ;;  %v7451_v49 = vld [vmem:[%s10583_s1 + $0x88] sm:$0xff] }
 0x234   :  { %7444 = vmatprep.subr.msk.bf16.mxu1 %vm10905_vm1, %v1985_v28  ;;  %1909 = vmatprep.mubr.bf16.mxu0 %v10855_v4  ;;  %vm10908_vm14 = vmmov %vm10905_vm1  ;;  %v2222_v36 = vsel %vm10911_vm6, %v7984_v37, %v7978_v57  ;;  %v2229_v28 = vpack.c.bf16 %v7451_v49, %v7451_v49 }
 0x235   :  { %1950 = vmatprep.mubr.bf16.mxu1 %v10855_v4  ;;  %v1990_v25 = vsel %vm10908_vm14, %v1982_v27, 0  ;;  %vm10909_vm9 = vmmov %vm10905_vm1  ;;  %vm10916_vm14 = vnez %v10915_v38 }
 0x236   :  { %v1996_v12 = vsel %vm10909_vm9, %v1984_v35, 0  ;;  %vm10910_vm12 = vmmov %vm10903_vm10  ;;  %v2226_v42 = vsel %vm10916_vm14, %v2222_v36, 0.0 }
 0x237   :  { %v2097_v0 = vsel %vm10910_vm12, %v7968_v54, %v7969_v39  ;;  %vm10912_vm1 = vmmov %vm10911_vm6  ;;  %vm10921_vm6 = vcmask 64512   ;;  %v2233_v45 = vpack.c.bf16 %v2226_v42, %v2226_v42 }
 0x238   :  { %v2220_v59 = vsel %vm10912_vm1, %v7979_v11, %v7983_v8  ;;  %v2106_v5 = vpack.c.bf16 %v2097_v0, %v2097_v0  ;;  %vm10919_vm12 = vmmov %vm10912_vm1 }
 0x239   :  { %7438 = vmatmul.mubr.msk.bf16.vlgmr.msra.gmra.mxu0 %vm10906_vm2, %v1857_v52  ;;  %vm10913_vm2 = vmmov %vm10909_vm9  ;;  %vm10918_vm9 = vnez %v10917_v30  ;;  %v2221_v44 = vsel %vm10919_vm12, %v7978_v57, %v7979_v11  ;;  %vm10924_vm12 = vcmp.le.s32.totalorder %v8492_v19, 14 }
 0x23a   :  { %7440 = vmatmul.mubr.msk.bf16.vlgmr.msra.gmra.mxu1 %vm10907_vm11, %v1857_v52  ;;  %2016 = vmatpush1.bf16.msra.mxu0 %v1990_v25  ;;  %vm10914_vm11 = vmmov %vm10913_vm2  ;;  %v2224_v43 = vsel %vm10918_vm9, %v2220_v59, 0.0  ;;  %v2114_v47 = vsel %vm10913_vm2, %v2106_v5, 0  ;;  %v2223_v23 = vsel %vm10924_vm12, %v2221_v44, 0.0 }
 0x23b   :  { %2057 = vmatpush1.bf16.msra.mxu1 %v1996_v12  ;;  %7447 = vmatprep.subr.msk.bf16.mxu0 %vm10913_vm2, %v2107_v7  ;;  %vm10920_vm10 = vmmov %vm10912_vm1  ;;  %v2231_v48 = vpack.c.bf16 %v2224_v43, %v2224_v43  ;;  %v2230_v39 = vpack.c.bf16 %v2223_v23, %v2223_v23 }
 0x23c   :  { %7449 = vmatprep.subr.msk.bf16.mxu1 %vm10914_vm11, %v2109_v13  ;;  %2033 = vmatprep.mubr.bf16.mxu0 %v10855_v4  ;;  %v2219_v53 = vsel %vm10920_vm10, %v7983_v8, %v7984_v37  ;;  %vm10922_vm1 = vmmov %vm10921_vm6  ;;  %vm10925_vm10 = vcmp.le.s32.totalorder %v8495_v20, 14 }
 0x23d   :  { %2074 = vmatprep.mubr.bf16.mxu1 %v10855_v4  ;;  %vm10923_vm11 = vmmov %vm10913_vm2  ;;  %v2225_v26 = vsel %vm10925_vm10, %v2219_v53, 0.0 }
 0x23e   :  { %v2120_v2 = vsel %vm10923_vm11, %v2108_v40, 0  ;;  %v2232_v54 = vpack.c.bf16 %v2225_v26, %v2225_v26 }
 0x241   :  { %7443 = vmatmul.mubr.msk.bf16.vlgmr.msra.gmra.mxu0 %vm10921_vm6, %v1981_v6  ;;  %vm10926_vm6 = vmmov %vm10913_vm2 }
 0x242   :  { %7445 = vmatmul.mubr.msk.bf16.vlgmr.msra.gmra.mxu1 %vm10922_vm1, %v1981_v6  ;;  %2140 = vmatpush1.bf16.msra.mxu0 %v2114_v47  ;;  %vm10927_vm1 = vmmov %vm10913_vm2  ;;  %vm10928_vm2 = vcmask 64512  }
 0x243   :  { %2181 = vmatpush1.bf16.msra.mxu1 %v2120_v2  ;;  %7452 = vmatprep.subr.msk.bf16.mxu0 %vm10926_vm6, %v2231_v48  ;;  %vm10929_vm11 = vmmov %vm10928_vm2 }
 0x244   :  { %7454 = vmatprep.subr.msk.bf16.mxu1 %vm10927_vm1, %v2233_v45  ;;  %2157 = vmatprep.mubr.bf16.mxu0 %v10855_v4  ;;  %vm10930_vm14 = vmmov %vm10927_vm1 }
 0x245   :  { %2198 = vmatprep.mubr.bf16.mxu1 %v10855_v4  ;;  %v2238_v14 = vsel %vm10930_vm14, %v2230_v39, 0  ;;  %vm10931_vm12 = vmmov %vm10927_vm1 }
 0x246   :  { %v2244_v21 = vsel %vm10931_vm12, %v2232_v54, 0  ;;  %vm10932_vm10 = vmmov %vm10928_vm2 }
 0x247   :  { %vm10933_vm6 = vmmov %vm10928_vm2 }
 0x248   :  { %vm10934_vm14 = vmmov %vm10927_vm1 }
 0x249   :  { %7448 = vmatmul.mubr.msk.bf16.vlgmr.msra.gmra.mxu0 %vm10928_vm2, %v2105_v3  ;;  %vm10935_vm2 = vmmov %vm10927_vm1 }
 0x24a   :  { %7450 = vmatmul.mubr.msk.bf16.vlgmr.msra.gmra.mxu1 %vm10929_vm11, %v2105_v3  ;;  %2264 = vmatpush1.bf16.msra.mxu0 %v2238_v14  ;;  %vm10936_vm11 = vmmov %vm10927_vm1 }
 0x24b   :  { %2305 = vmatpush1.bf16.msra.mxu1 %v2244_v21  ;;  %2281 = vmatprep.mubr.bf16.mxu0 %v10855_v4  ;;  %vm10937_vm12 = vmmov %vm10933_vm6 }
 0x24c   :  { %2322 = vmatprep.mubr.bf16.mxu1 %v10855_v4 }
 0x251   :  { %7453 = vmatmul.mubr.msk.bf16.vlgmr.msra.gmra.mxu0 %vm10932_vm10, %v2229_v28  ;;  %vm10938_vm10 = vmmov %vm10933_vm6 }
 0x252   :  { %7455 = vmatmul.mubr.msk.bf16.vlgmr.msra.gmra.mxu1 %vm10933_vm6, %v2229_v28  ;;  %2406 = vmatprep.mubr.bf16.mxu0 %v10855_v4  ;;  %vm10682_vm6 = vcmask 1042432  }
 0x253   :  { %2447 = vmatprep.mubr.bf16.mxu1 %v10855_v4 }
 0x2cf   :  { %v1338_v62 = vpop.f32.mrf.mxu0 }
 0x2d1   :  { %v1379_v1 = vpop.f32.mrf.mxu1  ;;  %v1340_v50 = vpop.f32.mrf.mxu0 }
 0x2d3   :  { %v1381_v56 = vpop.f32.mrf.mxu1  ;;  %v1342_v58 = vpop.f32.mrf.mxu0 }
 0x2d5   :  { %v1383_v52 = vpop.f32.mrf.mxu1  ;;  %v1343_v27 = vpop.f32.mrf.mxu0 }
 0x2d7   :  { %v1384_v35 = vpop.f32.mrf.mxu1 }
 0x2d9   :  { %v1435_v55 = vpop.f32.mrf.mxu0 }
 0x2da   :  { %v1476_v41 = vpop.f32.mrf.mxu1 }
 0x2db   :  { %v1437_v37 = vpop.f32.mrf.mxu0 }
 0x2dc   :  { %v1478_v8 = vpop.f32.mrf.mxu1 }
 0x2dd   :  { %v1439_v11 = vpop.f32.mrf.mxu0 }
 0x2de   :  { %v1480_v57 = vpop.f32.mrf.mxu1 }
 0x2df   :  { %v1440_v25 = vpop.f32.mrf.mxu0 }
 0x2e0   :  { %v1481_v12 = vpop.f32.mrf.mxu1  ;;  %v1436_v25 = vadd.f32 %v1435_v55, %v1338_v62 }
 0x2e1   :  { %v1555_v7 = vpop.f32.mrf.mxu0  ;;  %v1477_v12 = vadd.f32 %v1476_v41, %v1379_v1 }
 0x2e2   :  { %v1596_v13 = vpop.f32.mrf.mxu1 }
 0x2e3   :  { %v1557_v18 = vpop.f32.mrf.mxu0 }
 0x2e4   :  { %v1598_v0 = vpop.f32.mrf.mxu1 }
 0x2e5   :  { %v1559_v10 = vpop.f32.mrf.mxu0 }
 0x2e6   :  { %v1600_v36 = vpop.f32.mrf.mxu1 }
 0x2e7   :  { %v1560_v59 = vpop.f32.mrf.mxu0 }
 0x2e8   :  { %v1601_v6 = vpop.f32.mrf.mxu1  ;;  %v1438_v59 = vadd.f32 %v1437_v37, %v1340_v50 }
 0x2e9   :  { %v1679_v5 = vpop.f32.mrf.mxu0  ;;  %v1479_v6 = vadd.f32 %v1478_v8, %v1381_v56 }
 0x2ea   :  { %v1720_v40 = vpop.f32.mrf.mxu1 }
 0x2eb   :  { %v1681_v42 = vpop.f32.mrf.mxu0 }
 0x2ec   :  { %v1722_v43 = vpop.f32.mrf.mxu1 }
 0x2ed   :  { %v1683_v44 = vpop.f32.mrf.mxu0 }
 0x2ee   :  { %v1724_v53 = vpop.f32.mrf.mxu1  ;;  %v1603_v44 = vadd.f32 %v1555_v7, %v1436_v25 }
 0x2ef   :  { %v1684_v47 = vpop.f32.mrf.mxu0  ;;  %v1605_v53 = vadd.f32 %v1596_v13, %v1477_v12 }
 0x2f0   :  { %v1725_v2 = vpop.f32.mrf.mxu1 }
 0x2f1   :  { %v1787_v48 = vpop.f32.mrf.mxu0 }
 0x2f2   :  { %v1828_v45 = vpop.f32.mrf.mxu1 }
 0x2f3   :  { %v1789_v31 = vpop.f32.mrf.mxu0 }
 0x2f4   :  { %v1830_v23 = vpop.f32.mrf.mxu1 }
 0x2f5   :  { %v1791_v26 = vpop.f32.mrf.mxu0 }
 0x2f6   :  { %v1832_v3 = vpop.f32.mrf.mxu1  ;;  %v1604_v26 = vadd.f32 %v1557_v18, %v1438_v59 }
 0x2f7   :  { %v1792_v39 = vpop.f32.mrf.mxu0  ;;  %v1606_v3 = vadd.f32 %v1598_v0, %v1479_v6 }
 0x2f8   :  { %v1833_v54 = vpop.f32.mrf.mxu1  ;;  %v1727_v39 = vadd.f32 %v1679_v5, %v1603_v44 }
 0x2f9   :  { %v1911_v14 = vpop.f32.mrf.mxu0  ;;  %v1729_v54 = vadd.f32 %v1720_v40, %v1605_v53 }
 0x2fa   :  { %v1952_v21 = vpop.f32.mrf.mxu1  ;;  %v1835_v38 = vadd.f32 %v1787_v48, %v1727_v39  ;;  %v2337_v48 = vpop.permute.xlu0 %2336 }
 0x2fb   :  { %v1913_v49 = vpop.f32.mrf.mxu0  ;;  %v1837_v30 = vadd.f32 %v1828_v45, %v1729_v54  ;;  %v2347_v54 = vld [vmem:[%s10584_s2] sm:$0x7] }
 0x2fc   :  { %v1954_v28 = vpop.f32.mrf.mxu1  ;;  %v1959_v50 = vadd.f32 %v1911_v14, %v1835_v38 }
 0x2fd   :  { %v1915_v60 = vpop.f32.mrf.mxu0  ;;  %v1961_v56 = vadd.f32 %v1952_v21, %v1837_v30 }
 0x2fe   :  { %v1956_v63 = vpop.f32.mrf.mxu1 }
 0x2ff   :  { %v1916_v58 = vpop.f32.mrf.mxu0 }
 0x300   :  { %v1957_v52 = vpop.f32.mrf.mxu1  ;;  %v1728_v58 = vadd.f32 %v1681_v42, %v1604_v26 }
 0x301   :  { %v2035_v27 = vpop.f32.mrf.mxu0  ;;  %v1730_v52 = vadd.f32 %v1722_v43, %v1606_v3 }
 0x302   :  { %v2076_v35 = vpop.f32.mrf.mxu1  ;;  %v1836_v55 = vadd.f32 %v1789_v31, %v1728_v58  ;;  %v2083_v18 = vadd.f32 %v2035_v27, %v1959_v50 }
 0x303   :  { %v2037_v11 = vpop.f32.mrf.mxu0  ;;  %v1838_v41 = vadd.f32 %v1830_v23, %v1730_v52  ;;  %v2085_v0 = vadd.f32 %v2076_v35, %v1961_v56 }
 0x304   :  { %v2078_v57 = vpop.f32.mrf.mxu1  ;;  %v1960_v7 = vadd.f32 %v1913_v49, %v1836_v55  ;;  %v9201_v55 = vld [vmem:[%s10582_s3] sm:$0xff] }
 0x305   :  { %v2039_v10 = vpop.f32.mrf.mxu0  ;;  %v1962_v13 = vadd.f32 %v1954_v28, %v1838_v41  ;;  %v2357_v41 = vpop.permute.xlu1 %2356 }
 0x306   :  { %v2080_v36 = vpop.f32.mrf.mxu1  ;;  %v2084_v25 = vadd.f32 %v2037_v11, %v1960_v7 }
 0x307   :  { %v2040_v47 = vpop.f32.mrf.mxu0  ;;  %v2086_v12 = vadd.f32 %v2078_v57, %v1962_v13 }
 0x308   :  { %v2081_v2 = vpop.f32.mrf.mxu1 }
 0x309   :  { %v2159_v60 = vpop.f32.mrf.mxu0 }
 0x30a   :  { %v2200_v63 = vpop.f32.mrf.mxu1  ;;  %v2207_v42 = vadd.f32 %v2159_v60, %v2083_v18 }
 0x30b   :  { %v2161_v62 = vpop.f32.mrf.mxu0  ;;  %v2209_v43 = vadd.f32 %v2200_v63, %v2085_v0 }
 0x30c   :  { %v2202_v1 = vpop.f32.mrf.mxu1  ;;  %v2208_v36 = vadd.f32 %v2161_v62, %v2084_v25  ;;  %v2348_v62 = vpack.c.bf16 %v2347_v54, %v2347_v54 }
 0x30d   :  { %v2163_v37 = vpop.f32.mrf.mxu0  ;;  %v2210_v31 = vadd.f32 %v2202_v1, %v2086_v12  ;;  %v8389_v1 = vmov 3  }
 0x30e   :  { %v2204_v8 = vpop.f32.mrf.mxu1  ;;  %7987 = vset.pattern.permute.xlu1 %v8389_v1 }
 0x30f   :  { %v2164_v5 = vpop.f32.mrf.mxu0  ;;  %2541 = vperm.xlu1 %7987, %v9201_v55  }
 0x310   :  { %v2205_v40 = vpop.f32.mrf.mxu1 }
 0x311   :  { %v2283_v45 = vpop.f32.mrf.mxu0 }
 0x312   :  { %v2324_v10 = vpop.f32.mrf.mxu1  ;;  %v2331_v23 = vadd.f32 %v2283_v45, %v2207_v42 }
 0x313   :  { %v2333_v38 = vadd.f32 %v2324_v10, %v2209_v43  ;;  %v2285_v30 = vpop.f32.mrf.mxu0 }
 0x314   :  { %v2326_v14 = vpop.f32.mrf.mxu1  ;;  %v2339_v21 = vadd.f32 %v2337_v48, %v2331_v23  ;;  %v2332_v28 = vadd.f32 %v2285_v30, %v2208_v36 }
 0x315   :  { %v2341_v49 = vadd.f32 %v2337_v48, %v2333_v38  ;;  %v2334_v27 = vadd.f32 %v2326_v14, %v2210_v31  ;;  %v2287_v35 = vpop.f32.mrf.mxu0 }
 0x316   :  { %v2328_v59 = vpop.f32.mrf.mxu1  ;;  %v2340_v6 = vadd.f32 %v2337_v48, %v2332_v28  ;;  %v2343_v57 = vmax.f32 %v2339_v21, 0.0 }
 0x317   :  { %v2342_v11 = vadd.f32 %v2337_v48, %v2334_v27  ;;  %v2345_v44 = vmax.f32 %v2341_v49, 0.0  ;;  %v2288_v53 = vpop.f32.mrf.mxu0 }
 0x318   :  { %v2329_v47 = vpop.f32.mrf.mxu1  ;;  %v2344_v2 = vmax.f32 %v2340_v6, 0.0  ;;  %v2349_v3 = vpack.c.bf16 %v2343_v57, %v2343_v57 }
 0x319   :  { %v2346_v26 = vmax.f32 %v2342_v11, 0.0  ;;  %v2351_v39 = vpack.c.bf16 %v2345_v44, %v2345_v44 }
 0x31a   :  { %v2350_v60 = vpack.c.bf16 %v2344_v2, %v2344_v2  ;;  %v2363_v58 = vsel %vm10935_vm2, %v2349_v3, 0  ;;  %vm10683_vm2 = vcmask 23552  }
 0x31b   :  { %v2352_v63 = vpack.c.bf16 %v2346_v26, %v2346_v26  ;;  %v2369_v52 = vsel %vm10936_vm11, %v2351_v39, 0  ;;  %vm10948_vm11 = vcmp.lt.s32.totalorder %v8473_v9, 16 }
 0x31c   :  { %7456 = vmatprep.subr.msk.bf16.mxu0 %vm10934_vm14, %v2350_v60  ;;  %vm2548_vm14 = vcmask 1040384  }
 0x31d   :  { %7458 = vmatprep.subr.msk.bf16.mxu1 %vm10927_vm1, %v2352_v63  ;;  %2389 = vmatpush1.bf16.msra.mxu0 %v2363_v58  ;;  %vm2549_vm1 = vcmask 1041408  }
 0x31e   :  { %2430 = vmatpush1.bf16.msra.mxu1 %v2369_v52 }
 0x320   :  { %7457 = vmatmul.mubr.msk.bf16.vlgmr.msra.gmra.mxu0 %vm10937_vm12, %v2348_v62  ;;  %vm10949_vm12 = vmmov %vm10948_vm11 }
 0x321   :  { %7459 = vmatmul.mubr.msk.bf16.vlgmr.msra.gmra.mxu1 %vm10938_vm10, %v2348_v62  ;;  %2596 = vmatprep.mubr.bf16.mxu0 %v10855_v4  ;;  %vm10950_vm10 = vmmov %vm10948_vm11 }
 0x322   :  { %2637 = vmatprep.mubr.bf16.mxu1 %v10855_v4 }
 0x3e0   :  { %v2408_v50 = vpop.f32.mrf.mxu0 }
 0x3e1   :  { %v2449_v56 = vpop.f32.mrf.mxu1  ;;  %v2409_v37 = vadd.f32 %v2408_v50, %v2357_v41 }
 0x3e2   :  { %v2450_v8 = vadd.f32 %v2449_v56, %v2357_v41  ;;  %v2410_v7 = vpop.f32.mrf.mxu0 }
 0x3e3   :  { %v2451_v13 = vpop.f32.mrf.mxu1  ;;  %v2457_v18 = vsel %vm10682_vm6, %v2409_v37, -inf  ;;  %v2411_v5 = vadd.f32 %v2410_v7, %v2357_v41 }
 0x3e4   :  { %v2471_v0 = vsel %vm10682_vm6, %v2450_v8, -inf  ;;  %v2452_v40 = vadd.f32 %v2451_v13, %v2357_v41  ;;  %v2458_v25 = vrot.slane %v2457_v18, 4  ;;  %v2412_v42 = vpop.f32.mrf.mxu0 }
 0x3e5   :  { %v2472_v12 = vrot.slane %v2471_v0, 4  ;;  %v2453_v43 = vpop.f32.mrf.mxu1  ;;  %v2464_v48 = vsel %vm10682_vm6, %v2411_v5, -inf }
 0x3e6   :  { %v2478_v45 = vsel %vm10682_vm6, %v2452_v40, -inf  ;;  %v2459_v10 = vmax.f32 %v2457_v18, %v2458_v25  ;;  %v2465_v31 = vrot.slane %v2464_v48, 4  ;;  %v2413_v38 = vpop.f32.mrf.mxu0 }
 0x3e7   :  { %v2473_v36 = vmax.f32 %v2471_v0, %v2472_v12  ;;  %v2479_v23 = vrot.slane %v2478_v45, 4  ;;  %v2454_v30 = vpop.f32.mrf.mxu1 }
 0x3e8   :  { %v2460_v14 = vrot.slane %v2459_v10, 2  ;;  %v2466_v49 = vmax.f32 %v2464_v48, %v2465_v31 }
 0x3e9   :  { %v2474_v21 = vrot.slane %v2473_v36, 2  ;;  %v2480_v28 = vmax.f32 %v2478_v45, %v2479_v23 }
 0x3ea   :  { %v2461_v27 = vmax.f32 %v2459_v10, %v2460_v14  ;;  %v2467_v59 = vrot.slane %v2466_v49, 2 }
 0x3eb   :  { %v2475_v35 = vmax.f32 %v2473_v36, %v2474_v21  ;;  %v2481_v6 = vrot.slane %v2480_v28, 2 }
 0x3ec   :  { %v2462_v11 = vrot.slane %v2461_v27, 1  ;;  %v2468_v44 = vmax.f32 %v2466_v49, %v2467_v59 }
 0x3ed   :  { %v2476_v57 = vrot.slane %v2475_v35, 1  ;;  %v2482_v53 = vmax.f32 %v2480_v28, %v2481_v6 }
 0x3ee   :  { %v2463_v47 = vmax.f32 %v2461_v27, %v2462_v11  ;;  %v2469_v26 = vrot.slane %v2468_v44, 1 }
 0x3ef   :  { %v2477_v2 = vmax.f32 %v2475_v35, %v2476_v57  ;;  %v2483_v3 = vrot.slane %v2482_v53, 1 }
 0x3f0   :  { %v2485_v39 = vsub.f32 %v2409_v37, %v2463_v47  ;;  %v2470_v60 = vmax.f32 %v2468_v44, %v2469_v26 }
 0x3f1   :  { %v2487_v54 = vsub.f32 %v2450_v8, %v2477_v2  ;;  %v2484_v63 = vmax.f32 %v2482_v53, %v2483_v3  ;;  %v8390_v3 = vmov 65535  }
 0x3f2   :  { %v2489_v58 = vmul.f32 1.442695, %v2485_v39  ;;  %v2486_v62 = vsub.f32 %v2411_v5, %v2470_v60  ;;  %v2550_v39 = vsel %vm2548_vm14, 4294967295, %v8390_v3  ;;  %vm10952_vm14 = vmmov %vm10950_vm10 }
 0x3f3   :  { %v2493_v52 = vmul.f32 1.442695, %v2487_v54  ;;  %v2488_v1 = vsub.f32 %v2452_v40, %v2484_v63 }
 0x3f4   :  { %8317 = vpow2.f32 %v2489_v58  ;;  %v2491_v41 = vmul.f32 1.442695, %v2486_v62 }
 0x3f5   :  { %v2495_v50 = vmul.f32 1.442695, %v2488_v1  ;;  %8319 = vpow2.f32 %v2493_v52 }
 0x3f6   :  { %8321 = vpow2.f32 %v2491_v41 }
 0x3f7   :  { %8323 = vpow2.f32 %v2495_v50  ;;  %v9226_v50 = vsel %vm2549_vm1, %v2550_v39, 0  ;;  %vm10684_vm1 = vmpackc.low %vm8505_vm4, %vm8505_vm4  ;;  %vm10981_vm4 = vcmp.le.s32.totalorder %v8503_v24, 14 }
 0x3f8   :  { %10943 = vst [vmem:[#allocation43_spill] sm:$0xff] %v9226_v50 }
 0x401   :  { %v8318_v56 = vpop.eup %8317 }
 0x402   :  { %v8320_v7 = vpop.eup %8319  ;;  %v2497_v13 = vsel %vm10682_vm6, %v8318_v56, 0.0 }
 0x403   :  { %v8322_v18 = vpop.eup %8321  ;;  %v2498_v0 = vrot.slane %v2497_v13, 4  ;;  %v2511_v37 = vsel %vm10682_vm6, %v8320_v7, 0.0 }
 0x404   :  { %v8324_v8 = vpop.eup %8323  ;;  %v2512_v25 = vrot.slane %v2511_v37, 4  ;;  %v2504_v12 = vsel %vm10682_vm6, %v8322_v18, 0.0 }
 0x405   :  { %v2499_v5 = vadd.f32 %v2498_v0, %v2497_v13  ;;  %v2505_v40 = vrot.slane %v2504_v12, 4  ;;  %v2518_v42 = vsel %vm10682_vm6, %v8324_v8, 0.0  ;;  %v7460_v0 = vld [vmem:[%s10584_s2 + $0x8] sm:$0xff]  ;;  %vm10685_vm6 = vcmask 130048  }
 0x406   :  { %v2513_v43 = vadd.f32 %v2512_v25, %v2511_v37  ;;  %v2519_v48 = vrot.slane %v2518_v42, 4 }
 0x407   :  { %v2500_v45 = vrot.slane %v2499_v5, 2  ;;  %v2506_v10 = vadd.f32 %v2505_v40, %v2504_v12  ;;  %v2542_v40 = vpop.permute.xlu1 %2541 }
 0x408   :  { %v2514_v36 = vrot.slane %v2513_v43, 2  ;;  %v2520_v31 = vadd.f32 %v2519_v48, %v2518_v42 }
 0x409   :  { %v2501_v23 = vadd.f32 %v2500_v45, %v2499_v5  ;;  %v2507_v38 = vrot.slane %v2506_v10, 2  ;;  %v2535_v5 = vpack.c.bf16 %v7460_v0, %v7460_v0 }
 0x40a   :  { %v2515_v30 = vadd.f32 %v2514_v36, %v2513_v43  ;;  %v2521_v14 = vrot.slane %v2520_v31, 2 }
 0x40b   :  { %v2502_v21 = vrot.slane %v2501_v23, 1  ;;  %v2508_v49 = vadd.f32 %v2507_v38, %v2506_v10 }
 0x40c   :  { %v2516_v28 = vrot.slane %v2515_v30, 1  ;;  %v2522_v27 = vadd.f32 %v2521_v14, %v2520_v31 }
 0x40d   :  { %v2503_v35 = vadd.f32 %v2502_v21, %v2501_v23  ;;  %v2509_v59 = vrot.slane %v2508_v49, 1 }
 0x40e   :  { %v2517_v6 = vadd.f32 %v2516_v28, %v2515_v30  ;;  %v2523_v11 = vrot.slane %v2522_v27, 1 }
 0x40f   :  { %8325 = vrcp.f32 %v2503_v35  ;;  %v2510_v57 = vadd.f32 %v2509_v59, %v2508_v49 }
 0x410   :  { %8327 = vrcp.f32 %v2517_v6  ;;  %v2524_v44 = vadd.f32 %v2523_v11, %v2522_v27  ;;  %v8391_v11 = vmov 4  }
 0x411   :  { %8329 = vrcp.f32 %v2510_v57  ;;  %8068 = vset.pattern.permute.xlu0 %v8391_v11 }
 0x412   :  { %8331 = vrcp.f32 %v2524_v44 }
 0x41c   :  { %v8326_v53 = vpop.eup %8325 }
 0x41d   :  { %v8328_v47 = vpop.eup %8327  ;;  %v9212_v2 = vmul.f32 %v8326_v53, %v8318_v56 }
 0x41e   :  { %v8330_v26 = vpop.eup %8329  ;;  %v9214_v54 = vmul.f32 %v8328_v47, %v8320_v7 }
 0x41f   :  { %10939 = vst [vmem:[#allocation39_spill] sm:$0xff] %v9212_v2  ;;  %v8332_v60 = vpop.eup %8331  ;;  %v9216_v63 = vmul.f32 %v8330_v26, %v8322_v18  ;;  %v10699_v58 = vrot.slane %v9212_v2, 2  ;;  %v2536_v62 = vpack.c.bf16 %v9212_v2, %v9212_v2 }
 0x420   :  { %10940 = vst [vmem:[#allocation40_spill] sm:$0xff] %v9214_v54  ;;  %v9219_v52 = vmul.f32 %v8332_v60, %v8324_v8  ;;  %v10698_v1 = vrot.slane %v9214_v54, 2  ;;  %v2538_v7 = vpack.c.bf16 %v9214_v54, %v9214_v54  ;;  %v7464_v60 = vld [vmem:[%s10583_s1 + $0x98] sm:$0xff] }
 0x421   :  { %10941 = vst [vmem:[#allocation41_spill] sm:$0xff] %v9216_v63  ;;  %v2537_v41 = vpack.c.bf16 %v9216_v63, %v9216_v63  ;;  %v10697_v56 = vrot.slane %v9216_v63, 2  ;;  %7354 = vst [vmem:[%s10585_s4 + $0x10] sm:$0x1] %v10699_v58  ;;  %v2553_v25 = vand.u32 %v9226_v50, %v2536_v62 }
 0x422   :  { %10942 = vst [vmem:[#allocation42_spill] sm:$0xff] %v9219_v52  ;;  %v2539_v13 = vpack.c.bf16 %v9219_v52, %v9219_v52  ;;  %v10696_v18 = vrot.slane %v9219_v52, 2  ;;  %7801 = vst [vmem:[%s10585_s4 + $0x30] sm:$0x1] %v10698_v1  ;;  %v2559_v12 = vand.u32 %v9226_v50, %v2538_v7  ;;  %v10951_v7 = vld [vmem:[#allocation6_spill] sm:$0xff]  ;;  %v7517_v52 = vld [vmem:[%s10583_s1 + $0xb0] sm:$0xff] }
 0x423   :  { %v2556_v37 = vand.u32 %v9226_v50, %v2537_v41  ;;  %7355 = vst [vmem:[%s10585_s4 + $0x18] sm:$0x1] %v10697_v56  ;;  %v3093_v54 = vpack.c.bf16 %v7517_v52, %v7517_v52  ;;  %v11026_v52 = vld [vmem:[#allocation25_spill] sm:$0xff] }
 0x424   :  { %v2562_v8 = vand.u32 %v9226_v50, %v2539_v13  ;;  %7802 = vst [vmem:[%s10585_s4 + $0x38] sm:$0x1] %v10696_v18 }
 0x425   :  { %2578 = vmatprep.subr.bf16.mxu0 %v2556_v37  ;;  %v10953_v37 = vld [vmem:[#allocation10_spill] sm:$0xff] }
 0x426   :  { %2619 = vmatprep.subr.bf16.mxu1 %v2562_v8  ;;  %2579 = vmatpush1.bf16.msra.mxu0 %v2553_v25  ;;  %v10954_v25 = vld [vmem:[#allocation9_spill] sm:$0xff] }
 0x427   :  { %2620 = vmatpush1.bf16.msra.mxu1 %v2559_v12 }
 0x429   :  { %7461 = vmatmul.mubr.msk.bf16.vlgmr.msra.gmra.mxu0 %vm10683_vm2, %v2535_v5 }
 0x42a   :  { %7462 = vmatmul.mubr.msk.bf16.vlgmr.msra.gmra.mxu1 %vm10683_vm2, %v2535_v5  ;;  %2732 = vmatprep.mubr.bf16.mxu0 %v10855_v4  ;;  %vm10961_vm2 = vcmp.ge.s32.totalorder %v8503_v24, 1 }
 0x42b   :  { %2773 = vmatprep.mubr.bf16.mxu1 %v10855_v4 }
 0x4e9   :  { %v2598_v42 = vpop.f32.mrf.mxu0 }
 0x4ea   :  { %v2599_v43 = vadd.f32 %v2598_v42, %v2542_v40  ;;  %v2639_v48 = vpop.f32.mrf.mxu1 }
 0x4eb   :  { %v2640_v45 = vadd.f32 %v2639_v48, %v2542_v40  ;;  %v2600_v10 = vpop.f32.mrf.mxu0 }
 0x4ec   :  { %v2601_v36 = vadd.f32 %v2600_v10, %v2542_v40  ;;  %v2641_v31 = vpop.f32.mrf.mxu1  ;;  %v9267_v14 = vmax.f32 %v2599_v43, 0.0 }
 0x4ed   :  { %v9265_v23 = vmax.f32 %v2640_v45, 0.0  ;;  %v2642_v38 = vadd.f32 %v2641_v31, %v2542_v40  ;;  %v2602_v30 = vpop.f32.mrf.mxu0  ;;  %v10955_v45 = vld [vmem:[#allocation8_spill] sm:$0xff]  ;;  %v10957_v31 = vmov 0 }
 0x4ee   :  { %10945 = vst [vmem:[#allocation45_spill] sm:$0xff] %v9267_v14  ;;  %v9269_v21 = vmax.f32 %v2601_v36, 0.0  ;;  %v2643_v49 = vpop.f32.mrf.mxu1  ;;  %v2691_v36 = vpack.c.bf16 %v7464_v60, %v7464_v60  ;;  %v10962_v30 = vmov 0 }
 0x4ef   :  { %10944 = vst [vmem:[#allocation44_spill] sm:$0xff] %v9265_v23  ;;  %v9271_v28 = vmax.f32 %v2642_v38, 0.0  ;;  %v2603_v27 = vpop.f32.mrf.mxu0 }
 0x4f0   :  { %10946 = vst [vmem:[#allocation46_spill] sm:$0xff] %v9269_v21  ;;  %v2644_v35 = vpop.f32.mrf.mxu1  ;;  %v7988_v59 = vpack.i.bf16 %v9269_v21, %v9267_v14 }
 0x4f1   :  { %10947 = vst [vmem:[#allocation47_spill] sm:$0xff] %v9271_v28  ;;  %v7993_v6 = vpack.i.bf16 %v9271_v28, %v9265_v23 }
 0x4f2   :  { %7989 = vrot.lane.b32.xlu0 %v7988_v59, %s8378_s23 }
 0x4f3   :  { %7994 = vrot.lane.b32.xlu1 %v7993_v6, %s8378_s23 }
 0x4f6   :  { %7999 = vrot.lane.b32.xlu0 %v7988_v59, %s8379_s24 }
 0x4f7   :  { %8004 = vrot.lane.b32.xlu1 %v7993_v6, %s8379_s24 }
 0x4fa   :  { %8009 = vrot.lane.b32.xlu0 %v7988_v59, %s8381_s25 }
 0x4fb   :  { %8014 = vrot.lane.b32.xlu1 %v7993_v6, %s8381_s25 }
 0x4fe   :  { %8019 = vrot.lane.b32.xlu0 %v7988_v59, %s8382_s26 }
 0x4ff   :  { %8024 = vrot.lane.b32.xlu1 %v7993_v6, %s8382_s26 }
 0x502   :  { %8029 = vrot.lane.b32.xlu0 %v7988_v59, %s8383_s27 }
 0x503   :  { %8034 = vrot.lane.b32.xlu1 %v7993_v6, %s8383_s27 }
 0x506   :  { %8039 = vrot.lane.b32.xlu0 %v7988_v59, %s8384_s28 }
 0x507   :  { %8044 = vrot.lane.b32.xlu1 %v7993_v6, %s8384_s28 }
 0x50a   :  { %8049 = vrot.lane.b32.xlu0 %v7988_v59, %s8385_s29 }
 0x50b   :  { %8054 = vrot.lane.b32.xlu1 %v7993_v6, %s8385_s29 }
 0x50e   :  { %8059 = vrot.lane.b32.xlu0 %v7988_v59, %s8386_s30  ;;  %v10968_v59 = vld [vmem:[#allocation5_spill] sm:$0xff] }
 0x50f   :  { %8064 = vrot.lane.b32.xlu1 %v7993_v6, %s8386_s30 }
 0x512   :  { %3636 = vperm.xlu0 %8068, %v9201_v55  }
 0x564   :  { %v7990_v57 = vpop.permute.xlu0 %7989 }
 0x565   :  { %v7995_v44 = vpop.permute.xlu1 %7994  ;;  %v7992_v53 = vunpack.i.h.bf16 %v7990_v57  ;;  %v7991_v47 = vunpack.i.l.bf16 %v7990_v57  ;;  %v10969_v57 = vld [vmem:[#allocation7_spill] sm:$0xff] }
 0x566   :  { %v7997_v26 = vunpack.i.h.bf16 %v7995_v44  ;;  %v7996_v3 = vunpack.i.l.bf16 %v7995_v44 }
 0x567   :  { %v2683_v39 = vsel %vm10948_vm11, %v7991_v47, %v7992_v53  ;;  %vm9332_vm11 = vmpackc.low %vm10961_vm2, %vm10961_vm2 }
 0x568   :  { %v2682_v62 = vsel %vm10949_vm12, %v7992_v53, %v7996_v3  ;;  %v2684_v41 = vsel %vm10950_vm10, %v7997_v26, %v7991_v47  ;;  %v8000_v55 = vpop.permute.xlu0 %7999  ;;  %v2693_v13 = vpack.c.bf16 %v2683_v39, %v10951_v7  ;;  %v2681_v0 = vsel %vm10952_vm14, %v7996_v3, %v7997_v26  ;;  %vm10690_vm2 = vmpackc.low %vm8556_vm3, %vm8556_vm3  ;;  %v10970_v53 = vld [vmem:[#allocation12_spill] sm:$0xff]  ;;  %v10971_v26 = vld [vmem:[#allocation11_spill] sm:$0xff] }
 0x569   :  { %v7470_v8 = vpack.c.bf16 %v2682_v62, %v10953_v37  ;;  %v7466_v12 = vpack.c.bf16 %v2684_v41, %v10954_v25  ;;  %v8005_v5 = vpop.permute.xlu1 %8004  ;;  %v8002_v40 = vunpack.i.h.bf16 %v8000_v55  ;;  %v8001_v42 = vunpack.i.l.bf16 %v8000_v55 }
 0x56a   :  { %v8007_v43 = vunpack.i.h.bf16 %v8005_v5  ;;  %v8006_v48 = vunpack.i.l.bf16 %v8005_v5  ;;  %2714 = vmatprep.subr.bf16.mxu0 %v2693_v13  ;;  %v2695_v10 = vpack.c.bf16 %v2681_v0, %v10955_v45  ;;  %vm10956_vm12 = vcmp.ge.s32.totalorder %v8486_v16, 1  ;;  %v7463_v13 = vld [vmem:[%s10583_s1 + $0x90] sm:$0xff] }
 0x56b   :  { %vm9318_vm10 = vmpackc.low %vm10956_vm12, %vm10956_vm12  ;;  %vm10960_vm14 = vcmp.lt.s32.totalorder %v8473_v9, 17  ;;  %7467 = vmatpush1.bf16.msk.msra.mxu0 %vm10684_vm1, %v7466_v12  ;;  %v10963_v30 = vsel %vm9332_vm11, 4294967295, %v10962_v30  ;;  %v10975_v0 = vmov 0 }
 0x56c   :  { %v10958_v31 = vsel %vm9318_vm10, 4294967295, %v10957_v31  ;;  %v2660_v38 = vsel %vm10960_vm14, %v8001_v42, %v8002_v40  ;;  %10964 = vst [vmem:[#allocation49_spill] sm:$0xff] %v10963_v30  ;;  %vm10965_vm12 = vmmov %vm10960_vm14  ;;  %2755 = vmatprep.subr.bf16.mxu1 %v2695_v10  ;;  %v8010_v11 = vpop.permute.xlu0 %8009  ;;  %v10987_v10 = vld [vmem:[#allocation15_spill] sm:$0xff] }
 0x56d   :  { %10959 = vst [vmem:[#allocation48_spill] sm:$0xff] %v10958_v31  ;;  %v2658_v49 = vsel %vm10965_vm12, %v8006_v48, %v8007_v43  ;;  %vm10966_vm9 = vmmov %vm10965_vm12  ;;  %v7474_v6 = vpack.c.bf16 %v2660_v38, %v10968_v59  ;;  %v8015_v39 = vpop.permute.xlu1 %8014  ;;  %v8012_v60 = vunpack.i.h.bf16 %v8010_v11  ;;  %v8011_v55 = vunpack.i.l.bf16 %v8010_v11 }
 0x56e   :  { %v2659_v27 = vsel %vm10966_vm9, %v8002_v40, %v8006_v48  ;;  %vm10967_vm14 = vmmov %vm10966_vm9  ;;  %v7481_v44 = vpack.c.bf16 %v2658_v49, %v10969_v57  ;;  %v8017_v62 = vunpack.i.h.bf16 %v8015_v39  ;;  %v8016_v41 = vunpack.i.l.bf16 %v8015_v39  ;;  %7468 = vmatmul.mubr.msk.bf16.vlgmr.msra.gmra.mxu0 %vm10685_vm6, %v2691_v36  ;;  %v10992_v39 = vld [vmem:[#allocation16_spill] sm:$0xff] }
 0x56f   :  { %v2661_v35 = vsel %vm10967_vm14, %v8007_v43, %v8001_v42  ;;  %v7484_v47 = vpack.c.bf16 %v2659_v27, %v10970_v53  ;;  %vm10972_vm9 = vmpackc.low %vm8520_vm8, %vm8520_vm8  ;;  %7475 = vmatprep.subr.msk.bf16.mxu0 %vm9318_vm10, %v7474_v6  ;;  %vm10973_vm12 = vnez %v10778_v51  ;;  %vm10978_vm14 = vcmp.lt.s32.totalorder %v8473_v9, 15  ;;  %v10985_v42 = vld [vmem:[#allocation13_spill] sm:$0xff]  ;;  %2817 = vmatprep.mubr.bf16.mxu0 %v10855_v4 }
 0x570   :  { %v7477_v3 = vpack.c.bf16 %v2661_v35, %v10971_v26  ;;  %7471 = vmatpush1.bf16.msk.msra.mxu1 %vm10972_vm9, %v7470_v8  ;;  %vm10974_vm9 = vcmp.le.s32.totalorder %v8486_v16, 14  ;;  %v2875_v8 = vsel %vm10978_vm14, %v8016_v41, %v8017_v62  ;;  %vm10979_vm6 = vmmov %vm10978_vm14  ;;  %vm10980_vm8 = vcmask 130048   ;;  %v8020_v5 = vpop.permute.xlu0 %8019 }
 0x571   :  { %7482 = vmatprep.subr.msk.bf16.mxu1 %vm9332_vm11, %v7481_v44  ;;  %vm9373_vm1 = vmpackc.low %vm10974_vm9, %vm10974_vm9  ;;  %v2877_v12 = vsel %vm10979_vm6, %v8011_v55, %v8012_v60  ;;  %v10982_v40 = vmov 0  ;;  %v7496_v43 = vpack.c.bf16 %v2875_v8, %v10985_v42  ;;  %v2668_v49 = vpack.c.bf16 %v7463_v13, %v7463_v13  ;;  %v10994_v8 = vld [vmem:[#allocation18_spill] sm:$0xff] }
 0x572   :  { %7478 = vmatpush1.bf16.msk.msra.mxu0 %vm10690_vm2, %v7477_v3  ;;  %v10976_v0 = vsel %vm9373_vm1, 4294967295, %v10975_v0  ;;  %vm9385_vm2 = vmpackc.low %vm10981_vm4, %vm10981_vm4  ;;  %v7489_v38 = vpack.c.bf16 %v2877_v12, %v10987_v10  ;;  %v8022_v6 = vunpack.i.h.bf16 %v8020_v5  ;;  %v8021_v11 = vunpack.i.l.bf16 %v8020_v5  ;;  %v7487_v5 = vld [vmem:[%s10583_s1 + $0xa0] sm:$0xff] }
 0x573   :  { %10977 = vst [vmem:[#allocation50_spill] sm:$0xff] %v10976_v0  ;;  %7472 = vmatmul.mubr.msk.bf16.vlgmr.msra.gmra.mxu1 %vm10980_vm8, %v2691_v36  ;;  %v10983_v40 = vsel %vm9385_vm2, 4294967295, %v10982_v40  ;;  %vm10986_vm9 = vmmov %vm10979_vm6  ;;  %v8025_v36 = vpop.permute.xlu1 %8024 }
 0x574   :  { %10984 = vst [vmem:[#allocation51_spill] sm:$0xff] %v10983_v40  ;;  %v2878_v48 = vsel %vm10986_vm9, %v8017_v62, %v8011_v55  ;;  %vm10988_vm8 = vmpackc.low %vm10973_vm12, %vm10973_vm12  ;;  %v8027_v27 = vunpack.i.h.bf16 %v8025_v36  ;;  %v8026_v35 = vunpack.i.l.bf16 %v8025_v36  ;;  %2858 = vmatprep.mubr.bf16.mxu1 %v10855_v4  ;;  %7490 = vmatprep.subr.msk.bf16.mxu0 %vm9373_vm1, %v7489_v38  ;;  %v10993_v55 = vld [vmem:[#allocation17_spill] sm:$0xff] }
 0x575   :  { %7485 = vmatpush1.bf16.msk.msra.mxu1 %vm10988_vm8, %v7484_v47  ;;  %vm10989_vm4 = vmmov %vm10979_vm6  ;;  %vm10990_vm6 = vcmp.lt.s32.totalorder %v8473_v9, 1  ;;  %v7492_v62 = vpack.c.bf16 %v2878_v48, %v10992_v39  ;;  %vm10995_vm8 = vcmask 130048   ;;  %v2885_v48 = vpack.c.bf16 %v7487_v5, %v7487_v5  ;;  %v8367_v5 = vld [vmem:[%s10581_s0 + $0x18] sm:$0xff] }
 0x576   :  { %7497 = vmatprep.subr.msk.bf16.mxu1 %vm9385_vm2, %v7496_v43  ;;  %v2876_v44 = vsel %vm10989_vm4, %v8012_v60, %v8016_v41  ;;  %v2987_v47 = vsel %vm10990_vm6, %v8026_v35, %v8027_v27  ;;  %vm10991_vm14 = vmmov %vm10990_vm6  ;;  %7479 = vmatmul.mubr.msk.bf16.vlgmr.msra.gmra.mxu0 %vm10995_vm8, %v2668_v49  ;;  %vm10996_vm4 = vnez %v10785_v33  ;;  %v10997_v60 = vld [vmem:[#allocation14_spill] sm:$0xff] }
 0x577   :  { %v2989_v3 = vsel %vm10991_vm14, %v8021_v11, %v8022_v6  ;;  %vm10693_vm9 = vmpackc.low %vm8604_vm0, %vm8604_vm0  ;;  %v7511_v13 = vpack.c.bf16 %v2987_v47, %v10993_v55  ;;  %v7499_v41 = vpack.c.bf16 %v2876_v44, %v10997_v60  ;;  %2925 = vmatprep.mubr.bf16.mxu0 %v10855_v4  ;;  %v2990_v43 = vsel %vm10991_vm14, %v8027_v27, %v8021_v11  ;;  %v8035_v36 = vpop.permute.xlu1 %8034  ;;  %v11004_v27 = vld [vmem:[#allocation20_spill] sm:$0xff] }
 0x578   :  { %v7504_v12 = vpack.c.bf16 %v2989_v3, %v10994_v8  ;;  %vm10692_vm12 = vmpackc.low %vm10996_vm4, %vm10996_vm4  ;;  %7493 = vmatpush1.bf16.msk.msra.mxu0 %vm10693_vm9, %v7492_v62  ;;  %v11001_v44 = vmov 0  ;;  %v7507_v11 = vpack.c.bf16 %v2990_v43, %v11004_v27  ;;  %vm11006_vm9 = vcmp.ge.s32.totalorder %v8495_v20, 1 }
 0x579   :  { %vm10998_vm6 = vmmov %vm10995_vm8  ;;  %v11007_v47 = vmov 0  ;;  %v8036_v3 = vunpack.i.l.bf16 %v8035_v36  ;;  %v3097_v43 = vpack.c.bf16 %v9271_v28, %v8367_v5 }
 0x57a   :  { %7505 = vmatprep.subr.msk.bf16.mxu0 %vm9318_vm10, %v7504_v12  ;;  %vm10999_vm8 = vmmov %vm10991_vm14  ;;  %vm11005_vm14 = vcmask 130048   ;;  %v8366_v12 = vld [vmem:[%s10581_s0 + $0x8] sm:$0xff] }
 0x57b   :  { %7486 = vmatmul.mubr.msk.bf16.vlgmr.msra.gmra.mxu1 %vm10998_vm6, %v2668_v49  ;;  %v2988_v38 = vsel %vm10999_vm8, %v8022_v6, %v8026_v35  ;;  %v8030_v49 = vpop.permute.xlu0 %8029  ;;  %vm11000_vm6 = vcmp.ge.s32.totalorder %v8492_v19, 1  ;;  %v11010_v35 = vld [vmem:[#allocation19_spill] sm:$0xff]  ;;  %vm11011_vm8 = vmmov %vm11005_vm14 }
 0x57c   :  { %7500 = vmatpush1.bf16.msk.msra.mxu1 %vm10692_vm12, %v7499_v41  ;;  %2966 = vmatprep.mubr.bf16.mxu1 %v10855_v4  ;;  %vm9448_vm12 = vmpackc.low %vm11000_vm6, %vm11000_vm6  ;;  %v7514_v6 = vpack.c.bf16 %v2988_v38, %v11010_v35  ;;  %v8032_v62 = vunpack.i.h.bf16 %v8030_v49  ;;  %v3095_v41 = vpack.c.bf16 %v9269_v21, %v8366_v12  ;;  %v8037_v38 = vunpack.i.h.bf16 %v8035_v36  ;;  %v8045_v12 = vpop.permute.xlu1 %8044  ;;  %v8368_v36 = vld [vmem:[%s10581_s0] sm:$0xff] }
 0x57d   :  { %7512 = vmatprep.subr.msk.bf16.mxu1 %vm9332_vm11, %v7511_v13  ;;  %v11002_v44 = vsel %vm9448_vm12, 4294967295, %v11001_v44  ;;  %vm9457_vm11 = vmpackc.low %vm11006_vm9, %vm11006_vm9  ;;  %v7502_v13 = vld [vmem:[%s10583_s1 + $0xa8] sm:$0xff]  ;;  %vm11012_vm9 = vcmp.lt.s32.totalorder %v8473_v9, 127 }
 0x57e   :  { %11003 = vst [vmem:[#allocation52_spill] sm:$0xff] %v11002_v44  ;;  %7494 = vmatmul.mubr.msk.bf16.vlgmr.msra.gmra.mxu0 %vm11005_vm14, %v2885_v48  ;;  %v11008_v47 = vsel %vm9457_vm11, 4294967295, %v11007_v47  ;;  %v3196_v18 = vsel %vm11012_vm9, %v8032_v62, %v8036_v3  ;;  %vm11013_vm6 = vmmov %vm11012_vm9 }
 0x57f   :  { %11009 = vst [vmem:[#allocation53_spill] sm:$0xff] %v11008_v47  ;;  %7508 = vmatpush1.bf16.msk.msra.mxu0 %vm9448_vm12, %v7507_v11  ;;  %3037 = vmatprep.mubr.bf16.mxu0 %v10855_v4  ;;  %v8031_v11 = vunpack.i.l.bf16 %v8030_v49  ;;  %v8040_v56 = vpop.permute.xlu0 %8039  ;;  %v3094_v49 = vpack.c.bf16 %v9267_v14, %v8368_v36  ;;  %vm11015_vm14 = vmmov %vm11011_vm8  ;;  %v11016_v36 = vld [vmem:[#allocation22_spill] sm:$0xff] }
 0x580   :  { %3115 = vmatprep.subr.bf16.mxu0 %v3095_v41  ;;  %v8042_v5 = vunpack.i.h.bf16 %v8040_v56  ;;  %vm11017_vm9 = vmmov %vm11013_vm6  ;;  %v8055_v2 = vpop.permute.xlu1 %8054 }
 0x581   :  { %v3198_v1 = vsel %vm11013_vm6, %v8037_v38, %v8031_v11  ;;  %vm11018_vm6 = vcmp.lt.s32.totalorder %v8473_v9, 113 }
 0x582   :  { %v7529_v63 = vpack.c.bf16 %v3198_v1, %v11016_v36 }
 0x583   :  { %7501 = vmatmul.mubr.msk.bf16.vlgmr.msra.gmra.mxu1 %vm11011_vm8, %v2885_v48  ;;  %v2997_v48 = vpack.c.bf16 %v7502_v13, %v7502_v13  ;;  %v8046_v13 = vunpack.i.l.bf16 %v8045_v12 }
 0x584   :  { %7515 = vmatpush1.bf16.msk.msra.mxu1 %vm9457_vm11, %v7514_v6  ;;  %3078 = vmatprep.mubr.bf16.mxu1 %v10855_v4  ;;  %v11014_v6 = vld [vmem:[#allocation21_spill] sm:$0xff] }
 0x585   :  { %3156 = vmatprep.subr.bf16.mxu1 %v3097_v43  ;;  %v7522_v41 = vpack.c.bf16 %v3196_v18, %v11014_v6  ;;  %v8369_v43 = vld [vmem:[%s10581_s0 + $0x10] sm:$0xff]  ;;  %v8047_v18 = vunpack.i.h.bf16 %v8045_v12  ;;  %v3308_v1 = vsel %vm11018_vm6, %v8042_v5, %v8046_v13 }
 0x586   :  { %7509 = vmatmul.mubr.msk.bf16.vlgmr.msra.gmra.mxu0 %vm11015_vm14, %v2997_v48  ;;  %v3096_v58 = vpack.c.bf16 %v9265_v23, %v8369_v43  ;;  %v3197_v43 = vsel %vm11017_vm9, %v8031_v11, %v8032_v62  ;;  %vm11019_vm14 = vmmov %vm11017_vm9  ;;  %v11032_v11 = vld [vmem:[#allocation24_spill] sm:$0xff] }
 0x587   :  { %3116 = vmatpush1.bf16.msra.mxu0 %v3094_v49  ;;  %3133 = vmatprep.mubr.bf16.mxu0 %v10855_v4  ;;  %v8041_v49 = vunpack.i.l.bf16 %v8040_v56  ;;  %v11024_v56 = vld [vmem:[#allocation23_spill] sm:$0xff]  ;;  %vm11025_vm9 = vmmov %vm11018_vm6 }
 0x588   :  { %7523 = vmatprep.subr.msk.bf16.mxu0 %vm9373_vm1, %v7522_v41  ;;  %v8050_v41 = vpop.permute.xlu0 %8049  ;;  %v7525_v62 = vpack.c.bf16 %v3197_v43, %v11024_v56  ;;  %vm10708_vm6 = vmpackc.low %vm8766_vm5, %vm8766_vm5  ;;  %v8056_v43 = vunpack.i.l.bf16 %v8055_v2 }
 0x589   :  { %v8052_v56 = vunpack.i.h.bf16 %v8050_v41 }
 0x58b   :  { %7516 = vmatmul.mubr.msk.bf16.vlgmr.msra.gmra.mxu1 %vm11011_vm8, %v2997_v48  ;;  %v3195_v48 = vsel %vm11019_vm14, %v8036_v3, %v8037_v38  ;;  %vm11020_vm8 = vcmp.le.s32.totalorder %v8492_v19, 14  ;;  %v7537_v3 = vpack.c.bf16 %v3308_v1, %v11026_v52  ;;  %vm11027_vm14 = vcmask 130048   ;;  %v7520_v1 = vld [vmem:[%s10583_s1 + $0xb8] sm:$0xff]  ;;  %v11033_v52 = vld [vmem:[#allocation26_spill] sm:$0xff] }
 0x58c   :  { %3157 = vmatpush1.bf16.msra.mxu1 %v3096_v58  ;;  %3174 = vmatprep.mubr.bf16.mxu1 %v10855_v4  ;;  %vm9514_vm1 = vmpackc.low %vm11020_vm8, %vm11020_vm8  ;;  %v11021_v58 = vmov 0  ;;  %v11029_v38 = vmov 0  ;;  %v7532_v12 = vpack.c.bf16 %v3195_v48, %v11032_v11  ;;  %v8057_v48 = vunpack.i.h.bf16 %v8055_v2 }
 0x58d   :  { %7530 = vmatprep.subr.msk.bf16.mxu1 %vm9385_vm2, %v7529_v63  ;;  %v11022_v58 = vsel %vm9514_vm1, 4294967295, %v11021_v58  ;;  %v3310_v63 = vsel %vm11025_vm9, %v8047_v18, %v8041_v49  ;;  %vm11028_vm2 = vcmp.le.s32.totalorder %v8495_v20, 14  ;;  %vm10711_vm9 = vmpackc.low %vm8782_vm7, %vm8782_vm7 }
 0x58e   :  { %11023 = vst [vmem:[#allocation54_spill] sm:$0xff] %v11022_v58  ;;  %7518 = vmatmul.mubr.msk.bf16.vlgmr.msra.gmra.mxu0 %vm11027_vm14, %v3093_v54  ;;  %vm9529_vm8 = vmpackc.low %vm11028_vm2, %vm11028_vm2  ;;  %v7544_v36 = vpack.c.bf16 %v3310_v63, %v11033_v52 }
 0x58f   :  { %v11030_v38 = vsel %vm9529_vm8, 4294967295, %v11029_v38  ;;  %7526 = vmatpush1.bf16.msk.msra.mxu0 %vm9514_vm1, %v7525_v62  ;;  %3245 = vmatprep.mubr.bf16.mxu0 %v10855_v4  ;;  %vm11034_vm2 = vmmov %vm11027_vm14  ;;  %v8051_v62 = vunpack.i.l.bf16 %v8050_v41  ;;  %vm11035_vm14 = vcmp.lt.s32.totalorder %v8473_v9, 113  ;;  %v8065_v41 = vpop.permute.xlu1 %8064 }
 0x590   :  { %11031 = vst [vmem:[#allocation55_spill] sm:$0xff] %v11030_v38  ;;  %7538 = vmatprep.subr.msk.bf16.mxu0 %vm10708_vm6, %v7537_v3  ;;  %v3309_v11 = vsel %vm11035_vm14, %v8041_v49, %v8042_v5  ;;  %vm11037_vm6 = vmmov %vm11035_vm14  ;;  %v8060_v3 = vpop.permute.xlu0 %8059  ;;  %v11040_v49 = vld [vmem:[#allocation29_spill] sm:$0xff]  ;;  %v8066_v35 = vunpack.i.l.bf16 %v8065_v41 }
 0x591   :  { %v3307_v2 = vsel %vm11037_vm6, %v8046_v13, %v8047_v18  ;;  %vm10712_vm14 = vmpackc.low %vm8724_vm15, %vm8724_vm15  ;;  %v8062_v27 = vunpack.i.h.bf16 %v8060_v3  ;;  %v7535_v13 = vld [vmem:[%s10583_s1 + $0xc0] sm:$0xff] }
 0x592   :  { %vm10717_vm6 = vmpackc.low %vm8747_vm13, %vm8747_vm13  ;;  %v11043_v18 = vld [vmem:[#allocation30_spill] sm:$0xff] }
 0x593   :  { %7519 = vmatmul.mubr.msk.bf16.vlgmr.msra.gmra.mxu1 %vm11034_vm2, %v3093_v54  ;;  %v3205_v54 = vpack.c.bf16 %v7520_v1, %v7520_v1  ;;  %vm11036_vm2 = vcmp.lt.s32.totalorder %v8473_v9, 112  ;;  %v11042_v1 = vld [vmem:[#allocation28_spill] sm:$0xff] }
 0x594   :  { %7533 = vmatpush1.bf16.msk.msra.mxu1 %vm9529_vm8, %v7532_v12  ;;  %3286 = vmatprep.mubr.bf16.mxu1 %v10855_v4  ;;  %v3420_v63 = vsel %vm11036_vm2, %v8052_v56, %v8056_v43  ;;  %v11038_v12 = vld [vmem:[#allocation27_spill] sm:$0xff]  ;;  %vm11039_vm10 = vmmov %vm11036_vm2  ;;  %v7547_v6 = vpack.c.bf16 %v3307_v2, %v11042_v1 }
 0x595   :  { %7545 = vmatprep.subr.msk.bf16.mxu1 %vm10711_vm9, %v7544_v36  ;;  %v7540_v52 = vpack.c.bf16 %v3309_v11, %v11038_v12  ;;  %v3422_v5 = vsel %vm11039_vm10, %v8057_v48, %v8051_v62  ;;  %v7552_v36 = vpack.c.bf16 %v3420_v63, %v11040_v49  ;;  %vm11041_vm9 = vcmask 130048   ;;  %v11055_v49 = vld [vmem:[#allocation36_spill] sm:$0xff] }
 0x596   :  { %7527 = vmatmul.mubr.msk.bf16.vlgmr.msra.gmra.mxu0 %vm11041_vm9, %v3205_v54  ;;  %v7556_v11 = vpack.c.bf16 %v3422_v5, %v11043_v18  ;;  %vm11044_vm10 = vmmov %vm11041_vm9  ;;  %v8061_v63 = vunpack.i.l.bf16 %v8060_v3  ;;  %v11048_v3 = vld [vmem:[#allocation31_spill] sm:$0xff]  ;;  %v11050_v18 = vld [vmem:[#allocation33_spill] sm:$0xff] }
 0x597   :  { %7541 = vmatpush1.bf16.msk.msra.mxu0 %vm9448_vm12, %v7540_v52  ;;  %3357 = vmatprep.mubr.bf16.mxu0 %v10855_v4  ;;  %v8067_v52 = vunpack.i.h.bf16 %v8065_v41  ;;  %vm11045_vm9 = vmmov %vm11036_vm2  ;;  %vm11046_vm2 = vcmp.lt.s32.totalorder %v8473_v9, 111  ;;  %vm11053_vm12 = vcmask 130048  }
 0x598   :  { %7553 = vmatprep.subr.msk.bf16.mxu0 %vm10712_vm14, %v7552_v36  ;;  %v3421_v2 = vsel %vm11045_vm9, %v8051_v62, %v8052_v56  ;;  %v3532_v5 = vsel %vm11046_vm2, %v8062_v27, %v8066_v35  ;;  %vm11049_vm14 = vmmov %vm11046_vm2  ;;  %v11052_v56 = vld [vmem:[#allocation34_spill] sm:$0xff]  ;;  %vm11056_vm2 = vnez %v11055_v49 }
 0x599   :  { %v3534_v36 = vsel %vm11049_vm14, %v8067_v52, %v8061_v63  ;;  %v7561_v62 = vpack.c.bf16 %v3532_v5, %v11052_v56  ;;  %vm11058_vm14 = vmmov %vm11053_vm12 }
 0x59b   :  { %7534 = vmatmul.mubr.msk.bf16.vlgmr.msra.gmra.mxu1 %vm11044_vm10, %v3205_v54  ;;  %v3317_v54 = vpack.c.bf16 %v7535_v13, %v7535_v13  ;;  %vm11047_vm10 = vmmov %vm11045_vm9  ;;  %vm11051_vm9 = vnez %v11050_v18  ;;  %v11054_v13 = vld [vmem:[#allocation32_spill] sm:$0xff] }
 0x59c   :  { %7548 = vmatpush1.bf16.msk.msra.mxu1 %vm9457_vm11, %v7547_v6  ;;  %3398 = vmatprep.mubr.bf16.mxu1 %v10855_v4  ;;  %v3419_v41 = vsel %vm11047_vm10, %v8056_v43, %v8057_v48  ;;  %v3430_v6 = vpack.c.bf16 %v3421_v2, %v11048_v3  ;;  %vm10742_vm11 = vmpackc.low %vm11051_vm9, %vm11051_vm9  ;;  %v7550_v43 = vld [vmem:[%s10583_s1 + $0xc8] sm:$0xff] }
 0x59d   :  { %7557 = vmatprep.subr.msk.bf16.mxu1 %vm10717_vm6, %v7556_v11  ;;  %v3432_v11 = vpack.c.bf16 %v3419_v41, %v11054_v13  ;;  %vm10741_vm10 = vmpackc.low %vm11056_vm2, %vm11056_vm2  ;;  %v11057_v48 = vld [vmem:[#allocation35_spill] sm:$0xff]  ;;  %v3429_v41 = vpack.c.bf16 %v7550_v43, %v7550_v43  ;;  %vm11062_vm6 = vcmask 130048  }
 0x59e   :  { %7542 = vmatmul.mubr.msk.bf16.vlgmr.msra.gmra.mxu0 %vm11053_vm12, %v3317_v54  ;;  %v7568_v2 = vpack.c.bf16 %v3534_v36, %v11057_v48  ;;  %vm11059_vm12 = vcmp.lt.s32.totalorder %v8473_v9, 111 }
 0x59f   :  { %3452 = vmatpush1.bf16.msra.mxu0 %v3430_v6  ;;  %3469 = vmatprep.mubr.bf16.mxu0 %v10855_v4  ;;  %v3533_v5 = vsel %vm11059_vm12, %v8061_v63, %v8062_v27  ;;  %v11061_v6 = vld [vmem:[#allocation37_spill] sm:$0xff]  ;;  %v7559_v27 = vld [vmem:[%s10583_s1 + $0xd0] sm:$0xff] }
 0x5a0   :  { %7562 = vmatprep.subr.msk.bf16.mxu0 %vm10742_vm11, %v7561_v62  ;;  %v7564_v36 = vpack.c.bf16 %v3533_v5, %v11061_v6  ;;  %v11063_v62 = vld [vmem:[#allocation38_spill] sm:$0xff] }
 0x5a3   :  { %7549 = vmatmul.mubr.msk.bf16.vlgmr.msra.gmra.mxu1 %vm11058_vm14, %v3317_v54  ;;  %vm11060_vm14 = vmmov %vm11059_vm12 }
 0x5a4   :  { %3493 = vmatpush1.bf16.msra.mxu1 %v3432_v11  ;;  %3510 = vmatprep.mubr.bf16.mxu1 %v10855_v4  ;;  %v3531_v54 = vsel %vm11060_vm14, %v8066_v35, %v8067_v52  ;;  %vm11064_vm12 = vmmov %vm11062_vm6  ;;  %v3541_v35 = vpack.c.bf16 %v7559_v27, %v7559_v27 }
 0x5a5   :  { %7569 = vmatprep.subr.msk.bf16.mxu1 %vm10741_vm10, %v7568_v2  ;;  %v7571_v11 = vpack.c.bf16 %v3531_v54, %v11063_v62  ;;  %vm11065_vm14 = vmmov %vm11062_vm6 }
 0x5a6   :  { %7554 = vmatmul.mubr.msk.bf16.vlgmr.msra.gmra.mxu0 %vm11062_vm6, %v3429_v41 }
 0x5a7   :  { %7565 = vmatpush1.bf16.msk.msra.mxu0 %vm9514_vm1, %v7564_v36  ;;  %3581 = vmatprep.mubr.bf16.mxu0 %v10855_v4 }
 0x5ab   :  { %7558 = vmatmul.mubr.msk.bf16.vlgmr.msra.gmra.mxu1 %vm11064_vm12, %v3429_v41  ;;  %vm11066_vm12 = vcmp.lt.s32.totalorder %v8473_v9, 16 }
 0x5ac   :  { %7572 = vmatpush1.bf16.msk.msra.mxu1 %vm9529_vm8, %v7571_v11  ;;  %3622 = vmatprep.mubr.bf16.mxu1 %v10855_v4  ;;  %vm11069_vm10 = vmmov %vm11066_vm12  ;;  %vm11072_vm8 = vnez %v10766_v29 }
 0x5ad   :  { %vm11070_vm11 = vmmov %vm11069_vm10 }
 0x5ae   :  { %7566 = vmatmul.mubr.msk.bf16.vlgmr.msra.gmra.mxu0 %vm11062_vm6, %v3541_v35  ;;  %vm11067_vm6 = vcmp.lt.s32.totalorder %v8473_v9, 17 }
 0x5af   :  { %3736 = vmatprep.mubr.bf16.mxu0 %v10855_v4 }
 0x5b3   :  { %7573 = vmatmul.mubr.msk.bf16.vlgmr.msra.gmra.mxu1 %vm11065_vm14, %v3541_v35  ;;  %vm11068_vm14 = vcmask 1043456  }
 0x5b4   :  { %3777 = vmatprep.mubr.bf16.mxu1 %v10855_v4 }
 0x62e   :  { %v2734_v52 = vpop.f32.mrf.mxu0 }
 0x630   :  { %v2736_v43 = vpop.f32.mrf.mxu0 }
 0x632   :  { %v2738_v5 = vpop.f32.mrf.mxu0 }
 0x633   :  { %v2775_v63 = vpop.f32.mrf.mxu1 }
 0x634   :  { %v2739_v54 = vpop.f32.mrf.mxu0 }
 0x635   :  { %v2777_v2 = vpop.f32.mrf.mxu1 }
 0x636   :  { %v2819_v11 = vpop.f32.mrf.mxu0 }
 0x637   :  { %v2779_v41 = vpop.f32.mrf.mxu1 }
 0x638   :  { %v2821_v6 = vpop.f32.mrf.mxu0 }
 0x639   :  { %v2780_v36 = vpop.f32.mrf.mxu1  ;;  %v2822_v37 = vadd.f32 %v2821_v6, %v2736_v43 }
 0x63a   :  { %v2823_v48 = vpop.f32.mrf.mxu0 }
 0x63b   :  { %v2860_v62 = vpop.f32.mrf.mxu1 }
 0x63c   :  { %v2824_v13 = vpop.f32.mrf.mxu0 }
 0x63d   :  { %v2862_v27 = vpop.f32.mrf.mxu1 }
 0x63e   :  { %v2927_v1 = vpop.f32.mrf.mxu0 }
 0x63f   :  { %v2864_v56 = vpop.f32.mrf.mxu1 }
 0x640   :  { %v2929_v12 = vpop.f32.mrf.mxu0 }
 0x641   :  { %v2865_v3 = vpop.f32.mrf.mxu1  ;;  %v2976_v7 = vadd.f32 %v2929_v12, %v2822_v37 }
 0x642   :  { %v2931_v58 = vpop.f32.mrf.mxu0 }
 0x643   :  { %v2968_v35 = vpop.f32.mrf.mxu1 }
 0x644   :  { %v2932_v44 = vpop.f32.mrf.mxu0 }
 0x645   :  { %v2970_v38 = vpop.f32.mrf.mxu1 }
 0x646   :  { %v3039_v5 = vpop.f32.mrf.mxu0 }
 0x647   :  { %v2972_v47 = vpop.f32.mrf.mxu1 }
 0x648   :  { %v3041_v54 = vpop.f32.mrf.mxu0 }
 0x649   :  { %v2973_v8 = vpop.f32.mrf.mxu1 }
 0x64a   :  { %v3043_v55 = vpop.f32.mrf.mxu0 }
 0x64b   :  { %v3080_v41 = vpop.f32.mrf.mxu1 }
 0x64c   :  { %v3044_v39 = vpop.f32.mrf.mxu0 }
 0x64d   :  { %v3082_v36 = vpop.f32.mrf.mxu1 }
 0x64e   :  { %v3135_v48 = vpop.f32.mrf.mxu0 }
 0x64f   :  { %v3084_v60 = vpop.f32.mrf.mxu1 }
 0x650   :  { %v3137_v13 = vpop.f32.mrf.mxu0 }
 0x651   :  { %v3085_v40 = vpop.f32.mrf.mxu1 }
 0x652   :  { %v3139_v0 = vpop.f32.mrf.mxu0  ;;  %v2820_v40 = vadd.f32 %v2819_v11, %v2734_v52 }
 0x653   :  { %v3176_v56 = vpop.f32.mrf.mxu1 }
 0x654   :  { %v3140_v30 = vpop.f32.mrf.mxu0  ;;  %v2975_v25 = vadd.f32 %v2927_v1, %v2820_v40 }
 0x655   :  { %v3178_v3 = vpop.f32.mrf.mxu1  ;;  %v2861_v30 = vadd.f32 %v2860_v62, %v2775_v63 }
 0x656   :  { %v3247_v58 = vpop.f32.mrf.mxu0  ;;  %v3087_v23 = vadd.f32 %v3039_v5, %v2975_v25 }
 0x657   :  { %v3180_v42 = vpop.f32.mrf.mxu1 }
 0x658   :  { %v3249_v44 = vpop.f32.mrf.mxu0 }
 0x659   :  { %v3181_v10 = vpop.f32.mrf.mxu1 }
 0x65a   :  { %v3251_v31 = vpop.f32.mrf.mxu0  ;;  %v2863_v10 = vadd.f32 %v2862_v27, %v2777_v2 }
 0x65b   :  { %v3288_v47 = vpop.f32.mrf.mxu1  ;;  %v2977_v31 = vadd.f32 %v2968_v35, %v2861_v30  ;;  %v9684_v30 = vld [vmem:[%s10582_s3] sm:$0xff] }
 0x65c   :  { %v3252_v57 = vpop.f32.mrf.mxu0 }
 0x65d   :  { %v3290_v8 = vpop.f32.mrf.mxu1  ;;  %v3088_v57 = vadd.f32 %v3041_v54, %v2976_v7  ;;  %v3089_v18 = vadd.f32 %v3080_v41, %v2977_v31  ;;  %v3637_v54 = vpop.permute.xlu0 %3636 }
 0x65e   :  { %v3359_v55 = vpop.f32.mrf.mxu0 }
 0x65f   :  { %v3292_v53 = vpop.f32.mrf.mxu1  ;;  %v3184_v11 = vadd.f32 %v3137_v13, %v3088_v57  ;;  %v3185_v43 = vadd.f32 %v3176_v56, %v3089_v18 }
 0x660   :  { %v3361_v39 = vpop.f32.mrf.mxu0  ;;  %v2978_v53 = vadd.f32 %v2970_v38, %v2863_v10 }
 0x661   :  { %v3293_v26 = vpop.f32.mrf.mxu1  ;;  %v3296_v62 = vadd.f32 %v3249_v44, %v3184_v11 }
 0x662   :  { %v3363_v45 = vpop.f32.mrf.mxu0  ;;  %v3183_v26 = vadd.f32 %v3135_v48, %v3087_v23  ;;  %v3090_v52 = vadd.f32 %v3082_v36, %v2978_v53 }
 0x663   :  { %v3400_v60 = vpop.f32.mrf.mxu1  ;;  %v3408_v2 = vadd.f32 %v3361_v39, %v3296_v62 }
 0x664   :  { %v3364_v42 = vpop.f32.mrf.mxu0  ;;  %v3295_v45 = vadd.f32 %v3247_v58, %v3183_v26  ;;  %v3186_v40 = vadd.f32 %v3178_v3, %v3090_v52 }
 0x665   :  { %v3402_v59 = vpop.f32.mrf.mxu1  ;;  %v8392_v42 = vmov 5  }
 0x666   :  { %v3471_v14 = vpop.f32.mrf.mxu0  ;;  %v3407_v63 = vadd.f32 %v3359_v55, %v3295_v45  ;;  %v3298_v12 = vadd.f32 %v3290_v8, %v3186_v40  ;;  %8149 = vset.pattern.permute.xlu0 %v8392_v42 }
 0x667   :  { %v3404_v0 = vpop.f32.mrf.mxu1 }
 0x668   :  { %v3473_v50 = vpop.f32.mrf.mxu0  ;;  %v3519_v38 = vadd.f32 %v3471_v14, %v3407_v63  ;;  %v3410_v35 = vadd.f32 %v3402_v59, %v3298_v12 }
 0x669   :  { %v3405_v28 = vpop.f32.mrf.mxu1  ;;  %v3520_v5 = vadd.f32 %v3473_v50, %v3408_v2 }
 0x66a   :  { %v3475_v1 = vpop.f32.mrf.mxu0  ;;  %v3297_v28 = vadd.f32 %v3288_v47, %v3185_v43 }
 0x66b   :  { %v3512_v21 = vpop.f32.mrf.mxu1 }
 0x66c   :  { %v3476_v25 = vpop.f32.mrf.mxu0  ;;  %v3409_v27 = vadd.f32 %v3400_v60, %v3297_v28 }
 0x66d   :  { %v3514_v6 = vpop.f32.mrf.mxu1 }
 0x66e   :  { %v3583_v23 = vpop.f32.mrf.mxu0  ;;  %v3521_v13 = vadd.f32 %v3512_v21, %v3409_v27  ;;  %v3522_v18 = vadd.f32 %v3514_v6, %v3410_v35  ;;  %v7575_v27 = vld [vmem:[%s10583_s1 + $0xe0] sm:$0xff] }
 0x66f   :  { %v3516_v37 = vpop.f32.mrf.mxu1  ;;  %v3631_v41 = vadd.f32 %v3583_v23, %v3519_v38 }
 0x670   :  { %v3585_v48 = vpop.f32.mrf.mxu0 }
 0x671   :  { %v3517_v7 = vpop.f32.mrf.mxu1  ;;  %v3632_v56 = vadd.f32 %v3585_v48, %v3520_v5  ;;  %v9653_v55 = vadd.f32 %v3637_v54, %v3631_v41 }
 0x672   :  { %v3587_v58 = vpop.f32.mrf.mxu0 }
 0x673   :  { %v3624_v36 = vpop.f32.mrf.mxu1  ;;  %v9655_v47 = vadd.f32 %v3637_v54, %v3632_v56  ;;  %v3684_v58 = vpack.c.bf16 %v7575_v27, %v7575_v27 }
 0x674   :  { %v3633_v44 = vadd.f32 %v3624_v36, %v3521_v13  ;;  %v3588_v39 = vpop.f32.mrf.mxu0 }
 0x675   :  { %v3626_v3 = vpop.f32.mrf.mxu1  ;;  %v8079_v50 = vpack.i.bf16 %v9655_v47, %v9653_v55 }
 0x676   :  { %v3634_v14 = vadd.f32 %v3626_v3, %v3522_v18  ;;  %v9661_v0 = vadd.f32 %v3637_v54, %v3633_v44 }
 0x677   :  { %v3628_v8 = vpop.f32.mrf.mxu1  ;;  %8080 = vrot.lane.b32.xlu0 %v8079_v50, %s8379_s24  ;;  %8070 = vrot.lane.b32.xlu1 %v8079_v50, %s8378_s23 }
 0x678   :  { %v9657_v60 = vadd.f32 %v3637_v54, %v3634_v14 }
 0x679   :  { %v3629_v59 = vpop.f32.mrf.mxu1 }
 0x67a   :  { %v8074_v21 = vpack.i.bf16 %v9657_v60, %v9661_v0 }
 0x67b   :  { %8090 = vrot.lane.b32.xlu0 %v8079_v50, %s8381_s25 }
 0x67c   :  { %8075 = vrot.lane.b32.xlu1 %v8074_v21, %s8378_s23 }
 0x67f   :  { %8100 = vrot.lane.b32.xlu0 %v8079_v50, %s8382_s26 }
 0x680   :  { %8085 = vrot.lane.b32.xlu1 %v8074_v21, %s8379_s24 }
 0x683   :  { %8110 = vrot.lane.b32.xlu0 %v8079_v50, %s8383_s27 }
 0x684   :  { %8095 = vrot.lane.b32.xlu1 %v8074_v21, %s8381_s25 }
 0x687   :  { %8120 = vrot.lane.b32.xlu0 %v8079_v50, %s8384_s28 }
 0x688   :  { %8105 = vrot.lane.b32.xlu1 %v8074_v21, %s8382_s26 }
 0x68b   :  { %8130 = vrot.lane.b32.xlu0 %v8079_v50, %s8385_s29 }
 0x68c   :  { %8115 = vrot.lane.b32.xlu1 %v8074_v21, %s8383_s27 }
 0x68f   :  { %8140 = vrot.lane.b32.xlu0 %v8079_v50, %s8386_s30 }
 0x690   :  { %8125 = vrot.lane.b32.xlu1 %v8074_v21, %s8384_s28 }
 0x693   :  { %4736 = vperm.xlu0 %8149, %v9684_v30  }
 0x694   :  { %8135 = vrot.lane.b32.xlu1 %v8074_v21, %s8385_s29 }
 0x698   :  { %8145 = vrot.lane.b32.xlu1 %v8074_v21, %s8386_s30 }
 0x6e9   :  { %v8081_v10 = vpop.permute.xlu0 %8080  ;;  %v8071_v31 = vpop.permute.xlu1 %8070 }
 0x6ea   :  { %v8073_v53 = vunpack.i.h.bf16 %v8071_v31  ;;  %v8072_v57 = vunpack.i.l.bf16 %v8071_v31  ;;  %v8083_v26 = vunpack.i.h.bf16 %v8081_v10  ;;  %v8082_v52 = vunpack.i.l.bf16 %v8081_v10 }
 0x6ec   :  { %v3676_v11 = vsel %vm11066_vm12, %v8072_v57, %v8073_v53  ;;  %v3653_v62 = vsel %vm11067_vm6, %v8082_v52, %v8083_v26  ;;  %vm11071_vm12 = vmmov %vm11069_vm10  ;;  %vm11073_vm6 = vnez %v10770_v32 }
 0x6ed   :  { %v3686_v45 = vpack.c.bf16 %v3676_v11, %v3676_v11  ;;  %v8091_v6 = vpop.permute.xlu0 %8090 }
 0x6ee   :  { %v8076_v1 = vpop.permute.xlu1 %8075  ;;  %v8093_v63 = vunpack.i.h.bf16 %v8091_v6  ;;  %v8092_v37 = vunpack.i.l.bf16 %v8091_v6 }
 0x6ef   :  { %v8078_v43 = vunpack.i.h.bf16 %v8076_v1  ;;  %v8077_v40 = vunpack.i.l.bf16 %v8076_v1  ;;  %7576 = vmatprep.subr.msk.bf16.mxu0 %vm11068_vm14, %v3686_v45 }
 0x6f1   :  { %v3674_v25 = vsel %vm11069_vm10, %v8077_v40, %v8078_v43  ;;  %v3675_v28 = vsel %vm11070_vm11, %v8073_v53, %v8077_v40  ;;  %v3677_v12 = vsel %vm11071_vm12, %v8078_v43, %v8072_v57  ;;  %vm11074_vm10 = vcmp.ge.s32.totalorder %v8486_v16, 1  ;;  %v8101_v36 = vpop.permute.xlu0 %8100 }
 0x6f2   :  { %v3688_v2 = vpack.c.bf16 %v3674_v25, %v3674_v25  ;;  %v8086_v38 = vpop.permute.xlu1 %8085  ;;  %v3678_v7 = vsel %vm11072_vm8, %v3677_v12, 0.0  ;;  %v3680_v23 = vsel %vm11073_vm6, %v3675_v28, 0.0  ;;  %v3656_v35 = vsel %vm11074_vm10, %v3653_v62, 0.0  ;;  %v7574_v28 = vld [vmem:[%s10583_s1 + $0xd8] sm:$0xff] }
 0x6f3   :  { %v8088_v5 = vunpack.i.h.bf16 %v8086_v38  ;;  %v8087_v41 = vunpack.i.l.bf16 %v8086_v38  ;;  %vm11075_vm11 = vcmp.lt.s32.totalorder %v8473_v9, 15  ;;  %v3685_v48 = vpack.c.bf16 %v3678_v7, %v3678_v7 }
 0x6f4   :  { %v3893_v54 = vsel %vm11075_vm11, %v8092_v37, %v8093_v63  ;;  %7578 = vmatprep.subr.msk.bf16.mxu1 %vm11068_vm14, %v3688_v2  ;;  %v3687_v13 = vpack.c.bf16 %v3680_v23, %v3680_v23  ;;  %vm11076_vm12 = vcmp.lt.s32.totalorder %v8473_v9, 17  ;;  %vm11079_vm10 = vcmp.ge.s32.totalorder %v8503_v24, 1  ;;  %vm11080_vm11 = vmmov %vm11068_vm14 }
 0x6f5   :  { %v3654_v18 = vsel %vm11076_vm12, %v8088_v5, %v8082_v52  ;;  %vm11077_vm1 = vmmov %vm11076_vm12  ;;  %v3693_v8 = vsel %vm11080_vm11, %v3685_v48, 0  ;;  %v3663_v50 = vpack.c.bf16 %v3656_v35, %v3656_v35  ;;  %vm11082_vm14 = vcmp.le.s32.totalorder %v8486_v16, 14 }
 0x6f6   :  { %v3651_v56 = vsel %vm11077_vm1, %v8087_v41, %v8088_v5  ;;  %vm11078_vm6 = vmmov %vm11077_vm1  ;;  %v8096_v14 = vpop.permute.xlu1 %8095  ;;  %v3896_v59 = vsel %vm11082_vm14, %v3893_v54, 0.0  ;;  %v8103_v21 = vunpack.i.h.bf16 %v8101_v36  ;;  %3719 = vmatpush1.bf16.msra.mxu0 %v3693_v8  ;;  %v8102_v31 = vunpack.i.l.bf16 %v8101_v36 }
 0x6f7   :  { %v3652_v3 = vsel %vm11078_vm6, %v8083_v26, %v8087_v41  ;;  %v3658_v44 = vsel %vm11079_vm10, %v3651_v56, 0.0  ;;  %vm11081_vm8 = vmmov %vm11080_vm11  ;;  %v8098_v42 = vunpack.i.h.bf16 %v8096_v14  ;;  %v8097_v10 = vunpack.i.l.bf16 %v8096_v14 }
 0x6f8   :  { %v3699_v39 = vsel %vm11081_vm8, %v3687_v13, 0  ;;  %vm11083_vm1 = vmmov %vm11081_vm8  ;;  %v3665_v53 = vpack.c.bf16 %v3658_v44, %v3658_v44  ;;  %v3655_v57 = vsel %vm8556_vm3, %v3654_v18, 0.0  ;;  %vm11084_vm6 = vnez %v10778_v51  ;;  %v7584_v44 = vld [vmem:[%s10583_s1 + $0xe8] sm:$0xff] }
 0x6f9   :  { %3760 = vmatpush1.bf16.msra.mxu1 %v3699_v39  ;;  %7580 = vmatprep.subr.msk.bf16.mxu0 %vm11083_vm1, %v3663_v50  ;;  %v3657_v26 = vsel %vm11084_vm6, %v3652_v3, 0.0  ;;  %vm11085_vm8 = vcmp.lt.s32.totalorder %v8473_v9, 15  ;;  %vm11087_vm10 = vcmp.le.s32.totalorder %v8503_v24, 14  ;;  %vm11088_vm11 = vcmask 64512  }
 0x6fa   :  { %v3894_v52 = vsel %vm11085_vm8, %v8098_v42, %v8092_v37  ;;  %vm11086_vm12 = vmmov %vm11085_vm8  ;;  %7577 = vmatmul.mubr.msk.bf16.vlgmr.msra.gmra.mxu0 %vm11088_vm11, %v3684_v58  ;;  %v8106_v6 = vpop.permute.xlu1 %8105  ;;  %v3662_v1 = vpack.c.bf16 %v3655_v57, %v3655_v57  ;;  %v3664_v43 = vpack.c.bf16 %v3657_v26, %v3657_v26  ;;  %v3903_v40 = vpack.c.bf16 %v3896_v59, %v3896_v59 }
 0x6fb   :  { %v3891_v11 = vsel %vm11086_vm12, %v8097_v10, %v8098_v42  ;;  %vm11089_vm14 = vmmov %vm11088_vm11  ;;  %vm11091_vm6 = vcmask 1043456   ;;  %v8108_v37 = vunpack.i.h.bf16 %v8106_v6  ;;  %v8107_v25 = vunpack.i.l.bf16 %v8106_v6  ;;  %3833 = vmatprep.mubr.bf16.mxu0 %v10855_v4  ;;  %v8111_v42 = vpop.permute.xlu0 %8110  ;;  %v7589_v6 = vld [vmem:[%s10583_s1 + $0xf0] sm:$0xff] }
 0x6fc   :  { %v3898_v45 = vsel %vm11087_vm10, %v3891_v11, 0.0  ;;  %7579 = vmatmul.mubr.msk.bf16.vlgmr.msra.gmra.mxu1 %vm11089_vm14, %v3684_v58  ;;  %vm11090_vm1 = vmmov %vm11085_vm8  ;;  %7582 = vmatprep.subr.msk.bf16.mxu1 %vm11091_vm6, %v3665_v53  ;;  %v3895_v12 = vsel %vm8604_vm0, %v3894_v52, 0.0  ;;  %vm11092_vm8 = vcmp.lt.s32.totalorder %v8473_v9, 1  ;;  %vm11096_vm11 = vcmp.ge.s32.totalorder %v8503_v24, 1 }
 0x6fd   :  { %v3892_v62 = vsel %vm11090_vm1, %v8093_v63, %v8097_v10  ;;  %v4017_v2 = vsel %vm11092_vm8, %v8102_v31, %v8103_v21  ;;  %vm11093_vm12 = vmmov %vm11091_vm6  ;;  %v3905_v7 = vpack.c.bf16 %v3898_v45, %v3898_v45  ;;  %3874 = vmatprep.mubr.bf16.mxu1 %v10855_v4  ;;  %v3661_v35 = vpack.c.bf16 %v7574_v28, %v7574_v28 }
 0x6fe   :  { %v3790_v38 = vsel %vm11093_vm12, %v3662_v1, 0  ;;  %vm11094_vm10 = vmmov %vm11091_vm6  ;;  %v3902_v5 = vpack.c.bf16 %v3895_v12, %v3895_v12  ;;  %v3897_v41 = vsel %vm10996_vm4, %v3892_v62, 0.0  ;;  %vm11098_vm1 = vcmp.ge.s32.totalorder %v8486_v16, 1  ;;  %v8116_v39 = vpop.permute.xlu1 %8115 }
 0x6ff   :  { %v3796_v63 = vsel %vm11094_vm10, %v3664_v43, 0  ;;  %vm11095_vm6 = vmmov %vm11092_vm8  ;;  %3816 = vmatpush1.bf16.msra.mxu0 %v3790_v38  ;;  %v4020_v54 = vsel %vm11098_vm1, %v4017_v2, 0.0  ;;  %v3904_v13 = vpack.c.bf16 %v3897_v41, %v3897_v41  ;;  %vm11106_vm1 = vcmp.ge.s32.totalorder %v8492_v19, 1 }
 0x700   :  { %v4015_v23 = vsel %vm11095_vm6, %v8107_v25, %v8108_v37  ;;  %3857 = vmatpush1.bf16.msra.mxu1 %v3796_v63  ;;  %vm11097_vm14 = vmmov %vm11094_vm10  ;;  %v4027_v58 = vpack.c.bf16 %v4020_v54, %v4020_v54  ;;  %v3901_v50 = vpack.c.bf16 %v7584_v44, %v7584_v44  ;;  %v8118_v10 = vunpack.i.h.bf16 %v8116_v39 }
 0x701   :  { %v4022_v27 = vsel %vm11096_vm11, %v4015_v23, 0.0  ;;  %7585 = vmatprep.subr.msk.bf16.mxu0 %vm11097_vm14, %v3903_v40  ;;  %vm11099_vm8 = vmmov %vm11094_vm10  ;;  %v4135_v53 = vpack.c.bf16 %v9655_v47, %v9655_v47  ;;  %v4137_v57 = vpack.c.bf16 %v9657_v60, %v9657_v60  ;;  %v8113_v26 = vunpack.i.h.bf16 %v8111_v42 }
 0x702   :  { %7587 = vmatprep.subr.msk.bf16.mxu1 %vm11099_vm8, %v3905_v7  ;;  %vm11100_vm12 = vmmov %vm11095_vm6  ;;  %v4029_v18 = vpack.c.bf16 %v4022_v27, %v4022_v27  ;;  %v8112_v52 = vunpack.i.l.bf16 %v8111_v42  ;;  %v8126_v1 = vpop.permute.xlu1 %8125  ;;  %v4134_v43 = vpack.c.bf16 %v9653_v55, %v9653_v55  ;;  %v4136_v40 = vpack.c.bf16 %v9661_v0, %v9661_v0 }
 0x703   :  { %v4018_v36 = vsel %vm11100_vm12, %v8108_v37, %v8102_v31  ;;  %vm11101_vm10 = vmmov %vm11095_vm6  ;;  %vm11102_vm6 = vcmask 64512   ;;  %v8117_v31 = vunpack.i.l.bf16 %v8116_v39  ;;  %v4025_v62 = vpack.c.bf16 %v7589_v6, %v7589_v6  ;;  %v8121_v37 = vpop.permute.xlu0 %8120 }
 0x704   :  { %v4016_v48 = vsel %vm11101_vm10, %v8103_v21, %v8107_v25  ;;  %7581 = vmatmul.mubr.msk.bf16.vlgmr.msra.gmra.mxu0 %vm11102_vm6, %v3661_v35  ;;  %vm11103_vm11 = vmmov %vm11102_vm6  ;;  %v4019_v14 = vsel %vm11106_vm1, %v4018_v36, 0.0  ;;  %vm11114_vm1 = vcmp.lt.s32.totalorder %v8473_v9, 127  ;;  %v8128_v38 = vunpack.i.h.bf16 %v8126_v1 }
 0x705   :  { %7583 = vmatmul.mubr.msk.bf16.vlgmr.msra.gmra.mxu1 %vm11103_vm11, %v3661_v35  ;;  %vm11104_vm14 = vmmov %vm11099_vm8  ;;  %3953 = vmatprep.mubr.bf16.mxu0 %v10855_v4  ;;  %v4026_v59 = vpack.c.bf16 %v4019_v14, %v4019_v14  ;;  %v4250_v47 = vsel %vm11114_vm1, %v8118_v10, %v8112_v52  ;;  %v8127_v63 = vunpack.i.l.bf16 %v8126_v1  ;;  %v8123_v7 = vunpack.i.h.bf16 %v8121_v37 }
 0x706   :  { %v3910_v56 = vsel %vm11104_vm14, %v3902_v5, 0  ;;  %vm11105_vm4 = vmmov %vm11099_vm8  ;;  %vm11107_vm8 = vcmp.ge.s32.totalorder %v8495_v20, 1  ;;  %3994 = vmatprep.mubr.bf16.mxu1 %v10855_v4  ;;  %v8122_v23 = vunpack.i.l.bf16 %v8121_v37  ;;  %v7594_v5 = vld [vmem:[%s10583_s1 + $0xf8] sm:$0xff] }
 0x707   :  { %v3916_v3 = vsel %vm11105_vm4, %v3904_v13, 0  ;;  %3936 = vmatpush1.bf16.msra.mxu0 %v3910_v56  ;;  %v4021_v8 = vsel %vm11107_vm8, %v4016_v48, 0.0  ;;  %vm11108_vm12 = vmmov %vm11105_vm4  ;;  %v8136_v13 = vpop.permute.xlu1 %8135  ;;  %v4133_v56 = vpack.c.bf16 %v7594_v5, %v7594_v5 }
 0x708   :  { %3977 = vmatpush1.bf16.msra.mxu1 %v3916_v3  ;;  %7590 = vmatprep.subr.msk.bf16.mxu0 %vm11108_vm12, %v4027_v58  ;;  %vm11109_vm10 = vmmov %vm11105_vm4  ;;  %v4028_v21 = vpack.c.bf16 %v4021_v8, %v4021_v8 }
 0x709   :  { %7592 = vmatprep.subr.msk.bf16.mxu1 %vm11109_vm10, %v4029_v18  ;;  %vm11110_vm4 = vmmov %vm11102_vm6  ;;  %v8131_v18 = vpop.permute.xlu0 %8130 }
 0x70a   :  { %vm11111_vm6 = vmmov %vm11110_vm4  ;;  %v8132_v42 = vunpack.i.l.bf16 %v8131_v18 }
 0x70b   :  { %vm11112_vm11 = vmmov %vm11109_vm10 }
 0x70c   :  { %7586 = vmatmul.mubr.msk.bf16.vlgmr.msra.gmra.mxu0 %vm11110_vm4, %v3901_v50  ;;  %v4034_v11 = vsel %vm11112_vm11, %v4026_v59, 0  ;;  %vm11113_vm14 = vmmov %vm11109_vm10  ;;  %vm11117_vm4 = vcmp.le.s32.totalorder %v8503_v24, 14  ;;  %v8137_v59 = vunpack.i.l.bf16 %v8136_v13 }
 0x70d   :  { %7588 = vmatmul.mubr.msk.bf16.vlgmr.msra.gmra.mxu1 %vm11111_vm6, %v3901_v50  ;;  %v4040_v45 = vsel %vm11113_vm14, %v4028_v21, 0  ;;  %4060 = vmatpush1.bf16.msra.mxu0 %v4034_v11  ;;  %vm11115_vm8 = vmmov %vm11114_vm1  ;;  %v4254_v25 = vsel %vm11117_vm4, %v4250_v47, 0.0  ;;  %vm11118_vm6 = vcmp.le.s32.totalorder %v8486_v16, 14  ;;  %vm11125_vm4 = vcmp.le.s32.totalorder %v8492_v19, 14  ;;  %v8146_v47 = vpop.permute.xlu1 %8145 }
 0x70e   :  { %4101 = vmatpush1.bf16.msra.mxu1 %v4040_v45  ;;  %v4248_v60 = vsel %vm11115_vm8, %v8113_v26, %v8117_v31  ;;  %vm11116_vm12 = vmmov %vm11109_vm10  ;;  %4077 = vmatprep.mubr.bf16.mxu0 %v10855_v4  ;;  %v4261_v35 = vpack.c.bf16 %v4254_v25, %v4254_v25  ;;  %v8138_v50 = vunpack.i.h.bf16 %v8136_v13  ;;  %v8133_v21 = vunpack.i.h.bf16 %v8131_v18  ;;  %v7780_v13 = vld [vmem:[%s10583_s1 + $0x1a0] sm:$0xff] }
 0x70f   :  { %7595 = vmatprep.subr.msk.bf16.mxu0 %vm11116_vm12, %v4135_v53  ;;  %7597 = vmatprep.subr.msk.bf16.mxu1 %vm11109_vm10, %v4137_v57  ;;  %v4252_v28 = vsel %vm11118_vm6, %v4248_v60, 0.0  ;;  %vm11119_vm11 = vmmov %vm11114_vm1  ;;  %vm11123_vm12 = vcmask 64512   ;;  %vm11126_vm6 = vcmp.le.s32.totalorder %v8495_v20, 14  ;;  %v8141_v60 = vpop.permute.xlu0 %8140  ;;  %v8148_v25 = vunpack.i.h.bf16 %v8146_v47 }
 0x710   :  { %4118 = vmatprep.mubr.bf16.mxu1 %v10855_v4  ;;  %v4249_v12 = vsel %vm11119_vm11, %v8112_v52, %v8113_v26  ;;  %vm11120_vm14 = vmmov %vm11114_vm1  ;;  %v4259_v27 = vpack.c.bf16 %v4252_v28, %v4252_v28  ;;  %vm11127_vm11 = vcmp.lt.s32.totalorder %v8473_v9, 113  ;;  %v7599_v26 = vld [vmem:[%s10583_s1 + $0x100] sm:$0xff]  ;;  %v8147_v28 = vunpack.i.l.bf16 %v8146_v47 }
 0x711   :  { %v4247_v2 = vsel %vm11120_vm14, %v8117_v31, %v8118_v10  ;;  %vm11121_vm1 = vmmov %vm11109_vm10  ;;  %v4251_v41 = vsel %vm11125_vm4, %v4249_v12, 0.0  ;;  %v4374_v36 = vsel %vm11127_vm11, %v8128_v38, %v8122_v23  ;;  %vm11132_vm4 = vcmask 64512  }
 0x712   :  { %v4142_v55 = vsel %vm11121_vm1, %v4134_v43, 0  ;;  %vm11122_vm8 = vmmov %vm11121_vm1  ;;  %v4253_v54 = vsel %vm11126_vm6, %v4247_v2, 0.0  ;;  %v4258_v3 = vpack.c.bf16 %v4251_v41, %v4251_v41  ;;  %v4378_v44 = vsel %vm8782_vm7, %v4374_v36, 0.0 }
 0x713   :  { %v4148_v0 = vsel %vm11122_vm8, %v4136_v40, 0  ;;  %vm11124_vm10 = vmmov %vm11123_vm12  ;;  %v4260_v58 = vpack.c.bf16 %v4253_v54, %v4253_v54  ;;  %v4385_v57 = vpack.c.bf16 %v4378_v44, %v4378_v44  ;;  %v4257_v1 = vpack.c.bf16 %v7599_v26, %v7599_v26 }
 0x714   :  { %7591 = vmatmul.mubr.msk.bf16.vlgmr.msra.gmra.mxu0 %vm11123_vm12, %v4025_v62  ;;  %vm11128_vm14 = vmmov %vm11127_vm11  ;;  %v8143_v12 = vunpack.i.h.bf16 %v8141_v60  ;;  %v8142_v2 = vunpack.i.l.bf16 %v8141_v60 }
 0x715   :  { %7593 = vmatmul.mubr.msk.bf16.vlgmr.msra.gmra.mxu1 %vm11124_vm10, %v4025_v62  ;;  %4168 = vmatpush1.bf16.msra.mxu0 %v4142_v55  ;;  %v4372_v48 = vsel %vm11128_vm14, %v8123_v7, %v8127_v63  ;;  %vm11129_vm8 = vmmov %vm11121_vm1 }
 0x716   :  { %4209 = vmatpush1.bf16.msra.mxu1 %v4148_v0  ;;  %7600 = vmatprep.subr.msk.bf16.mxu0 %vm11121_vm1, %v4259_v27  ;;  %v4376_v14 = vsel %vm8766_vm5, %v4372_v48, 0.0  ;;  %vm11130_vm12 = vmmov %vm11127_vm11 }
 0x717   :  { %7602 = vmatprep.subr.msk.bf16.mxu1 %vm11129_vm8, %v4261_v35  ;;  %4185 = vmatprep.mubr.bf16.mxu0 %v10855_v4  ;;  %v4373_v8 = vsel %vm11130_vm12, %v8122_v23, %v8123_v7  ;;  %vm11131_vm10 = vmmov %vm11127_vm11  ;;  %v4383_v53 = vpack.c.bf16 %v4376_v14, %v4376_v14  ;;  %vm11137_vm8 = vcmp.ge.s32.totalorder %v8495_v20, 1  ;;  %vm11138_vm12 = vcmp.lt.s32.totalorder %v8473_v9, 112  ;;  %v7604_v7 = vld [vmem:[%s10583_s1 + $0x108] sm:$0xff] }
 0x718   :  { %4226 = vmatprep.mubr.bf16.mxu1 %v10855_v4  ;;  %v4371_v39 = vsel %vm11131_vm10, %v8127_v63, %v8128_v38  ;;  %vm11133_vm6 = vmmov %vm11132_vm4  ;;  %v4498_v45 = vsel %vm11138_vm12, %v8138_v50, %v8132_v42  ;;  %v4381_v41 = vpack.c.bf16 %v7604_v7, %v7604_v7 }
 0x719   :  { %vm11134_vm11 = vmmov %vm11121_vm1  ;;  %v4377_v11 = vsel %vm11137_vm8, %v4371_v39, 0.0  ;;  %v4502_v62 = vsel %vm8747_vm13, %v4498_v45, 0.0  ;;  %v7609_v39 = vld [vmem:[%s10583_s1 + $0x110] sm:$0xff] }
 0x71a   :  { %v4266_v10 = vsel %vm11134_vm11, %v4258_v3, 0  ;;  %vm11135_vm14 = vmmov %vm11121_vm1  ;;  %vm11136_vm1 = vcmp.ge.s32.totalorder %v8492_v19, 1  ;;  %v4384_v40 = vpack.c.bf16 %v4377_v11, %v4377_v11  ;;  %v4509_v0 = vpack.c.bf16 %v4502_v62, %v4502_v62  ;;  %v8371_v11 = vld [vmem:[%s10582_s3] sm:$0x7] }
 0x71b   :  { %v4272_v31 = vsel %vm11135_vm14, %v4260_v58, 0  ;;  %v4375_v52 = vsel %vm11136_vm1, %v4373_v8, 0.0  ;;  %vm11139_vm10 = vmmov %vm11138_vm12 }
 0x71c   :  { %7596 = vmatmul.mubr.msk.bf16.vlgmr.msra.gmra.mxu0 %vm11132_vm4, %v4133_v56  ;;  %v4496_v6 = vsel %vm11139_vm10, %v8133_v21, %v8137_v59  ;;  %vm11140_vm4 = vmmov %vm11134_vm11  ;;  %v4382_v43 = vpack.c.bf16 %v4375_v52, %v4375_v52  ;;  %vm11142_vm11 = vcmask 64512   ;;  %v4495_v27 = vsel %vm11139_vm10, %v8137_v59, %v8138_v50 }
 0x71d   :  { %7598 = vmatmul.mubr.msk.bf16.vlgmr.msra.gmra.mxu1 %vm11133_vm6, %v4133_v56  ;;  %4292 = vmatpush1.bf16.msra.mxu0 %v4266_v10  ;;  %vm11141_vm6 = vmmov %vm11140_vm4  ;;  %v4500_v37 = vsel %vm8724_vm15, %v4496_v6, 0.0  ;;  %v4508_v36 = vpack.c.bf16 %v4495_v27, %v4495_v27  ;;  %v8393_v52 = vmov 6  }
 0x71e   :  { %4333 = vmatpush1.bf16.msra.mxu1 %v4272_v31  ;;  %7605 = vmatprep.subr.msk.bf16.mxu0 %vm11140_vm4, %v4383_v53  ;;  %vm11143_vm14 = vmmov %vm11142_vm11  ;;  %v4507_v55 = vpack.c.bf16 %v4500_v37, %v4500_v37 }
 0x71f   :  { %7607 = vmatprep.subr.msk.bf16.mxu1 %vm11141_vm6, %v4385_v57  ;;  %4309 = vmatprep.mubr.bf16.mxu0 %v10855_v4  ;;  %vm11144_vm1 = vmmov %vm11140_vm4  ;;  %vm11147_vm4 = vcmp.lt.s32.totalorder %v8473_v9, 111  ;;  %v7614_v57 = vld [vmem:[%s10583_s1 + $0x118] sm:$0xff] }
 0x720   :  { %4350 = vmatprep.mubr.bf16.mxu1 %v10855_v4  ;;  %v4390_v38 = vsel %vm11144_vm1, %v4382_v43, 0  ;;  %vm11145_vm8 = vmmov %vm11144_vm1  ;;  %v4622_v35 = vsel %vm11147_vm4, %v8148_v25, %v8142_v2  ;;  %v4629_v26 = vpack.c.bf16 %v7614_v57, %v7614_v57  ;;  %8150 = vset.pattern.permute.xlu1 %v8393_v52 }
 0x721   :  { %v4396_v63 = vsel %vm11145_vm8, %v4384_v40, 0  ;;  %vm11146_vm12 = vmmov %vm11139_vm10  ;;  %v4626_v48 = vsel %vm11056_vm2, %v4622_v35, 0.0  ;;  %4755 = vperm.xlu1 %8150, %v8371_v11  }
 0x722   :  { %v4497_v23 = vsel %vm11146_vm12, %v8132_v42, %v8133_v21  ;;  %vm11148_vm6 = vmmov %vm11147_vm4  ;;  %vm11154_vm12 = vcmask 64512   ;;  %v4633_v8 = vpack.c.bf16 %v4626_v48, %v4626_v48  ;;  %v4505_v21 = vpack.c.bf16 %v7609_v39, %v7609_v39 }
 0x723   :  { %v4620_v5 = vsel %vm11148_vm6, %v8143_v12, %v8147_v28  ;;  %v4506_v54 = vpack.c.bf16 %v4497_v23, %v4497_v23  ;;  %vm11155_vm10 = vmmov %vm11154_vm12 }
 0x724   :  { %7601 = vmatmul.mubr.msk.bf16.vlgmr.msra.gmra.mxu0 %vm11142_vm11, %v4257_v1  ;;  %vm11149_vm11 = vmmov %vm11144_vm1  ;;  %v4624_v18 = vsel %vm11051_vm9, %v4620_v5, 0.0 }
 0x725   :  { %7603 = vmatmul.mubr.msk.bf16.vlgmr.msra.gmra.mxu1 %vm11143_vm14, %v4257_v1  ;;  %4416 = vmatpush1.bf16.msra.mxu0 %v4390_v38  ;;  %vm11150_vm14 = vmmov %vm11144_vm1  ;;  %v4631_v14 = vpack.c.bf16 %v4624_v18, %v4624_v18 }
 0x726   :  { %4457 = vmatpush1.bf16.msra.mxu1 %v4396_v63  ;;  %7610 = vmatprep.subr.msk.bf16.mxu0 %vm11149_vm11, %v4507_v55  ;;  %vm11152_vm1 = vmmov %vm11147_vm4 }
 0x727   :  { %7612 = vmatprep.subr.msk.bf16.mxu1 %vm11150_vm14, %v4509_v0  ;;  %4433 = vmatprep.mubr.bf16.mxu0 %v10855_v4  ;;  %v4621_v56 = vsel %vm11152_vm1, %v8142_v2, %v8143_v12  ;;  %vm11153_vm8 = vmmov %vm11152_vm1  ;;  %vm11159_vm14 = vcmp.le.s32.totalorder %v8495_v20, 14 }
 0x728   :  { %4474 = vmatprep.mubr.bf16.mxu1 %v10855_v4  ;;  %v4619_v3 = vsel %vm11153_vm8, %v8147_v28, %v8148_v25  ;;  %vm11156_vm4 = vmmov %vm11149_vm11  ;;  %vm11158_vm11 = vcmp.le.s32.totalorder %v8492_v19, 14 }
 0x729   :  { %v4514_v58 = vsel %vm11156_vm4, %v4506_v54, 0  ;;  %vm11157_vm6 = vmmov %vm11156_vm4  ;;  %v4623_v50 = vsel %vm11158_vm11, %v4621_v56, 0.0  ;;  %v4625_v59 = vsel %vm11159_vm14, %v4619_v3, 0.0 }
 0x72a   :  { %v4520_v44 = vsel %vm11157_vm6, %v4508_v36, 0  ;;  %vm11160_vm1 = vmmov %vm11156_vm4  ;;  %v4630_v42 = vpack.c.bf16 %v4623_v50, %v4623_v50  ;;  %v4632_v10 = vpack.c.bf16 %v4625_v59, %v4625_v59 }
 0x72b   :  { %vm11161_vm8 = vmmov %vm11160_vm1 }
 0x72c   :  { %7606 = vmatmul.mubr.msk.bf16.vlgmr.msra.gmra.mxu0 %vm11154_vm12, %v4381_v41  ;;  %vm11162_vm12 = vmmov %vm11155_vm10 }
 0x72d   :  { %7608 = vmatmul.mubr.msk.bf16.vlgmr.msra.gmra.mxu1 %vm11155_vm10, %v4381_v41  ;;  %4540 = vmatpush1.bf16.msra.mxu0 %v4514_v58  ;;  %vm11163_vm4 = vmmov %vm11160_vm1 }
 0x72e   :  { %4581 = vmatpush1.bf16.msra.mxu1 %v4520_v44  ;;  %7615 = vmatprep.subr.msk.bf16.mxu0 %vm11160_vm1, %v4631_v14  ;;  %v4638_v31 = vsel %vm11163_vm4, %v4630_v42, 0  ;;  %vm11164_vm6 = vmmov %vm11160_vm1 }
 0x72f   :  { %7617 = vmatprep.subr.msk.bf16.mxu1 %vm11161_vm8, %v4633_v8  ;;  %4557 = vmatprep.mubr.bf16.mxu0 %v10855_v4  ;;  %v4644_v53 = vsel %vm11164_vm6, %v4632_v10, 0  ;;  %vm11165_vm11 = vmmov %vm11155_vm10 }
 0x730   :  { %4598 = vmatprep.mubr.bf16.mxu1 %v10855_v4  ;;  %vm11166_vm14 = vmmov %vm11155_vm10 }
 0x731   :  { %vm11167_vm8 = vmmov %vm11160_vm1 }
 0x732   :  { %vm11170_vm4 = vmmov %vm11165_vm11 }
 0x733   :  { %vm11171_vm6 = vmmov %vm11170_vm4 }
 0x734   :  { %7611 = vmatmul.mubr.msk.bf16.vlgmr.msra.gmra.mxu0 %vm11162_vm12, %v4505_v21  ;;  %vm11168_vm12 = vmmov %vm11160_vm1 }
 0x735   :  { %7613 = vmatmul.mubr.msk.bf16.vlgmr.msra.gmra.mxu1 %vm11155_vm10, %v4505_v21  ;;  %4664 = vmatpush1.bf16.msra.mxu0 %v4638_v31  ;;  %vm11169_vm10 = vmmov %vm11160_vm1 }
 0x736   :  { %4705 = vmatpush1.bf16.msra.mxu1 %v4644_v53  ;;  %4681 = vmatprep.mubr.bf16.mxu0 %v10855_v4 }
 0x737   :  { %4722 = vmatprep.mubr.bf16.mxu1 %v10855_v4 }
 0x73c   :  { %7616 = vmatmul.mubr.msk.bf16.vlgmr.msra.gmra.mxu0 %vm11165_vm11, %v4629_v26  ;;  %vm11176_vm11 = vcmask 23552  }
 0x73d   :  { %7618 = vmatmul.mubr.msk.bf16.vlgmr.msra.gmra.mxu1 %vm11166_vm14, %v4629_v26  ;;  %4805 = vmatprep.mubr.bf16.mxu0 %v10855_v4  ;;  %vm11177_vm14 = vmmov %vm11176_vm11 }
 0x73e   :  { %4846 = vmatprep.mubr.bf16.mxu1 %v10855_v4 }
 0x7ba   :  { %v3738_v45 = vpop.f32.mrf.mxu0 }
 0x7bc   :  { %v3779_v6 = vpop.f32.mrf.mxu1  ;;  %v3740_v47 = vpop.f32.mrf.mxu0 }
 0x7be   :  { %v3781_v60 = vpop.f32.mrf.mxu1  ;;  %v3742_v1 = vpop.f32.mrf.mxu0 }
 0x7c0   :  { %v3783_v43 = vpop.f32.mrf.mxu1  ;;  %v3743_v40 = vpop.f32.mrf.mxu0 }
 0x7c2   :  { %v3784_v62 = vpop.f32.mrf.mxu1 }
 0x7c4   :  { %v3835_v37 = vpop.f32.mrf.mxu0 }
 0x7c5   :  { %v3876_v25 = vpop.f32.mrf.mxu1 }
 0x7c6   :  { %v3837_v28 = vpop.f32.mrf.mxu0 }
 0x7c7   :  { %v3878_v12 = vpop.f32.mrf.mxu1 }
 0x7c8   :  { %v3839_v2 = vpop.f32.mrf.mxu0 }
 0x7c9   :  { %v3880_v38 = vpop.f32.mrf.mxu1 }
 0x7ca   :  { %v3840_v63 = vpop.f32.mrf.mxu0 }
 0x7cb   :  { %v3881_v55 = vpop.f32.mrf.mxu1 }
 0x7cc   :  { %v3955_v0 = vpop.f32.mrf.mxu0  ;;  %v3836_v55 = vadd.f32 %v3835_v37, %v3738_v45 }
 0x7cd   :  { %v3996_v7 = vpop.f32.mrf.mxu1 }
 0x7ce   :  { %v3957_v23 = vpop.f32.mrf.mxu0 }
 0x7cf   :  { %v3998_v27 = vpop.f32.mrf.mxu1 }
 0x7d0   :  { %v3959_v35 = vpop.f32.mrf.mxu0 }
 0x7d1   :  { %v4000_v5 = vpop.f32.mrf.mxu1  ;;  %v3877_v35 = vadd.f32 %v3876_v25, %v3779_v6 }
 0x7d2   :  { %v3960_v41 = vpop.f32.mrf.mxu0 }
 0x7d3   :  { %v4001_v54 = vpop.f32.mrf.mxu1 }
 0x7d4   :  { %v4079_v36 = vpop.f32.mrf.mxu0  ;;  %v3838_v54 = vadd.f32 %v3837_v28, %v3740_v47 }
 0x7d5   :  { %v4120_v48 = vpop.f32.mrf.mxu1 }
 0x7d6   :  { %v4081_v18 = vpop.f32.mrf.mxu0 }
 0x7d7   :  { %v4122_v56 = vpop.f32.mrf.mxu1 }
 0x7d8   :  { %v4083_v3 = vpop.f32.mrf.mxu0 }
 0x7d9   :  { %v4124_v58 = vpop.f32.mrf.mxu1  ;;  %v3879_v3 = vadd.f32 %v3878_v12, %v3781_v60 }
 0x7da   :  { %v4084_v44 = vpop.f32.mrf.mxu0  ;;  %v4003_v58 = vadd.f32 %v3955_v0, %v3836_v55 }
 0x7db   :  { %v4125_v14 = vpop.f32.mrf.mxu1  ;;  %v4005_v44 = vadd.f32 %v3996_v7, %v3877_v35 }
 0x7dc   :  { %v4187_v8 = vpop.f32.mrf.mxu0 }
 0x7dd   :  { %v4228_v39 = vpop.f32.mrf.mxu1 }
 0x7de   :  { %v4189_v50 = vpop.f32.mrf.mxu0 }
 0x7df   :  { %v4230_v59 = vpop.f32.mrf.mxu1 }
 0x7e0   :  { %v4191_v21 = vpop.f32.mrf.mxu0 }
 0x7e1   :  { %v4232_v42 = vpop.f32.mrf.mxu1 }
 0x7e2   :  { %v4192_v10 = vpop.f32.mrf.mxu0  ;;  %v4004_v42 = vadd.f32 %v3957_v23, %v3838_v54 }
 0x7e3   :  { %v4233_v31 = vpop.f32.mrf.mxu1  ;;  %v4006_v10 = vadd.f32 %v3998_v27, %v3879_v3 }
 0x7e4   :  { %v4311_v53 = vpop.f32.mrf.mxu0  ;;  %v4127_v31 = vadd.f32 %v4079_v36, %v4003_v58 }
 0x7e5   :  { %v4352_v57 = vpop.f32.mrf.mxu1  ;;  %v4130_v20 = vadd.f32 %v4122_v56, %v4006_v10 }
 0x7e6   :  { %v4313_v26 = vpop.f32.mrf.mxu0  ;;  %v4235_v19 = vadd.f32 %v4187_v8, %v4127_v31  ;;  %v4737_v8 = vpop.permute.xlu0 %4736  ;;  %v7619_v31 = vld [vmem:[%s10584_s2 + $0x10] sm:$0x7] }
 0x7e7   :  { %v4354_v52 = vpop.f32.mrf.mxu1  ;;  %v4238_v25 = vadd.f32 %v4230_v59, %v4130_v20 }
 0x7e8   :  { %v4315_v11 = vpop.f32.mrf.mxu0  ;;  %v4359_v47 = vadd.f32 %v4311_v53, %v4235_v19 }
 0x7e9   :  { %v4356_v1 = vpop.f32.mrf.mxu1  ;;  %v4129_v11 = vadd.f32 %v4120_v48, %v4005_v44  ;;  %v4362_v7 = vadd.f32 %v4354_v52, %v4238_v25 }
 0x7ea   :  { %v4316_v43 = vpop.f32.mrf.mxu0 }
 0x7eb   :  { %v4357_v40 = vpop.f32.mrf.mxu1  ;;  %v4237_v24 = vadd.f32 %v4228_v39, %v4129_v11 }
 0x7ec   :  { %v4435_v62 = vpop.f32.mrf.mxu0  ;;  %v4128_v40 = vadd.f32 %v4081_v18, %v4004_v42 }
 0x7ed   :  { %v4476_v2 = vpop.f32.mrf.mxu1  ;;  %v4361_v60 = vadd.f32 %v4352_v57, %v4237_v24  ;;  %v4483_v23 = vadd.f32 %v4435_v62, %v4359_v47 }
 0x7ee   :  { %v4437_v38 = vpop.f32.mrf.mxu0  ;;  %v4236_v37 = vadd.f32 %v4189_v50, %v4128_v40 }
 0x7ef   :  { %v4478_v63 = vpop.f32.mrf.mxu1  ;;  %v4485_v27 = vadd.f32 %v4476_v2, %v4361_v60 }
 0x7f0   :  { %v4439_v5 = vpop.f32.mrf.mxu0  ;;  %v4360_v0 = vadd.f32 %v4313_v26, %v4236_v37  ;;  %v4486_v35 = vadd.f32 %v4478_v63, %v4362_v7  ;;  %v4756_v37 = vpop.permute.xlu1 %4755 }
 0x7f1   :  { %v4480_v41 = vpop.f32.mrf.mxu1 }
 0x7f2   :  { %v4440_v14 = vpop.f32.mrf.mxu0  ;;  %v4484_v55 = vadd.f32 %v4437_v38, %v4360_v0 }
 0x7f3   :  { %v4481_v21 = vpop.f32.mrf.mxu1 }
 0x7f4   :  { %v4559_v1 = vpop.f32.mrf.mxu0 }
 0x7f5   :  { %v4600_v43 = vpop.f32.mrf.mxu1  ;;  %v4607_v18 = vadd.f32 %v4559_v1, %v4483_v23 }
 0x7f6   :  { %v4561_v45 = vpop.f32.mrf.mxu0  ;;  %v4609_v56 = vadd.f32 %v4600_v43, %v4485_v27 }
 0x7f7   :  { %v4602_v6 = vpop.f32.mrf.mxu1  ;;  %v4608_v41 = vadd.f32 %v4561_v45, %v4484_v55  ;;  %v4749_v45 = vpack.c.bf16 %v7619_v31, %v7619_v31 }
 0x7f8   :  { %v4563_v28 = vpop.f32.mrf.mxu0  ;;  %v4610_v50 = vadd.f32 %v4602_v6, %v4486_v35  ;;  %v8394_v6 = vmov 7  }
 0x7f9   :  { %v4604_v12 = vpop.f32.mrf.mxu1  ;;  %8151 = vset.pattern.permute.xlu1 %v8394_v6 }
 0x7fa   :  { %v4564_v36 = vpop.f32.mrf.mxu0  ;;  %4887 = vperm.xlu1 %8151, %v9684_v30  }
 0x7fb   :  { %v4605_v48 = vpop.f32.mrf.mxu1 }
 0x7fc   :  { %v4683_v39 = vpop.f32.mrf.mxu0 }
 0x7fd   :  { %v4724_v5 = vpop.f32.mrf.mxu1  ;;  %v4731_v20 = vadd.f32 %v4683_v39, %v4607_v18 }
 0x7fe   :  { %v4733_v19 = vadd.f32 %v4724_v5, %v4609_v56  ;;  %v4685_v24 = vpop.f32.mrf.mxu0 }
 0x7ff   :  { %v4726_v59 = vpop.f32.mrf.mxu1  ;;  %v4739_v53 = vadd.f32 %v4737_v8, %v4731_v20  ;;  %v4732_v26 = vadd.f32 %v4685_v24, %v4608_v41 }
 0x800   :  { %v4741_v57 = vadd.f32 %v4737_v8, %v4733_v19  ;;  %v4734_v52 = vadd.f32 %v4726_v59, %v4610_v50  ;;  %v4687_v62 = vpop.f32.mrf.mxu0 }
 0x801   :  { %v4728_v2 = vpop.f32.mrf.mxu1  ;;  %v4740_v54 = vadd.f32 %v4737_v8, %v4732_v26  ;;  %v4743_v63 = vmax.f32 %v4739_v53, 0.0 }
 0x802   :  { %v4742_v38 = vadd.f32 %v4737_v8, %v4734_v52  ;;  %v4745_v3 = vmax.f32 %v4741_v57, 0.0  ;;  %v4688_v58 = vpop.f32.mrf.mxu0 }
 0x803   :  { %v4729_v44 = vpop.f32.mrf.mxu1  ;;  %v4744_v14 = vmax.f32 %v4740_v54, 0.0  ;;  %v4750_v42 = vpack.c.bf16 %v4743_v63, %v4743_v63  ;;  %v7628_v63 = vld [vmem:[%s10584_s2 + $0x18] sm:$0xff] }
 0x804   :  { %v4746_v21 = vmax.f32 %v4742_v38, 0.0  ;;  %v4752_v10 = vpack.c.bf16 %v4745_v3, %v4745_v3  ;;  %v11175_v3 = vld [vmem:[#allocation43_spill] sm:$0xff] }
 0x805   :  { %v4751_v11 = vpack.c.bf16 %v4744_v14, %v4744_v14  ;;  %v4762_v43 = vsel %vm11168_vm12, %v4750_v42, 0  ;;  %v4881_v42 = vpack.c.bf16 %v7628_v63, %v7628_v63  ;;  %vm11184_vm12 = vcmp.lt.s32.totalorder %v8473_v9, 16 }
 0x806   :  { %v4753_v1 = vpack.c.bf16 %v4746_v21, %v4746_v21  ;;  %v4768_v40 = vsel %vm11169_vm10, %v4752_v10, 0  ;;  %v8395_v10 = vmov 8   ;;  %vm11186_vm10 = vcmp.lt.s32.totalorder %v8473_v9, 17 }
 0x807   :  { %7620 = vmatprep.subr.msk.bf16.mxu0 %vm11160_vm1, %v4751_v11  ;;  %8152 = vset.pattern.permute.xlu0 %v8395_v10  ;;  %vm11182_vm1 = vcmask 130048  }
 0x808   :  { %7622 = vmatprep.subr.msk.bf16.mxu1 %vm11167_vm8, %v4753_v1  ;;  %4788 = vmatpush1.bf16.msra.mxu0 %v4762_v43  ;;  %vm11183_vm8 = vmmov %vm11182_vm1 }
 0x809   :  { %4829 = vmatpush1.bf16.msra.mxu1 %v4768_v40  ;;  %4999 = vperm.xlu0 %8152, %v9684_v30   ;;  %v7631_v30 = vld [vmem:[%s10584_s2 + $0x20] sm:$0xff] }
 0x80b   :  { %7621 = vmatmul.mubr.msk.bf16.vlgmr.msra.gmra.mxu0 %vm11170_vm4, %v4749_v45  ;;  %vm11187_vm4 = vmmov %vm11184_vm12 }
 0x80c   :  { %7623 = vmatmul.mubr.msk.bf16.vlgmr.msra.gmra.mxu1 %vm11171_vm6, %v4749_v45  ;;  %4937 = vmatprep.mubr.bf16.mxu0 %v10855_v4  ;;  %vm11188_vm6 = vmmov %vm11187_vm4 }
 0x80d   :  { %4978 = vmatprep.mubr.bf16.mxu1 %v10855_v4 }
 0x875   :  { %v4888_v31 = vpop.permute.xlu1 %4887 }
 0x8cb   :  { %v4807_v25 = vpop.f32.mrf.mxu0 }
 0x8cc   :  { %v4848_v47 = vpop.f32.mrf.mxu1  ;;  %v4808_v60 = vadd.f32 %v4807_v25, %v4756_v37 }
 0x8cd   :  { %v4849_v28 = vadd.f32 %v4848_v47, %v4756_v37  ;;  %v4809_v12 = vpop.f32.mrf.mxu0 }
 0x8ce   :  { %v4850_v0 = vpop.f32.mrf.mxu1  ;;  %v7624_v7 = vmul.f32 -1.442695, %v4808_v60  ;;  %v4810_v27 = vadd.f32 %v4809_v12, %v4756_v37 }
 0x8cf   :  { %v7626_v23 = vmul.f32 -1.442695, %v4849_v28  ;;  %v4851_v36 = vadd.f32 %v4850_v0, %v4756_v37  ;;  %v4811_v48 = vpop.f32.mrf.mxu0 }
 0x8d0   :  { %v4852_v55 = vpop.f32.mrf.mxu1  ;;  %8333 = vpow2.f32 %v7624_v7  ;;  %v7625_v35 = vmul.f32 -1.442695, %v4810_v27  ;;  %v11178_v27 = vld [vmem:[#allocation46_spill] sm:$0xff] }
 0x8d1   :  { %v7627_v18 = vmul.f32 -1.442695, %v4851_v36  ;;  %8335 = vpow2.f32 %v7626_v23  ;;  %v4812_v56 = vpop.f32.mrf.mxu0  ;;  %v11179_v55 = vld [vmem:[#allocation45_spill] sm:$0xff] }
 0x8d2   :  { %v4853_v8 = vpop.f32.mrf.mxu1  ;;  %8337 = vpow2.f32 %v7625_v35 }
 0x8d3   :  { %8339 = vpow2.f32 %v7627_v18  ;;  %v11180_v18 = vld [vmem:[#allocation47_spill] sm:$0xff]  ;;  %v11181_v8 = vld [vmem:[#allocation44_spill] sm:$0xff] }
 0x8dd   :  { %v8334_v39 = vpop.eup %8333 }
 0x8de   :  { %v8336_v5 = vpop.eup %8335  ;;  %v4867_v41 = vadd.f32 1.0, %v8334_v39 }
 0x8df   :  { %v8338_v50 = vpop.eup %8337  ;;  %v4869_v20 = vadd.f32 1.0, %v8336_v5  ;;  %v4993_v5 = vpack.c.bf16 %v7631_v30, %v7631_v30 }
 0x8e0   :  { %v8340_v19 = vpop.eup %8339  ;;  %8341 = vrcp.f32 %v4867_v41  ;;  %v4868_v24 = vadd.f32 1.0, %v8338_v50  ;;  %v5000_v41 = vpop.permute.xlu0 %4999 }
 0x8e1   :  { %8343 = vrcp.f32 %v4869_v20  ;;  %v4870_v59 = vadd.f32 1.0, %v8340_v19 }
 0x8e2   :  { %8345 = vrcp.f32 %v4868_v24 }
 0x8e3   :  { %8347 = vrcp.f32 %v4870_v59 }
 0x8ed   :  { %v9929_v53 = vpop.eup %8341 }
 0x8ee   :  { %v9931_v57 = vpop.eup %8343  ;;  %v4882_v52 = vpack.c.bf16 %v9929_v53, %v9929_v53 }
 0x8ef   :  { %11172 = vst [vmem:[#allocation36_spill] sm:$0xff] %v9931_v57  ;;  %v9933_v26 = vpop.eup %8345  ;;  %v4884_v62 = vpack.c.bf16 %v9931_v57, %v9931_v57 }
 0x8f0   :  { %11173 = vst [vmem:[#allocation33_spill] sm:$0xff] %v9933_v26  ;;  %v9939_v2 = vpop.eup %8347  ;;  %v4883_v54 = vpack.c.bf16 %v9933_v26, %v9933_v26  ;;  %v4894_v21 = vand.u32 %v4882_v52, %v11175_v3 }
 0x8f1   :  { %11174 = vst [vmem:[#allocation56_spill] sm:$0xff] %v9939_v2  ;;  %v4885_v38 = vpack.c.bf16 %v9939_v2, %v9939_v2  ;;  %v4900_v44 = vand.u32 %v4884_v62, %v11175_v3 }
 0x8f2   :  { %v4897_v58 = vand.u32 %v4883_v54, %v11175_v3 }
 0x8f3   :  { %v4903_v14 = vand.u32 %v4885_v38, %v11175_v3 }
 0x8f4   :  { %4919 = vmatprep.subr.bf16.mxu0 %v4897_v58 }
 0x8f5   :  { %4960 = vmatprep.subr.bf16.mxu1 %v4903_v14  ;;  %4920 = vmatpush1.bf16.msra.mxu0 %v4894_v21 }
 0x8f6   :  { %4961 = vmatpush1.bf16.msra.mxu1 %v4900_v44 }
 0x8f8   :  { %7629 = vmatmul.mubr.msk.bf16.vlgmr.msra.gmra.mxu0 %vm11176_vm11, %v4881_v42  ;;  %vm11189_vm11 = vmmov %vm11187_vm4 }
 0x8f9   :  { %7630 = vmatmul.mubr.msk.bf16.vlgmr.msra.gmra.mxu1 %vm11177_vm14, %v4881_v42  ;;  %5037 = vmatprep.mubr.bf16.mxu0 %v10855_v4  ;;  %vm11194_vm14 = vnez %v10766_v29 }
 0x8fa   :  { %5078 = vmatprep.mubr.bf16.mxu1 %v10855_v4 }
 0x9b8   :  { %v4939_v11 = vpop.f32.mrf.mxu0 }
 0x9b9   :  { %v4940_v1 = vadd.f32 %v4939_v11, %v4888_v31  ;;  %v4980_v43 = vpop.f32.mrf.mxu1  ;;  %v8396_v11 = vmov 9  }
 0x9ba   :  { %v4981_v40 = vadd.f32 %v4980_v43, %v4888_v31  ;;  %v4941_v45 = vpop.f32.mrf.mxu0  ;;  %8233 = vset.pattern.permute.xlu0 %v8396_v11 }
 0x9bb   :  { %v4942_v6 = vadd.f32 %v4941_v45, %v4888_v31  ;;  %v4982_v37 = vpop.f32.mrf.mxu1  ;;  %v4987_v25 = vmax.f32 %v4940_v1, 0.0  ;;  %v10007_v1 = vld [vmem:[%s10582_s3] sm:$0xff] }
 0x9bc   :  { %v4983_v47 = vadd.f32 %v4982_v37, %v4888_v31  ;;  %v4943_v60 = vpop.f32.mrf.mxu0  ;;  %v4989_v28 = vmax.f32 %v4981_v40, 0.0 }
 0x9bd   :  { %v4988_v12 = vmax.f32 %v4942_v6, 0.0  ;;  %v4984_v0 = vpop.f32.mrf.mxu1  ;;  %v4994_v35 = vpack.c.bf16 %v11179_v55, %v4987_v25 }
 0x9be   :  { %v4990_v7 = vmax.f32 %v4983_v47, 0.0  ;;  %v4944_v23 = vpop.f32.mrf.mxu0  ;;  %v4996_v39 = vpack.c.bf16 %v11181_v8, %v4989_v28 }
 0x9bf   :  { %v4995_v36 = vpack.c.bf16 %v11178_v27, %v4988_v12  ;;  %v4985_v48 = vpop.f32.mrf.mxu1  ;;  %v11185_v12 = vld [vmem:[#allocation6_spill] sm:$0xff]  ;;  %v7635_v27 = vld [vmem:[%s10583_s1 + $0x128] sm:$0xff] }
 0x9c0   :  { %v4997_v56 = vpack.c.bf16 %v11180_v18, %v4990_v7 }
 0x9c1   :  { %5019 = vmatprep.subr.bf16.mxu0 %v4995_v36 }
 0x9c2   :  { %5060 = vmatprep.subr.bf16.mxu1 %v4997_v56  ;;  %5020 = vmatpush1.bf16.msra.mxu0 %v4994_v35  ;;  %v11190_v56 = vld [vmem:[#allocation9_spill] sm:$0xff] }
 0x9c3   :  { %5061 = vmatpush1.bf16.msra.mxu1 %v4996_v39  ;;  %v11191_v39 = vld [vmem:[#allocation10_spill] sm:$0xff] }
 0x9c5   :  { %7632 = vmatmul.mubr.msk.bf16.vlgmr.msra.gmra.mxu0 %vm11182_vm1, %v4993_v5  ;;  %vm11195_vm1 = vmpackc.low %vm11194_vm14, %vm11194_vm14 }
 0x9c6   :  { %7633 = vmatmul.mubr.msk.bf16.vlgmr.msra.gmra.mxu1 %vm11183_vm8, %v4993_v5  ;;  %5172 = vmatprep.mubr.bf16.mxu0 %v10855_v4  ;;  %vm11196_vm8 = vmmov %vm11186_vm10 }
 0x9c7   :  { %5213 = vmatprep.mubr.bf16.mxu1 %v10855_v4 }
 0xa85   :  { %v5039_v50 = vpop.f32.mrf.mxu0 }
 0xa86   :  { %v9968_v20 = vadd.f32 %v5039_v50, %v5000_v41  ;;  %v5080_v19 = vpop.f32.mrf.mxu1  ;;  %v11192_v50 = vld [vmem:[#allocation8_spill] sm:$0xff] }
 0xa87   :  { %v5041_v24 = vpop.f32.mrf.mxu0  ;;  %v9970_v59 = vadd.f32 %v5080_v19, %v5000_v41 }
 0xa88   :  { %v9972_v52 = vadd.f32 %v5041_v24, %v5000_v41  ;;  %v5082_v62 = vpop.f32.mrf.mxu1  ;;  %v5087_v63 = vmax.f32 %v9968_v20, 0.0  ;;  %v7688_v20 = vld [vmem:[%s10583_s1 + $0x140] sm:$0xff] }
 0xa89   :  { %v9974_v54 = vadd.f32 %v5082_v62, %v5000_v41  ;;  %v5043_v38 = vpop.f32.mrf.mxu0  ;;  %v5089_v14 = vmax.f32 %v9970_v59, 0.0 }
 0xa8a   :  { %v5088_v3 = vmax.f32 %v9972_v52, 0.0  ;;  %v5084_v58 = vpop.f32.mrf.mxu1  ;;  %v5132_v38 = vpack.c.bf16 %v7635_v27, %v7635_v27  ;;  %v11241_v52 = vld [vmem:[#allocation53_spill] sm:$0xff] }
 0xa8b   :  { %v5044_v44 = vpop.f32.mrf.mxu0  ;;  %v5090_v21 = vmax.f32 %v9974_v54, 0.0  ;;  %v11193_v58 = vld [vmem:[#allocation5_spill] sm:$0xff] }
 0xa8c   :  { %v5085_v42 = vpop.f32.mrf.mxu1  ;;  %v8163_v10 = vpack.i.bf16 %v5088_v3, %v5087_v63 }
 0xa8d   :  { %v8158_v31 = vpack.i.bf16 %v5090_v21, %v5089_v14 }
 0xa8e   :  { %8164 = vrot.lane.b32.xlu0 %v8163_v10, %s8379_s24  ;;  %8154 = vrot.lane.b32.xlu1 %v8163_v10, %s8378_s23 }
 0xa92   :  { %8174 = vrot.lane.b32.xlu0 %v8163_v10, %s8381_s25  ;;  %8159 = vrot.lane.b32.xlu1 %v8158_v31, %s8378_s23 }
 0xa96   :  { %8184 = vrot.lane.b32.xlu0 %v8163_v10, %s8382_s26  ;;  %8169 = vrot.lane.b32.xlu1 %v8158_v31, %s8379_s24 }
 0xa9a   :  { %8194 = vrot.lane.b32.xlu0 %v8163_v10, %s8383_s27  ;;  %8179 = vrot.lane.b32.xlu1 %v8158_v31, %s8381_s25 }
 0xa9e   :  { %8204 = vrot.lane.b32.xlu0 %v8163_v10, %s8384_s28  ;;  %8189 = vrot.lane.b32.xlu1 %v8158_v31, %s8382_s26 }
 0xaa2   :  { %8214 = vrot.lane.b32.xlu0 %v8163_v10, %s8385_s29  ;;  %8199 = vrot.lane.b32.xlu1 %v8158_v31, %s8383_s27 }
 0xaa6   :  { %8224 = vrot.lane.b32.xlu0 %v8163_v10, %s8386_s30  ;;  %8209 = vrot.lane.b32.xlu1 %v8158_v31, %s8384_s28 }
 0xaaa   :  { %8219 = vrot.lane.b32.xlu1 %v8158_v31, %s8385_s29  ;;  %6076 = vperm.xlu0 %8233, %v10007_v1  }
 0xaae   :  { %8229 = vrot.lane.b32.xlu1 %v8158_v31, %s8386_s30 }
 0xb00   :  { %v8165_v43 = vpop.permute.xlu0 %8164  ;;  %v8155_v40 = vpop.permute.xlu1 %8154 }
 0xb01   :  { %v8157_v45 = vunpack.i.h.bf16 %v8155_v40  ;;  %v8156_v6 = vunpack.i.l.bf16 %v8155_v40  ;;  %v8167_v37 = vunpack.i.h.bf16 %v8165_v43  ;;  %v8166_v25 = vunpack.i.l.bf16 %v8165_v43  ;;  %v11202_v40 = vld [vmem:[#allocation11_spill] sm:$0xff] }
 0xb03   :  { %v5124_v47 = vsel %vm11184_vm12, %v8156_v6, %v8157_v45  ;;  %v5101_v30 = vsel %vm11186_vm10, %v8166_v25, %v8167_v37  ;;  %vm11197_vm12 = vmmov %vm11196_vm8 }
 0xb04   :  { %v8175_v60 = vpop.permute.xlu0 %8174  ;;  %v8160_v28 = vpop.permute.xlu1 %8159  ;;  %v5134_v0 = vpack.c.bf16 %v11185_v12, %v5124_v47  ;;  %v7645_v44 = vpack.c.bf16 %v11193_v58, %v5101_v30  ;;  %vm11198_vm10 = vmmov %vm11196_vm8  ;;  %v11204_v47 = vld [vmem:[#allocation12_spill] sm:$0xff] }
 0xb05   :  { %v8162_v7 = vunpack.i.h.bf16 %v8160_v28  ;;  %v8161_v23 = vunpack.i.l.bf16 %v8160_v28  ;;  %v8177_v36 = vunpack.i.h.bf16 %v8175_v60  ;;  %v8176_v18 = vunpack.i.l.bf16 %v8175_v60  ;;  %v11205_v28 = vld [vmem:[#allocation48_spill] sm:$0xff] }
 0xb06   :  { %5154 = vmatprep.subr.bf16.mxu0 %v5134_v0 }
 0xb07   :  { %v5123_v48 = vsel %vm11187_vm4, %v8157_v45, %v8161_v23  ;;  %v5125_v55 = vsel %vm11188_vm6, %v8162_v7, %v8156_v6  ;;  %v5122_v35 = vsel %vm11189_vm11, %v8161_v23, %v8162_v7  ;;  %vm11199_vm4 = vnez %v10770_v32  ;;  %v11203_v6 = vld [vmem:[#allocation7_spill] sm:$0xff]  ;;  %v7634_v7 = vld [vmem:[%s10583_s1 + $0x120] sm:$0xff] }
 0xb08   :  { %v7637_v8 = vpack.c.bf16 %v11190_v56, %v5125_v55  ;;  %v7641_v5 = vpack.c.bf16 %v11191_v39, %v5123_v48  ;;  %v8170_v41 = vpop.permute.xlu1 %8169  ;;  %v5136_v19 = vpack.c.bf16 %v11192_v50, %v5122_v35  ;;  %vm11200_vm6 = vmpackc.low %vm11199_vm4, %vm11199_vm4  ;;  %vm11201_vm11 = vcmp.lt.s32.totalorder %v8473_v9, 15  ;;  %v8185_v43 = vpop.permute.xlu0 %8184  ;;  %v11210_v23 = vld [vmem:[#allocation15_spill] sm:$0xff]  ;;  %v11212_v35 = vld [vmem:[#allocation49_spill] sm:$0xff] }
 0xb09   :  { %v8172_v24 = vunpack.i.h.bf16 %v8170_v41  ;;  %v8171_v62 = vunpack.i.l.bf16 %v8170_v41  ;;  %v5317_v11 = vsel %vm11201_vm11, %v8176_v18, %v8177_v36  ;;  %v8187_v27 = vunpack.i.h.bf16 %v8185_v43  ;;  %v11214_v56 = vld [vmem:[#allocation13_spill] sm:$0xff]  ;;  %v11218_v41 = vld [vmem:[#allocation50_spill] sm:$0xff] }
 0xb0a   :  { %7638 = vmatpush1.bf16.msk.msra.mxu0 %vm11195_vm1, %v7637_v8  ;;  %5195 = vmatprep.subr.bf16.mxu1 %v5136_v19  ;;  %vm11206_vm1 = vnez %v11205_v28  ;;  %v7660_v30 = vpack.c.bf16 %v11210_v23, %v5317_v11  ;;  %v8186_v48 = vunpack.i.l.bf16 %v8185_v43  ;;  %v11226_v11 = vld [vmem:[#allocation17_spill] sm:$0xff]  ;;  %v11236_v28 = vld [vmem:[#allocation19_spill] sm:$0xff] }
 0xb0b   :  { %v5102_v42 = vsel %vm11196_vm8, %v8172_v24, %v8166_v25  ;;  %v5099_v10 = vsel %vm11197_vm12, %v8171_v62, %v8172_v24  ;;  %v5100_v31 = vsel %vm11198_vm10, %v8167_v37, %v8171_v62  ;;  %7642 = vmatpush1.bf16.msk.msra.mxu1 %vm11200_vm6, %v7641_v5  ;;  %7646 = vmatprep.subr.msk.bf16.mxu0 %vm11206_vm1, %v7645_v44  ;;  %vm11207_vm8 = vcmask 130048   ;;  %vm11209_vm10 = vmpackc.low %vm8556_vm3, %vm8556_vm3  ;;  %v11224_v44 = vld [vmem:[#allocation16_spill] sm:$0xff]  ;;  %v8373_v23 = vld [vmem:[%s10581_s0 + $0x8] sm:$0xff] }
 0xb0c   :  { %v7648_v45 = vpack.c.bf16 %v11202_v40, %v5102_v42  ;;  %v7652_v25 = vpack.c.bf16 %v11203_v6, %v5099_v10  ;;  %v7655_v60 = vpack.c.bf16 %v11204_v47, %v5100_v31  ;;  %v8180_v37 = vpop.permute.xlu1 %8179  ;;  %vm11208_vm12 = vmmov %vm11207_vm8  ;;  %vm11219_vm3 = vnez %v11218_v41  ;;  %v11225_v10 = vld [vmem:[#allocation14_spill] sm:$0xff] }
 0xb0d   :  { %v8182_v12 = vunpack.i.h.bf16 %v8180_v37  ;;  %v8181_v0 = vunpack.i.l.bf16 %v8180_v37  ;;  %7639 = vmatmul.mubr.msk.bf16.vlgmr.msra.gmra.mxu0 %vm11207_vm8, %v5132_v38  ;;  %vm11211_vm6 = vmmov %vm11201_vm11  ;;  %vm11213_vm11 = vnez %v11212_v35  ;;  %vm11215_vm8 = vnez %v10778_v51  ;;  %v11235_v37 = vld [vmem:[#allocation20_spill] sm:$0xff] }
 0xb0e   :  { %7643 = vmatmul.mubr.msk.bf16.vlgmr.msra.gmra.mxu1 %vm11208_vm12, %v5132_v38  ;;  %7649 = vmatpush1.bf16.msk.msra.mxu0 %vm11209_vm10, %v7648_v45  ;;  %vm11216_vm12 = vmpackc.low %vm11215_vm8, %vm11215_vm8  ;;  %v5109_v24 = vpack.c.bf16 %v7634_v7, %v7634_v7  ;;  %v11220_v38 = vld [vmem:[#allocation51_spill] sm:$0xff]  ;;  %vm11227_vm8 = vcmask 130048   ;;  %v7658_v45 = vld [vmem:[%s10583_s1 + $0x130] sm:$0xff] }
 0xb0f   :  { %v5315_v55 = vsel %vm11211_vm6, %v8181_v0, %v8182_v12  ;;  %7653 = vmatprep.subr.msk.bf16.mxu1 %vm11213_vm11, %v7652_v25  ;;  %vm11217_vm10 = vmmov %vm11211_vm6  ;;  %7661 = vmatprep.subr.msk.bf16.mxu0 %vm11219_vm3, %v7660_v30  ;;  %v5316_v62 = vsel %vm11211_vm6, %v8177_v36, %v8181_v0  ;;  %vm11221_vm4 = vnez %v11220_v38  ;;  %v11228_v36 = vld [vmem:[#allocation18_spill] sm:$0xff]  ;;  %v5325_v25 = vpack.c.bf16 %v7658_v45, %v7658_v45  ;;  %v8195_v0 = vpop.permute.xlu0 %8194 }
 0xb10   :  { %v7667_v8 = vpack.c.bf16 %v11214_v56, %v5315_v55  ;;  %7656 = vmatpush1.bf16.msk.msra.mxu1 %vm11216_vm12, %v7655_v60  ;;  %v8190_v39 = vpop.permute.xlu1 %8189  ;;  %v5318_v5 = vsel %vm11217_vm10, %v8182_v12, %v8176_v18  ;;  %5257 = vmatprep.mubr.bf16.mxu0 %v10855_v4  ;;  %vm11222_vm12 = vcmp.lt.s32.totalorder %v8473_v9, 1  ;;  %v7670_v31 = vpack.c.bf16 %v11225_v10, %v5316_v62  ;;  %vm11229_vm6 = vmpackc.low %vm8604_vm0, %vm8604_vm0  ;;  %v11238_v55 = vld [vmem:[#allocation52_spill] sm:$0xff]  ;;  %v7673_v56 = vld [vmem:[%s10583_s1 + $0x138] sm:$0xff] }
 0xb11   :  { %v8192_v50 = vunpack.i.h.bf16 %v8190_v39  ;;  %v8191_v19 = vunpack.i.l.bf16 %v8190_v39  ;;  %5298 = vmatprep.mubr.bf16.mxu1 %v10855_v4  ;;  %v5429_v58 = vsel %vm11222_vm12, %v8186_v48, %v8187_v27  ;;  %vm11223_vm10 = vmmov %vm11222_vm12  ;;  %v7663_v42 = vpack.c.bf16 %v11224_v44, %v5318_v5  ;;  %v8376_v44 = vld [vmem:[%s10581_s0 + $0x10] sm:$0xff]  ;;  %v11247_v10 = vld [vmem:[#allocation22_spill] sm:$0xff] }
 0xb12   :  { %7668 = vmatprep.subr.msk.bf16.mxu1 %vm11221_vm4, %v7667_v8  ;;  %v7675_v40 = vpack.c.bf16 %v11228_v36, %v5429_v58  ;;  %vm11230_vm12 = vmmov %vm11227_vm8  ;;  %v5535_v30 = vpack.c.bf16 %v8373_v23, %v5088_v3  ;;  %v8197_v3 = vunpack.i.h.bf16 %v8195_v0  ;;  %v8196_v39 = vunpack.i.l.bf16 %v8195_v0  ;;  %v11245_v58 = vld [vmem:[#allocation21_spill] sm:$0xff] }
 0xb13   :  { %v5427_v18 = vsel %vm11223_vm10, %v8191_v19, %v8192_v50  ;;  %vm11231_vm10 = vnez %v10785_v33  ;;  %v5437_v5 = vpack.c.bf16 %v7673_v56, %v7673_v56  ;;  %v8205_v62 = vpop.permute.xlu0 %8204  ;;  %v5533_v36 = vpack.c.bf16 %v7688_v20, %v7688_v20 }
 0xb14   :  { %v7682_v43 = vpack.c.bf16 %v11226_v11, %v5427_v18  ;;  %vm11232_vm14 = vmpackc.low %vm11231_vm10, %vm11231_vm10  ;;  %v8200_v60 = vpop.permute.xlu1 %8199 }
 0xb15   :  { %7650 = vmatmul.mubr.msk.bf16.vlgmr.msra.gmra.mxu0 %vm11227_vm8, %v5109_v24  ;;  %vm11233_vm8 = vcmp.lt.s32.totalorder %v8473_v9, 1  ;;  %v8202_v8 = vunpack.i.h.bf16 %v8200_v60 }
 0xb16   :  { %7664 = vmatpush1.bf16.msk.msra.mxu0 %vm11229_vm6, %v7663_v42  ;;  %7657 = vmatmul.mubr.msk.bf16.vlgmr.msra.gmra.mxu1 %vm11230_vm12, %v5109_v24  ;;  %v5430_v6 = vsel %vm11233_vm8, %v8192_v50, %v8186_v48  ;;  %vm11234_vm6 = vmmov %vm11233_vm8  ;;  %v8201_v48 = vunpack.i.l.bf16 %v8200_v60  ;;  %vm11243_vm8 = vcmp.lt.s32.totalorder %v8473_v9, 127  ;;  %v5536_v42 = vpack.c.bf16 %v8376_v44, %v5089_v14  ;;  %v11252_v60 = vld [vmem:[#allocation24_spill] sm:$0xff]  ;;  %v11269_v44 = vld [vmem:[#allocation29_spill] sm:$0xff] }
 0xb17   :  { %7671 = vmatpush1.bf16.msk.msra.mxu1 %vm11232_vm14, %v7670_v31  ;;  %7676 = vmatprep.subr.msk.bf16.mxu0 %vm11206_vm1, %v7675_v40  ;;  %v5428_v47 = vsel %vm11234_vm6, %v8187_v27, %v8191_v19  ;;  %v7678_v12 = vpack.c.bf16 %v11235_v37, %v5430_v6  ;;  %vm11237_vm14 = vmmov %vm11230_vm12  ;;  %vm11239_vm1 = vnez %v11238_v55  ;;  %v8374_v27 = vld [vmem:[%s10581_s0 + $0x18] sm:$0xff]  ;;  %v8375_v19 = vld [vmem:[%s10581_s0] sm:$0xff]  ;;  %v8206_v14 = vunpack.i.l.bf16 %v8205_v62 }
 0xb18   :  { %7683 = vmatprep.subr.msk.bf16.mxu1 %vm11213_vm11, %v7682_v43  ;;  %5365 = vmatprep.mubr.bf16.mxu0 %v10855_v4  ;;  %v7685_v7 = vpack.c.bf16 %v11236_v28, %v5428_v47  ;;  %vm11240_vm11 = vmmov %vm11230_vm12  ;;  %v5537_v35 = vpack.c.bf16 %v8374_v27, %v5090_v21  ;;  %vm11242_vm12 = vnez %v11241_v52  ;;  %v5636_v54 = vsel %vm11243_vm8, %v8197_v3, %v8201_v48  ;;  %v8210_v50 = vpop.permute.xlu1 %8209  ;;  %v11251_v6 = vld [vmem:[#allocation23_spill] sm:$0xff]  ;;  %v8215_v47 = vpop.permute.xlu0 %8214  ;;  %v11255_v28 = vld [vmem:[#allocation26_spill] sm:$0xff] }
 0xb19   :  { %5406 = vmatprep.mubr.bf16.mxu1 %v10855_v4  ;;  %vm11244_vm6 = vmmov %vm11243_vm8  ;;  %v5534_v24 = vpack.c.bf16 %v8375_v19, %v5087_v63  ;;  %v7693_v18 = vpack.c.bf16 %v11245_v58, %v5636_v54  ;;  %v8211_v11 = vunpack.i.l.bf16 %v8210_v50  ;;  %v8212_v63 = vunpack.i.h.bf16 %v8210_v50  ;;  %v11267_v19 = vld [vmem:[#allocation27_spill] sm:$0xff]  ;;  %v11268_v58 = vld [vmem:[#allocation28_spill] sm:$0xff] }
 0xb1a   :  { %v5638_v21 = vsel %vm11244_vm6, %v8202_v8, %v8196_v39  ;;  %v8207_v43 = vunpack.i.h.bf16 %v8205_v62  ;;  %vm11248_vm8 = vmmov %vm11244_vm6  ;;  %v5635_v40 = vsel %vm11244_vm6, %v8201_v48, %v8202_v8  ;;  %v7691_v48 = vld [vmem:[%s10583_s1 + $0x148] sm:$0xff]  ;;  %v8217_v56 = vunpack.i.h.bf16 %v8215_v47 }
 0xb1b   :  { %v7700_v31 = vpack.c.bf16 %v11247_v10, %v5638_v21  ;;  %v5637_v59 = vsel %vm11248_vm8, %v8196_v39, %v8197_v3  ;;  %v7703_v37 = vpack.c.bf16 %v11252_v60, %v5635_v40  ;;  %v8216_v3 = vunpack.i.l.bf16 %v8215_v47  ;;  %v11271_v10 = vld [vmem:[#allocation30_spill] sm:$0xff]  ;;  %v11282_v60 = vld [vmem:[#allocation35_spill] sm:$0xff] }
 0xb1c   :  { %v8220_v38 = vpop.permute.xlu1 %8219  ;;  %v5645_v39 = vpack.c.bf16 %v7691_v48, %v7691_v48  ;;  %v8225_v62 = vpop.permute.xlu0 %8224 }
 0xb1d   :  { %7665 = vmatmul.mubr.msk.bf16.vlgmr.msra.gmra.mxu0 %vm11237_vm14, %v5325_v25  ;;  %vm11246_vm14 = vmmov %vm11240_vm11  ;;  %v8221_v23 = vunpack.i.l.bf16 %v8220_v38  ;;  %v8222_v27 = vunpack.i.h.bf16 %v8220_v38  ;;  %v8226_v52 = vunpack.i.l.bf16 %v8225_v62  ;;  %v11280_v38 = vld [vmem:[#allocation32_spill] sm:$0xff] }
 0xb1e   :  { %7679 = vmatpush1.bf16.msk.msra.mxu0 %vm11239_vm1, %v7678_v12  ;;  %7672 = vmatmul.mubr.msk.bf16.vlgmr.msra.gmra.mxu1 %vm11240_vm11, %v5325_v25  ;;  %v7696_v25 = vpack.c.bf16 %v11251_v6, %v5637_v59  ;;  %v11253_v12 = vld [vmem:[#allocation25_spill] sm:$0xff] }
 0xb1f   :  { %7686 = vmatpush1.bf16.msk.msra.mxu1 %vm11242_vm12, %v7685_v7  ;;  %5555 = vmatprep.subr.bf16.mxu0 %v5535_v30  ;;  %v11256_v30 = vld [vmem:[#allocation54_spill] sm:$0xff] }
 0xb20   :  { %5596 = vmatprep.subr.bf16.mxu1 %v5537_v35  ;;  %5477 = vmatprep.mubr.bf16.mxu0 %v10855_v4  ;;  %v11259_v35 = vld [vmem:[#allocation55_spill] sm:$0xff]  ;;  %v8230_v50 = vpop.permute.xlu1 %8229 }
 0xb21   :  { %5518 = vmatprep.mubr.bf16.mxu1 %v10855_v4  ;;  %vm11260_vm6 = vnez %v11259_v35  ;;  %v8231_v20 = vunpack.i.l.bf16 %v8230_v50 }
 0xb25   :  { %7680 = vmatmul.mubr.msk.bf16.vlgmr.msra.gmra.mxu0 %vm11246_vm14, %v5437_v5  ;;  %vm11249_vm14 = vcmp.lt.s32.totalorder %v8473_v9, 113 }
 0xb26   :  { %5556 = vmatpush1.bf16.msra.mxu0 %v5534_v24  ;;  %7687 = vmatmul.mubr.msk.bf16.vlgmr.msra.gmra.mxu1 %vm11240_vm11, %v5437_v5  ;;  %v5748_v41 = vsel %vm11249_vm14, %v8207_v43, %v8211_v11 }
 0xb27   :  { %5597 = vmatpush1.bf16.msra.mxu1 %v5536_v42  ;;  %7694 = vmatprep.subr.msk.bf16.mxu0 %vm11219_vm3, %v7693_v18  ;;  %vm11250_vm3 = vmmov %vm11249_vm14  ;;  %v7708_v0 = vpack.c.bf16 %v11253_v12, %v5748_v41  ;;  %v11279_v41 = vld [vmem:[#allocation31_spill] sm:$0xff]  ;;  %v7721_v12 = vld [vmem:[%s10583_s1 + $0x158] sm:$0xff] }
 0xb28   :  { %7701 = vmatprep.subr.msk.bf16.mxu1 %vm11221_vm4, %v7700_v31  ;;  %5573 = vmatprep.mubr.bf16.mxu0 %v10855_v4  ;;  %v5750_v45 = vsel %vm11250_vm3, %v8212_v63, %v8206_v14  ;;  %vm11254_vm4 = vmmov %vm11240_vm11  ;;  %vm11257_vm11 = vnez %v11256_v30 }
 0xb29   :  { %5614 = vmatprep.mubr.bf16.mxu1 %v10855_v4  ;;  %v7715_v7 = vpack.c.bf16 %v11255_v28, %v5750_v45  ;;  %vm11258_vm8 = vmmov %vm11254_vm4  ;;  %v5869_v28 = vpack.c.bf16 %v7721_v12, %v7721_v12 }
 0xb2a   :  { %vm11261_vm14 = vmpackc.low %vm8766_vm5, %vm8766_vm5 }
 0xb2b   :  { %vm11262_vm3 = vmpackc.low %vm8782_vm7, %vm8782_vm7 }
 0xb2d   :  { %7689 = vmatmul.mubr.msk.bf16.vlgmr.msra.gmra.mxu0 %vm11254_vm4, %v5533_v36  ;;  %vm11263_vm4 = vcmp.lt.s32.totalorder %v8473_v9, 113 }
 0xb2e   :  { %7697 = vmatpush1.bf16.msk.msra.mxu0 %vm11257_vm11, %v7696_v25  ;;  %7690 = vmatmul.mubr.msk.bf16.vlgmr.msra.gmra.mxu1 %vm11258_vm8, %v5533_v36  ;;  %v5749_v8 = vsel %vm11263_vm4, %v8206_v14, %v8207_v43  ;;  %vm11264_vm8 = vmmov %vm11263_vm4  ;;  %v8227_v43 = vunpack.i.h.bf16 %v8225_v62  ;;  %v11281_v25 = vld [vmem:[#allocation34_spill] sm:$0xff] }
 0xb2f   :  { %7704 = vmatpush1.bf16.msk.msra.mxu1 %vm11260_vm6, %v7703_v37  ;;  %7709 = vmatprep.subr.msk.bf16.mxu0 %vm11261_vm14, %v7708_v0  ;;  %v5747_v5 = vsel %vm11264_vm8, %v8211_v11, %v8212_v63  ;;  %vm11265_vm14 = vcmp.lt.s32.totalorder %v8473_v9, 112  ;;  %v7711_v24 = vpack.c.bf16 %v11267_v19, %v5749_v8  ;;  %v7706_v11 = vld [vmem:[%s10583_s1 + $0x150] sm:$0xff]  ;;  %v8232_v63 = vunpack.i.h.bf16 %v8230_v50  ;;  %v7730_v8 = vld [vmem:[%s10583_s1 + $0x160] sm:$0xff] }
 0xb30   :  { %7716 = vmatprep.subr.msk.bf16.mxu1 %vm11262_vm3, %v7715_v7  ;;  %5685 = vmatprep.mubr.bf16.mxu0 %v10855_v4  ;;  %v5860_v54 = vsel %vm11265_vm14, %v8217_v56, %v8221_v23  ;;  %vm11266_vm5 = vmmov %vm11265_vm14  ;;  %v7718_v18 = vpack.c.bf16 %v11268_v58, %v5747_v5  ;;  %vm11270_vm3 = vcmask 130048   ;;  %v5757_v59 = vpack.c.bf16 %v7706_v11, %v7706_v11 }
 0xb31   :  { %5726 = vmatprep.mubr.bf16.mxu1 %v10855_v4  ;;  %v5862_v21 = vsel %vm11266_vm5, %v8222_v27, %v8216_v3  ;;  %v7723_v42 = vpack.c.bf16 %v11269_v44, %v5860_v54  ;;  %vm11272_vm4 = vmmov %vm11270_vm3 }
 0xb32   :  { %v7727_v31 = vpack.c.bf16 %v11271_v10, %v5862_v21  ;;  %vm11273_vm5 = vmpackc.low %vm8724_vm15, %vm8724_vm15 }
 0xb33   :  { %vm11275_vm8 = vmmov %vm11265_vm14  ;;  %vm11277_vm14 = vcmp.lt.s32.totalorder %v8473_v9, 111 }
 0xb34   :  { %v5861_v55 = vsel %vm11275_vm8, %v8216_v3, %v8217_v56  ;;  %v5972_v36 = vsel %vm11277_vm14, %v8227_v43, %v8231_v20  ;;  %v5981_v3 = vpack.c.bf16 %v7730_v8, %v7730_v8 }
 0xb35   :  { %7698 = vmatmul.mubr.msk.bf16.vlgmr.msra.gmra.mxu0 %vm11270_vm3, %v5645_v39  ;;  %vm11278_vm3 = vmmov %vm11277_vm14  ;;  %v5870_v45 = vpack.c.bf16 %v11279_v41, %v5861_v55  ;;  %v7732_v47 = vpack.c.bf16 %v11281_v25, %v5972_v36 }
 0xb36   :  { %7712 = vmatpush1.bf16.msk.msra.mxu0 %vm11239_vm1, %v7711_v24  ;;  %7705 = vmatmul.mubr.msk.bf16.vlgmr.msra.gmra.mxu1 %vm11272_vm4, %v5645_v39  ;;  %vm11274_vm1 = vmpackc.low %vm8747_vm13, %vm8747_vm13  ;;  %v5974_v40 = vsel %vm11278_vm3, %v8232_v63, %v8226_v52 }
 0xb37   :  { %7719 = vmatpush1.bf16.msk.msra.mxu1 %vm11242_vm12, %v7718_v18  ;;  %7724 = vmatprep.subr.msk.bf16.mxu0 %vm11273_vm5, %v7723_v42  ;;  %vm11276_vm12 = vmmov %vm11275_vm8  ;;  %v7739_v37 = vpack.c.bf16 %v11282_v60, %v5974_v40 }
 0xb38   :  { %7728 = vmatprep.subr.msk.bf16.mxu1 %vm11274_vm1, %v7727_v31  ;;  %5797 = vmatprep.mubr.bf16.mxu0 %v10855_v4  ;;  %v5859_v14 = vsel %vm11276_vm12, %v8221_v23, %v8222_v27  ;;  %vm11283_vm5 = vmmov %vm11272_vm4  ;;  %v11288_v23 = vld [vmem:[#allocation37_spill] sm:$0xff]  ;;  %v11289_v27 = vld [vmem:[#allocation38_spill] sm:$0xff] }
 0xb39   :  { %5838 = vmatprep.mubr.bf16.mxu1 %v10855_v4  ;;  %v5872_v6 = vpack.c.bf16 %v11280_v38, %v5859_v14  ;;  %vm11284_vm1 = vmpackc.low %vm11051_vm9, %vm11051_vm9 }
 0xb3a   :  { %vm11285_vm8 = vmpackc.low %vm11056_vm2, %vm11056_vm2 }
 0xb3b   :  { %vm11286_vm12 = vmmov %vm11278_vm3 }
 0xb3c   :  { %v5973_v0 = vsel %vm11286_vm12, %v8226_v52, %v8227_v43  ;;  %vm11287_vm14 = vmmov %vm11278_vm3 }
 0xb3d   :  { %7713 = vmatmul.mubr.msk.bf16.vlgmr.msra.gmra.mxu0 %vm11272_vm4, %v5757_v59  ;;  %v5971_v7 = vsel %vm11287_vm14, %v8231_v20, %v8232_v63  ;;  %v7735_v48 = vpack.c.bf16 %v11288_v23, %v5973_v0  ;;  %vm11290_vm3 = vmmov %vm11272_vm4 }
 0xb3e   :  { %5892 = vmatpush1.bf16.msra.mxu0 %v5870_v45  ;;  %7720 = vmatmul.mubr.msk.bf16.vlgmr.msra.gmra.mxu1 %vm11283_vm5, %v5757_v59  ;;  %v7742_v56 = vpack.c.bf16 %v11289_v27, %v5971_v7  ;;  %vm11291_vm4 = vmmov %vm11290_vm3 }
 0xb3f   :  { %5933 = vmatpush1.bf16.msra.mxu1 %v5872_v6  ;;  %7733 = vmatprep.subr.msk.bf16.mxu0 %vm11284_vm1, %v7732_v47  ;;  %vm11292_vm5 = vmmov %vm11290_vm3 }
 0xb40   :  { %7740 = vmatprep.subr.msk.bf16.mxu1 %vm11285_vm8, %v7739_v37  ;;  %5909 = vmatprep.mubr.bf16.mxu0 %v10855_v4  ;;  %vm11293_vm1 = vmmov %vm11290_vm3  ;;  %vm11296_vm8 = vcmask 1043456  }
 0xb41   :  { %5950 = vmatprep.mubr.bf16.mxu1 %v10855_v4 }
 0xb45   :  { %7725 = vmatmul.mubr.msk.bf16.vlgmr.msra.gmra.mxu0 %vm11290_vm3, %v5869_v28 }
 0xb46   :  { %7736 = vmatpush1.bf16.msk.msra.mxu0 %vm11257_vm11, %v7735_v48  ;;  %7729 = vmatmul.mubr.msk.bf16.vlgmr.msra.gmra.mxu1 %vm11291_vm4, %v5869_v28  ;;  %vm11294_vm11 = vcmp.lt.s32.totalorder %v8473_v9, 16  ;;  %vm11300_vm4 = vnez %v10766_v29 }
 0xb47   :  { %7743 = vmatpush1.bf16.msk.msra.mxu1 %vm11260_vm6, %v7742_v56  ;;  %6021 = vmatprep.mubr.bf16.mxu0 %v10855_v4  ;;  %vm11295_vm6 = vcmp.lt.s32.totalorder %v8473_v9, 17  ;;  %vm11297_vm12 = vmmov %vm11294_vm11 }
 0xb48   :  { %6062 = vmatprep.mubr.bf16.mxu1 %v10855_v4  ;;  %vm11298_vm14 = vmmov %vm11294_vm11 }
 0xb49   :  { %vm11299_vm3 = vmmov %vm11294_vm11 }
 0xb4d   :  { %7737 = vmatmul.mubr.msk.bf16.vlgmr.msra.gmra.mxu0 %vm11292_vm5, %v5981_v3  ;;  %vm11301_vm5 = vnez %v10770_v32 }
 0xb4e   :  { %7744 = vmatmul.mubr.msk.bf16.vlgmr.msra.gmra.mxu1 %vm11293_vm1, %v5981_v3  ;;  %6176 = vmatprep.mubr.bf16.mxu0 %v10855_v4  ;;  %vm11302_vm1 = vcmp.ge.s32.totalorder %v8486_v16, 1 }
 0xb4f   :  { %6217 = vmatprep.mubr.bf16.mxu1 %v10855_v4 }
 0xbcd   :  { %v5174_v30 = vpop.f32.mrf.mxu0 }
 0xbce   :  { %v5215_v39 = vpop.f32.mrf.mxu1 }
 0xbcf   :  { %v5176_v5 = vpop.f32.mrf.mxu0 }
 0xbd0   :  { %v5217_v54 = vpop.f32.mrf.mxu1 }
 0xbd1   :  { %v5178_v21 = vpop.f32.mrf.mxu0 }
 0xbd2   :  { %v5219_v35 = vpop.f32.mrf.mxu1 }
 0xbd3   :  { %v5179_v50 = vpop.f32.mrf.mxu0 }
 0xbd4   :  { %v5220_v19 = vpop.f32.mrf.mxu1 }
 0xbd5   :  { %v5259_v24 = vpop.f32.mrf.mxu0 }
 0xbd6   :  { %v5300_v62 = vpop.f32.mrf.mxu1 }
 0xbd7   :  { %v5261_v58 = vpop.f32.mrf.mxu0 }
 0xbd8   :  { %v5302_v18 = vpop.f32.mrf.mxu1 }
 0xbd9   :  { %v5263_v44 = vpop.f32.mrf.mxu0 }
 0xbda   :  { %v5304_v42 = vpop.f32.mrf.mxu1 }
 0xbdb   :  { %v5264_v10 = vpop.f32.mrf.mxu0 }
 0xbdc   :  { %v5305_v31 = vpop.f32.mrf.mxu1 }
 0xbdd   :  { %v5367_v20 = vpop.f32.mrf.mxu0  ;;  %v5260_v31 = vadd.f32 %v5259_v24, %v5174_v30 }
 0xbde   :  { %v5408_v11 = vpop.f32.mrf.mxu1 }
 0xbdf   :  { %v5369_v63 = vpop.f32.mrf.mxu0 }
 0xbe0   :  { %v5410_v43 = vpop.f32.mrf.mxu1 }
 0xbe1   :  { %v5371_v55 = vpop.f32.mrf.mxu0 }
 0xbe2   :  { %v5412_v52 = vpop.f32.mrf.mxu1 }
 0xbe3   :  { %v5372_v59 = vpop.f32.mrf.mxu0 }
 0xbe4   :  { %v5413_v14 = vpop.f32.mrf.mxu1  ;;  %v5262_v59 = vadd.f32 %v5261_v58, %v5176_v5 }
 0xbe5   :  { %v5479_v36 = vpop.f32.mrf.mxu0  ;;  %v5415_v14 = vadd.f32 %v5367_v20, %v5260_v31 }
 0xbe6   :  { %v5520_v40 = vpop.f32.mrf.mxu1 }
 0xbe7   :  { %v5481_v41 = vpop.f32.mrf.mxu0 }
 0xbe8   :  { %v5522_v45 = vpop.f32.mrf.mxu1 }
 0xbe9   :  { %v5483_v38 = vpop.f32.mrf.mxu0 }
 0xbea   :  { %v5524_v6 = vpop.f32.mrf.mxu1 }
 0xbeb   :  { %v5484_v25 = vpop.f32.mrf.mxu0  ;;  %v5303_v6 = vadd.f32 %v5302_v18, %v5217_v54 }
 0xbec   :  { %v5525_v47 = vpop.f32.mrf.mxu1 }
 0xbed   :  { %v5575_v60 = vpop.f32.mrf.mxu0  ;;  %v5301_v47 = vadd.f32 %v5300_v62, %v5215_v39 }
 0xbee   :  { %v5616_v37 = vpop.f32.mrf.mxu1 }
 0xbef   :  { %v5577_v12 = vpop.f32.mrf.mxu0 }
 0xbf0   :  { %v5618_v0 = vpop.f32.mrf.mxu1 }
 0xbf1   :  { %v5579_v28 = vpop.f32.mrf.mxu0 }
 0xbf2   :  { %v5620_v7 = vpop.f32.mrf.mxu1  ;;  %v5416_v28 = vadd.f32 %v5369_v63, %v5262_v59 }
 0xbf3   :  { %v5580_v23 = vpop.f32.mrf.mxu0  ;;  %v5527_v7 = vadd.f32 %v5479_v36, %v5415_v14 }
 0xbf4   :  { %v5621_v48 = vpop.f32.mrf.mxu1 }
 0xbf5   :  { %v5687_v27 = vpop.f32.mrf.mxu0  ;;  %v5418_v48 = vadd.f32 %v5410_v43, %v5303_v6 }
 0xbf6   :  { %v5728_v56 = vpop.f32.mrf.mxu1 }
 0xbf7   :  { %v5689_v8 = vpop.f32.mrf.mxu0  ;;  %v5530_v26 = vadd.f32 %v5522_v45, %v5418_v48 }
 0xbf8   :  { %v5730_v3 = vpop.f32.mrf.mxu1 }
 0xbf9   :  { %v5691_v21 = vpop.f32.mrf.mxu0  ;;  %v5626_v58 = vadd.f32 %v5618_v0, %v5530_v26 }
 0xbfa   :  { %v5732_v35 = vpop.f32.mrf.mxu1 }
 0xbfb   :  { %v5692_v50 = vpop.f32.mrf.mxu0  ;;  %v5417_v35 = vadd.f32 %v5408_v11, %v5301_v47  ;;  %v5738_v63 = vadd.f32 %v5730_v3, %v5626_v58 }
 0xbfc   :  { %v5733_v19 = vpop.f32.mrf.mxu1  ;;  %v5528_v50 = vadd.f32 %v5481_v41, %v5416_v28 }
 0xbfd   :  { %v5799_v44 = vpop.f32.mrf.mxu0  ;;  %v5623_v19 = vadd.f32 %v5575_v60, %v5527_v7  ;;  %v5529_v30 = vadd.f32 %v5520_v40, %v5417_v35  ;;  %v8397_v7 = vmov 10  }
 0xbfe   :  { %v5840_v42 = vpop.f32.mrf.mxu1  ;;  %v5624_v24 = vadd.f32 %v5577_v12, %v5528_v50  ;;  %8314 = vset.pattern.permute.xlu0 %v8397_v7 }
 0xbff   :  { %v5801_v10 = vpop.f32.mrf.mxu0  ;;  %v5625_v54 = vadd.f32 %v5616_v37, %v5529_v30 }
 0xc00   :  { %v5842_v55 = vpop.f32.mrf.mxu1  ;;  %v5736_v18 = vadd.f32 %v5689_v8, %v5624_v24 }
 0xc01   :  { %v5803_v52 = vpop.f32.mrf.mxu0  ;;  %v5737_v43 = vadd.f32 %v5728_v56, %v5625_v54  ;;  %v5850_v60 = vadd.f32 %v5842_v55, %v5738_v63 }
 0xc02   :  { %v5844_v38 = vpop.f32.mrf.mxu1  ;;  %v5735_v52 = vadd.f32 %v5687_v27, %v5623_v19  ;;  %v5848_v31 = vadd.f32 %v5801_v10, %v5736_v18 }
 0xc03   :  { %v5804_v25 = vpop.f32.mrf.mxu0  ;;  %v5849_v45 = vadd.f32 %v5840_v42, %v5737_v43  ;;  %v6077_v38 = vpop.permute.xlu0 %6076 }
 0xc04   :  { %v5845_v23 = vpop.f32.mrf.mxu1  ;;  %v5847_v39 = vadd.f32 %v5799_v44, %v5735_v52 }
 0xc05   :  { %v5911_v21 = vpop.f32.mrf.mxu0 }
 0xc06   :  { %v5952_v2 = vpop.f32.mrf.mxu1  ;;  %v5959_v11 = vadd.f32 %v5911_v21, %v5847_v39 }
 0xc07   :  { %v5913_v57 = vpop.f32.mrf.mxu0  ;;  %v5961_v0 = vadd.f32 %v5952_v2, %v5849_v45 }
 0xc08   :  { %v5954_v5 = vpop.f32.mrf.mxu1  ;;  %v5960_v14 = vadd.f32 %v5913_v57, %v5848_v31 }
 0xc09   :  { %v5915_v20 = vpop.f32.mrf.mxu0  ;;  %v5962_v27 = vadd.f32 %v5954_v5, %v5850_v60 }
 0xc0a   :  { %v5956_v62 = vpop.f32.mrf.mxu1 }
 0xc0b   :  { %v5916_v36 = vpop.f32.mrf.mxu0 }
 0xc0c   :  { %v5957_v41 = vpop.f32.mrf.mxu1 }
 0xc0d   :  { %v6023_v59 = vpop.f32.mrf.mxu0  ;;  %v7746_v41 = vld [vmem:[%s10583_s1 + $0x170] sm:$0xff] }
 0xc0e   :  { %v6071_v40 = vadd.f32 %v6023_v59, %v5959_v11  ;;  %v6064_v12 = vpop.f32.mrf.mxu1 }
 0xc0f   :  { %v6025_v26 = vpop.f32.mrf.mxu0  ;;  %v6073_v3 = vadd.f32 %v6064_v12, %v5961_v0  ;;  %v11308_v0 = vld [vmem:[#allocation4_spill] sm:$0xff] }
 0xc10   :  { %v6072_v37 = vadd.f32 %v6025_v26, %v5960_v14  ;;  %v6066_v8 = vpop.f32.mrf.mxu1  ;;  %v10281_v25 = vadd.f32 %v6077_v38, %v6071_v40  ;;  %v6124_v26 = vpack.c.bf16 %v7746_v41, %v7746_v41 }
 0xc11   :  { %v6074_v44 = vadd.f32 %v6066_v8, %v5962_v27  ;;  %v6027_v6 = vpop.f32.mrf.mxu0  ;;  %v10289_v28 = vadd.f32 %v6077_v38, %v6073_v3 }
 0xc12   :  { %v10283_v56 = vadd.f32 %v6077_v38, %v6072_v37  ;;  %v6068_v10 = vpop.f32.mrf.mxu1 }
 0xc13   :  { %v6028_v55 = vpop.f32.mrf.mxu0  ;;  %v10285_v47 = vadd.f32 %v6077_v38, %v6074_v44 }
 0xc14   :  { %v6069_v57 = vpop.f32.mrf.mxu1  ;;  %v8244_v42 = vpack.i.bf16 %v10283_v56, %v10281_v25 }
 0xc15   :  { %v8239_v2 = vpack.i.bf16 %v10285_v47, %v10289_v28 }
 0xc16   :  { %8245 = vrot.lane.b32.xlu0 %v8244_v42, %s8379_s24  ;;  %8235 = vrot.lane.b32.xlu1 %v8244_v42, %s8378_s23 }
 0xc1a   :  { %8255 = vrot.lane.b32.xlu0 %v8244_v42, %s8381_s25  ;;  %8240 = vrot.lane.b32.xlu1 %v8239_v2, %s8378_s23 }
 0xc1e   :  { %8265 = vrot.lane.b32.xlu0 %v8244_v42, %s8382_s26  ;;  %8250 = vrot.lane.b32.xlu1 %v8239_v2, %s8379_s24 }
 0xc22   :  { %8275 = vrot.lane.b32.xlu0 %v8244_v42, %s8383_s27  ;;  %8260 = vrot.lane.b32.xlu1 %v8239_v2, %s8381_s25 }
 0xc26   :  { %8285 = vrot.lane.b32.xlu0 %v8244_v42, %s8384_s28  ;;  %8270 = vrot.lane.b32.xlu1 %v8239_v2, %s8382_s26 }
 0xc2a   :  { %8295 = vrot.lane.b32.xlu0 %v8244_v42, %s8385_s29  ;;  %8280 = vrot.lane.b32.xlu1 %v8239_v2, %s8383_s27 }
 0xc2e   :  { %8305 = vrot.lane.b32.xlu0 %v8244_v42, %s8386_s30  ;;  %8290 = vrot.lane.b32.xlu1 %v8239_v2, %s8384_s28 }
 0xc32   :  { %8300 = vrot.lane.b32.xlu1 %v8239_v2, %s8385_s29  ;;  %7176 = vperm.xlu0 %8314, %v10007_v1  }
 0xc36   :  { %8310 = vrot.lane.b32.xlu1 %v8239_v2, %s8386_s30 }
 0xc88   :  { %v8246_v23 = vpop.permute.xlu0 %8245  ;;  %v8236_v48 = vpop.permute.xlu1 %8235 }
 0xc89   :  { %v8238_v21 = vunpack.i.h.bf16 %v8236_v48  ;;  %v8237_v35 = vunpack.i.l.bf16 %v8236_v48  ;;  %v8248_v50 = vunpack.i.h.bf16 %v8246_v23  ;;  %v8247_v19 = vunpack.i.l.bf16 %v8246_v23 }
 0xc8b   :  { %v6116_v30 = vsel %vm11294_vm11, %v8237_v35, %v8238_v21  ;;  %v6093_v54 = vsel %vm11295_vm6, %v8247_v19, %v8248_v50  ;;  %vm11303_vm11 = vcmp.lt.s32.totalorder %v8473_v9, 15  ;;  %vm11304_vm6 = vmmov %vm11296_vm8 }
 0xc8c   :  { %v6126_v24 = vpack.c.bf16 %v6116_v30, %v6116_v30  ;;  %v8256_v52 = vpop.permute.xlu0 %8255  ;;  %v8241_v5 = vpop.permute.xlu1 %8240  ;;  %v6096_v60 = vsel %vm11302_vm1, %v6093_v54, 0.0  ;;  %vm11312_vm1 = vcmp.le.s32.totalorder %v8486_v16, 14 }
 0xc8d   :  { %v8243_v58 = vunpack.i.h.bf16 %v8241_v5  ;;  %v8242_v20 = vunpack.i.l.bf16 %v8241_v5  ;;  %v8258_v18 = vunpack.i.h.bf16 %v8256_v52  ;;  %v8257_v39 = vunpack.i.l.bf16 %v8256_v52 }
 0xc8e   :  { %7747 = vmatprep.subr.msk.bf16.mxu0 %vm11296_vm8, %v6126_v24  ;;  %vm11305_vm8 = vcmp.lt.s32.totalorder %v8473_v9, 17  ;;  %v6103_v3 = vpack.c.bf16 %v6096_v60, %v6096_v60 }
 0xc8f   :  { %v6114_v1 = vsel %vm11297_vm12, %v8242_v20, %v8243_v58  ;;  %v6115_v62 = vsel %vm11298_vm14, %v8238_v21, %v8242_v20  ;;  %v6117_v63 = vsel %vm11299_vm3, %v8243_v58, %v8237_v35  ;;  %v6333_v14 = vsel %vm11303_vm11, %v8257_v39, %v8258_v18  ;;  %vm11306_vm12 = vmmov %vm11305_vm8  ;;  %v7745_v58 = vld [vmem:[%s10583_s1 + $0x168] sm:$0xff] }
 0xc90   :  { %v6128_v36 = vpack.c.bf16 %v6114_v1, %v6114_v1  ;;  %v8251_v43 = vpop.permute.xlu1 %8250  ;;  %v6118_v31 = vsel %vm11300_vm4, %v6117_v63, 0.0  ;;  %v6120_v11 = vsel %vm11301_vm5, %v6115_v62, 0.0  ;;  %v8266_v40 = vpop.permute.xlu0 %8265  ;;  %vm11307_vm14 = vmmov %vm11305_vm8  ;;  %vm11309_vm3 = vcmp.ge.s32.totalorder %v11308_v0, 1 }
 0xc91   :  { %v8253_v59 = vunpack.i.h.bf16 %v8251_v43  ;;  %v8252_v45 = vunpack.i.l.bf16 %v8251_v43  ;;  %v6125_v29 = vpack.c.bf16 %v6118_v31, %v6118_v31  ;;  %v6127_v12 = vpack.c.bf16 %v6120_v11, %v6120_v11  ;;  %vm11310_vm4 = vmmov %vm11304_vm6 }
 0xc92   :  { %7749 = vmatprep.subr.msk.bf16.mxu1 %vm11304_vm6, %v6128_v36  ;;  %vm11311_vm5 = vmmov %vm11310_vm4  ;;  %v6336_v10 = vsel %vm11312_vm1, %v6333_v14, 0.0  ;;  %v8268_v55 = vunpack.i.h.bf16 %v8266_v40  ;;  %v8267_v2 = vunpack.i.l.bf16 %v8266_v40  ;;  %vm11314_vm6 = vnez %v10776_v46  ;;  %v7755_v40 = vld [vmem:[%s10583_s1 + $0x178] sm:$0xff] }
 0xc93   :  { %v6094_v32 = vsel %vm11305_vm8, %v8253_v59, %v8247_v19  ;;  %v6091_v27 = vsel %vm11306_vm12, %v8252_v45, %v8253_v59  ;;  %v6092_v38 = vsel %vm11307_vm14, %v8248_v50, %v8252_v45  ;;  %v6133_v44 = vsel %vm11310_vm4, %v6125_v29, 0  ;;  %vm11313_vm11 = vmmov %vm11310_vm4  ;;  %v11336_v29 = vld [vmem:[#allocation2_spill] sm:$0xff] }
 0xc94   :  { %v6098_v37 = vsel %vm11309_vm3, %v6091_v27, 0.0  ;;  %v8261_v8 = vpop.permute.xlu1 %8260  ;;  %v6139_v6 = vsel %vm11311_vm5, %v6127_v12, 0  ;;  %6159 = vmatpush1.bf16.msra.mxu0 %v6133_v44  ;;  %v6095_v23 = vsel %vm11314_vm6, %v6094_v32, 0.0  ;;  %vm11315_vm8 = vnez %v10778_v51  ;;  %v11338_v32 = vld [vmem:[#allocation3_spill] sm:$0xff]  ;;  %v8276_v44 = vpop.permute.xlu0 %8275 }
 0xc95   :  { %v8263_v57 = vunpack.i.h.bf16 %v8261_v8  ;;  %v8262_v42 = vunpack.i.l.bf16 %v8261_v8  ;;  %6200 = vmatpush1.bf16.msra.mxu1 %v6139_v6  ;;  %7751 = vmatprep.subr.msk.bf16.mxu0 %vm11313_vm11, %v6103_v3  ;;  %v6105_v7 = vpack.c.bf16 %v6098_v37, %v6098_v37  ;;  %v6097_v48 = vsel %vm11315_vm8, %v6092_v38, 0.0  ;;  %vm11323_vm8 = vmmov %vm11313_vm11 }
 0xc96   :  { %vm11316_vm12 = vcmp.lt.s32.totalorder %v8473_v9, 15  ;;  %vm11318_vm3 = vcmp.le.s32.totalorder %v11308_v0, 14  ;;  %vm11319_vm4 = vcmask 64512   ;;  %v6102_v30 = vpack.c.bf16 %v6095_v23, %v6095_v23  ;;  %v7760_v23 = vld [vmem:[%s10583_s1 + $0x180] sm:$0xff] }
 0xc97   :  { %v6334_v21 = vsel %vm11316_vm12, %v8263_v57, %v8257_v39  ;;  %vm11317_vm14 = vmmov %vm11316_vm12  ;;  %7748 = vmatmul.mubr.msk.bf16.vlgmr.msra.gmra.mxu0 %vm11319_vm4, %v6124_v26  ;;  %v6104_v46 = vpack.c.bf16 %v6097_v48, %v6097_v48  ;;  %v6343_v24 = vpack.c.bf16 %v6336_v10, %v6336_v10  ;;  %7753 = vmatprep.subr.msk.bf16.mxu1 %vm11313_vm11, %v6105_v7  ;;  %vm11322_vm6 = vcmp.lt.s32.totalorder %v8473_v9, 1 }
 0xc98   :  { %v6331_v35 = vsel %vm11317_vm14, %v8262_v42, %v8263_v57  ;;  %vm11320_vm5 = vmmov %vm11319_vm4  ;;  %v8271_v19 = vpop.permute.xlu1 %8270  ;;  %6273 = vmatprep.mubr.bf16.mxu0 %v10855_v4  ;;  %v6335_v20 = vsel %vm8604_vm0, %v6334_v21, 0.0  ;;  %v6457_v54 = vsel %vm11322_vm6, %v8267_v2, %v8268_v55  ;;  %v6230_v39 = vsel %vm11323_vm8, %v6102_v30, 0 }
 0xc99   :  { %v6338_v50 = vsel %vm11318_vm3, %v6331_v35, 0.0  ;;  %7750 = vmatmul.mubr.msk.bf16.vlgmr.msra.gmra.mxu1 %vm11320_vm5, %v6124_v26  ;;  %vm11321_vm1 = vmmov %vm11316_vm12  ;;  %v8273_v52 = vunpack.i.h.bf16 %v8271_v19  ;;  %v8272_v5 = vunpack.i.l.bf16 %v8271_v19  ;;  %6256 = vmatpush1.bf16.msra.mxu0 %v6230_v39  ;;  %vm11326_vm3 = vcmp.ge.s32.totalorder %v11308_v0, 1  ;;  %v8286_v19 = vpop.permute.xlu0 %8285 }
 0xc9a   :  { %v6332_v51 = vsel %vm11321_vm1, %v8258_v18, %v8262_v42  ;;  %vm11324_vm12 = vmmov %vm11323_vm8  ;;  %v6345_v1 = vpack.c.bf16 %v6338_v50, %v6338_v50  ;;  %6314 = vmatprep.mubr.bf16.mxu1 %v10855_v4  ;;  %v6101_v22 = vpack.c.bf16 %v7745_v58, %v7745_v58  ;;  %v6342_v36 = vpack.c.bf16 %v6335_v20, %v6335_v20 }
 0xc9b   :  { %v6236_v18 = vsel %vm11324_vm12, %v6104_v46, 0  ;;  %vm11325_vm14 = vmmov %vm11322_vm6  ;;  %v6337_v43 = vsel %vm11231_vm10, %v6332_v51, 0.0  ;;  %vm11328_vm0 = vcmp.ge.s32.totalorder %v8486_v16, 1  ;;  %v6341_v26 = vpack.c.bf16 %v7755_v40, %v7755_v40 }
 0xc9c   :  { %v6455_v62 = vsel %vm11325_vm14, %v8272_v5, %v8273_v52  ;;  %6297 = vmatpush1.bf16.msra.mxu1 %v6236_v18  ;;  %vm11327_vm4 = vmmov %vm11323_vm8  ;;  %v6460_v31 = vsel %vm11328_vm0, %v6457_v54, 0.0  ;;  %v6344_v60 = vpack.c.bf16 %v6337_v43, %v6337_v43  ;;  %vm11337_vm14 = vcmp.ge.s32.totalorder %v11336_v29, 1  ;;  %v8281_v38 = vpop.permute.xlu1 %8280  ;;  %v7765_v54 = vld [vmem:[%s10583_s1 + $0x188] sm:$0xff] }
 0xc9d   :  { %v6462_v63 = vsel %vm11326_vm3, %v6455_v62, 0.0  ;;  %7756 = vmatprep.subr.msk.bf16.mxu0 %vm11327_vm4, %v6343_v24  ;;  %vm11329_vm5 = vmmov %vm11327_vm4  ;;  %v6467_v14 = vpack.c.bf16 %v6460_v31, %v6460_v31  ;;  %vm11339_vm3 = vcmp.ge.s32.totalorder %v11338_v32, 1  ;;  %v8283_v6 = vunpack.i.h.bf16 %v8281_v38 }
 0xc9e   :  { %7758 = vmatprep.subr.msk.bf16.mxu1 %vm11329_vm5, %v6345_v1  ;;  %vm11330_vm1 = vmmov %vm11322_vm6  ;;  %v6469_v59 = vpack.c.bf16 %v6462_v63, %v6462_v63  ;;  %vm11332_vm6 = vcmask 64512   ;;  %v8282_v3 = vunpack.i.l.bf16 %v8281_v38  ;;  %v6575_v10 = vpack.c.bf16 %v10283_v56, %v10283_v56  ;;  %v7770_v38 = vld [vmem:[%s10583_s1 + $0x190] sm:$0xff] }
 0xc9f   :  { %v6458_v11 = vsel %vm11330_vm1, %v8273_v52, %v8267_v2  ;;  %vm11331_vm11 = vmmov %vm11330_vm1  ;;  %7752 = vmatmul.mubr.msk.bf16.vlgmr.msra.gmra.mxu0 %vm11332_vm6, %v6101_v22  ;;  %v8278_v57 = vunpack.i.h.bf16 %v8276_v44  ;;  %v8277_v42 = vunpack.i.l.bf16 %v8276_v44  ;;  %v6574_v21 = vpack.c.bf16 %v10281_v25, %v10281_v25 }
 0xca0   :  { %v6456_v41 = vsel %vm11331_vm11, %v8268_v55, %v8272_v5  ;;  %vm11333_vm8 = vmmov %vm11332_vm6  ;;  %v6459_v12 = vsel %vm11337_vm14, %v6458_v11, 0.0  ;;  %6393 = vmatprep.mubr.bf16.mxu0 %v10855_v4  ;;  %v6577_v55 = vpack.c.bf16 %v10285_v47, %v10285_v47  ;;  %v8291_v48 = vpop.permute.xlu1 %8290  ;;  %v6576_v35 = vpack.c.bf16 %v10289_v28, %v10289_v28 }
 0xca1   :  { %7754 = vmatmul.mubr.msk.bf16.vlgmr.msra.gmra.mxu1 %vm11333_vm8, %v6101_v22  ;;  %vm11334_vm12 = vmmov %vm11327_vm4  ;;  %v6461_v27 = vsel %vm11339_vm3, %v6456_v41, 0.0  ;;  %v6466_v37 = vpack.c.bf16 %v6459_v12, %v6459_v12  ;;  %vm11345_vm8 = vcmp.lt.s32.totalorder %v8473_v9, 127  ;;  %v6465_v50 = vpack.c.bf16 %v7760_v23, %v7760_v23  ;;  %v8296_v22 = vpop.permute.xlu0 %8295 }
 0xca2   :  { %v6350_v33 = vsel %vm11334_vm12, %v6342_v36, 0  ;;  %vm11335_vm10 = vmmov %vm11327_vm4  ;;  %6434 = vmatprep.mubr.bf16.mxu1 %v10855_v4  ;;  %v6468_v8 = vpack.c.bf16 %v6461_v27, %v6461_v27  ;;  %v6690_v56 = vsel %vm11345_vm8, %v8283_v6, %v8277_v42  ;;  %vm11349_vm3 = vcmp.le.s32.totalorder %v11308_v0, 14 }
 0xca3   :  { %v6356_v45 = vsel %vm11335_vm10, %v6344_v60, 0  ;;  %6376 = vmatpush1.bf16.msra.mxu0 %v6350_v33  ;;  %vm11340_vm0 = vmmov %vm11327_vm4  ;;  %v6694_v30 = vsel %vm11349_vm3, %v6690_v56, 0.0  ;;  %v8293_v52 = vunpack.i.h.bf16 %v8291_v48  ;;  %v8292_v5 = vunpack.i.l.bf16 %v8291_v48 }
 0xca4   :  { %6417 = vmatpush1.bf16.msra.mxu1 %v6356_v45  ;;  %7761 = vmatprep.subr.msk.bf16.mxu0 %vm11327_vm4, %v6467_v14  ;;  %vm11341_vm5 = vmmov %vm11332_vm6  ;;  %vm11350_vm4 = vcmp.le.s32.totalorder %v8486_v16, 14  ;;  %v8288_v58 = vunpack.i.h.bf16 %v8286_v19  ;;  %v8287_v20 = vunpack.i.l.bf16 %v8286_v19  ;;  %v6701_v0 = vpack.c.bf16 %v6694_v30, %v6694_v30  ;;  %v8301_v63 = vpop.permute.xlu1 %8300 }
 0xca5   :  { %7763 = vmatprep.subr.msk.bf16.mxu1 %vm11340_vm0, %v6469_v59  ;;  %vm11342_vm1 = vmmov %vm11341_vm5  ;;  %v6573_v36 = vpack.c.bf16 %v7765_v54, %v7765_v54  ;;  %v8303_v33 = vunpack.i.h.bf16 %v8301_v63  ;;  %v8302_v45 = vunpack.i.l.bf16 %v8301_v63  ;;  %v8298_v14 = vunpack.i.h.bf16 %v8296_v22 }
 0xca6   :  { %vm11343_vm11 = vmmov %vm11340_vm0  ;;  %v8297_v40 = vunpack.i.l.bf16 %v8296_v22  ;;  %v8398_v22 = vmov 11  }
 0xca7   :  { %7757 = vmatmul.mubr.msk.bf16.vlgmr.msra.gmra.mxu0 %vm11341_vm5, %v6341_v26  ;;  %v6474_v2 = vsel %vm11343_vm11, %v6466_v37, 0  ;;  %vm11344_vm6 = vmmov %vm11340_vm0  ;;  %8315 = vset.pattern.permute.xlu1 %v8398_v22 }
 0xca8   :  { %v6480_v7 = vsel %vm11344_vm6, %v6468_v8, 0  ;;  %6500 = vmatpush1.bf16.msra.mxu0 %v6474_v2  ;;  %vm11346_vm12 = vmmov %vm11345_vm8  ;;  %6517 = vmatprep.mubr.bf16.mxu0 %v10855_v4 }
 0xca9   :  { %7759 = vmatmul.mubr.msk.bf16.vlgmr.msra.gmra.mxu1 %vm11342_vm1, %v6341_v26  ;;  %v6688_v47 = vsel %vm11346_vm12, %v8278_v57, %v8282_v3  ;;  %vm11347_vm10 = vmmov %vm11340_vm0  ;;  %vm11357_vm12 = vcmp.le.s32.totalorder %v11336_v29, 14  ;;  %8316 = vset.pattern.permute.xlu0 %v8398_v22 }
 0xcaa   :  { %6541 = vmatpush1.bf16.msra.mxu1 %v6480_v7  ;;  %7766 = vmatprep.subr.msk.bf16.mxu0 %vm11347_vm10, %v6575_v10  ;;  %vm11348_vm14 = vmmov %vm11340_vm0  ;;  %v6692_v46 = vsel %vm11350_vm4, %v6688_v47, 0.0  ;;  %vm11358_vm10 = vcmp.le.s32.totalorder %v11338_v32, 14  ;;  %v6697_v10 = vpack.c.bf16 %v7770_v38, %v7770_v38 }
 0xcab   :  { %7768 = vmatprep.subr.msk.bf16.mxu1 %vm11348_vm14, %v6577_v55  ;;  %6558 = vmatprep.mubr.bf16.mxu1 %v10855_v4  ;;  %vm11351_vm0 = vmmov %vm11345_vm8  ;;  %v6699_v16 = vpack.c.bf16 %v6692_v46, %v6692_v46  ;;  %vm11359_vm14 = vcmp.lt.s32.totalorder %v8473_v9, 113 }
 0xcac   :  { %v6689_v24 = vsel %vm11351_vm0, %v8277_v42, %v8278_v57  ;;  %vm11352_vm5 = vmmov %vm11351_vm0  ;;  %v6814_v1 = vsel %vm11359_vm14, %v8293_v52, %v8287_v20 }
 0xcad   :  { %v6687_v51 = vsel %vm11352_vm5, %v8282_v3, %v8283_v6  ;;  %vm11353_vm1 = vmmov %vm11344_vm6  ;;  %vm11355_vm6 = vcmask 64512   ;;  %v6691_v39 = vsel %vm11357_vm12, %v6689_v24, 0.0  ;;  %v6818_v11 = vsel %vm8782_vm7, %v6814_v1, 0.0  ;;  %v8311_v6 = vpop.permute.xlu1 %8310  ;;  %v8306_v3 = vpop.permute.xlu0 %8305 }
 0xcae   :  { %v6582_v25 = vsel %vm11353_vm1, %v6574_v21, 0  ;;  %vm11354_vm11 = vmmov %vm11353_vm1  ;;  %v6693_v18 = vsel %vm11358_vm10, %v6687_v51, 0.0  ;;  %v6698_v43 = vpack.c.bf16 %v6691_v39, %v6691_v39  ;;  %vm11363_vm5 = vnez %v10805_v17 }
 0xcaf   :  { %v6588_v28 = vsel %vm11354_vm11, %v6576_v35, 0  ;;  %7762 = vmatmul.mubr.msk.bf16.vlgmr.msra.gmra.mxu0 %vm11355_vm6, %v6465_v50  ;;  %vm11356_vm8 = vmmov %vm11355_vm6  ;;  %v6700_v31 = vpack.c.bf16 %v6693_v18, %v6693_v18  ;;  %v6825_v27 = vpack.c.bf16 %v6818_v11, %v6818_v11  ;;  %vm11369_vm10 = vcmp.ge.s32.totalorder %v11336_v29, 1 }
 0xcb0   :  { %6608 = vmatpush1.bf16.msra.mxu0 %v6582_v25  ;;  %vm11360_vm3 = vmmov %vm11359_vm14  ;;  %6625 = vmatprep.mubr.bf16.mxu0 %v10855_v4  ;;  %vm11370_vm14 = vcmp.ge.s32.totalorder %v11338_v32, 1  ;;  %v8313_v7 = vunpack.i.h.bf16 %v8311_v6  ;;  %v8312_v23 = vunpack.i.l.bf16 %v8311_v6  ;;  %v8308_v56 = vunpack.i.h.bf16 %v8306_v3 }
 0xcb1   :  { %7764 = vmatmul.mubr.msk.bf16.vlgmr.msra.gmra.mxu1 %vm11356_vm8, %v6465_v50  ;;  %v6812_v62 = vsel %vm11360_vm3, %v8288_v58, %v8292_v5  ;;  %vm11361_vm4 = vmmov %vm11353_vm1  ;;  %v8307_v47 = vunpack.i.l.bf16 %v8306_v3  ;;  %v6821_v24 = vpack.c.bf16 %v7775_v61, %v7775_v61  ;;  %v6945_v39 = vpack.c.bf16 %v7780_v13, %v7780_v13 }
 0xcb2   :  { %6649 = vmatpush1.bf16.msra.mxu1 %v6588_v28  ;;  %7771 = vmatprep.subr.msk.bf16.mxu0 %vm11361_vm4, %v6699_v16  ;;  %vm11362_vm0 = vmmov %vm11353_vm1  ;;  %v6816_v41 = vsel %vm11363_vm5, %v6812_v62, 0.0  ;;  %v7785_v62 = vld [vmem:[%s10583_s1 + $0x1a8] sm:$0xff] }
 0xcb3   :  { %7773 = vmatprep.subr.msk.bf16.mxu1 %vm11362_vm0, %v6701_v0  ;;  %6666 = vmatprep.mubr.bf16.mxu1 %v10855_v4  ;;  %vm11364_vm1 = vmmov %vm11360_vm3  ;;  %v6823_v17 = vpack.c.bf16 %v6816_v41, %v6816_v41  ;;  %vm11371_vm3 = vcmp.lt.s32.totalorder %v8473_v9, 112  ;;  %v7069_v63 = vpack.c.bf16 %v7785_v62, %v7785_v62 }
 0xcb4   :  { %v6813_v60 = vsel %vm11364_vm1, %v8287_v20, %v8288_v58  ;;  %vm11365_vm11 = vmmov %vm11364_vm1  ;;  %v6938_v8 = vsel %vm11371_vm3, %v8303_v33, %v8297_v40 }
 0xcb5   :  { %v6811_v59 = vsel %vm11365_vm11, %v8292_v5, %v8293_v52  ;;  %vm11366_vm8 = vmmov %vm11355_vm6  ;;  %v6815_v26 = vsel %vm11369_vm10, %v6813_v60, 0.0  ;;  %v6942_v42 = vsel %vm8747_vm13, %v6938_v8, 0.0 }
 0xcb6   :  { %vm11367_vm12 = vmmov %vm11362_vm0  ;;  %v6817_v37 = vsel %vm11370_vm14, %v6811_v59, 0.0  ;;  %v6822_v55 = vpack.c.bf16 %v6815_v26, %v6815_v26  ;;  %v6949_v50 = vpack.c.bf16 %v6942_v42, %v6942_v42 }
 0xcb7   :  { %7767 = vmatmul.mubr.msk.bf16.vlgmr.msra.gmra.mxu0 %vm11355_vm6, %v6573_v36  ;;  %v6706_v34 = vsel %vm11367_vm12, %v6698_v43, 0  ;;  %vm11368_vm7 = vmmov %vm11362_vm0  ;;  %v6824_v57 = vpack.c.bf16 %v6817_v37, %v6817_v37  ;;  %vm11380_vm12 = vcmp.lt.s32.totalorder %v8473_v9, 111 }
 0xcb8   :  { %v6712_v12 = vsel %vm11368_vm7, %v6700_v31, 0  ;;  %6732 = vmatpush1.bf16.msra.mxu0 %v6706_v34  ;;  %vm11372_vm4 = vmmov %vm11371_vm3  ;;  %6749 = vmatprep.mubr.bf16.mxu0 %v10855_v4  ;;  %v7062_v30 = vsel %vm11380_vm12, %v8313_v7, %v8307_v47 }
 0xcb9   :  { %7769 = vmatmul.mubr.msk.bf16.vlgmr.msra.gmra.mxu1 %vm11366_vm8, %v6573_v36  ;;  %v6936_v44 = vsel %vm11372_vm4, %v8298_v14, %v8302_v45  ;;  %7776 = vmatprep.subr.msk.bf16.mxu0 %vm11362_vm0, %v6823_v17  ;;  %vm11373_vm5 = vmmov %vm11362_vm0  ;;  %v7066_v5 = vsel %vm11056_vm2, %v7062_v30, 0.0  ;;  %vm11391_vm2 = vcmp.le.s32.totalorder %v11338_v32, 14  ;;  %v8377_v36 = vld [vmem:[%s10582_s3] sm:$0x7] }
 0xcba   :  { %6773 = vmatpush1.bf16.msra.mxu1 %v6712_v12  ;;  %6790 = vmatprep.mubr.bf16.mxu1 %v10855_v4  ;;  %v6940_v2 = vsel %vm8724_vm15, %v6936_v44, 0.0  ;;  %vm11374_vm1 = vmmov %vm11355_vm6  ;;  %v7073_v49 = vpack.c.bf16 %v7066_v5, %v7066_v5 }
 0xcbb   :  { %7778 = vmatprep.subr.msk.bf16.mxu1 %vm11373_vm5, %v6825_v27  ;;  %vm11375_vm11 = vmmov %vm11374_vm1  ;;  %v6947_v35 = vpack.c.bf16 %v6940_v2, %v6940_v2  ;;  %7195 = vperm.xlu1 %8315, %v8377_v36  }
 0xcbc   :  { %vm11376_vm6 = vmmov %vm11362_vm0 }
 0xcbd   :  { %v6830_v48 = vsel %vm11376_vm6, %v6822_v55, 0  ;;  %vm11377_vm8 = vmmov %vm11362_vm0 }
 0xcbe   :  { %v6836_v21 = vsel %vm11377_vm8, %v6824_v57, 0  ;;  %vm11378_vm13 = vmmov %vm11371_vm3 }
 0xcbf   :  { %7772 = vmatmul.mubr.msk.bf16.vlgmr.msra.gmra.mxu0 %vm11374_vm1, %v6697_v10  ;;  %v6937_v15 = vsel %vm11378_vm13, %v8297_v40, %v8298_v14  ;;  %vm11379_vm15 = vmmov %vm11371_vm3 }
 0xcc0   :  { %6856 = vmatpush1.bf16.msra.mxu0 %v6830_v48  ;;  %v6935_v19 = vsel %vm11379_vm15, %v8302_v45, %v8303_v33  ;;  %vm11381_vm7 = vmmov %vm11380_vm12  ;;  %6873 = vmatprep.mubr.bf16.mxu0 %v10855_v4  ;;  %v6946_v51 = vpack.c.bf16 %v6937_v15, %v6937_v15 }
 0xcc1   :  { %7774 = vmatmul.mubr.msk.bf16.vlgmr.msra.gmra.mxu1 %vm11375_vm11, %v6697_v10  ;;  %v7060_v46 = vsel %vm11381_vm7, %v8308_v56, %v8312_v23  ;;  %vm11382_vm10 = vmmov %vm11362_vm0  ;;  %v6948_v52 = vpack.c.bf16 %v6935_v19, %v6935_v19 }
 0xcc2   :  { %6897 = vmatpush1.bf16.msra.mxu1 %v6836_v21  ;;  %7781 = vmatprep.subr.msk.bf16.mxu0 %vm11382_vm10, %v6947_v35  ;;  %vm11383_vm14 = vmmov %vm11362_vm0  ;;  %v7064_v25 = vsel %vm11051_vm9, %v7060_v46, 0.0  ;;  %vm11390_vm9 = vcmp.le.s32.totalorder %v11336_v29, 14 }
 0xcc3   :  { %7783 = vmatprep.subr.msk.bf16.mxu1 %vm11383_vm14, %v6949_v50  ;;  %6914 = vmatprep.mubr.bf16.mxu1 %v10855_v4  ;;  %vm11384_vm3 = vmmov %vm11381_vm7  ;;  %v7071_v0 = vpack.c.bf16 %v7064_v25, %v7064_v25 }
 0xcc4   :  { %v7061_v28 = vsel %vm11384_vm3, %v8307_v47, %v8308_v56  ;;  %vm11385_vm4 = vmmov %vm11384_vm3 }
 0xcc5   :  { %v7059_v58 = vsel %vm11385_vm4, %v8312_v23, %v8313_v7  ;;  %vm11386_vm0 = vmmov %vm11374_vm1  ;;  %v7063_v9 = vsel %vm11390_vm9, %v7061_v28, 0.0  ;;  %vm7347_vm9 = vcmask 1045504  }
 0xcc6   :  { %vm11387_vm5 = vmmov %vm11386_vm0  ;;  %v7065_v54 = vsel %vm11391_vm2, %v7059_v58, 0.0  ;;  %v7070_v18 = vpack.c.bf16 %v7063_v9, %v7063_v9  ;;  %vm11408_vm2 = vcmask 1042432  }
 0xcc7   :  { %7777 = vmatmul.mubr.msk.bf16.vlgmr.msra.gmra.mxu0 %vm11386_vm0, %v6821_v24  ;;  %vm11388_vm1 = vmmov %vm11376_vm6  ;;  %v7072_v1 = vpack.c.bf16 %v7065_v54, %v7065_v54 }
 0xcc8   :  { %v6954_v20 = vsel %vm11388_vm1, %v6946_v51, 0  ;;  %vm11389_vm11 = vmmov %vm11388_vm1  ;;  %6997 = vmatprep.mubr.bf16.mxu0 %v10855_v4 }
 0xcc9   :  { %7779 = vmatmul.mubr.msk.bf16.vlgmr.msra.gmra.mxu1 %vm11387_vm5, %v6821_v24  ;;  %v6960_v16 = vsel %vm11389_vm11, %v6948_v52, 0  ;;  %6980 = vmatpush1.bf16.msra.mxu0 %v6954_v20  ;;  %vm11392_vm6 = vmmov %vm11388_vm1 }
 0xcca   :  { %7021 = vmatpush1.bf16.msra.mxu1 %v6960_v16  ;;  %7786 = vmatprep.subr.msk.bf16.mxu0 %vm11392_vm6, %v7071_v0  ;;  %vm11393_vm8 = vmmov %vm11388_vm1 }
 0xccb   :  { %7788 = vmatprep.subr.msk.bf16.mxu1 %vm11393_vm8, %v7073_v49  ;;  %7038 = vmatprep.mubr.bf16.mxu1 %v10855_v4  ;;  %vm11394_vm13 = vmmov %vm11386_vm0 }
 0xccc   :  { %vm11395_vm15 = vmmov %vm11386_vm0 }
 0xccd   :  { %vm11396_vm12 = vmmov %vm11388_vm1 }
 0xcce   :  { %v7078_v29 = vsel %vm11396_vm12, %v7070_v18, 0  ;;  %vm11397_vm7 = vmmov %vm11388_vm1 }
 0xccf   :  { %7782 = vmatmul.mubr.msk.bf16.vlgmr.msra.gmra.mxu0 %vm11394_vm13, %v6945_v39  ;;  %v7084_v32 = vsel %vm11397_vm7, %v7072_v1, 0  ;;  %vm11398_vm10 = vmmov %vm11386_vm0 }
 0xcd0   :  { %7104 = vmatpush1.bf16.msra.mxu0 %v7078_v29  ;;  %7121 = vmatprep.mubr.bf16.mxu0 %v10855_v4  ;;  %vm11399_vm14 = vmmov %vm11386_vm0 }
 0xcd1   :  { %7784 = vmatmul.mubr.msk.bf16.vlgmr.msra.gmra.mxu1 %vm11395_vm15, %v6945_v39  ;;  %vm11400_vm3 = vmmov %vm11388_vm1 }
 0xcd2   :  { %7145 = vmatpush1.bf16.msra.mxu1 %v7084_v32  ;;  %7162 = vmatprep.mubr.bf16.mxu1 %v10855_v4  ;;  %vm11401_vm4 = vmmov %vm11388_vm1 }
 0xcd3   :  { %vm11402_vm0 = vmmov %vm11388_vm1 }
 0xcd4   :  { %vm11403_vm5 = vmmov %vm11402_vm0 }
 0xcd5   :  { %vm11404_vm1 = vmmov %vm11398_vm10 }
 0xcd6   :  { %vm11405_vm11 = vmmov %vm11404_vm1 }
 0xcd7   :  { %7787 = vmatmul.mubr.msk.bf16.vlgmr.msra.gmra.mxu0 %vm11398_vm10, %v7069_v63  ;;  %vm11412_vm6 = vmmov %vm11408_vm2 }
 0xcd8   :  { %7245 = vmatprep.mubr.bf16.mxu0 %v10855_v4  ;;  %vm11415_vm8 = vmmov %vm11408_vm2 }
 0xcd9   :  { %7789 = vmatmul.mubr.msk.bf16.vlgmr.msra.gmra.mxu1 %vm11399_vm14, %v7069_v63  ;;  %vm11418_vm13 = vmmov %vm11408_vm2 }
 0xcda   :  { %7286 = vmatprep.mubr.bf16.mxu1 %v10855_v4 }
 0xd57   :  { %v6178_v43 = vpop.f32.mrf.mxu0 }
 0xd59   :  { %v6219_v31 = vpop.f32.mrf.mxu1  ;;  %v6180_v11 = vpop.f32.mrf.mxu0 }
 0xd5b   :  { %v6221_v41 = vpop.f32.mrf.mxu1  ;;  %v6182_v60 = vpop.f32.mrf.mxu0 }
 0xd5d   :  { %v6223_v59 = vpop.f32.mrf.mxu1  ;;  %v6183_v33 = vpop.f32.mrf.mxu0 }
 0xd5f   :  { %v6224_v45 = vpop.f32.mrf.mxu1  ;;  %v6275_v14 = vpop.f32.mrf.mxu0 }
 0xd60   :  { %v6276_v9 = vadd.f32 %v6275_v14, %v6178_v43 }
 0xd61   :  { %v6316_v40 = vpop.f32.mrf.mxu1  ;;  %v6277_v34 = vpop.f32.mrf.mxu0 }
 0xd62   :  { %v6317_v54 = vadd.f32 %v6316_v40, %v6219_v31  ;;  %v6278_v1 = vadd.f32 %v6277_v34, %v6180_v11 }
 0xd63   :  { %v6318_v4 = vpop.f32.mrf.mxu1  ;;  %v6279_v12 = vpop.f32.mrf.mxu0 }
 0xd64   :  { %v6319_v29 = vadd.f32 %v6318_v4, %v6221_v41 }
 0xd65   :  { %v6320_v17 = vpop.f32.mrf.mxu1  ;;  %v6280_v27 = vpop.f32.mrf.mxu0 }
 0xd67   :  { %v6321_v38 = vpop.f32.mrf.mxu1  ;;  %v6395_v26 = vpop.f32.mrf.mxu0 }
 0xd68   :  { %v6443_v32 = vadd.f32 %v6395_v26, %v6276_v9  ;;  %v7790_v9 = vld [vmem:[%s10584_s2 + $0x28] sm:$0x7] }
 0xd69   :  { %v6436_v37 = vpop.f32.mrf.mxu1  ;;  %v6397_v8 = vpop.f32.mrf.mxu0 }
 0xd6a   :  { %v6445_v62 = vadd.f32 %v6436_v37, %v6317_v54  ;;  %v6444_v36 = vadd.f32 %v6397_v8, %v6278_v1 }
 0xd6b   :  { %v6438_v44 = vpop.f32.mrf.mxu1  ;;  %v6399_v6 = vpop.f32.mrf.mxu0 }
 0xd6c   :  { %v6446_v60 = vadd.f32 %v6438_v44, %v6319_v29  ;;  %v7189_v29 = vpack.c.bf16 %v7790_v9, %v7790_v9 }
 0xd6d   :  { %v6440_v3 = vpop.f32.mrf.mxu1  ;;  %v6400_v10 = vpop.f32.mrf.mxu0 }
 0xd6f   :  { %v6441_v55 = vpop.f32.mrf.mxu1  ;;  %v6519_v57 = vpop.f32.mrf.mxu0 }
 0xd70   :  { %v6567_v59 = vadd.f32 %v6519_v57, %v6443_v32  ;;  %v7196_v32 = vpop.permute.xlu1 %7195 }
 0xd71   :  { %v6560_v42 = vpop.f32.mrf.mxu1  ;;  %v6521_v2 = vpop.f32.mrf.mxu0 }
 0xd72   :  { %v6569_v33 = vadd.f32 %v6560_v42, %v6445_v62  ;;  %v6568_v17 = vadd.f32 %v6521_v2, %v6444_v36 }
 0xd73   :  { %v6562_v7 = vpop.f32.mrf.mxu1  ;;  %v6523_v23 = vpop.f32.mrf.mxu0 }
 0xd74   :  { %v6570_v27 = vadd.f32 %v6562_v7, %v6446_v60  ;;  %v7177_v7 = vpop.permute.xlu0 %7176 }
 0xd75   :  { %v6564_v56 = vpop.f32.mrf.mxu1  ;;  %v6524_v47 = vpop.f32.mrf.mxu0 }
 0xd77   :  { %v6565_v48 = vpop.f32.mrf.mxu1  ;;  %v6627_v21 = vpop.f32.mrf.mxu0 }
 0xd78   :  { %v6675_v38 = vadd.f32 %v6627_v21, %v6567_v59 }
 0xd79   :  { %v6668_v35 = vpop.f32.mrf.mxu1  ;;  %v6629_v50 = vpop.f32.mrf.mxu0 }
 0xd7a   :  { %v6677_v6 = vadd.f32 %v6668_v35, %v6569_v33  ;;  %v6676_v14 = vadd.f32 %v6629_v50, %v6568_v17 }
 0xd7b   :  { %v6670_v61 = vpop.f32.mrf.mxu1  ;;  %v6631_v15 = vpop.f32.mrf.mxu0 }
 0xd7c   :  { %v6678_v40 = vadd.f32 %v6670_v61, %v6570_v27 }
 0xd7d   :  { %v6672_v19 = vpop.f32.mrf.mxu1  ;;  %v6632_v30 = vpop.f32.mrf.mxu0 }
 0xd7f   :  { %v6673_v46 = vpop.f32.mrf.mxu1  ;;  %v6751_v24 = vpop.f32.mrf.mxu0 }
 0xd80   :  { %v6799_v11 = vadd.f32 %v6751_v24, %v6675_v38 }
 0xd81   :  { %v6792_v51 = vpop.f32.mrf.mxu1  ;;  %v6753_v52 = vpop.f32.mrf.mxu0 }
 0xd82   :  { %v6801_v41 = vadd.f32 %v6792_v51, %v6677_v6  ;;  %v6800_v26 = vadd.f32 %v6753_v52, %v6676_v14 }
 0xd83   :  { %v6794_v5 = vpop.f32.mrf.mxu1  ;;  %v6755_v25 = vpop.f32.mrf.mxu0 }
 0xd84   :  { %v6802_v37 = vadd.f32 %v6794_v5, %v6678_v40 }
 0xd85   :  { %v6796_v28 = vpop.f32.mrf.mxu1  ;;  %v6756_v58 = vpop.f32.mrf.mxu0 }
 0xd87   :  { %v6797_v20 = vpop.f32.mrf.mxu1  ;;  %v6875_v16 = vpop.f32.mrf.mxu0 }
 0xd88   :  { %v6923_v8 = vadd.f32 %v6875_v16, %v6799_v11 }
 0xd89   :  { %v6916_v0 = vpop.f32.mrf.mxu1  ;;  %v6877_v49 = vpop.f32.mrf.mxu0 }
 0xd8a   :  { %v6925_v44 = vadd.f32 %v6916_v0, %v6801_v41  ;;  %v6924_v55 = vadd.f32 %v6877_v49, %v6800_v26 }
 0xd8b   :  { %v6918_v13 = vpop.f32.mrf.mxu1  ;;  %v6879_v39 = vpop.f32.mrf.mxu0 }
 0xd8c   :  { %v6926_v57 = vadd.f32 %v6918_v13, %v6802_v37 }
 0xd8d   :  { %v6920_v18 = vpop.f32.mrf.mxu1  ;;  %v6880_v63 = vpop.f32.mrf.mxu0 }
 0xd8f   :  { %v6921_v22 = vpop.f32.mrf.mxu1  ;;  %v6999_v45 = vpop.f32.mrf.mxu0 }
 0xd90   :  { %v7047_v42 = vadd.f32 %v6999_v45, %v6923_v8 }
 0xd91   :  { %v7040_v12 = vpop.f32.mrf.mxu1  ;;  %v7001_v43 = vpop.f32.mrf.mxu0 }
 0xd92   :  { %v7049_v2 = vadd.f32 %v7040_v12, %v6925_v44  ;;  %v7048_v47 = vadd.f32 %v7001_v43, %v6924_v55  ;;  %v7323_v44 = vrot.slane %v9929_v53, 5  ;;  %v11413_v53 = vld [vmem:[#allocation40_spill] sm:$0xff] }
 0xd93   :  { %v7042_v31 = vpop.f32.mrf.mxu1  ;;  %v7003_v34 = vpop.f32.mrf.mxu0 }
 0xd94   :  { %v7050_v48 = vadd.f32 %v7042_v31, %v6926_v57 }
 0xd95   :  { %v7044_v4 = vpop.f32.mrf.mxu1  ;;  %v7004_v3 = vpop.f32.mrf.mxu0 }
 0xd97   :  { %v7045_v10 = vpop.f32.mrf.mxu1  ;;  %v7123_v23 = vpop.f32.mrf.mxu0 }
 0xd98   :  { %v7171_v21 = vadd.f32 %v7123_v23, %v7047_v42  ;;  %v11406_v10 = vld [vmem:[#allocation36_spill] sm:$0xff]  ;;  %v11407_v42 = vld [vmem:[#allocation33_spill] sm:$0xff] }
 0xd99   :  { %v7164_v56 = vpop.f32.mrf.mxu1  ;;  %v7125_v50 = vpop.f32.mrf.mxu0  ;;  %v7325_v55 = vrot.slane %v11406_v10, 5 }
 0xd9a   :  { %v7173_v35 = vadd.f32 %v7164_v56, %v7049_v2  ;;  %v7179_v15 = vadd.f32 %v7177_v7, %v7171_v21  ;;  %v7172_v30 = vadd.f32 %v7125_v50, %v7048_v47  ;;  %v7324_v2 = vrot.slane %v11407_v42, 5  ;;  %v11409_v56 = vld [vmem:[#allocation56_spill] sm:$0xff] }
 0xd9b   :  { %v7166_v61 = vpop.f32.mrf.mxu1  ;;  %v7127_v24 = vpop.f32.mrf.mxu0  ;;  %v7326_v47 = vrot.slane %v11409_v56, 5 }
 0xd9c   :  { %v7181_v19 = vadd.f32 %v7177_v7, %v7173_v35  ;;  %v7174_v46 = vadd.f32 %v7166_v61, %v7050_v48  ;;  %v7183_v52 = vmax.f32 %v7179_v15, 0.0  ;;  %v7180_v25 = vadd.f32 %v7177_v7, %v7172_v30  ;;  %v11410_v48 = vld [vmem:[#allocation39_spill] sm:$0xff] }
 0xd9d   :  { %v7168_v51 = vpop.f32.mrf.mxu1  ;;  %v7128_v58 = vpop.f32.mrf.mxu0  ;;  %v11411_v21 = vrot.slane %v11410_v48, 2  ;;  %v11414_v15 = vrot.slane %v11413_v53, 2 }
 0xd9e   :  { %v7185_v5 = vmax.f32 %v7181_v19, 0.0  ;;  %v7182_v28 = vadd.f32 %v7177_v7, %v7174_v46  ;;  %v7190_v16 = vpack.c.bf16 %v7183_v52, %v7183_v52  ;;  %v7184_v49 = vmax.f32 %v7180_v25, 0.0  ;;  %v11416_v46 = vld [vmem:[#allocation41_spill] sm:$0xff] }
 0xd9f   :  { %v7169_v20 = vpop.f32.mrf.mxu1  ;;  %v11417_v24 = vrot.slane %v11416_v46, 2 }
 0xda0   :  { %v7192_v0 = vpack.c.bf16 %v7185_v5, %v7185_v5  ;;  %v7186_v13 = vmax.f32 %v7182_v28, 0.0  ;;  %v7191_v54 = vpack.c.bf16 %v7184_v49, %v7184_v49  ;;  %v7202_v18 = vsel %vm11402_vm0, %v7190_v16, 0  ;;  %v11419_v5 = vld [vmem:[#allocation42_spill] sm:$0xff] }
 0xda1   :  { %v11420_v25 = vrot.slane %v11419_v5, 2 }
 0xda2   :  { %v7193_v39 = vpack.c.bf16 %v7186_v13, %v7186_v13  ;;  %7791 = vmatprep.subr.msk.bf16.mxu0 %vm11400_vm3, %v7191_v54  ;;  %v7208_v1 = vsel %vm11403_vm5, %v7192_v0, 0 }
 0xda3   :  { %7228 = vmatpush1.bf16.msra.mxu0 %v7202_v18 }
 0xda4   :  { %7793 = vmatprep.subr.msk.bf16.mxu1 %vm11401_vm4, %v7193_v39 }
 0xda5   :  { %7269 = vmatpush1.bf16.msra.mxu1 %v7208_v1 }
 0xda6   :  { %7792 = vmatmul.mubr.msk.bf16.vlgmr.msra.gmra.mxu0 %vm11404_vm1, %v7189_v29 }
 0xda8   :  { %7794 = vmatmul.mubr.msk.bf16.vlgmr.msra.gmra.mxu1 %vm11405_vm11, %v7189_v29 }
 0xe66   :  { %v7247_v62 = vpop.f32.mrf.mxu0 }
 0xe67   :  { %v7248_v22 = vadd.f32 %v7247_v62, %v7196_v32 }
 0xe68   :  { %v7288_v63 = vpop.f32.mrf.mxu1  ;;  %v7249_v60 = vpop.f32.mrf.mxu0 }
 0xe69   :  { %v7289_v36 = vadd.f32 %v7288_v63, %v7196_v32  ;;  %v7795_v33 = vmul.f32 -1.442695, %v7248_v22  ;;  %v7250_v12 = vadd.f32 %v7249_v60, %v7196_v32 }
 0xe6a   :  { %v7290_v59 = vpop.f32.mrf.mxu1  ;;  %v7251_v27 = vpop.f32.mrf.mxu0 }
 0xe6b   :  { %v7797_v45 = vmul.f32 -1.442695, %v7289_v36  ;;  %v7291_v17 = vadd.f32 %v7290_v59, %v7196_v32  ;;  %8349 = vpow2.f32 %v7795_v33  ;;  %v7796_v6 = vmul.f32 -1.442695, %v7250_v12 }
 0xe6c   :  { %v7292_v38 = vpop.f32.mrf.mxu1  ;;  %v7252_v31 = vpop.f32.mrf.mxu0 }
 0xe6d   :  { %v7798_v43 = vmul.f32 -1.442695, %v7291_v17  ;;  %8351 = vpow2.f32 %v7797_v45 }
 0xe6e   :  { %v7293_v14 = vpop.f32.mrf.mxu1  ;;  %8353 = vpow2.f32 %v7796_v6 }
 0xe6f   :  { %8355 = vpow2.f32 %v7798_v43 }
 0xe78   :  { %v8350_v40 = vpop.eup %8349 }
 0xe79   :  { %v7307_v41 = vadd.f32 1.0, %v8350_v40 }
 0xe7a   :  { %v8352_v11 = vpop.eup %8351 }
 0xe7b   :  { %v8354_v34 = vpop.eup %8353  ;;  %v7309_v4 = vadd.f32 1.0, %v8352_v11  ;;  %8357 = vrcp.f32 %v7307_v41 }
 0xe7c   :  { %v8356_v26 = vpop.eup %8355  ;;  %v7308_v37 = vadd.f32 1.0, %v8354_v34 }
 0xe7d   :  { %8359 = vrcp.f32 %v7309_v4  ;;  %v7310_v8 = vadd.f32 1.0, %v8356_v26 }
 0xe7e   :  { %8361 = vrcp.f32 %v7308_v37 }
 0xe7f   :  { %8363 = vrcp.f32 %v7310_v8 }
 0xe88   :  { %v8358_v3 = vpop.eup %8357 }
 0xe89   :  { %v7343_v7 = vsel %vm11408_vm2, %v8358_v3, %v7323_v44 }
 0xe8a   :  { %v8360_v57 = vpop.eup %8359  ;;  %v7348_v35 = vsel %vm7347_vm9, %v7343_v7, %v11411_v21 }
 0xe8b   :  { %v8362_v23 = vpop.eup %8361  ;;  %v7345_v50 = vsel %vm11412_vm6, %v8360_v57, %v7325_v55  ;;  %7352 = vst [vmem:[%s10585_s4] sm:$0xff] %v7348_v35 }
 0xe8c   :  { %v8364_v61 = vpop.eup %8363  ;;  %v7350_v19 = vsel %vm7347_vm9, %v7345_v50, %v11414_v15  ;;  %v7344_v30 = vsel %vm11415_vm8, %v8362_v23, %v7324_v2 }
 0xe8d   :  { %7799 = vst [vmem:[%s10585_s4 + $0x20] sm:$0xff] %v7350_v19  ;;  %v7349_v51 = vsel %vm7347_vm9, %v7344_v30, %v11417_v24  ;;  %v7346_v52 = vsel %vm11418_vm13, %v8364_v61, %v7326_v47 }
 0xe8e   :  { %7353 = vst [vmem:[%s10585_s4 + $0x8] sm:$0xff] %v7349_v51  ;;  %v7351_v28 = vsel %vm7347_vm9, %v7346_v52, %v11420_v25 }
 0xe8f   :  { %7800 = vst [vmem:[%s10585_s4 + $0x28] sm:$0xff] %v7351_v28 }

</bundles_post_ra>
